<compile_context>
chip_gen: v7x
topology: tpu7x:2x2x1
jax: 0.10.0
libtpu: 0.0.40
codegen_flags: <defaults>
</compile_context>

<pallas_src>
import functools
import math

import jax
import jax.numpy as jnp
from jax.experimental import pallas as pl
from jax.experimental.pallas import tpu as pltpu

EPS = 1e-5  # nn.BatchNorm2d default eps


def basic_block_kernel(x_ref, mean_ref, invstd_ref, wvg_ref, bvg_ref,
                       kdw_ref, bdw_ref, wsca_ref, bsca_ref,
                       wproj_ref, bproj_ref, o_ref, sp_ref, *, H, W, C, BLK):
    HW = H * W
    base = W  # slab rows: [top reflect (W) | v (HW) | bottom reflect (W)]

    # Column-edge masks on an (HW, 1) column (broadcast against (HW, C) taps); cheap AND for
    # power-of-two W, computed once per grid step.
    r_iota = jax.lax.broadcasted_iota(jnp.int32, (HW, 1), 0)
    w_idx = (r_iota & (W - 1)) if (W & (W - 1)) == 0 else (r_iota % W)
    left_edge = w_idx == 0
    right_edge = w_idx == W - 1

    kdw = kdw_ref[...]          # (9, C) f32 depthwise taps
    wvg = wvg_ref[...]          # (C, 2C) bf16 fused Wv|Wg
    mean = mean_ref[...]        # (1, C)
    invstd = invstd_ref[...]    # (1, C)
    # (C, C) diagonal mask: transposes the (1, C) SCA vector via masked lane-reduce.
    diag = (jax.lax.broadcasted_iota(jnp.int32, (C, C), 0)
            == jax.lax.broadcasted_iota(jnp.int32, (C, C), 1))

    for b in range(BLK):
        # ---- BatchNorm2d (training-mode batch stats precomputed in the wrapper, affine = id) ----
        xn = (x_ref[b] - mean) * invstd                                     # (HW, C) f32

        # ---- fused Wv | Wg 1x1 convs: one bf16 MXU pass, f32 accumulation ----
        vg = jnp.dot(xn.astype(jnp.bfloat16), wvg,
                     preferred_element_type=jnp.float32) + bvg_ref[...]     # (HW, 2C)
        g = jax.nn.sigmoid(vg[:, C:])       # gate now (EUP) so vg dies before the tap loop
        v = vg[:, :C]

        # ---- stage v + h-direction reflect rows into the sublane-aligned slab ----
        sp_ref[base:base + HW, :] = v
        sp_ref[0:W, :] = v[W:2 * W, :]                                      # reflect of row h=1
        sp_ref[base + HW:base + HW + W, :] = v[HW - 2 * W:HW - W, :]        # reflect of row h=H-2

        # ---- depthwise 3x3 reflect conv: 3 aligned row-window loads + XLU rolls for +-1 cols ----
        acc = jnp.zeros((HW, C), jnp.float32)
        for ii, di in enumerate((-1, 0, 1)):                                # row offset
            mid = sp_ref[base + di * W:base + di * W + HW, :]               # (h+di, w)
            lft = pltpu.roll(mid, 1, 0)        # (h+di, w-1); wrapped rows only at w==0  (discarded)
            rgt = pltpu.roll(mid, HW - 1, 0)   # (h+di, w+1); wrapped rows only at w==W-1 (discarded)
            taps = (jnp.where(left_edge, rgt, lft),                         # dj=-1, reflect at w==0
                    mid,                                                    # dj= 0
                    jnp.where(right_edge, lft, rgt))                        # dj=+1, reflect at w==W-1
            for jj in range(3):
                k = 3 * ii + jj
                acc = acc + taps[jj] * kdw[k:k + 1, :]
        out = (acc + bdw_ref[...]) * g                                      # gated depthwise output

        # ---- sca: global average pool -> 1x1 conv; fold the channel scale into proj rows ----
        s = jnp.mean(out, axis=0, keepdims=True)                            # (1, C)
        s2 = jnp.dot(s.astype(jnp.bfloat16), wsca_ref[...],
                     preferred_element_type=jnp.float32) + bsca_ref[...]    # (1, C)
        s2_col = jnp.sum(jnp.where(diag, s2, 0.0), axis=1, keepdims=True)   # (C, 1)
        wp = (s2_col * wproj_ref[...]).astype(jnp.bfloat16)                 # row-scaled proj weight

        # ---- proj 1x1 conv (single bf16 MXU pass), then residual ----
        proj = jnp.dot(out.astype(jnp.bfloat16), wp,
                       preferred_element_type=jnp.float32) + bproj_ref[...]
        o_ref[b] = x_ref[b] + proj


def basic_block(x_nchw, p):
    """BasicBlock forward. x_nchw: (N, C, H, W) float32. Returns (N, C, H, W)."""
    N, C, H, W = x_nchw.shape
    HW = H * W
    x32 = x_nchw.astype(jnp.float32)

    # channels-last flattened spatial: (N, H*W, C); BN stats read from the same layout so XLA
    # can fuse the stats pass with the transpose.  Centered two-pass variance for accuracy.
    x_l = jnp.transpose(x32, (0, 2, 3, 1)).reshape(N, HW, C)
    mean_c = jnp.mean(x_l, axis=(0, 1))
    var_c = jnp.mean(jnp.square(x_l - mean_c), axis=(0, 1))
    mean = mean_c.reshape(1, C)
    invstd = jax.lax.rsqrt(var_c + EPS).reshape(1, C)

    # Several images per grid step when per-image slabs are tiny (grid-step overhead ~0.35 us).
    per_img_bytes = HW * C * 4
    BLK = 1
    for cand in range(1, min(N, 8) + 1):
        if N % cand == 0 and cand * per_img_bytes <= (1 << 20):
            BLK = cand

    slab_rows = HW + 2 * W
    # Rough per-step live set (double-buffered x/out blocks, slab, in-kernel temporaries);
    # clamp the VMEM request so it stays legal on v7x (64 MiB physical) as well as v5e/v6e.
    per_step = (4 * BLK * HW * C + 10 * HW * C + slab_rows * C) * 4
    vmem_limit = int(min(48 << 20, max(32 << 20, 2 * per_step)))

    kernel = functools.partial(basic_block_kernel, H=H, W=W, C=C, BLK=BLK)
    const2d = lambda shape: pl.BlockSpec(shape, lambda n: (0, 0))           # resident weight operands

    out = pl.pallas_call(
        kernel,
        out_shape=jax.ShapeDtypeStruct((N, HW, C), jnp.float32),
        grid=(N // BLK,),
        in_specs=[
            pl.BlockSpec((BLK, HW, C), lambda n: (n, 0, 0)),                # x (per-step image block)
            const2d((1, C)), const2d((1, C)),                               # BN mean / invstd
            const2d((C, 2 * C)), const2d((1, 2 * C)),                       # fused Wv|Wg (bf16), bias
            const2d((9, C)), const2d((1, C)),                               # depthwise taps, bias
            const2d((C, C)), const2d((1, C)),                               # sca weight (bf16), bias
            const2d((C, C)), const2d((1, C)),                               # proj weight, bias
        ],
        out_specs=pl.BlockSpec((BLK, HW, C), lambda n: (n, 0, 0)),
        scratch_shapes=[pltpu.VMEM((slab_rows, C), jnp.float32)],
        compiler_params=pltpu.CompilerParams(
            dimension_semantics=("parallel",),
            vmem_limit_bytes=vmem_limit),
    )(x_l, mean, invstd,
      p["w_vg"].astype(jnp.bfloat16), p["b_vg"],
      p["kdw"], p["b_dw"],
      p["w_sca"].astype(jnp.bfloat16), p["b_sca"],
      p["w_proj"], p["b_proj"])

    return jnp.transpose(out.reshape(N, H, W, C), (0, 3, 1, 2))             # back to NCHW


def init_params(key, net_depth, dim, kernel_size=3):
    """Deterministic init matching ConvLayer._init_weights (trunc-normal weights, zero biases)."""
    gain = (8 * net_depth) ** (-0.25)

    def std_for(fan_in, fan_out):
        return gain * math.sqrt(2.0 / float(fan_in + fan_out))

    def tn(k, shape, std):
        return std * jax.random.truncated_normal(k, -2.0, 2.0, shape, jnp.float32)

    ks = jax.random.split(key, 5)
    std1 = std_for(dim, dim)                                                # 1x1 convs
    stdd = std_for(kernel_size ** 2, dim * kernel_size ** 2)                # depthwise conv

    wv1 = tn(ks[0], (dim, dim), std1)                    # PyTorch (out, in) of the 1x1 conv
    wdw = tn(ks[1], (dim, kernel_size * kernel_size), stdd)   # (C, 9) = (C, 1, 3, 3) flattened
    wg1 = tn(ks[2], (dim, dim), std1)
    wsc = tn(ks[3], (dim, dim), std1)
    wpr = tn(ks[4], (dim, dim), std1)

    zc = jnp.zeros((1, dim), jnp.float32)
    return dict(
        w_vg=jnp.concatenate([wv1.T, wg1.T], axis=1),    # (Cin, 2*Cout): [Wv | Wg]
        b_vg=jnp.zeros((1, 2 * dim), jnp.float32),
        kdw=wdw.T, b_dw=zc,                              # (9, C)
        w_sca=wsc.T, b_sca=zc,                           # (Cin, Cout)
        w_proj=wpr.T, b_proj=zc,
    )


def reference(x, p):
    """Pure-JAX reference of the same forward math (NCHW, full precision) for a self-check."""
    N, C, H, W = x.shape
    x = x.astype(jnp.float32)
    mean = x.mean(axis=(0, 2, 3), keepdims=True)
    var = ((x - mean) ** 2).mean(axis=(0, 2, 3), keepdims=True)
    xn = (x - mean) / jnp.sqrt(var + EPS)

    def conv1x1(t, w_io, b):                             # w_io: (Cin, Cout), b: (1, Cout)
        return (jnp.einsum("nihw,io->nohw", t, w_io, precision="highest")
                + b.reshape(1, -1, 1, 1))

    v = conv1x1(xn, p["w_vg"][:, :C], p["b_vg"][:, :C])
    g = jax.nn.sigmoid(conv1x1(xn, p["w_vg"][:, C:], p["b_vg"][:, C:]))

    vp = jnp.pad(v, ((0, 0), (0, 0), (1, 1), (1, 1)), mode="reflect")
    kdw = p["kdw"]                                       # (9, C)
    pv = sum(vp[:, :, i:i + H, j:j + W] * kdw[3 * i + j].reshape(1, C, 1, 1)
             for i in range(3) for j in range(3)) + p["b_dw"].reshape(1, C, 1, 1)

    out = pv * g
    s = conv1x1(out.mean(axis=(2, 3), keepdims=True), p["w_sca"], p["b_sca"])
    out = out * s
    out = conv1x1(out, p["w_proj"], p["b_proj"])
    return x + out


if __name__ == "__main__":
    net_depth, dim, H, W, N = 4, 4, 16, 16, 2
    key = jax.random.PRNGKey(0)
    kx, kp = jax.random.split(key)

    x = jax.random.normal(kx, (N, dim, H, W), jnp.float32)                  # NCHW like PyTorch
    params = init_params(kp, net_depth, dim)

    y = jax.block_until_ready(basic_block(x, params))
    y_ref = reference(x, params)

    assert y.shape == x.shape and y.dtype == jnp.float32
    assert bool(jnp.all(jnp.isfinite(y)))
    assert bool(jnp.allclose(y, y_ref, atol=1e-3, rtol=1e-3)), "mismatch vs pure-JAX reference"
    print("KERNEL_OK")
</pallas_src>

<mosaic_0001>
module attributes {stable_mosaic.version = 11 : i64} {
  func.func @basic_block_kernel(%arg0: i32, %arg1: memref<2x256x4xf32, #tpu.memory_space<vmem>>, %arg2: memref<1x4xf32, #tpu.memory_space<vmem>>, %arg3: memref<1x4xf32, #tpu.memory_space<vmem>>, %arg4: memref<4x8xbf16, #tpu.memory_space<vmem>>, %arg5: memref<1x8xf32, #tpu.memory_space<vmem>>, %arg6: memref<9x4xf32, #tpu.memory_space<vmem>>, %arg7: memref<1x4xf32, #tpu.memory_space<vmem>>, %arg8: memref<4x4xbf16, #tpu.memory_space<vmem>>, %arg9: memref<1x4xf32, #tpu.memory_space<vmem>>, %arg10: memref<4x4xf32, #tpu.memory_space<vmem>>, %arg11: memref<1x4xf32, #tpu.memory_space<vmem>>, %arg12: memref<2x256x4xf32, #tpu.memory_space<vmem>>, %arg13: memref<288x4xf32, #tpu.memory_space<vmem>>) attributes {dimension_semantics = [#tpu.dimension_semantics<parallel>], iteration_bounds = array<i64: 1>, scalar_prefetch = 0 : i64, scratch_operands = 1 : i64, tpu.core_type = #tpu.core_type<tc>, window_params = [{transform_indices = @transform_0, window_bounds = array<i64: 2, 256, 4>}, {pipeline_mode = #tpu.pipeline_mode<synchronous>, transform_indices = @transform_1, window_bounds = array<i64: 1, 4>}, {pipeline_mode = #tpu.pipeline_mode<synchronous>, transform_indices = @transform_2, window_bounds = array<i64: 1, 4>}, {pipeline_mode = #tpu.pipeline_mode<synchronous>, transform_indices = @transform_3, window_bounds = array<i64: 4, 8>}, {pipeline_mode = #tpu.pipeline_mode<synchronous>, transform_indices = @transform_4, window_bounds = array<i64: 1, 8>}, {pipeline_mode = #tpu.pipeline_mode<synchronous>, transform_indices = @transform_5, window_bounds = array<i64: 9, 4>}, {pipeline_mode = #tpu.pipeline_mode<synchronous>, transform_indices = @transform_6, window_bounds = array<i64: 1, 4>}, {pipeline_mode = #tpu.pipeline_mode<synchronous>, transform_indices = @transform_7, window_bounds = array<i64: 4, 4>}, {pipeline_mode = #tpu.pipeline_mode<synchronous>, transform_indices = @transform_8, window_bounds = array<i64: 1, 4>}, {pipeline_mode = #tpu.pipeline_mode<synchronous>, transform_indices = @transform_9, window_bounds = array<i64: 4, 4>}, {pipeline_mode = #tpu.pipeline_mode<synchronous>, transform_indices = @transform_10, window_bounds = array<i64: 1, 4>}, {transform_indices = @transform_11, window_bounds = array<i64: 2, 256, 4>}]} {
    %0 = tpu.iota {dimensions = array<i32: 0>} : vector<256x1xi32>
    %c15_i32 = arith.constant 15 : i32
    %1 = vector.broadcast %c15_i32 : i32 to vector<256x1xi32>
    %2 = arith.andi %0, %1 : vector<256x1xi32>
    %c0_i32 = arith.constant 0 : i32
    %3 = vector.broadcast %c0_i32 : i32 to vector<256x1xi32>
    %4 = arith.cmpi eq, %2, %3 : vector<256x1xi32>
    %c15_i32_0 = arith.constant 15 : i32
    %5 = vector.broadcast %c15_i32_0 : i32 to vector<256x1xi32>
    %6 = arith.cmpi eq, %2, %5 : vector<256x1xi32>
    %c0 = arith.constant 0 : index
    %c0_1 = arith.constant 0 : index
    %7 = vector.load %arg6[%c0, %c0_1] : memref<9x4xf32, #tpu.memory_space<vmem>>, vector<9x4xf32>
    %c0_2 = arith.constant 0 : index
    %c0_3 = arith.constant 0 : index
    %8 = vector.load %arg4[%c0_2, %c0_3] : memref<4x8xbf16, #tpu.memory_space<vmem>>, vector<4x8xbf16>
    %c0_4 = arith.constant 0 : index
    %c0_5 = arith.constant 0 : index
    %9 = vector.load %arg2[%c0_4, %c0_5] : memref<1x4xf32, #tpu.memory_space<vmem>>, vector<1x4xf32>
    %c0_6 = arith.constant 0 : index
    %c0_7 = arith.constant 0 : index
    %10 = vector.load %arg3[%c0_6, %c0_7] : memref<1x4xf32, #tpu.memory_space<vmem>>, vector<1x4xf32>
    %11 = tpu.iota {dimensions = array<i32: 0>} : vector<4x4xi32>
    %12 = tpu.iota {dimensions = array<i32: 1>} : vector<4x4xi32>
    %13 = arith.cmpi eq, %11, %12 : vector<4x4xi32>
    %c0_8 = arith.constant 0 : index
    %c0_9 = arith.constant 0 : index
    %c0_10 = arith.constant 0 : index
    %14 = vector.load %arg1[%c0_8, %c0_9, %c0_10] : memref<2x256x4xf32, #tpu.memory_space<vmem>>, vector<1x256x4xf32>
    %15 = vector.shape_cast %14 : vector<1x256x4xf32> to vector<256x4xf32>
    %16 = vector.broadcast %9 : vector<1x4xf32> to vector<256x4xf32>
    %17 = arith.subf %15, %16 : vector<256x4xf32>
    %18 = vector.broadcast %10 : vector<1x4xf32> to vector<256x4xf32>
    %19 = arith.mulf %17, %18 : vector<256x4xf32>
    %20 = arith.truncf %19 : vector<256x4xf32> to vector<256x4xbf16>
    %cst = arith.constant dense<0.000000e+00> : vector<256x8xf32>
    %21 = tpu.matmul %20, %8, %cst {dimension_numbers = #tpu.dot_dimension_numbers<[1], [0], [0], [1], [0, 0, 1, 1], [], []>} : vector<256x4xbf16>, vector<4x8xbf16>, vector<256x8xf32> -> vector<256x8xf32>
    %c0_11 = arith.constant 0 : index
    %c0_12 = arith.constant 0 : index
    %22 = vector.load %arg5[%c0_11, %c0_12] : memref<1x8xf32, #tpu.memory_space<vmem>>, vector<1x8xf32>
    %23 = vector.broadcast %22 : vector<1x8xf32> to vector<256x8xf32>
    %24 = arith.addf %21, %23 : vector<256x8xf32>
    %25 = vector.extract_strided_slice %24 {offsets = [0, 4], sizes = [256, 4], strides = [1, 1]} : vector<256x8xf32> to vector<256x4xf32>
    %26 = arith.negf %25 : vector<256x4xf32>
    %27 = math.exp %26 : vector<256x4xf32>
    %cst_13 = arith.constant 1.000000e+00 : f32
    %28 = vector.broadcast %cst_13 : f32 to vector<256x4xf32>
    %29 = arith.addf %28, %27 : vector<256x4xf32>
    %30 = arith.divf %28, %29 : vector<256x4xf32>
    %31 = vector.extract_strided_slice %24 {offsets = [0, 0], sizes = [256, 4], strides = [1, 1]} : vector<256x8xf32> to vector<256x4xf32>
    %c16 = arith.constant 16 : index
    %c0_14 = arith.constant 0 : index
    %32 = vector.load %arg13[%c16, %c0_14] : memref<288x4xf32, #tpu.memory_space<vmem>>, vector<256x4xf32>
    tpu.vector_store %arg13[%c16, %c0_14], %31 {strides = array<i32>} : memref<288x4xf32, #tpu.memory_space<vmem>>, vector<256x4xf32>,
    %33 = vector.extract_strided_slice %31 {offsets = [16, 0], sizes = [16, 4], strides = [1, 1]} : vector<256x4xf32> to vector<16x4xf32>
    %c0_15 = arith.constant 0 : index
    %c0_16 = arith.constant 0 : index
    %34 = vector.load %arg13[%c0_15, %c0_16] : memref<288x4xf32, #tpu.memory_space<vmem>>, vector<16x4xf32>
    tpu.vector_store %arg13[%c0_15, %c0_16], %33 {strides = array<i32>} : memref<288x4xf32, #tpu.memory_space<vmem>>, vector<16x4xf32>,
    %35 = vector.extract_strided_slice %31 {offsets = [224, 0], sizes = [16, 4], strides = [1, 1]} : vector<256x4xf32> to vector<16x4xf32>
    %c272 = arith.constant 272 : index
    %c0_17 = arith.constant 0 : index
    %36 = vector.load %arg13[%c272, %c0_17] : memref<288x4xf32, #tpu.memory_space<vmem>>, vector<16x4xf32>
    tpu.vector_store %arg13[%c272, %c0_17], %35 {strides = array<i32>} : memref<288x4xf32, #tpu.memory_space<vmem>>, vector<16x4xf32>,
    %cst_18 = arith.constant 0.000000e+00 : f32
    %37 = vector.broadcast %cst_18 : f32 to vector<256x4xf32>
    %c0_19 = arith.constant 0 : index
    %c0_20 = arith.constant 0 : index
    %38 = vector.load %arg13[%c0_19, %c0_20] : memref<288x4xf32, #tpu.memory_space<vmem>>, vector<256x4xf32>
    %c1_i32 = arith.constant 1 : i32
    %39 = tpu.dynamic_rotate %38 by %c1_i32 dim 0 : vector<256x4xf32>, i32 -> vector<256x4xf32>
    %c255_i32 = arith.constant 255 : i32
    %40 = tpu.dynamic_rotate %38 by %c255_i32 dim 0 : vector<256x4xf32>, i32 -> vector<256x4xf32>
    %41 = vector.shape_cast %4 : vector<256x1xi1> to vector<256x1xi1>
    %42 = vector.broadcast %41 : vector<256x1xi1> to vector<256x4xi1>
    %43 = arith.select %42, %40, %39 : vector<256x4xi1>, vector<256x4xf32>
    %44 = vector.shape_cast %6 : vector<256x1xi1> to vector<256x1xi1>
    %45 = vector.broadcast %44 : vector<256x1xi1> to vector<256x4xi1>
    %46 = arith.select %45, %39, %40 : vector<256x4xi1>, vector<256x4xf32>
    %47 = vector.extract_strided_slice %7 {offsets = [0, 0], sizes = [1, 4], strides = [1, 1]} : vector<9x4xf32> to vector<1x4xf32>
    %48 = vector.broadcast %47 : vector<1x4xf32> to vector<256x4xf32>
    %49 = arith.mulf %43, %48 : vector<256x4xf32>
    %50 = arith.addf %37, %49 : vector<256x4xf32>
    %51 = vector.extract_strided_slice %7 {offsets = [1, 0], sizes = [1, 4], strides = [1, 1]} : vector<9x4xf32> to vector<1x4xf32>
    %52 = vector.broadcast %51 : vector<1x4xf32> to vector<256x4xf32>
    %53 = arith.mulf %38, %52 : vector<256x4xf32>
    %54 = arith.addf %50, %53 : vector<256x4xf32>
    %55 = vector.extract_strided_slice %7 {offsets = [2, 0], sizes = [1, 4], strides = [1, 1]} : vector<9x4xf32> to vector<1x4xf32>
    %56 = vector.broadcast %55 : vector<1x4xf32> to vector<256x4xf32>
    %57 = arith.mulf %46, %56 : vector<256x4xf32>
    %58 = arith.addf %54, %57 : vector<256x4xf32>
    %c16_21 = arith.constant 16 : index
    %c0_22 = arith.constant 0 : index
    %59 = vector.load %arg13[%c16_21, %c0_22] : memref<288x4xf32, #tpu.memory_space<vmem>>, vector<256x4xf32>
    %c1_i32_23 = arith.constant 1 : i32
    %60 = tpu.dynamic_rotate %59 by %c1_i32_23 dim 0 : vector<256x4xf32>, i32 -> vector<256x4xf32>
    %c255_i32_24 = arith.constant 255 : i32
    %61 = tpu.dynamic_rotate %59 by %c255_i32_24 dim 0 : vector<256x4xf32>, i32 -> vector<256x4xf32>
    %62 = vector.shape_cast %4 : vector<256x1xi1> to vector<256x1xi1>
    %63 = vector.broadcast %62 : vector<256x1xi1> to vector<256x4xi1>
    %64 = arith.select %63, %61, %60 : vector<256x4xi1>, vector<256x4xf32>
    %65 = vector.shape_cast %6 : vector<256x1xi1> to vector<256x1xi1>
    %66 = vector.broadcast %65 : vector<256x1xi1> to vector<256x4xi1>
    %67 = arith.select %66, %60, %61 : vector<256x4xi1>, vector<256x4xf32>
    %68 = vector.extract_strided_slice %7 {offsets = [3, 0], sizes = [1, 4], strides = [1, 1]} : vector<9x4xf32> to vector<1x4xf32>
    %69 = vector.broadcast %68 : vector<1x4xf32> to vector<256x4xf32>
    %70 = arith.mulf %64, %69 : vector<256x4xf32>
    %71 = arith.addf %58, %70 : vector<256x4xf32>
    %72 = vector.extract_strided_slice %7 {offsets = [4, 0], sizes = [1, 4], strides = [1, 1]} : vector<9x4xf32> to vector<1x4xf32>
    %73 = vector.broadcast %72 : vector<1x4xf32> to vector<256x4xf32>
    %74 = arith.mulf %59, %73 : vector<256x4xf32>
    %75 = arith.addf %71, %74 : vector<256x4xf32>
    %76 = vector.extract_strided_slice %7 {offsets = [5, 0], sizes = [1, 4], strides = [1, 1]} : vector<9x4xf32> to vector<1x4xf32>
    %77 = vector.broadcast %76 : vector<1x4xf32> to vector<256x4xf32>
    %78 = arith.mulf %67, %77 : vector<256x4xf32>
    %79 = arith.addf %75, %78 : vector<256x4xf32>
    %c32 = arith.constant 32 : index
    %c0_25 = arith.constant 0 : index
    %80 = vector.load %arg13[%c32, %c0_25] : memref<288x4xf32, #tpu.memory_space<vmem>>, vector<256x4xf32>
    %c1_i32_26 = arith.constant 1 : i32
    %81 = tpu.dynamic_rotate %80 by %c1_i32_26 dim 0 : vector<256x4xf32>, i32 -> vector<256x4xf32>
    %c255_i32_27 = arith.constant 255 : i32
    %82 = tpu.dynamic_rotate %80 by %c255_i32_27 dim 0 : vector<256x4xf32>, i32 -> vector<256x4xf32>
    %83 = vector.shape_cast %4 : vector<256x1xi1> to vector<256x1xi1>
    %84 = vector.broadcast %83 : vector<256x1xi1> to vector<256x4xi1>
    %85 = arith.select %84, %82, %81 : vector<256x4xi1>, vector<256x4xf32>
    %86 = vector.shape_cast %6 : vector<256x1xi1> to vector<256x1xi1>
    %87 = vector.broadcast %86 : vector<256x1xi1> to vector<256x4xi1>
    %88 = arith.select %87, %81, %82 : vector<256x4xi1>, vector<256x4xf32>
    %89 = vector.extract_strided_slice %7 {offsets = [6, 0], sizes = [1, 4], strides = [1, 1]} : vector<9x4xf32> to vector<1x4xf32>
    %90 = vector.broadcast %89 : vector<1x4xf32> to vector<256x4xf32>
    %91 = arith.mulf %85, %90 : vector<256x4xf32>
    %92 = arith.addf %79, %91 : vector<256x4xf32>
    %93 = vector.extract_strided_slice %7 {offsets = [7, 0], sizes = [1, 4], strides = [1, 1]} : vector<9x4xf32> to vector<1x4xf32>
    %94 = vector.broadcast %93 : vector<1x4xf32> to vector<256x4xf32>
    %95 = arith.mulf %80, %94 : vector<256x4xf32>
    %96 = arith.addf %92, %95 : vector<256x4xf32>
    %97 = vector.extract_strided_slice %7 {offsets = [8, 0], sizes = [1, 4], strides = [1, 1]} : vector<9x4xf32> to vector<1x4xf32>
    %98 = vector.broadcast %97 : vector<1x4xf32> to vector<256x4xf32>
    %99 = arith.mulf %88, %98 : vector<256x4xf32>
    %100 = arith.addf %96, %99 : vector<256x4xf32>
    %c0_28 = arith.constant 0 : index
    %c0_29 = arith.constant 0 : index
    %101 = vector.load %arg7[%c0_28, %c0_29] : memref<1x4xf32, #tpu.memory_space<vmem>>, vector<1x4xf32>
    %102 = vector.broadcast %101 : vector<1x4xf32> to vector<256x4xf32>
    %103 = arith.addf %100, %102 : vector<256x4xf32>
    %104 = arith.mulf %103, %30 : vector<256x4xf32>
    %cst_30 = arith.constant dense<0.000000e+00> : vector<4xf32>
    %105 = vector.multi_reduction <add>, %104, %cst_30 [0] : vector<256x4xf32> to vector<4xf32>
    %106 = vector.shape_cast %105 : vector<4xf32> to vector<1x4xf32>
    %cst_31 = arith.constant 2.560000e+02 : f32
    %107 = vector.broadcast %cst_31 : f32 to vector<1x4xf32>
    %108 = arith.divf %106, %107 : vector<1x4xf32>
    %109 = arith.truncf %108 : vector<1x4xf32> to vector<1x4xbf16>
    %c0_32 = arith.constant 0 : index
    %c0_33 = arith.constant 0 : index
    %110 = vector.load %arg8[%c0_32, %c0_33] : memref<4x4xbf16, #tpu.memory_space<vmem>>, vector<4x4xbf16>
    %cst_34 = arith.constant dense<0.000000e+00> : vector<1x4xf32>
    %111 = tpu.matmul %109, %110, %cst_34 {dimension_numbers = #tpu.dot_dimension_numbers<[1], [0], [0], [1], [0, 0, 1, 1], [], []>} : vector<1x4xbf16>, vector<4x4xbf16>, vector<1x4xf32> -> vector<1x4xf32>
    %c0_35 = arith.constant 0 : index
    %c0_36 = arith.constant 0 : index
    %112 = vector.load %arg9[%c0_35, %c0_36] : memref<1x4xf32, #tpu.memory_space<vmem>>, vector<1x4xf32>
    %113 = arith.addf %111, %112 : vector<1x4xf32>
    %cst_37 = arith.constant 0.000000e+00 : f32
    %114 = vector.shape_cast %113 : vector<1x4xf32> to vector<1x4xf32>
    %115 = vector.broadcast %114 : vector<1x4xf32> to vector<4x4xf32>
    %116 = vector.broadcast %cst_37 : f32 to vector<4x4xf32>
    %117 = arith.select %13, %115, %116 : vector<4x4xi1>, vector<4x4xf32>
    %cst_38 = arith.constant dense<0.000000e+00> : vector<4xf32>
    %118 = vector.multi_reduction <add>, %117, %cst_38 [1] : vector<4x4xf32> to vector<4xf32>
    %119 = vector.shape_cast %118 : vector<4xf32> to vector<4x1xf32>
    %c0_39 = arith.constant 0 : index
    %c0_40 = arith.constant 0 : index
    %120 = vector.load %arg10[%c0_39, %c0_40] : memref<4x4xf32, #tpu.memory_space<vmem>>, vector<4x4xf32>
    %121 = vector.broadcast %119 : vector<4x1xf32> to vector<4x4xf32>
    %122 = arith.mulf %121, %120 : vector<4x4xf32>
    %123 = arith.truncf %122 : vector<4x4xf32> to vector<4x4xbf16>
    %124 = arith.truncf %104 : vector<256x4xf32> to vector<256x4xbf16>
    %cst_41 = arith.constant dense<0.000000e+00> : vector<256x4xf32>
    %125 = tpu.matmul %124, %123, %cst_41 {dimension_numbers = #tpu.dot_dimension_numbers<[1], [0], [0], [1], [0, 0, 1, 1], [], []>} : vector<256x4xbf16>, vector<4x4xbf16>, vector<256x4xf32> -> vector<256x4xf32>
    %c0_42 = arith.constant 0 : index
    %c0_43 = arith.constant 0 : index
    %126 = vector.load %arg11[%c0_42, %c0_43] : memref<1x4xf32, #tpu.memory_space<vmem>>, vector<1x4xf32>
    %127 = vector.broadcast %126 : vector<1x4xf32> to vector<256x4xf32>
    %128 = arith.addf %125, %127 : vector<256x4xf32>
    %c0_44 = arith.constant 0 : index
    %c0_45 = arith.constant 0 : index
    %c0_46 = arith.constant 0 : index
    %129 = vector.load %arg1[%c0_44, %c0_45, %c0_46] : memref<2x256x4xf32, #tpu.memory_space<vmem>>, vector<1x256x4xf32>
    %130 = vector.shape_cast %129 : vector<1x256x4xf32> to vector<256x4xf32>
    %131 = arith.addf %130, %128 : vector<256x4xf32>
    %c0_47 = arith.constant 0 : index
    %c0_48 = arith.constant 0 : index
    %c0_49 = arith.constant 0 : index
    %132 = vector.load %arg12[%c0_47, %c0_48, %c0_49] : memref<2x256x4xf32, #tpu.memory_space<vmem>>, vector<1x256x4xf32>
    %133 = vector.shape_cast %132 : vector<1x256x4xf32> to vector<256x4xf32>
    %134 = vector.shape_cast %131 : vector<256x4xf32> to vector<1x256x4xf32>
    tpu.vector_store %arg12[%c0_47, %c0_48, %c0_49], %134 {strides = array<i32>} : memref<2x256x4xf32, #tpu.memory_space<vmem>>, vector<1x256x4xf32>,
    %c1 = arith.constant 1 : index
    %c0_50 = arith.constant 0 : index
    %c0_51 = arith.constant 0 : index
    %135 = vector.load %arg1[%c1, %c0_50, %c0_51] : memref<2x256x4xf32, #tpu.memory_space<vmem>>, vector<1x256x4xf32>
    %136 = vector.shape_cast %135 : vector<1x256x4xf32> to vector<256x4xf32>
    %137 = vector.broadcast %9 : vector<1x4xf32> to vector<256x4xf32>
    %138 = arith.subf %136, %137 : vector<256x4xf32>
    %139 = vector.broadcast %10 : vector<1x4xf32> to vector<256x4xf32>
    %140 = arith.mulf %138, %139 : vector<256x4xf32>
    %141 = arith.truncf %140 : vector<256x4xf32> to vector<256x4xbf16>
    %cst_52 = arith.constant dense<0.000000e+00> : vector<256x8xf32>
    %142 = tpu.matmul %141, %8, %cst_52 {dimension_numbers = #tpu.dot_dimension_numbers<[1], [0], [0], [1], [0, 0, 1, 1], [], []>} : vector<256x4xbf16>, vector<4x8xbf16>, vector<256x8xf32> -> vector<256x8xf32>
    %c0_53 = arith.constant 0 : index
    %c0_54 = arith.constant 0 : index
    %143 = vector.load %arg5[%c0_53, %c0_54] : memref<1x8xf32, #tpu.memory_space<vmem>>, vector<1x8xf32>
    %144 = vector.broadcast %143 : vector<1x8xf32> to vector<256x8xf32>
    %145 = arith.addf %142, %144 : vector<256x8xf32>
    %146 = vector.extract_strided_slice %145 {offsets = [0, 4], sizes = [256, 4], strides = [1, 1]} : vector<256x8xf32> to vector<256x4xf32>
    %147 = arith.negf %146 : vector<256x4xf32>
    %148 = math.exp %147 : vector<256x4xf32>
    %cst_55 = arith.constant 1.000000e+00 : f32
    %149 = vector.broadcast %cst_55 : f32 to vector<256x4xf32>
    %150 = arith.addf %149, %148 : vector<256x4xf32>
    %151 = arith.divf %149, %150 : vector<256x4xf32>
    %152 = vector.extract_strided_slice %145 {offsets = [0, 0], sizes = [256, 4], strides = [1, 1]} : vector<256x8xf32> to vector<256x4xf32>
    %c16_56 = arith.constant 16 : index
    %c0_57 = arith.constant 0 : index
    %153 = vector.load %arg13[%c16_56, %c0_57] : memref<288x4xf32, #tpu.memory_space<vmem>>, vector<256x4xf32>
    tpu.vector_store %arg13[%c16_56, %c0_57], %152 {strides = array<i32>} : memref<288x4xf32, #tpu.memory_space<vmem>>, vector<256x4xf32>,
    %154 = vector.extract_strided_slice %152 {offsets = [16, 0], sizes = [16, 4], strides = [1, 1]} : vector<256x4xf32> to vector<16x4xf32>
    %c0_58 = arith.constant 0 : index
    %c0_59 = arith.constant 0 : index
    %155 = vector.load %arg13[%c0_58, %c0_59] : memref<288x4xf32, #tpu.memory_space<vmem>>, vector<16x4xf32>
    tpu.vector_store %arg13[%c0_58, %c0_59], %154 {strides = array<i32>} : memref<288x4xf32, #tpu.memory_space<vmem>>, vector<16x4xf32>,
    %156 = vector.extract_strided_slice %152 {offsets = [224, 0], sizes = [16, 4], strides = [1, 1]} : vector<256x4xf32> to vector<16x4xf32>
    %c272_60 = arith.constant 272 : index
    %c0_61 = arith.constant 0 : index
    %157 = vector.load %arg13[%c272_60, %c0_61] : memref<288x4xf32, #tpu.memory_space<vmem>>, vector<16x4xf32>
    tpu.vector_store %arg13[%c272_60, %c0_61], %156 {strides = array<i32>} : memref<288x4xf32, #tpu.memory_space<vmem>>, vector<16x4xf32>,
    %cst_62 = arith.constant 0.000000e+00 : f32
    %158 = vector.broadcast %cst_62 : f32 to vector<256x4xf32>
    %c0_63 = arith.constant 0 : index
    %c0_64 = arith.constant 0 : index
    %159 = vector.load %arg13[%c0_63, %c0_64] : memref<288x4xf32, #tpu.memory_space<vmem>>, vector<256x4xf32>
    %c1_i32_65 = arith.constant 1 : i32
    %160 = tpu.dynamic_rotate %159 by %c1_i32_65 dim 0 : vector<256x4xf32>, i32 -> vector<256x4xf32>
    %c255_i32_66 = arith.constant 255 : i32
    %161 = tpu.dynamic_rotate %159 by %c255_i32_66 dim 0 : vector<256x4xf32>, i32 -> vector<256x4xf32>
    %162 = vector.shape_cast %4 : vector<256x1xi1> to vector<256x1xi1>
    %163 = vector.broadcast %162 : vector<256x1xi1> to vector<256x4xi1>
    %164 = arith.select %163, %161, %160 : vector<256x4xi1>, vector<256x4xf32>
    %165 = vector.shape_cast %6 : vector<256x1xi1> to vector<256x1xi1>
    %166 = vector.broadcast %165 : vector<256x1xi1> to vector<256x4xi1>
    %167 = arith.select %166, %160, %161 : vector<256x4xi1>, vector<256x4xf32>
    %168 = vector.extract_strided_slice %7 {offsets = [0, 0], sizes = [1, 4], strides = [1, 1]} : vector<9x4xf32> to vector<1x4xf32>
    %169 = vector.broadcast %168 : vector<1x4xf32> to vector<256x4xf32>
    %170 = arith.mulf %164, %169 : vector<256x4xf32>
    %171 = arith.addf %158, %170 : vector<256x4xf32>
    %172 = vector.extract_strided_slice %7 {offsets = [1, 0], sizes = [1, 4], strides = [1, 1]} : vector<9x4xf32> to vector<1x4xf32>
    %173 = vector.broadcast %172 : vector<1x4xf32> to vector<256x4xf32>
    %174 = arith.mulf %159, %173 : vector<256x4xf32>
    %175 = arith.addf %171, %174 : vector<256x4xf32>
    %176 = vector.extract_strided_slice %7 {offsets = [2, 0], sizes = [1, 4], strides = [1, 1]} : vector<9x4xf32> to vector<1x4xf32>
    %177 = vector.broadcast %176 : vector<1x4xf32> to vector<256x4xf32>
    %178 = arith.mulf %167, %177 : vector<256x4xf32>
    %179 = arith.addf %175, %178 : vector<256x4xf32>
    %c16_67 = arith.constant 16 : index
    %c0_68 = arith.constant 0 : index
    %180 = vector.load %arg13[%c16_67, %c0_68] : memref<288x4xf32, #tpu.memory_space<vmem>>, vector<256x4xf32>
    %c1_i32_69 = arith.constant 1 : i32
    %181 = tpu.dynamic_rotate %180 by %c1_i32_69 dim 0 : vector<256x4xf32>, i32 -> vector<256x4xf32>
    %c255_i32_70 = arith.constant 255 : i32
    %182 = tpu.dynamic_rotate %180 by %c255_i32_70 dim 0 : vector<256x4xf32>, i32 -> vector<256x4xf32>
    %183 = vector.shape_cast %4 : vector<256x1xi1> to vector<256x1xi1>
    %184 = vector.broadcast %183 : vector<256x1xi1> to vector<256x4xi1>
    %185 = arith.select %184, %182, %181 : vector<256x4xi1>, vector<256x4xf32>
    %186 = vector.shape_cast %6 : vector<256x1xi1> to vector<256x1xi1>
    %187 = vector.broadcast %186 : vector<256x1xi1> to vector<256x4xi1>
    %188 = arith.select %187, %181, %182 : vector<256x4xi1>, vector<256x4xf32>
    %189 = vector.extract_strided_slice %7 {offsets = [3, 0], sizes = [1, 4], strides = [1, 1]} : vector<9x4xf32> to vector<1x4xf32>
    %190 = vector.broadcast %189 : vector<1x4xf32> to vector<256x4xf32>
    %191 = arith.mulf %185, %190 : vector<256x4xf32>
    %192 = arith.addf %179, %191 : vector<256x4xf32>
    %193 = vector.extract_strided_slice %7 {offsets = [4, 0], sizes = [1, 4], strides = [1, 1]} : vector<9x4xf32> to vector<1x4xf32>
    %194 = vector.broadcast %193 : vector<1x4xf32> to vector<256x4xf32>
    %195 = arith.mulf %180, %194 : vector<256x4xf32>
    %196 = arith.addf %192, %195 : vector<256x4xf32>
    %197 = vector.extract_strided_slice %7 {offsets = [5, 0], sizes = [1, 4], strides = [1, 1]} : vector<9x4xf32> to vector<1x4xf32>
    %198 = vector.broadcast %197 : vector<1x4xf32> to vector<256x4xf32>
    %199 = arith.mulf %188, %198 : vector<256x4xf32>
    %200 = arith.addf %196, %199 : vector<256x4xf32>
    %c32_71 = arith.constant 32 : index
    %c0_72 = arith.constant 0 : index
    %201 = vector.load %arg13[%c32_71, %c0_72] : memref<288x4xf32, #tpu.memory_space<vmem>>, vector<256x4xf32>
    %c1_i32_73 = arith.constant 1 : i32
    %202 = tpu.dynamic_rotate %201 by %c1_i32_73 dim 0 : vector<256x4xf32>, i32 -> vector<256x4xf32>
    %c255_i32_74 = arith.constant 255 : i32
    %203 = tpu.dynamic_rotate %201 by %c255_i32_74 dim 0 : vector<256x4xf32>, i32 -> vector<256x4xf32>
    %204 = vector.shape_cast %4 : vector<256x1xi1> to vector<256x1xi1>
    %205 = vector.broadcast %204 : vector<256x1xi1> to vector<256x4xi1>
    %206 = arith.select %205, %203, %202 : vector<256x4xi1>, vector<256x4xf32>
    %207 = vector.shape_cast %6 : vector<256x1xi1> to vector<256x1xi1>
    %208 = vector.broadcast %207 : vector<256x1xi1> to vector<256x4xi1>
    %209 = arith.select %208, %202, %203 : vector<256x4xi1>, vector<256x4xf32>
    %210 = vector.extract_strided_slice %7 {offsets = [6, 0], sizes = [1, 4], strides = [1, 1]} : vector<9x4xf32> to vector<1x4xf32>
    %211 = vector.broadcast %210 : vector<1x4xf32> to vector<256x4xf32>
    %212 = arith.mulf %206, %211 : vector<256x4xf32>
    %213 = arith.addf %200, %212 : vector<256x4xf32>
    %214 = vector.extract_strided_slice %7 {offsets = [7, 0], sizes = [1, 4], strides = [1, 1]} : vector<9x4xf32> to vector<1x4xf32>
    %215 = vector.broadcast %214 : vector<1x4xf32> to vector<256x4xf32>
    %216 = arith.mulf %201, %215 : vector<256x4xf32>
    %217 = arith.addf %213, %216 : vector<256x4xf32>
    %218 = vector.extract_strided_slice %7 {offsets = [8, 0], sizes = [1, 4], strides = [1, 1]} : vector<9x4xf32> to vector<1x4xf32>
    %219 = vector.broadcast %218 : vector<1x4xf32> to vector<256x4xf32>
    %220 = arith.mulf %209, %219 : vector<256x4xf32>
    %221 = arith.addf %217, %220 : vector<256x4xf32>
    %c0_75 = arith.constant 0 : index
    %c0_76 = arith.constant 0 : index
    %222 = vector.load %arg7[%c0_75, %c0_76] : memref<1x4xf32, #tpu.memory_space<vmem>>, vector<1x4xf32>
    %223 = vector.broadcast %222 : vector<1x4xf32> to vector<256x4xf32>
    %224 = arith.addf %221, %223 : vector<256x4xf32>
    %225 = arith.mulf %224, %151 : vector<256x4xf32>
    %cst_77 = arith.constant dense<0.000000e+00> : vector<4xf32>
    %226 = vector.multi_reduction <add>, %225, %cst_77 [0] : vector<256x4xf32> to vector<4xf32>
    %227 = vector.shape_cast %226 : vector<4xf32> to vector<1x4xf32>
    %cst_78 = arith.constant 2.560000e+02 : f32
    %228 = vector.broadcast %cst_78 : f32 to vector<1x4xf32>
    %229 = arith.divf %227, %228 : vector<1x4xf32>
    %230 = arith.truncf %229 : vector<1x4xf32> to vector<1x4xbf16>
    %c0_79 = arith.constant 0 : index
    %c0_80 = arith.constant 0 : index
    %231 = vector.load %arg8[%c0_79, %c0_80] : memref<4x4xbf16, #tpu.memory_space<vmem>>, vector<4x4xbf16>
    %cst_81 = arith.constant dense<0.000000e+00> : vector<1x4xf32>
    %232 = tpu.matmul %230, %231, %cst_81 {dimension_numbers = #tpu.dot_dimension_numbers<[1], [0], [0], [1], [0, 0, 1, 1], [], []>} : vector<1x4xbf16>, vector<4x4xbf16>, vector<1x4xf32> -> vector<1x4xf32>
    %c0_82 = arith.constant 0 : index
    %c0_83 = arith.constant 0 : index
    %233 = vector.load %arg9[%c0_82, %c0_83] : memref<1x4xf32, #tpu.memory_space<vmem>>, vector<1x4xf32>
    %234 = arith.addf %232, %233 : vector<1x4xf32>
    %cst_84 = arith.constant 0.000000e+00 : f32
    %235 = vector.shape_cast %234 : vector<1x4xf32> to vector<1x4xf32>
    %236 = vector.broadcast %235 : vector<1x4xf32> to vector<4x4xf32>
    %237 = vector.broadcast %cst_84 : f32 to vector<4x4xf32>
    %238 = arith.select %13, %236, %237 : vector<4x4xi1>, vector<4x4xf32>
    %cst_85 = arith.constant dense<0.000000e+00> : vector<4xf32>
    %239 = vector.multi_reduction <add>, %238, %cst_85 [1] : vector<4x4xf32> to vector<4xf32>
    %240 = vector.shape_cast %239 : vector<4xf32> to vector<4x1xf32>
    %c0_86 = arith.constant 0 : index
    %c0_87 = arith.constant 0 : index
    %241 = vector.load %arg10[%c0_86, %c0_87] : memref<4x4xf32, #tpu.memory_space<vmem>>, vector<4x4xf32>
    %242 = vector.broadcast %240 : vector<4x1xf32> to vector<4x4xf32>
    %243 = arith.mulf %242, %241 : vector<4x4xf32>
    %244 = arith.truncf %243 : vector<4x4xf32> to vector<4x4xbf16>
    %245 = arith.truncf %225 : vector<256x4xf32> to vector<256x4xbf16>
    %cst_88 = arith.constant dense<0.000000e+00> : vector<256x4xf32>
    %246 = tpu.matmul %245, %244, %cst_88 {dimension_numbers = #tpu.dot_dimension_numbers<[1], [0], [0], [1], [0, 0, 1, 1], [], []>} : vector<256x4xbf16>, vector<4x4xbf16>, vector<256x4xf32> -> vector<256x4xf32>
    %c0_89 = arith.constant 0 : index
    %c0_90 = arith.constant 0 : index
    %247 = vector.load %arg11[%c0_89, %c0_90] : memref<1x4xf32, #tpu.memory_space<vmem>>, vector<1x4xf32>
    %248 = vector.broadcast %247 : vector<1x4xf32> to vector<256x4xf32>
    %249 = arith.addf %246, %248 : vector<256x4xf32>
    %c1_91 = arith.constant 1 : index
    %c0_92 = arith.constant 0 : index
    %c0_93 = arith.constant 0 : index
    %250 = vector.load %arg1[%c1_91, %c0_92, %c0_93] : memref<2x256x4xf32, #tpu.memory_space<vmem>>, vector<1x256x4xf32>
    %251 = vector.shape_cast %250 : vector<1x256x4xf32> to vector<256x4xf32>
    %252 = arith.addf %251, %249 : vector<256x4xf32>
    %c1_94 = arith.constant 1 : index
    %c0_95 = arith.constant 0 : index
    %c0_96 = arith.constant 0 : index
    %253 = vector.load %arg12[%c1_94, %c0_95, %c0_96] : memref<2x256x4xf32, #tpu.memory_space<vmem>>, vector<1x256x4xf32>
    %254 = vector.shape_cast %253 : vector<1x256x4xf32> to vector<256x4xf32>
    %255 = vector.shape_cast %252 : vector<256x4xf32> to vector<1x256x4xf32>
    tpu.vector_store %arg12[%c1_94, %c0_95, %c0_96], %255 {strides = array<i32>} : memref<2x256x4xf32, #tpu.memory_space<vmem>>, vector<1x256x4xf32>,
    return
  }
  func.func @transform_0(%arg0: i32) -> (i32, i32, i32) {
    %c0_i32 = arith.constant 0 : i32
    %c0_i32_0 = arith.constant 0 : i32
    %c0_i32_1 = arith.constant 0 : i32
    return %arg0, %c0_i32, %c0_i32_0 : i32, i32, i32
  }
  func.func @transform_1(%arg0: i32) -> (i32, i32) {
    %c0_i32 = arith.constant 0 : i32
    %c0_i32_0 = arith.constant 0 : i32
    %c0_i32_1 = arith.constant 0 : i32
    return %c0_i32, %c0_i32_0 : i32, i32
  }
  func.func @transform_2(%arg0: i32) -> (i32, i32) {
    %c0_i32 = arith.constant 0 : i32
    %c0_i32_0 = arith.constant 0 : i32
    %c0_i32_1 = arith.constant 0 : i32
    return %c0_i32, %c0_i32_0 : i32, i32
  }
  func.func @transform_3(%arg0: i32) -> (i32, i32) {
    %c0_i32 = arith.constant 0 : i32
    %c0_i32_0 = arith.constant 0 : i32
    %c0_i32_1 = arith.constant 0 : i32
    return %c0_i32, %c0_i32_0 : i32, i32
  }
  func.func @transform_4(%arg0: i32) -> (i32, i32) {
    %c0_i32 = arith.constant 0 : i32
    %c0_i32_0 = arith.constant 0 : i32
    %c0_i32_1 = arith.constant 0 : i32
    return %c0_i32, %c0_i32_0 : i32, i32
  }
  func.func @transform_5(%arg0: i32) -> (i32, i32) {
    %c0_i32 = arith.constant 0 : i32
    %c0_i32_0 = arith.constant 0 : i32
    %c0_i32_1 = arith.constant 0 : i32
    return %c0_i32, %c0_i32_0 : i32, i32
  }
  func.func @transform_6(%arg0: i32) -> (i32, i32) {
    %c0_i32 = arith.constant 0 : i32
    %c0_i32_0 = arith.constant 0 : i32
    %c0_i32_1 = arith.constant 0 : i32
    return %c0_i32, %c0_i32_0 : i32, i32
  }
  func.func @transform_7(%arg0: i32) -> (i32, i32) {
    %c0_i32 = arith.constant 0 : i32
    %c0_i32_0 = arith.constant 0 : i32
    %c0_i32_1 = arith.constant 0 : i32
    return %c0_i32, %c0_i32_0 : i32, i32
  }
  func.func @transform_8(%arg0: i32) -> (i32, i32) {
    %c0_i32 = arith.constant 0 : i32
    %c0_i32_0 = arith.constant 0 : i32
    %c0_i32_1 = arith.constant 0 : i32
    return %c0_i32, %c0_i32_0 : i32, i32
  }
  func.func @transform_9(%arg0: i32) -> (i32, i32) {
    %c0_i32 = arith.constant 0 : i32
    %c0_i32_0 = arith.constant 0 : i32
    %c0_i32_1 = arith.constant 0 : i32
    return %c0_i32, %c0_i32_0 : i32, i32
  }
  func.func @transform_10(%arg0: i32) -> (i32, i32) {
    %c0_i32 = arith.constant 0 : i32
    %c0_i32_0 = arith.constant 0 : i32
    %c0_i32_1 = arith.constant 0 : i32
    return %c0_i32, %c0_i32_0 : i32, i32
  }
  func.func @transform_11(%arg0: i32) -> (i32, i32, i32) {
    %c0_i32 = arith.constant 0 : i32
    %c0_i32_0 = arith.constant 0 : i32
    %c0_i32_1 = arith.constant 0 : i32
    return %arg0, %c0_i32, %c0_i32_0 : i32, i32, i32
  }
}

</mosaic_0001>

<bundles_post_ra>
// kernel: tpu_custom_call.1
= control target key start
LH: loop header
LB: loop body
LE: loop exit
PB: predicated region body
PF: predicated region fallthrough
CT: control target
= control target key end

     0   :  { %vm10736_vm0 = vcmask 1041408   ;;  %vm10733_vm1 = vcmask 31744   ;;  %s5444_s15 = smov 124   ;;  %s10679_s3 = inlined_call_operand.vmem [shape: bf16[4,8], index: 3, kind: input, shape index: {}]   ;;  %s10680_s0 = inlined_call_operand.vmem [shape: f32[2,256,4], index: 0, kind: input, shape index: {}]   ;;  %s10681_s1 = inlined_call_operand.vmem [shape: f32[1,4], index: 1, kind: input, shape index: {}]   ;;  %s10682_s2 = inlined_call_operand.vmem [shape: f32[1,4], index: 2, kind: input, shape index: {}]   ;;  %s10683_s5 = inlined_call_operand.vmem [shape: f32[9,4], index: 5, kind: input, shape index: {}]   ;;  %s10684_s4 = inlined_call_operand.vmem [shape: f32[1,8], index: 4, kind: input, shape index: {}]   ;;  %s10685_s6 = inlined_call_operand.vmem [shape: f32[1,4], index: 6, kind: input, shape index: {}]   ;;  %s10686_s7 = inlined_call_operand.vmem [shape: bf16[4,4], index: 7, kind: input, shape index: {}]   ;;  %s10687_s8 = inlined_call_operand.vmem [shape: f32[1,4], index: 8, kind: input, shape index: {}]   ;;  %s10688_s9 = inlined_call_operand.vmem [shape: f32[4,4], index: 9, kind: input, shape index: {}]   ;;  %s10689_s10 = inlined_call_operand.vmem [shape: f32[1,4], index: 10, kind: input, shape index: {}]   ;;  %s10690_s11 = inlined_call_operand.vmem [shape: f32[2,256,4], index: 11, kind: output, shape index: {}]  }
   0x1   :  { %v170_v0 = vld [vmem:[%s10679_s3] sm:$0x3]  ;;  %v177_v5 = vld [vmem:[%s10680_s0 + $0x8] sm:$0xff]  ;;  %v178_v6 = vld [vmem:[%s10680_s0 + $0x10] sm:$0xff] }
   0x2   :  { %v5513_v1 = vld [vmem:[%s10681_s1] ss:$0 sm:$0xff]  ;;  %5158 = vmatprep.subr.msk.bf16.mxu0 %vm10736_vm0, %v170_v0  ;;  %v5522_v3 = vsel %vm10736_vm0, %v170_v0, 0  ;;  %v179_v9 = vld [vmem:[%s10680_s0 + $0x18] sm:$0xff]  ;;  %v181_v12 = vld [vmem:[%s10680_s0 + $0x28] sm:$0xff] }
   0x3   :  { %v5518_v2 = vld [vmem:[%s10682_s2] ss:$0 sm:$0xff]  ;;  %10996 = vst [vmem:[#allocation3_spill] sm:$0xff] %v5522_v3  ;;  %5011 = vmatpush3.bf16.msra.mxu0 %v5522_v3  ;;  %v215_v8 = vsub.f32 %v177_v5, %v5513_v1  ;;  %v216_v10 = vsub.f32 %v178_v6, %v5513_v1  ;;  %v217_v13 = vsub.f32 %v179_v9, %v5513_v1  ;;  %v182_v16 = vld [vmem:[%s10680_s0 + $0x30] sm:$0xff]  ;;  %v183_v17 = vld [vmem:[%s10680_s0 + $0x38] sm:$0xff] }
   0x4   :  { %v176_v4 = vld [vmem:[%s10680_s0] sm:$0xff]  ;;  %v219_v15 = vsub.f32 %v181_v12, %v5513_v1  ;;  %v220_v22 = vsub.f32 %v182_v16, %v5513_v1  ;;  %v185_v23 = vld [vmem:[%s10680_s0 + $0x48] sm:$0xff]  ;;  %v221_v27 = vsub.f32 %v183_v17, %v5513_v1  ;;  %v186_v37 = vld [vmem:[%s10680_s0 + $0x50] sm:$0xff] }
   0x5   :  { %v214_v7 = vsub.f32 %v176_v4, %v5513_v1  ;;  %v180_v11 = vld [vmem:[%s10680_s0 + $0x20] sm:$0xff]  ;;  %v253_v20 = vmul.f32 %v5518_v2, %v215_v8  ;;  %v254_v21 = vmul.f32 %v5518_v2, %v216_v10  ;;  %v255_v24 = vmul.f32 %v5518_v2, %v217_v13  ;;  %v187_v38 = vld [vmem:[%s10680_s0 + $0x58] sm:$0xff]  ;;  %v189_v40 = vld [vmem:[%s10680_s0 + $0x68] sm:$0xff] }
   0x6   :  { %v218_v14 = vsub.f32 %v180_v11, %v5513_v1  ;;  %v184_v18 = vld [vmem:[%s10680_s0 + $0x40] sm:$0xff]  ;;  %v257_v26 = vmul.f32 %v5518_v2, %v219_v15  ;;  %v223_v30 = vsub.f32 %v185_v23, %v5513_v1  ;;  %v258_v33 = vmul.f32 %v5518_v2, %v220_v22  ;;  %v190_v51 = vld [vmem:[%s10680_s0 + $0x70] sm:$0xff]  ;;  %v191_v52 = vld [vmem:[%s10680_s0 + $0x78] sm:$0xff] }
   0x7   :  { %v252_v19 = vmul.f32 %v5518_v2, %v214_v7  ;;  %v222_v29 = vsub.f32 %v184_v18, %v5513_v1  ;;  %v285_v31 = vpack.c.bf16 %v255_v24, %v254_v21  ;;  %v259_v34 = vmul.f32 %v5518_v2, %v221_v27  ;;  %v188_v39 = vld [vmem:[%s10680_s0 + $0x60] sm:$0xff]  ;;  %v193_v54 = vld [vmem:[%s10680_s0 + $0x88] sm:$0xff]  ;;  %v194_v4 = vld [vmem:[%s10680_s0 + $0x90] sm:$0xff] }
   0x8   :  { %v256_v25 = vmul.f32 %v5518_v2, %v218_v14  ;;  %v261_v36 = vmul.f32 %v5518_v2, %v223_v30  ;;  %v224_v42 = vsub.f32 %v186_v37, %v5513_v1  ;;  %v225_v43 = vsub.f32 %v187_v38, %v5513_v1  ;;  %v192_v53 = vld [vmem:[%s10680_s0 + $0x80] sm:$0xff]  ;;  %v195_v5 = vld [vmem:[%s10680_s0 + $0x98] sm:$0xff]  ;;  %v197_v7 = vld [vmem:[%s10680_s0 + $0xa8] sm:$0xff] }
   0x9   :  { %v284_v28 = vpack.c.bf16 %v253_v20, %v252_v19  ;;  %v260_v35 = vmul.f32 %v5518_v2, %v222_v29  ;;  %v287_v41 = vpack.c.bf16 %v259_v34, %v258_v33  ;;  %v226_v45 = vsub.f32 %v188_v39, %v5513_v1  ;;  %v196_v6 = vld [vmem:[%s10680_s0 + $0xa0] sm:$0xff]  ;;  %v198_v18 = vld [vmem:[%s10680_s0 + $0xb0] sm:$0xff]  ;;  %v199_v19 = vld [vmem:[%s10680_s0 + $0xb8] sm:$0xff] }
   0xa   :  { %v286_v32 = vpack.c.bf16 %v257_v26, %v256_v25  ;;  %v227_v46 = vsub.f32 %v189_v40, %v5513_v1  ;;  %v262_v47 = vmul.f32 %v5518_v2, %v224_v42  ;;  %v263_v48 = vmul.f32 %v5518_v2, %v225_v43  ;;  %v200_v20 = vld [vmem:[%s10680_s0 + $0xc0] sm:$0xff]  ;;  %v201_v21 = vld [vmem:[%s10680_s0 + $0xc8] sm:$0xff]  ;;  %v203_v33 = vld [vmem:[%s10680_s0 + $0xd8] sm:$0xff] }
   0xb   :  { %5012 = vmatprep.mubr.msk.bf16.mxu0 %vm10733_vm1, %v284_v28  ;;  %v288_v44 = vpack.c.bf16 %v261_v36, %v260_v35  ;;  %v264_v49 = vmul.f32 %v5518_v2, %v226_v45  ;;  %v228_v56 = vsub.f32 %v190_v51, %v5513_v1  ;;  %v229_v57 = vsub.f32 %v191_v52, %v5513_v1  ;;  %v204_v34 = vld [vmem:[%s10680_s0 + $0xe0] sm:$0xff]  ;;  %v205_v35 = vld [vmem:[%s10680_s0 + $0xe8] sm:$0xff] }
   0xc   :  { %5013 = vmatmul.mubr.msk.bf16.vlgmr.msra.gmra.mrb[0].mxu0 %vm10733_vm1, %v285_v31  ;;  %v265_v50 = vmul.f32 %v5518_v2, %v227_v46  ;;  %v289_v55 = vpack.c.bf16 %v263_v48, %v262_v47  ;;  %v230_v59 = vsub.f32 %v192_v53, %v5513_v1  ;;  %v231_v60 = vsub.f32 %v193_v54, %v5513_v1  ;;  %v206_v46 = vld [vmem:[%s10680_s0 + $0xf0] sm:$0xff]  ;;  %v207_v47 = vld [vmem:[%s10680_s0 + $0xf8] sm:$0xff] }
   0xd   :  { %5016 = vmatprep.mubr.msk.bf16.mxu0 %vm10733_vm1, %v286_v32  ;;  %v266_v61 = vmul.f32 %v5518_v2, %v228_v56  ;;  %v267_v62 = vmul.f32 %v5518_v2, %v229_v57  ;;  %v232_v9 = vsub.f32 %v194_v4, %v5513_v1  ;;  %v233_v10 = vsub.f32 %v195_v5, %v5513_v1  ;;  %v202_v32 = vld [vmem:[%s10680_s0 + $0xd0] sm:$0xff] }
   0xe   :  { %v290_v58 = vpack.c.bf16 %v265_v50, %v264_v49  ;;  %v268_v63 = vmul.f32 %v5518_v2, %v230_v59  ;;  %v269_v0 = vmul.f32 %v5518_v2, %v231_v60  ;;  %v234_v12 = vsub.f32 %v196_v6, %v5513_v1 }
   0xf   :  { %v291_v8 = vpack.c.bf16 %v267_v62, %v266_v61  ;;  %v235_v13 = vsub.f32 %v197_v7, %v5513_v1  ;;  %v270_v14 = vmul.f32 %v5518_v2, %v232_v9  ;;  %v271_v15 = vmul.f32 %v5518_v2, %v233_v10 }
  0x10   :  { %v292_v11 = vpack.c.bf16 %v269_v0, %v268_v63  ;;  %v272_v16 = vmul.f32 %v5518_v2, %v234_v12  ;;  %v236_v23 = vsub.f32 %v198_v18, %v5513_v1  ;;  %v237_v24 = vsub.f32 %v199_v19, %v5513_v1  ;;  %v5722_v0 = vld [vmem:[%s10684_s4] ss:$0 sm:$0xff] }
  0x11   :  { %v273_v17 = vmul.f32 %v5518_v2, %v235_v13  ;;  %v293_v22 = vpack.c.bf16 %v271_v15, %v270_v14  ;;  %v238_v26 = vsub.f32 %v200_v20, %v5513_v1  ;;  %v239_v27 = vsub.f32 %v201_v21, %v5513_v1 }
  0x12   :  { %v274_v28 = vmul.f32 %v5518_v2, %v236_v23  ;;  %v275_v29 = vmul.f32 %v5518_v2, %v237_v24  ;;  %v240_v37 = vsub.f32 %v202_v32, %v5513_v1  ;;  %v241_v38 = vsub.f32 %v203_v33, %v5513_v1 }
  0x13   :  { %v294_v25 = vpack.c.bf16 %v273_v17, %v272_v16  ;;  %v276_v30 = vmul.f32 %v5518_v2, %v238_v26  ;;  %v277_v31 = vmul.f32 %v5518_v2, %v239_v27  ;;  %v242_v40 = vsub.f32 %v204_v34, %v5513_v1 }
  0x14   :  { %5017 = vmatmul.mubr.msk.bf16.gmra.mrb[4].mxu0 %vm10733_vm1, %v287_v41  ;;  %v295_v36 = vpack.c.bf16 %v275_v29, %v274_v28  ;;  %v243_v41 = vsub.f32 %v205_v35, %v5513_v1  ;;  %v278_v42 = vmul.f32 %v5518_v2, %v240_v37  ;;  %v279_v43 = vmul.f32 %v5518_v2, %v241_v38 }
  0x15   :  { %5020 = vmatprep.mubr.msk.bf16.mxu0 %vm10733_vm1, %v288_v44  ;;  %v296_v39 = vpack.c.bf16 %v277_v31, %v276_v30  ;;  %v280_v44 = vmul.f32 %v5518_v2, %v242_v40  ;;  %v244_v49 = vsub.f32 %v206_v46, %v5513_v1  ;;  %v245_v50 = vsub.f32 %v207_v47, %v5513_v1 }
  0x16   :  { %v281_v45 = vmul.f32 %v5518_v2, %v243_v41  ;;  %v297_v48 = vpack.c.bf16 %v279_v43, %v278_v42  ;;  %v11000_v38 = vmov 0 }
  0x17   :  { %v282_v52 = vmul.f32 %v5518_v2, %v244_v49  ;;  %v283_v53 = vmul.f32 %v5518_v2, %v245_v50  ;;  %v168_v2 = vld [vmem:[%s10683_s5] sm:$0xff] }
  0x18   :  { %v298_v51 = vpack.c.bf16 %v281_v45, %v280_v44 }
  0x19   :  { %v299_v54 = vpack.c.bf16 %v283_v53, %v282_v52 }
  0x1c   :  { %5021 = vmatmul.mubr.msk.bf16.gmra.mrb[8].mxu0 %vm10733_vm1, %v289_v55  ;;  %v10691_v55 = vlaneseq }
  0x1d   :  { %5024 = vmatprep.mubr.msk.bf16.mxu0 %vm10733_vm1, %v290_v58 }
  0x1e   :  { %v5702_v56 = vshrl.u32 %v10691_v55, 7 }
  0x20   :  { %v1173_v57 = vsub.s32 1, %v5702_v56  ;;  %v1453_v1 = vsub.s32 4, %v5702_v56  ;;  %v42_v58 = vadd.s32 16, %v5702_v56  ;;  %v5708_v59 = vadd.s32 32, %v5702_v56 }
  0x21   :  { %v1733_v60 = vsub.s32 7, %v5702_v56  ;;  %v5715_v61 = vsub.s32 0, %v5702_v56  ;;  %v1241_v62 = vsub.s32 2, %v5702_v56  ;;  %v1385_v63 = vsub.s32 3, %v5702_v56 }
  0x22   :  { %v1521_v4 = vsub.s32 5, %v5702_v56  ;;  %v5725_v5 = vrot.slane %v168_v2, %v1173_v57  ;;  %v5727_v6 = vrot.slane %v168_v2, %v1453_v1  ;;  %v76_v9 = vand.u32 15, %v5708_v59 }
  0x23   :  { %10997 = vst [vmem:[#allocation4_spill] sm:$0xff] %v5715_v61  ;;  %v1665_v10 = vsub.s32 6, %v5702_v56  ;;  %v5735_v14 = vrot.slane %v168_v2, %v5715_v61  ;;  %v5737_v15 = vrot.slane %v168_v2, %v1241_v62  ;;  %v5739_v16 = vrot.slane %v168_v2, %v1385_v63 }
  0x24   :  { %5025 = vmatmul.mubr.msk.bf16.gmra.mrb[12].mxu0 %vm10733_vm1, %v291_v8  ;;  %v74_v8 = vand.u32 15, %v42_v58  ;;  %v5743_v19 = vadd.s32 48, %v5702_v56  ;;  %v5745_v20 = vrot.slane %v168_v2, %v1521_v4  ;;  %v5748_v21 = vadd.s32 24, %v5702_v56 }
  0x25   :  { %5028 = vmatprep.mubr.msk.bf16.mxu0 %vm10733_vm1, %v292_v11  ;;  %v5731_v11 = vrot.slane %v168_v2, %v1733_v60  ;;  %v5757_v26 = vadd.s32 56, %v5702_v56  ;;  %vm10738_vm2 = vcmp.lt.s32.totalorder %v5702_v56, 1  ;;  %v5763_v29 = vadd.s32 8, %v5702_v56 }
  0x26   :  { %v5766_v30 = vadd.s32 64, %v5702_v56  ;;  %v5771_v32 = vadd.s32 72, %v5702_v56  ;;  %v5774_v33 = vadd.s32 80, %v5702_v56  ;;  %vm10745_vm3 = vcmp.lt.s32.totalorder %v5702_v56, 7 }
  0x27   :  { %v5778_v35 = vrot.slane %v168_v2, %v1665_v10  ;;  %v78_v37 = vand.u32 15, %v5743_v19  ;;  %vm5784_vm4 = vcmp.eq.s32.totalorder %v74_v8, 0  ;;  %v5805_v57 = vadd.s32 104, %v5702_v56 }
  0x28   :  { %10998 = vst [vmem:[#allocation5_spill] sm:$0xff] %v5774_v33  ;;  %v11001_v38 = vsel %vm5784_vm4, 4294967295, %v11000_v38  ;;  %v5812_v62 = vadd.s32 112, %v5702_v56  ;;  %v5815_v63 = vadd.s32 120, %v5702_v56  ;;  %vm5887_vm6 = vcmp.eq.s32.totalorder %v76_v9, 0 }
  0x29   :  { %11002 = vst [vmem:[#allocation7_spill] sm:$0xff] %v11001_v38  ;;  %11004 = vst [vmem:[#allocation9_spill] sm:$0xff] %v5805_v57  ;;  %vm5837_vm5 = vcmp.eq.s32.totalorder %v78_v37, 0 }
  0x2a   :  { %11005 = vst [vmem:[#allocation10_spill] sm:$0xff] %v5812_v62  ;;  %11006 = vst [vmem:[#allocation11_spill] sm:$0xff] %v5815_v63  ;;  %v11040_v62 = vand.u32 15, %v5757_v26 }
  0x2c   :  { %5029 = vmatmul.mubr.msk.bf16.gmra.mrb[16].mxu0 %vm10733_vm1, %v293_v22  ;;  %vm6100_vm9 = vcmp.eq.s32.totalorder %v11040_v62, 15 }
  0x2d   :  { %5032 = vmatprep.mubr.msk.bf16.mxu0 %vm10733_vm1, %v294_v25  ;;  %v5754_v25 = vadd.s32 40, %v5702_v56 }
  0x34   :  { %5033 = vmatmul.mubr.msk.bf16.gmra.mrb[20].mxu0 %vm10733_vm1, %v295_v36  ;;  %v5781_v36 = vadd.s32 88, %v5702_v56 }
  0x35   :  { %5036 = vmatprep.mubr.msk.bf16.mxu0 %vm10733_vm1, %v296_v39 }
  0x36   :  { %10999 = vst [vmem:[#allocation6_spill] sm:$0xff] %v5781_v36 }
  0x3c   :  { %5037 = vmatmul.mubr.msk.bf16.gmra.mrb[24].mxu0 %vm10733_vm1, %v297_v48 }
  0x3d   :  { %5040 = vmatprep.mubr.msk.bf16.mxu0 %vm10733_vm1, %v298_v51 }
  0x44   :  { %5041 = vmatmul.mubr.msk.bf16.gmra.mrb[28].mxu0 %vm10733_vm1, %v299_v54  ;;  %v5802_v54 = vadd.s32 96, %v5702_v56 }
  0x46   :  { %11003 = vst [vmem:[#allocation8_spill] sm:$0xff] %v5802_v54 }
  0xdf   :  { %v5014_v7 = vpop.f32.mrb[0].mxu0 }
  0xe0   :  { %v403_v12 = vadd.f32 %v5014_v7, %v5722_v0  ;;  %v394_v13 = vpop.f32.mrb[1].mxu0 }
  0xe1   :  { %v395_v17 = vadd.f32 %v5722_v0, %v394_v13  ;;  %v5015_v18 = vpop.f32.mrb[2].mxu0 }
  0xe2   :  { %v4724_v22 = vmul.f32 -1.442695, %v403_v12  ;;  %715 = vst.msk [vmem:[#allocation2 + $0x20] sm:$0xff] %vm10733_vm1, %v403_v12  ;;  %745 = vst.msk [vmem:[#allocation2] sm:$0xff] %vm10733_vm1, %v403_v12  ;;  %v406_v23 = vadd.f32 %v5015_v18, %v5722_v0  ;;  %v397_v24 = vpop.f32.mrb[3].mxu0 }
  0xe3   :  { %v4722_v27 = vmul.f32 -1.442695, %v395_v17  ;;  %713 = vst.msk [vmem:[#allocation2 + $0x10] sm:$0xff] %vm10733_vm1, %v395_v17  ;;  %v398_v28 = vadd.f32 %v5722_v0, %v397_v24  ;;  %v11008_v24 = vmov 0 }
  0xe4   :  { %5165 = vpow2.f32 %v4724_v22  ;;  %v4725_v31 = vmul.f32 -1.442695, %v406_v23  ;;  %716 = vst.msk [vmem:[#allocation2 + $0x28] sm:$0xff] %vm10733_vm1, %v406_v23  ;;  %746 = vst.msk [vmem:[#allocation2 + $0x8] sm:$0xff] %vm10733_vm1, %v406_v23  ;;  %v11009_v24 = vsel %vm5837_vm5, 4294967295, %v11008_v24 }
  0xe5   :  { %5167 = vpow2.f32 %v4722_v27  ;;  %v4723_v34 = vmul.f32 -1.442695, %v398_v28  ;;  %714 = vst.msk [vmem:[#allocation2 + $0x18] sm:$0xff] %vm10733_vm1, %v398_v28  ;;  %11010 = vst [vmem:[#allocation13_spill] sm:$0xff] %v11009_v24 }
  0xe6   :  { %5169 = vpow2.f32 %v4725_v31 }
  0xe7   :  { %5171 = vpow2.f32 %v4723_v34  ;;  %v5018_v41 = vpop.f32.mrb[4].mxu0 }
  0xe8   :  { %v419_v45 = vadd.f32 %v5018_v41, %v5722_v0  ;;  %v410_v46 = vpop.f32.mrb[5].mxu0 }
  0xe9   :  { %v411_v50 = vadd.f32 %v5722_v0, %v410_v46  ;;  %v5019_v51 = vpop.f32.mrb[6].mxu0  ;;  %v5798_v52 = vld [vmem:[#allocation2 + $0x20] sm:$0xff] }
  0xea   :  { %v4728_v1 = vmul.f32 -1.442695, %v419_v45  ;;  %719 = vst.msk [vmem:[#allocation2 + $0x40] sm:$0xff] %vm10733_vm1, %v419_v45  ;;  %v422_v58 = vadd.f32 %v5019_v51, %v5722_v0  ;;  %v413_v2 = vpop.f32.mrb[7].mxu0  ;;  %v5809_v60 = vld [vmem:[#allocation2 + $0x10] sm:$0xff]  ;;  %v5820_v8 = vrot.slane %v5798_v52, 7 }
  0xeb   :  { %v4726_v4 = vmul.f32 -1.442695, %v411_v50  ;;  %717 = vst.msk [vmem:[#allocation2 + $0x30] sm:$0xff] %vm10733_vm1, %v411_v50  ;;  %v414_v7 = vadd.f32 %v5722_v0, %v413_v2  ;;  %v5822_v10 = vld [vmem:[#allocation2 + $0x8] sm:$0xff]  ;;  %v5827_v13 = vrot.slane %v5809_v60, 7  ;;  %v5831_v18 = vrot.slane %v5798_v52, 1 }
  0xec   :  { %v5824_v12 = vld [vmem:[#allocation2 + $0x28] sm:$0xff]  ;;  %5173 = vpow2.f32 %v4728_v1  ;;  %v4729_v17 = vmul.f32 -1.442695, %v422_v58  ;;  %720 = vst.msk [vmem:[#allocation2 + $0x48] sm:$0xff] %vm10733_vm1, %v422_v58  ;;  %v5833_v19 = vld [vmem:[#allocation2 + $0x18] sm:$0xff]  ;;  %v10692_v22 = vrot.slane %v5822_v10, 7 }
  0xed   :  { %11007 = vst [vmem:[#allocation12_spill] sm:$0xff] %v5831_v18  ;;  %5175 = vpow2.f32 %v4726_v4  ;;  %v4727_v23 = vmul.f32 -1.442695, %v414_v7  ;;  %718 = vst.msk [vmem:[#allocation2 + $0x38] sm:$0xff] %vm10733_vm1, %v414_v7  ;;  %v10699_v27 = vrot.slane %v5833_v19, 7  ;;  %v5843_v28 = vrot.slane %v5809_v60, 1 }
  0xee   :  { %v5166_v31 = vpop.eup %5165  ;;  %5177 = vpow2.f32 %v4729_v17  ;;  %v843_v34 = vsel %vm10738_vm2, %v10692_v22, %v5827_v13  ;;  %v10694_v41 = vrot.slane %v5833_v19, 1  ;;  %v10696_v37 = vrot.slane %v5824_v12, 1 }
  0xef   :  { %11011 = vst [vmem:[#allocation14_spill] sm:$0xff] %v5843_v28  ;;  %v5168_v45 = vpop.eup %5167  ;;  %v619_v46 = vadd.f32 1.0, %v5166_v31  ;;  %5179 = vpow2.f32 %v4727_v23  ;;  %v5022_v50 = vpop.f32.mrb[8].mxu0  ;;  %v10698_v51 = vrot.slane %v5824_v12, 7  ;;  %v5858_v1 = vsel %vm10738_vm2, %v10699_v27, %v5820_v8 }
  0xf0   :  { %v5170_v58 = vpop.eup %5169  ;;  %v617_v2 = vadd.f32 1.0, %v5168_v45  ;;  %v435_v4 = vadd.f32 %v5022_v50, %v5722_v0  ;;  %v426_v7 = vpop.f32.mrb[9].mxu0  ;;  %v5866_v17 = vsel %vm10745_vm3, %v5831_v18, %v10696_v37  ;;  %v5873_v23 = vsel %vm10745_vm3, %v5843_v28, %v10694_v41 }
  0xf1   :  { %v5172_v31 = vpop.eup %5171  ;;  %5181 = vrcp.f32 %v619_v46  ;;  %v620_v45 = vadd.f32 1.0, %v5170_v58  ;;  %v427_v50 = vadd.f32 %v5722_v0, %v426_v7  ;;  %v5023_v55 = vpop.f32.mrb[10].mxu0  ;;  %v977_v53 = vsel %vm5784_vm4, %v5873_v23, %v843_v34 }
  0xf2   :  { %5183 = vrcp.f32 %v617_v2  ;;  %v618_v49 = vadd.f32 1.0, %v5172_v31  ;;  %v4732_v48 = vmul.f32 -1.442695, %v435_v4  ;;  %723 = vst.msk [vmem:[#allocation2 + $0x60] sm:$0xff] %vm10733_vm1, %v435_v4  ;;  %v438_v47 = vadd.f32 %v5023_v55, %v5722_v0  ;;  %v429_v22 = vpop.f32.mrb[11].mxu0  ;;  %v5881_v42 = vld [vmem:[#allocation2 + $0x30] sm:$0xff] }
  0xf3   :  { %11012 = vst [vmem:[#allocation15_spill] sm:$0xff] %v5881_v42  ;;  %5185 = vrcp.f32 %v620_v45  ;;  %v4730_v46 = vmul.f32 -1.442695, %v427_v50  ;;  %721 = vst.msk [vmem:[#allocation2 + $0x50] sm:$0xff] %vm10733_vm1, %v427_v50  ;;  %v430_v58 = vadd.f32 %v5722_v0, %v429_v22  ;;  %v11013_v34 = vmov 0 }
  0xf4   :  { %v11014_v34 = vsel %vm5887_vm6, 4294967295, %v11013_v34  ;;  %v10693_v2 = vrot.slane %v5881_v42, 7  ;;  %5187 = vrcp.f32 %v618_v49  ;;  %v4733_v4 = vmul.f32 -1.442695, %v438_v47  ;;  %724 = vst.msk [vmem:[#allocation2 + $0x68] sm:$0xff] %vm10733_vm1, %v438_v47  ;;  %v5893_v55 = vld [vmem:[#allocation2 + $0x38] sm:$0xff] }
  0xf5   :  { %11015 = vst [vmem:[#allocation16_spill] sm:$0xff] %v11014_v34  ;;  %v1109_v7 = vmul.f32 %v5735_v14, %v977_v53  ;;  %v1177_v31 = vmul.f32 %v5725_v5, %v5809_v60  ;;  %5189 = vpow2.f32 %v4732_v48  ;;  %v4731_v22 = vmul.f32 -1.442695, %v430_v58  ;;  %722 = vst.msk [vmem:[#allocation2 + $0x58] sm:$0xff] %vm10733_vm1, %v430_v58 }
  0xf6   :  { %v10697_v59 = vrot.slane %v5881_v42, 1  ;;  %v10695_v9 = vrot.slane %v5893_v55, 1  ;;  %v5174_v45 = vpop.eup %5173  ;;  %5191 = vpow2.f32 %v4730_v46  ;;  %v5907_v47 = vsel %vm10738_vm2, %v10698_v51, %v10693_v2 }
  0xf7   :  { %11016 = vst [vmem:[#allocation17_spill] sm:$0xff] %v5907_v47  ;;  %v1209_v49 = vadd.f32 %v1177_v31, %v1109_v7  ;;  %v1321_v48 = vsel %vm5784_vm4, %v5866_v17, %v5858_v1  ;;  %v5176_v53 = vpop.eup %5175  ;;  %v623_v50 = vadd.f32 1.0, %v5174_v45  ;;  %5193 = vpow2.f32 %v4733_v4  ;;  %v5026_v58 = vpop.f32.mrb[12].mxu0 }
  0xf8   :  { %v5919_v46 = vsel %vm10745_vm3, %v10697_v59, %v10695_v9  ;;  %v1245_v7 = vmul.f32 %v5737_v15, %v5873_v23  ;;  %v5178_v31 = vpop.eup %5177  ;;  %v621_v44 = vadd.f32 1.0, %v5176_v53  ;;  %5195 = vpow2.f32 %v4731_v22  ;;  %v442_v43 = vpop.f32.mrb[13].mxu0 }
  0xf9   :  { %11017 = vst [vmem:[#allocation18_spill] sm:$0xff] %v5919_v46  ;;  %v451_v2 = vadd.f32 %v5026_v58, %v5722_v0  ;;  %v5180_v45 = vpop.eup %5179  ;;  %5197 = vrcp.f32 %v623_v50  ;;  %v624_v41 = vadd.f32 1.0, %v5178_v31  ;;  %v443_v9 = vadd.f32 %v5722_v0, %v442_v43  ;;  %v5027_v37 = vpop.f32.mrb[14].mxu0  ;;  %v6443_v34 = vld [vmem:[#allocation2 + $0x60] sm:$0xff] }
  0xfa   :  { %v1389_v59 = vmul.f32 %v5739_v16, %v1321_v48  ;;  %5199 = vrcp.f32 %v621_v44  ;;  %v622_v51 = vadd.f32 1.0, %v5180_v45  ;;  %v454_v22 = vadd.f32 %v5027_v37, %v5722_v0  ;;  %v445_v58 = vpop.f32.mrb[15].mxu0 }
  0xfb   :  { %v4736_v53 = vmul.f32 -1.442695, %v451_v2  ;;  %727 = vst.msk [vmem:[#allocation2 + $0x80] sm:$0xff] %vm10733_vm1, %v451_v2  ;;  %v5182_v27 = vpop.eup %5181  ;;  %5201 = vrcp.f32 %v624_v41  ;;  %v4734_v40 = vmul.f32 -1.442695, %v443_v9  ;;  %725 = vst.msk [vmem:[#allocation2 + $0x70] sm:$0xff] %vm10733_vm1, %v443_v9  ;;  %v446_v50 = vadd.f32 %v5722_v0, %v445_v58 }
  0xfc   :  { %v1277_v31 = vadd.f32 %v1245_v7, %v1209_v49  ;;  %v5184_v43 = vpop.eup %5183  ;;  %5203 = vrcp.f32 %v622_v51  ;;  %v4737_v4 = vmul.f32 -1.442695, %v454_v22  ;;  %728 = vst.msk [vmem:[#allocation2 + $0x88] sm:$0xff] %vm10733_vm1, %v454_v22  ;;  %1942 = vrot.lane.b32.xlu1 %v5182_v27, %s5444_s15  ;;  %v1457_v44 = vmul.f32 %v5727_v6, %v5798_v52 }
  0xfd   :  { %v5186_v37 = vpop.eup %5185  ;;  %5205 = vpow2.f32 %v4736_v53  ;;  %v4735_v2 = vmul.f32 -1.442695, %v446_v50  ;;  %726 = vst.msk [vmem:[#allocation2 + $0x78] sm:$0xff] %vm10733_vm1, %v446_v50  ;;  %1938 = vrot.lane.b32.xlu0 %v5184_v43, %s5444_s15  ;;  %v1601_v27 = vsel %vm5784_vm4, %v5919_v46, %v5907_v47  ;;  %v5957_v48 = vadd.s32 128, %v5702_v56 }
  0xfe   :  { %v1421_v51 = vadd.f32 %v1389_v59, %v1277_v31  ;;  %v5188_v9 = vpop.eup %5187  ;;  %5207 = vpow2.f32 %v4734_v40  ;;  %v1525_v59 = vmul.f32 %v5745_v20, %v5866_v17  ;;  %v1669_v58 = vmul.f32 %v5778_v35, %v1601_v27 }
  0xff   :  { %v5190_v45 = vpop.eup %5189  ;;  %5209 = vpow2.f32 %v4737_v4  ;;  %v5030_v53 = vpop.f32.mrb[16].mxu0  ;;  %11018 = vst [vmem:[#allocation19_spill] sm:$0xff] %v5957_v48  ;;  %v6075_v48 = vld [vmem:[#allocation2 + $0x40] sm:$0xff]  ;;  %v11044_v62 = vrot.slane %v5893_v55, 7 }
 0x100   :  { %v1489_v22 = vadd.f32 %v1457_v44, %v1421_v51  ;;  %v5192_v50 = vpop.eup %5191  ;;  %v627_v31 = vadd.f32 1.0, %v5190_v45  ;;  %5211 = vpow2.f32 %v4735_v2  ;;  %v467_v40 = vadd.f32 %v5030_v53, %v5722_v0  ;;  %1944 = vrot.lane.b32.xlu1 %v5186_v37, %s5444_s15  ;;  %v458_v43 = vpop.f32.mrb[17].mxu0 }
 0x101   :  { %v5194_v7 = vpop.eup %5193  ;;  %v625_v4 = vadd.f32 1.0, %v5192_v50  ;;  %v459_v44 = vadd.f32 %v5722_v0, %v458_v43  ;;  %v5031_v51 = vpop.f32.mrb[18].mxu0  ;;  %1940 = vrot.lane.b32.xlu0 %v5188_v9, %s5444_s15  ;;  %v11021_v43 = vmov 0 }
 0x102   :  { %v1557_v49 = vadd.f32 %v1525_v59, %v1489_v22  ;;  %v5196_v45 = vpop.eup %5195  ;;  %5213 = vrcp.f32 %v627_v31  ;;  %v628_v2 = vadd.f32 1.0, %v5194_v7  ;;  %v4740_v53 = vmul.f32 -1.442695, %v467_v40  ;;  %731 = vst.msk [vmem:[#allocation2 + $0xa0] sm:$0xff] %vm10733_vm1, %v467_v40  ;;  %v461_v41 = vpop.f32.mrb[19].mxu0  ;;  %v5969_v31 = vld [vmem:[#allocation2] sm:$0xff] }
 0x103   :  { %v470_v37 = vadd.f32 %v5031_v51, %v5722_v0  ;;  %v5198_v39 = vpop.eup %5197  ;;  %5215 = vrcp.f32 %v625_v4  ;;  %v626_v50 = vadd.f32 1.0, %v5196_v45  ;;  %v4738_v38 = vmul.f32 -1.442695, %v459_v44  ;;  %729 = vst.msk [vmem:[#allocation2 + $0x90] sm:$0xff] %vm10733_vm1, %v459_v44  ;;  %11019 = vst [vmem:[#allocation20_spill] sm:$0xff] %v5969_v31 }
 0x104   :  { %v462_v9 = vadd.f32 %v5722_v0, %v461_v41  ;;  %v5200_v22 = vpop.eup %5199  ;;  %5217 = vrcp.f32 %v628_v2  ;;  %v1701_v7 = vadd.f32 %v1669_v58, %v1557_v49  ;;  %v1737_v59 = vmul.f32 %v5731_v11, %v5881_v42 }
 0x105   :  { %v4741_v27 = vmul.f32 -1.442695, %v470_v37  ;;  %732 = vst.msk [vmem:[#allocation2 + $0xa8] sm:$0xff] %vm10733_vm1, %v470_v37  ;;  %v11020_v40 = vand.u32 15, %v5748_v21  ;;  %v11024_v4 = vand.u32 15, %v5754_v25  ;;  %v11025_v41 = vmov 0  ;;  %v5202_v44 = vpop.eup %5201  ;;  %1946 = vrot.lane.b32.xlu0 %v5200_v22, %s5444_s15 }
 0x106   :  { %5219 = vrcp.f32 %v626_v50  ;;  %v4739_v49 = vmul.f32 -1.442695, %v462_v9  ;;  %730 = vst.msk [vmem:[#allocation2 + $0x98] sm:$0xff] %vm10733_vm1, %v462_v9  ;;  %v5988_v21 = vld [vmem:[%s10683_s5 + $0x8] ss:$0 sm:$0xff]  ;;  %v5204_v51 = vpop.eup %5203  ;;  %v11028_v45 = vsel %vm5837_vm5, %v5919_v46, %v5907_v47  ;;  %v1769_v37 = vadd.f32 %v1737_v59, %v1701_v7 }
 0x107   :  { %vm5973_vm7 = vcmp.eq.s32.totalorder %v11020_v40, 15  ;;  %vm5979_vm8 = vcmp.eq.s32.totalorder %v11024_v4, 15  ;;  %5221 = vpow2.f32 %v4740_v53  ;;  %v5998_v2 = vmul.f32 %v5735_v14, %v11028_v45  ;;  %v5206_v9 = vpop.eup %5205  ;;  %v5034_v22 = vpop.f32.mrb[20].mxu0  ;;  %1948 = vrot.lane.b32.xlu1 %v5204_v51, %s5444_s15 }
 0x108   :  { %v11022_v43 = vsel %vm5973_vm7, 4294967295, %v11021_v43  ;;  %v11026_v41 = vsel %vm5979_vm8, 4294967295, %v11025_v41  ;;  %v1805_v50 = vmul.f32 %v5988_v21, %v5919_v46  ;;  %5223 = vpow2.f32 %v4738_v38  ;;  %v5208_v25 = vpop.eup %5207  ;;  %v474_v59 = vpop.f32.mrb[21].mxu0 }
 0x109   :  { %11023 = vst [vmem:[#allocation21_spill] sm:$0xff] %v11022_v43  ;;  %11027 = vst [vmem:[#allocation22_spill] sm:$0xff] %v11026_v41  ;;  %v6007_v4 = vmul.f32 %v5725_v5, %v5969_v31  ;;  %v631_v45 = vadd.f32 1.0, %v5206_v9  ;;  %5225 = vpow2.f32 %v4741_v27  ;;  %v483_v7 = vadd.f32 %v5034_v22, %v5722_v0  ;;  %v5210_v38 = vpop.eup %5209  ;;  %v5035_v40 = vpop.f32.mrb[22].mxu0  ;;  %1950 = vrot.lane.b32.xlu0 %v5198_v39, %s5444_s15  ;;  %v11103_v41 = vld [vmem:[#allocation9_spill] sm:$0xff] }
 0x10a   :  { %11029 = vst [vmem:[#allocation23_spill] sm:$0xff] %v5998_v2  ;;  %v6010_v58 = vadd.f32 %v1805_v50, %v1769_v37  ;;  %v629_v61 = vadd.f32 1.0, %v5208_v25  ;;  %5227 = vpow2.f32 %v4739_v49  ;;  %v475_v51 = vadd.f32 %v5722_v0, %v474_v59  ;;  %v5212_v9 = vpop.eup %5211  ;;  %v477_v25 = vpop.f32.mrb[23].mxu0 }
 0x10b   :  { %v11030_v53 = vrot.slane %v5822_v10, 1  ;;  %v11031_v3 = vrot.slane %v5969_v31, 1  ;;  %5229 = vrcp.f32 %v631_v45  ;;  %v632_v37 = vadd.f32 1.0, %v5210_v38  ;;  %735 = vst.msk [vmem:[#allocation2 + $0xc0] sm:$0xff] %vm10733_vm1, %v483_v7  ;;  %1952 = vrot.lane.b32.xlu1 %v5202_v44, %s5444_s15 }
 0x10c   :  { %v4744_v50 = vmul.f32 -1.442695, %v483_v7  ;;  %v486_v49 = vadd.f32 %v5035_v40, %v5722_v0  ;;  %5231 = vrcp.f32 %v629_v61  ;;  %v630_v22 = vadd.f32 1.0, %v5212_v9  ;;  %733 = vst.msk [vmem:[#allocation2 + $0xb0] sm:$0xff] %vm10733_vm1, %v475_v51 }
 0x10d   :  { %v6020_v27 = vsel %vm10745_vm3, %v11031_v3, %v11030_v53  ;;  %v4742_v39 = vmul.f32 -1.442695, %v475_v51  ;;  %v478_v59 = vadd.f32 %v5722_v0, %v477_v25  ;;  %v5214_v3 = vpop.eup %5213  ;;  %5233 = vrcp.f32 %v632_v37 }
 0x10e   :  { %v4745_v53 = vmul.f32 -1.442695, %v486_v49  ;;  %736 = vst.msk [vmem:[#allocation2 + $0xc8] sm:$0xff] %vm10733_vm1, %v486_v49  ;;  %v6030_v45 = vmul.f32 %v5737_v15, %v6020_v27  ;;  %v6034_v61 = vmul.f32 %v5727_v6, %v5809_v60  ;;  %v5216_v40 = vpop.eup %5215  ;;  %5235 = vrcp.f32 %v630_v22 }
 0x10f   :  { %v4743_v7 = vmul.f32 -1.442695, %v478_v59  ;;  %734 = vst.msk [vmem:[#allocation2 + $0xb8] sm:$0xff] %vm10733_vm1, %v478_v59  ;;  %v6039_v44 = vmul.f32 %v5745_v20, %v5873_v23  ;;  %v11033_v38 = vrot.slane %v5833_v19, 7  ;;  %v5218_v9 = vpop.eup %5217  ;;  %5237 = vpow2.f32 %v4744_v50  ;;  %1954 = vrot.lane.b32.xlu0 %v5216_v40, %s5444_s15 }
 0x110   :  { %v11034_v60 = vrot.slane %v5824_v12, 7  ;;  %v11035_v49 = vrot.slane %v5881_v42, 1  ;;  %v11036_v25 = vrot.slane %v5824_v12, 1  ;;  %v11037_v50 = vrot.slane %v5833_v19, 1  ;;  %v5220_v40 = vpop.eup %5219 }
 0x111   :  { %11032 = vst [vmem:[#allocation24_spill] sm:$0xff] %v6039_v44  ;;  %v6046_v51 = vsel %vm10738_vm2, %v5827_v13, %v11033_v38  ;;  %5239 = vpow2.f32 %v4742_v39  ;;  %v5038_v38 = vpop.f32.mrb[24].mxu0  ;;  %1956 = vrot.lane.b32.xlu1 %v5220_v40, %s5444_s15  ;;  %v6089_v63 = vmul.f32 %v5988_v21, %v5866_v17 }
 0x112   :  { %v6054_v37 = vsel %vm10738_vm2, %v5820_v8, %v11034_v60  ;;  %v6062_v22 = vsel %vm10745_vm3, %v11036_v25, %v11035_v49  ;;  %v6069_v59 = vsel %vm10745_vm3, %v11037_v50, %v5831_v18  ;;  %v6073_v60 = vmul.f32 %v5731_v11, %v5798_v52  ;;  %v5222_v50 = vpop.eup %5221  ;;  %v490_v18 = vpop.f32.mrb[25].mxu0 }
 0x113   :  { %v1074_v49 = vsel %vm5973_vm7, %v6046_v51, %v6069_v59  ;;  %5241 = vpow2.f32 %v4745_v53  ;;  %v499_v39 = vadd.f32 %v5038_v38, %v5722_v0  ;;  %11039 = vst [vmem:[#allocation26_spill] sm:$0xff] %v6089_v63  ;;  %v5224_v57 = vpop.eup %5223  ;;  %v635_v54 = vadd.f32 1.0, %v5222_v50  ;;  %v5039_v36 = vpop.f32.mrb[26].mxu0  ;;  %1958 = vrot.lane.b32.xlu0 %v5214_v3, %s5444_s15 }
 0x114   :  { %11038 = vst [vmem:[#allocation25_spill] sm:$0xff] %v6073_v60  ;;  %5243 = vpow2.f32 %v4743_v7  ;;  %v491_v2 = vadd.f32 %v5722_v0, %v490_v18  ;;  %v1110_v53 = vmul.f32 %v5735_v14, %v6046_v51  ;;  %v5226_v25 = vpop.eup %5225  ;;  %v633_v38 = vadd.f32 1.0, %v5224_v57  ;;  %v493_v63 = vpop.f32.mrb[27].mxu0 }
 0x115   :  { %v4748_v60 = vmul.f32 -1.442695, %v499_v39  ;;  %739 = vst.msk [vmem:[#allocation2 + $0xe0] sm:$0xff] %vm10733_vm1, %v499_v39  ;;  %v502_v40 = vadd.f32 %v5039_v36, %v5722_v0  ;;  %v11041_v7 = vmov 0  ;;  %v5228_v50 = vpop.eup %5227  ;;  %5245 = vrcp.f32 %v635_v54  ;;  %1960 = vrot.lane.b32.xlu1 %v5218_v9, %s5444_s15 }
 0x116   :  { %v11042_v7 = vsel %vm6100_vm9, 4294967295, %v11041_v7  ;;  %v636_v33 = vadd.f32 1.0, %v5226_v25  ;;  %737 = vst.msk [vmem:[#allocation2 + $0xd0] sm:$0xff] %vm10733_vm1, %v491_v2  ;;  %v494_v57 = vadd.f32 %v5722_v0, %v493_v63  ;;  %v1178_v36 = vmul.f32 %v5725_v5, %v5833_v19  ;;  %v5230_v3 = vpop.eup %5229 }
 0x117   :  { %11043 = vst [vmem:[#allocation27_spill] sm:$0xff] %v11042_v7  ;;  %5247 = vrcp.f32 %v633_v38  ;;  %v634_v39 = vadd.f32 1.0, %v5228_v50  ;;  %v4746_v26 = vmul.f32 -1.442695, %v491_v2  ;;  %740 = vst.msk [vmem:[#allocation2 + $0xe8] sm:$0xff] %vm10733_vm1, %v502_v40  ;;  %v11045_v54 = vrot.slane %v5881_v42, 7  ;;  %v5232_v63 = vpop.eup %5231 }
 0x118   :  { %5249 = vrcp.f32 %v636_v33  ;;  %v4749_v18 = vmul.f32 -1.442695, %v502_v40  ;;  %738 = vst.msk [vmem:[#allocation2 + $0xd8] sm:$0xff] %vm10733_vm1, %v494_v57  ;;  %v1210_v38 = vadd.f32 %v1178_v36, %v1110_v53  ;;  %v1246_v2 = vmul.f32 %v5737_v15, %v1074_v49  ;;  %v5234_v24 = vpop.eup %5233  ;;  %1962 = vrot.lane.b32.xlu0 %v5232_v63, %s5444_s15  ;;  %v6131_v33 = vld [vmem:[%s10685_s6] ss:$0 sm:$0xff]  ;;  %v5042_v40 = vpop.f32.mrb[28].mxu0 }
 0x119   :  { %v6117_v25 = vsel %vm10738_vm2, %v11045_v54, %v11044_v62  ;;  %v11046_v50 = vand.u32 15, %v5763_v29  ;;  %v11047_v9 = vmov 0  ;;  %5251 = vrcp.f32 %v634_v39  ;;  %11050 = vst [vmem:[#allocation29_spill] sm:$0xff] %v6131_v33  ;;  %v5236_v49 = vpop.eup %5235  ;;  %v506_v63 = vpop.f32.mrb[29].mxu0 }
 0x11a   :  { %v4747_v42 = vmul.f32 -1.442695, %v494_v57  ;;  %v1458_v53 = vmul.f32 %v5727_v6, %v5824_v12  ;;  %v1354_v29 = vsel %vm5973_vm7, %v6054_v37, %v6062_v22  ;;  %5253 = vpow2.f32 %v4748_v60  ;;  %v5238_v62 = vpop.eup %5237  ;;  %1964 = vrot.lane.b32.xlu1 %v5236_v49, %s5444_s15 }
 0x11b   :  { %vm6123_vm10 = vcmp.eq.s32.totalorder %v11046_v50, 15  ;;  %v6141_v57 = vadd.f32 %v6131_v33, %v6010_v58  ;;  %v1390_v36 = vmul.f32 %v5739_v16, %v6054_v37  ;;  %v1278_v39 = vadd.f32 %v1246_v2, %v1210_v38  ;;  %v5043_v2 = vpop.f32.mrb[30].mxu0 }
 0x11c   :  { %v11048_v9 = vsel %vm6123_vm10, 4294967295, %v11047_v9  ;;  %5255 = vpow2.f32 %v4746_v26  ;;  %v515_v54 = vadd.f32 %v5042_v40, %v5722_v0  ;;  %v11052_v50 = vrot.slane %v6075_v48, 1  ;;  %1966 = vrot.lane.b32.xlu0 %v5230_v3, %s5444_s15 }
 0x11d   :  { %11049 = vst [vmem:[#allocation28_spill] sm:$0xff] %v11048_v9  ;;  %11051 = vst [vmem:[#allocation30_spill] sm:$0xff] %v6141_v57  ;;  %v11053_v60 = vrot.slane %v5893_v55, 1  ;;  %v1114_v58 = vmul.f32 %v5735_v14, %v6117_v25  ;;  %v5240_v57 = vpop.eup %5239  ;;  %v639_v38 = vadd.f32 1.0, %v5238_v62  ;;  %5257 = vpow2.f32 %v4749_v18 }
 0x11e   :  { %v507_v26 = vadd.f32 %v5722_v0, %v506_v63  ;;  %v1422_v40 = vadd.f32 %v1390_v36, %v1278_v39  ;;  %v5242_v49 = vpop.eup %5241  ;;  %v637_v33 = vadd.f32 1.0, %v5240_v57  ;;  %5259 = vpow2.f32 %v4747_v42  ;;  %743 = vst.msk [vmem:[#allocation2 + $0x100] sm:$0xff] %vm10733_vm1, %v515_v54  ;;  %1968 = vrot.lane.b32.xlu1 %v5234_v24, %s5444_s15 }
 0x11f   :  { %v6153_v44 = vsel %vm10745_vm3, %v11053_v60, %v11052_v50  ;;  %v518_v47 = vadd.f32 %v5043_v2, %v5722_v0  ;;  %v509_v50 = vpop.f32.mrb[31].mxu0  ;;  %v1526_v60 = vmul.f32 %v5745_v20, %v1354_v29  ;;  %v5244_v46 = vpop.eup %5243  ;;  %5261 = vrcp.f32 %v639_v38 }
 0x120   :  { %v640_v62 = vadd.f32 1.0, %v5242_v49  ;;  %v4752_v18 = vmul.f32 -1.442695, %v515_v54  ;;  %741 = vst.msk [vmem:[#allocation2 + $0xf0] sm:$0xff] %vm10733_vm1, %v507_v26  ;;  %747 = vst.msk [vmem:[#allocation2 + $0x110] sm:$0xff] %vm10733_vm1, %v507_v26  ;;  %v510_v57 = vadd.f32 %v5722_v0, %v509_v50  ;;  %5263 = vrcp.f32 %v637_v33  ;;  %v5246_v54 = vpop.eup %5245 }
 0x121   :  { %v638_v42 = vadd.f32 1.0, %v5244_v46  ;;  %v4750_v36 = vmul.f32 -1.442695, %v507_v26  ;;  %744 = vst.msk [vmem:[#allocation2 + $0x108] sm:$0xff] %vm10733_vm1, %v518_v47  ;;  %v11054_v3 = vand.u32 15, %v5702_v56  ;;  %v11055_v29 = vmov 0  ;;  %v5248_v46 = vpop.eup %5247 }
 0x122   :  { %v1490_v39 = vadd.f32 %v1458_v53, %v1422_v40  ;;  %5265 = vrcp.f32 %v640_v62  ;;  %v4753_v63 = vmul.f32 -1.442695, %v518_v47  ;;  %742 = vst.msk [vmem:[#allocation2 + $0xf8] sm:$0xff] %vm10733_vm1, %v510_v57  ;;  %748 = vst.msk [vmem:[#allocation2 + $0x118] sm:$0xff] %vm10733_vm1, %v510_v57  ;;  %v1078_v0 = vsel %vm6100_vm9, %v6117_v25, %v6153_v44  ;;  %v5250_v2 = vpop.eup %5249  ;;  %1970 = vrot.lane.b32.xlu0 %v5248_v46, %s5444_s15 }
 0x123   :  { %vm6169_vm11 = vcmp.eq.s32.totalorder %v11054_v3, 0  ;;  %v1182_v24 = vmul.f32 %v5725_v5, %v5893_v55  ;;  %5267 = vrcp.f32 %v638_v42  ;;  %v4751_v33 = vmul.f32 -1.442695, %v510_v57  ;;  %v5252_v62 = vpop.eup %5251 }
 0x124   :  { %v11056_v29 = vsel %vm6169_vm11, 4294967295, %v11055_v29  ;;  %v1558_v38 = vadd.f32 %v1526_v60, %v1490_v39  ;;  %v11058_v53 = vrot.slane %v5822_v10, 7  ;;  %v11059_v47 = vrot.slane %v5969_v31, 7  ;;  %v5254_v3 = vpop.eup %5253  ;;  %1972 = vrot.lane.b32.xlu1 %v5252_v62, %s5444_s15 }
 0x125   :  { %11057 = vst [vmem:[#allocation31_spill] sm:$0xff] %v11056_v29  ;;  %5269 = vpow2.f32 %v4752_v18  ;;  %v11060_v40 = vrot.slane %v5822_v10, 1  ;;  %v1176_v60 = vmul.f32 %v5725_v5, %v5822_v10  ;;  %v6196_v57 = vadd.f32 %v1182_v24, %v1114_v58  ;;  %v11088_v29 = vld [vmem:[#allocation26_spill] sm:$0xff] }
 0x126   :  { %v844_v26 = vsel %vm10738_vm2, %v11059_v47, %v11058_v53  ;;  %5271 = vpow2.f32 %v4750_v36  ;;  %v6199_v42 = vmul.f32 %v5737_v15, %v1078_v0  ;;  %v1670_v39 = vmul.f32 %v5778_v35, %v6117_v25  ;;  %v5256_v53 = vpop.eup %5255  ;;  %1974 = vrot.lane.b32.xlu0 %v5246_v54, %s5444_s15 }
 0x127   :  { %v908_v49 = vsel %vm10745_vm3, %v11060_v40, %v5843_v28  ;;  %v1108_v50 = vmul.f32 %v5735_v14, %v844_v26  ;;  %5273 = vpow2.f32 %v4753_v63  ;;  %v1634_v36 = vsel %vm5973_vm7, %v6117_v25, %v6153_v44  ;;  %v5258_v0 = vpop.eup %5257 }
 0x128   :  { %v1072_v18 = vsel %vm6123_vm10, %v844_v26, %v908_v49  ;;  %5275 = vpow2.f32 %v4751_v33  ;;  %v1738_v63 = vmul.f32 %v5731_v11, %v5893_v55  ;;  %v641_v24 = vadd.f32 1.0, %v5256_v53  ;;  %v1308_v47 = vld [vmem:[#allocation2 + $0x108] sm:$0xff]  ;;  %v5260_v49 = vpop.eup %5259  ;;  %1976 = vrot.lane.b32.xlu1 %v5250_v2, %s5444_s15 }
 0x129   :  { %v1208_v46 = vadd.f32 %v1176_v60, %v1108_v50  ;;  %v1244_v10 = vmul.f32 %v5737_v15, %v1072_v18  ;;  %v1702_v26 = vadd.f32 %v1670_v39, %v1558_v38  ;;  %v1352_v40 = vsel %vm6123_vm10, %v6046_v51, %v6069_v59  ;;  %v780_v62 = vld [vmem:[#allocation2 + $0xf8] sm:$0xff]  ;;  %v5262_v54 = vpop.eup %5261 }
 0x12a   :  { %v643_v50 = vadd.f32 1.0, %v5254_v3  ;;  %v644_v60 = vadd.f32 1.0, %v5258_v0  ;;  %v6222_v18 = vrot.slane %v1308_v47, 7  ;;  %v6224_v58 = vld [vmem:[#allocation2 + $0x118] sm:$0xff]  ;;  %v1388_v53 = vmul.f32 %v5739_v16, %v6046_v51 }
 0x12b   :  { %v1276_v33 = vadd.f32 %v1244_v10, %v1208_v46  ;;  %11062 = vst [vmem:[#allocation33_spill] sm:$0xff] %v6224_v58  ;;  %5277 = vrcp.f32 %v641_v24  ;;  %v642_v38 = vadd.f32 1.0, %v5260_v49  ;;  %v6229_v39 = vrot.slane %v780_v62, 7  ;;  %v5264_v10 = vpop.eup %5263 }
 0x12c   :  { %11061 = vst [vmem:[#allocation32_spill] sm:$0xff] %v6222_v18  ;;  %v10722_v59 = vrot.slane %v6224_v58, 7  ;;  %v11063_v3 = vand.u32 15, %v5766_v30  ;;  %v11064_v46 = vmov 0  ;;  %v1313_v51 = vsel %vm10738_vm2, %v6222_v18, %v5827_v13  ;;  %v5266_v47 = vpop.eup %5265  ;;  %1978 = vrot.lane.b32.xlu0 %v5264_v10, %s5444_s15 }
 0x12d   :  { %v1806_v0 = vmul.f32 %v5988_v21, %v1634_v36  ;;  %v1420_v24 = vadd.f32 %v1388_v53, %v1276_v33  ;;  %v1456_v2 = vmul.f32 %v5727_v6, %v5833_v19  ;;  %5279 = vrcp.f32 %v642_v38  ;;  %v5268_v36 = vpop.eup %5267  ;;  %v6258_v38 = vld [vmem:[#allocation2 + $0x48] sm:$0xff] }
 0x12e   :  { %vm6234_vm12 = vcmp.eq.s32.totalorder %v11063_v3, 0  ;;  %v11067_v30 = vrot.slane %v5969_v31, 7  ;;  %v1319_v13 = vsel %vm6169_vm11, %v5873_v23, %v1313_v51  ;;  %v1770_v62 = vadd.f32 %v1738_v63, %v1702_v26  ;;  %1980 = vrot.lane.b32.xlu1 %v5268_v36, %s5444_s15 }
 0x12f   :  { %v11065_v46 = vsel %vm6234_vm12, 4294967295, %v11064_v46  ;;  %5281 = vrcp.f32 %v643_v50  ;;  %v1488_v33 = vadd.f32 %v1456_v2, %v1420_v24  ;;  %v1524_v53 = vmul.f32 %v5745_v20, %v1352_v40  ;;  %v5270_v3 = vpop.eup %5269 }
 0x130   :  { %11066 = vst [vmem:[#allocation34_spill] sm:$0xff] %v11065_v46  ;;  %v845_v49 = vsel %vm10738_vm2, %v6229_v39, %v11067_v30  ;;  %5283 = vrcp.f32 %v644_v60  ;;  %v1593_v23 = vsel %vm10738_vm2, %v10722_v59, %v5820_v8  ;;  %v5272_v63 = vpop.eup %5271  ;;  %v1387_v26 = vmul.f32 %v5739_v16, %v1319_v13  ;;  %1982 = vrot.lane.b32.xlu0 %v5262_v54, %s5444_s15 }
 0x131   :  { %v975_v19 = vsel %vm6169_vm11, %v6020_v27, %v845_v49  ;;  %v1632_v27 = vsel %vm6123_vm10, %v6054_v37, %v6062_v22  ;;  %v1556_v40 = vadd.f32 %v1524_v53, %v1488_v33  ;;  %v1668_v50 = vmul.f32 %v5778_v35, %v6054_v37  ;;  %v5274_v51 = vpop.eup %5273 }
 0x132   :  { %v1107_v10 = vmul.f32 %v5735_v14, %v975_v19  ;;  %v789_v60 = vrot.slane %v6075_v48, 7  ;;  %v645_v24 = vadd.f32 1.0, %v5272_v63  ;;  %v855_v2 = vrot.slane %v6258_v38, 1  ;;  %v5276_v49 = vpop.eup %5275  ;;  %1984 = vrot.lane.b32.xlu1 %v5266_v47, %s5444_s15 }
 0x133   :  { %v979_v30 = vsel %vm5887_vm6, %v5866_v17, %v5858_v1  ;;  %v647_v13 = vadd.f32 1.0, %v5270_v3  ;;  %v1700_v36 = vadd.f32 %v1668_v50, %v1556_v40  ;;  %v1736_v19 = vmul.f32 %v5731_v11, %v5824_v12 }
 0x134   :  { %v1207_v8 = vadd.f32 %v6007_v4, %v1107_v10  ;;  %v11068_v33 = vrot.slane %v5893_v55, 7  ;;  %v11069_v4 = vand.u32 15, %v5771_v32  ;;  %v11070_v53 = vmov 0 }
 0x135   :  { %5285 = vrcp.f32 %v645_v24  ;;  %v646_v1 = vadd.f32 1.0, %v5276_v49  ;;  %v11073_v10 = vrot.slane %v6075_v48, 1  ;;  %v648_v40 = vadd.f32 1.0, %v5274_v51 }
 0x136   :  { %v6288_v54 = vsel %vm10738_vm2, %v11068_v33, %v789_v60  ;;  %vm6292_vm13 = vcmp.eq.s32.totalorder %v11069_v4, 15  ;;  %v1275_v3 = vadd.f32 %v6030_v45, %v1207_v8  ;;  %v1838_v50 = vadd.f32 %v1806_v0, %v1770_v62  ;;  %v5278_v4 = vpop.eup %5277  ;;  %v11074_v8 = vld [vmem:[#allocation18_spill] sm:$0xff] }
 0x137   :  { %v11071_v53 = vsel %vm6292_vm13, 4294967295, %v11070_v53  ;;  %v6302_v63 = vsel %vm10745_vm3, %v11073_v10, %v855_v2  ;;  %v1768_v33 = vadd.f32 %v1736_v19, %v1700_v36  ;;  %v1111_v32 = vmul.f32 %v5735_v14, %v979_v30  ;;  %1986 = vrot.lane.b32.xlu0 %v5278_v4, %s5444_s15  ;;  %v11075_v30 = vld [vmem:[#allocation17_spill] sm:$0xff]  ;;  %v11078_v19 = vld [vmem:[#allocation24_spill] sm:$0xff] }
 0x138   :  { %11072 = vst [vmem:[#allocation35_spill] sm:$0xff] %v11071_v53  ;;  %5287 = vrcp.f32 %v646_v1  ;;  %v1419_v59 = vadd.f32 %v1387_v26, %v1275_v3  ;;  %v1599_v47 = vsel %vm6169_vm11, %v5866_v17, %v1593_v23  ;;  %v1179_v45 = vmul.f32 %v5725_v5, %v5798_v52  ;;  %v5280_v26 = vpop.eup %5279 }
 0x139   :  { %5289 = vrcp.f32 %v647_v13  ;;  %v6313_v51 = vadd.f32 %v6199_v42, %v6196_v57  ;;  %v1804_v0 = vmul.f32 %v5988_v21, %v1632_v27  ;;  %v983_v62 = vsel %vm6234_vm12, %v6302_v63, %v6288_v54  ;;  %v6329_v27 = vld [vmem:[#allocation2 + $0x50] sm:$0xff]  ;;  %v5282_v49 = vpop.eup %5281  ;;  %1988 = vrot.lane.b32.xlu1 %v5280_v26, %s5444_s15 }
 0x13a   :  { %v1487_v23 = vadd.f32 %v6034_v61, %v1419_v59  ;;  %v1211_v24 = vadd.f32 %v1179_v45, %v1111_v32  ;;  %v1247_v52 = vmul.f32 %v5737_v15, %v5866_v17  ;;  %v11076_v57 = vsel %vm5887_vm6, %v11074_v8, %v11075_v30  ;;  %v11077_v61 = vld [vmem:[#allocation29_spill] sm:$0xff]  ;;  %v5284_v17 = vpop.eup %5283 }
 0x13b   :  { %v1391_v42 = vmul.f32 %v5739_v16, %v11076_v57  ;;  %5291 = vrcp.f32 %v648_v40  ;;  %v1667_v13 = vmul.f32 %v5778_v35, %v1599_v47  ;;  %v6334_v59 = vadd.f32 %v11077_v61, %v1838_v50  ;;  %1990 = vrot.lane.b32.xlu0 %v5282_v49, %s5444_s15  ;;  %v11080_v47 = vld [vmem:[#allocation15_spill] sm:$0xff] }
 0x13c   :  { %v1836_v36 = vadd.f32 %v1804_v0, %v1768_v33  ;;  %v1555_v1 = vadd.f32 %v11078_v19, %v1487_v23  ;;  %v6338_v3 = vmul.f32 %v5735_v14, %v983_v62  ;;  %v1279_v10 = vadd.f32 %v1247_v52, %v1211_v24  ;;  %v11081_v24 = vld [vmem:[#allocation5_spill] sm:$0xff] }
 0x13d   :  { %v10723_v32 = vrot.slane %v6258_v38, 7  ;;  %v1459_v50 = vmul.f32 %v5727_v6, %v11080_v47  ;;  %v1603_v33 = vsel %vm5887_vm6, %v6302_v63, %v6288_v54  ;;  %v856_v45 = vrot.slane %v6329_v27, 1  ;;  %1992 = vrot.lane.b32.xlu1 %v5284_v17, %s5444_s15  ;;  %v11086_v19 = vld [vmem:[#allocation25_spill] sm:$0xff] }
 0x13e   :  { %v1699_v0 = vadd.f32 %v1667_v13, %v1555_v1  ;;  %v1423_v62 = vadd.f32 %v1391_v42, %v1279_v10  ;;  %v1112_v23 = vmul.f32 %v5735_v14, %v6054_v37  ;;  %v11082_v52 = vand.u32 15, %v11081_v24 }
 0x13f   :  { %v6357_v26 = vsel %vm10738_vm2, %v789_v60, %v10723_v32  ;;  %v11083_v30 = vmov 0  ;;  %v6369_v57 = vadd.f32 %v11077_v61, %v1836_v36  ;;  %v1527_v42 = vmul.f32 %v5745_v20, %v11074_v8  ;;  %v5286_v13 = vpop.eup %5285 }
 0x140   :  { %vm6363_vm14 = vcmp.eq.s32.totalorder %v11082_v52, 0  ;;  %v1739_v60 = vmul.f32 %v5731_v11, %v6075_v48  ;;  %v6377_v49 = vsel %vm10745_vm3, %v855_v2, %v856_v45  ;;  %v1767_v1 = vadd.f32 %v11086_v19, %v1699_v0  ;;  %1994 = vrot.lane.b32.xlu0 %v5286_v13, %s5444_s15  ;;  %v6394_v0 = vld [vmem:[#allocation2 + $0x58] sm:$0xff] }
 0x141   :  { %v11084_v30 = vsel %vm6363_vm14, 4294967295, %v11083_v30  ;;  %v1491_v10 = vadd.f32 %v1459_v50, %v1423_v62  ;;  %v1080_v36 = vsel %vm6292_vm13, %v6357_v26, %v6377_v49  ;;  %v1180_v17 = vmul.f32 %v5725_v5, %v5824_v12 }
 0x142   :  { %11085 = vst [vmem:[#allocation18_spill] sm:$0xff] %v11084_v30  ;;  %v1671_v24 = vmul.f32 %v5778_v35, %v1603_v33  ;;  %v1807_v2 = vmul.f32 %v5988_v21, %v6302_v63  ;;  %v1116_v52 = vmul.f32 %v5735_v14, %v6357_v26  ;;  %v1184_v50 = vmul.f32 %v5725_v5, %v6258_v38  ;;  %v5288_v62 = vpop.eup %5287 }
 0x143   :  { %v1559_v19 = vadd.f32 %v1527_v42, %v1491_v10  ;;  %v1212_v4 = vadd.f32 %v1180_v17, %v1112_v23  ;;  %v1460_v12 = vmul.f32 %v5727_v6, %v5893_v55  ;;  %v11087_v33 = vsel %vm5979_vm8, %v6054_v37, %v6062_v22  ;;  %v5290_v32 = vpop.eup %5289  ;;  %1996 = vrot.lane.b32.xlu1 %v5288_v62, %s5444_s15  ;;  %v11089_v42 = vld [vmem:[#allocation6_spill] sm:$0xff] }
 0x144   :  { %v1248_v13 = vmul.f32 %v5737_v15, %v11087_v33  ;;  %v1835_v9 = vadd.f32 %v11088_v29, %v1767_v1  ;;  %v1252_v43 = vmul.f32 %v5737_v15, %v1080_v36  ;;  %v1636_v23 = vsel %vm5979_vm8, %v6357_v26, %v6377_v49  ;;  %1998 = vrot.lane.b32.xlu0 %v5290_v32, %s5444_s15 }
 0x145   :  { %v1392_v55 = vmul.f32 %v5739_v16, %v6117_v25  ;;  %v11090_v10 = vand.u32 15, %v11089_v42  ;;  %v11091_v37 = vmov 0  ;;  %v1703_v22 = vadd.f32 %v1671_v24, %v1559_v19  ;;  %v5292_v36 = vpop.eup %5291 }
 0x146   :  { %v1280_v17 = vadd.f32 %v1248_v13, %v1212_v4  ;;  %v791_v29 = vrot.slane %v6329_v27, 7  ;;  %v857_v1 = vrot.slane %v6394_v0, 1  ;;  %v1216_v62 = vadd.f32 %v1184_v50, %v1116_v52  ;;  %v11094_v50 = vld [vmem:[#allocation23_spill] sm:$0xff] }
 0x147   :  { %vm6415_vm15 = vcmp.eq.s32.totalorder %v11090_v10, 15  ;;  %v1358_v33 = vsel %vm6100_vm9, %v6357_v26, %v6377_v49  ;;  %v1672_v42 = vmul.f32 %v5778_v35, %v6357_v26  ;;  %v1181_v24 = vmul.f32 %v5725_v5, %v11080_v47  ;;  %2000 = vrot.lane.b32.xlu1 %v5292_v36, %s5444_s15 }
 0x148   :  { %v11092_v37 = vsel %vm6415_vm15, 4294967295, %v11091_v37  ;;  %v1740_v4 = vmul.f32 %v5731_v11, %v6258_v38  ;;  %v1808_v19 = vmul.f32 %v5988_v21, %v1636_v23  ;;  %v1424_v13 = vadd.f32 %v1392_v55, %v1280_v17 }
 0x149   :  { %11093 = vst [vmem:[#allocation17_spill] sm:$0xff] %v11092_v37  ;;  %v6435_v32 = vsel %vm10745_vm3, %v856_v45, %v857_v1  ;;  %v1771_v52 = vadd.f32 %v1739_v60, %v1703_v22  ;;  %v6438_v49 = vadd.f32 %v1252_v43, %v1216_v62  ;;  %v1213_v10 = vadd.f32 %v1181_v24, %v11094_v50 }
 0x14a   :  { %v1249_v47 = vmul.f32 %v5737_v15, %v11074_v8  ;;  %v6446_v58 = vadd.f32 %v11077_v61, %v1835_v9  ;;  %v1492_v23 = vadd.f32 %v1460_v12, %v1424_v13  ;;  %v11095_v45 = vsel %vm5979_vm8, %v6117_v25, %v6153_v44 }
 0x14b   :  { %v1528_v60 = vmul.f32 %v5745_v20, %v11095_v45  ;;  %v11096_v43 = vrot.slane %v6258_v38, 7  ;;  %v11097_v9 = vsel %vm5837_vm5, %v6302_v63, %v6288_v54  ;;  %v1461_v44 = vmul.f32 %v5727_v6, %v6075_v48 }
 0x14c   :  { %v1281_v22 = vadd.f32 %v1249_v47, %v1213_v10  ;;  %v1393_v12 = vmul.f32 %v5739_v16, %v11097_v9  ;;  %v792_v36 = vrot.slane %v6394_v0, 7  ;;  %v858_v62 = vrot.slane %v6443_v34, 1  ;;  %v11098_v10 = vld [vmem:[#allocation8_spill] sm:$0xff] }
 0x14d   :  { %v835_v55 = vsel %vm10738_vm2, %v11096_v43, %v791_v29  ;;  %v1560_v25 = vadd.f32 %v1528_v60, %v1492_v23  ;;  %v1839_v24 = vadd.f32 %v1807_v2, %v1771_v52  ;;  %v1529_v50 = vmul.f32 %v5745_v20, %v6302_v63  ;;  %v6501_v9 = vld [vmem:[#allocation2 + $0x68] sm:$0xff] }
 0x14e   :  { %v985_v8 = vsel %vm6363_vm14, %v6435_v32, %v835_v55  ;;  %v1605_v17 = vsel %vm5837_vm5, %v6435_v32, %v835_v55  ;;  %v1327_v13 = vsel %vm6234_vm12, %v6435_v32, %v835_v55  ;;  %v1425_v54 = vadd.f32 %v1393_v12, %v1281_v22 }
 0x14f   :  { %v11099_v47 = vand.u32 15, %v11098_v10  ;;  %v11100_v23 = vmov 0  ;;  %v1704_v45 = vadd.f32 %v1672_v42, %v1560_v25  ;;  %v6486_v60 = vmul.f32 %v5735_v14, %v985_v8 }
 0x150   :  { %v6490_v2 = vsel %vm10738_vm2, %v791_v29, %v792_v36  ;;  %v6494_v52 = vsel %vm10745_vm3, %v857_v1, %v858_v62  ;;  %v1493_v43 = vadd.f32 %v1461_v44, %v1425_v54  ;;  %v1673_v55 = vmul.f32 %v5778_v35, %v1605_v17 }
 0x151   :  { %vm6481_vm1 = vcmp.eq.s32.totalorder %v11099_v47, 0  ;;  %v1741_v22 = vmul.f32 %v5731_v11, %v6329_v27  ;;  %v1118_v42 = vmul.f32 %v5735_v14, %v6490_v2  ;;  %v1772_v8 = vadd.f32 %v1740_v4, %v1704_v45 }
 0x152   :  { %v11101_v23 = vsel %vm6481_vm1, 4294967295, %v11100_v23  ;;  %v1809_v29 = vmul.f32 %v5988_v21, %v6435_v32  ;;  %v1082_v1 = vsel %vm6415_vm15, %v6490_v2, %v6494_v52  ;;  %v1394_v12 = vmul.f32 %v5739_v16, %v6357_v26 }
 0x153   :  { %11102 = vst [vmem:[#allocation29_spill] sm:$0xff] %v11101_v23  ;;  %v6512_v44 = vadd.f32 %v11077_v61, %v1839_v24  ;;  %v1561_v25 = vadd.f32 %v1529_v50, %v1493_v43  ;;  %v1186_v17 = vmul.f32 %v5725_v5, %v6394_v0  ;;  %v1462_v4 = vmul.f32 %v5727_v6, %v6258_v38 }
 0x154   :  { %v1530_v54 = vmul.f32 %v5745_v20, %v1358_v33  ;;  %v1426_v10 = vadd.f32 %v1394_v12, %v6313_v51  ;;  %v793_v47 = vrot.slane %v6443_v34, 7  ;;  %v859_v45 = vrot.slane %v6501_v9, 1 }
 0x155   :  { %v11104_v26 = vand.u32 15, %v11103_v41  ;;  %v11105_v24 = vmov 0  ;;  %v1705_v50 = vadd.f32 %v1673_v55, %v1561_v25  ;;  %v1218_v43 = vadd.f32 %v1186_v17, %v1118_v42  ;;  %v6553_v17 = vld [vmem:[#allocation2 + $0x70] sm:$0xff] }
 0x156   :  { %v1254_v40 = vmul.f32 %v5737_v15, %v1082_v1  ;;  %v1183_v38 = vmul.f32 %v5725_v5, %v6075_v48  ;;  %v1840_v33 = vadd.f32 %v1808_v19, %v1772_v8  ;;  %v1360_v51 = vsel %vm6292_vm13, %v6490_v2, %v6494_v52 }
 0x157   :  { %vm6524_vm0 = vcmp.eq.s32.totalorder %v11104_v26, 15  ;;  %v1638_v41 = vsel %vm6100_vm9, %v6490_v2, %v6494_v52  ;;  %v1494_v12 = vadd.f32 %v1462_v4, %v1426_v10  ;;  %v6541_v55 = vsel %vm10738_vm2, %v792_v36, %v793_v47 }
 0x158   :  { %v11106_v24 = vsel %vm6524_vm0, 4294967295, %v11105_v24  ;;  %v6545_v42 = vsel %vm10745_vm3, %v858_v62, %v859_v45  ;;  %v1215_v48 = vadd.f32 %v1183_v38, %v6338_v3  ;;  %v1251_v19 = vmul.f32 %v5737_v15, %v6302_v63 }
 0x159   :  { %11107 = vst [vmem:[#allocation24_spill] sm:$0xff] %v11106_v24  ;;  %v1773_v8 = vadd.f32 %v1741_v22, %v1705_v50  ;;  %v1674_v1 = vmul.f32 %v5778_v35, %v6490_v2  ;;  %v1562_v25 = vadd.f32 %v1530_v54, %v1494_v12  ;;  %v1395_v52 = vmul.f32 %v5739_v16, %v1327_v13  ;;  %v11131_v24 = vld [vmem:[#allocation30_spill] sm:$0xff] }
 0x15a   :  { %v6555_v36 = vadd.f32 %v1254_v40, %v1218_v43  ;;  %v1742_v62 = vmul.f32 %v5731_v11, %v6394_v0  ;;  %v1810_v4 = vmul.f32 %v5988_v21, %v1638_v41  ;;  %v1283_v3 = vadd.f32 %v1251_v19, %v1215_v48  ;;  %v11108_v43 = vld [vmem:[#allocation10_spill] sm:$0xff] }
 0x15b   :  { %v6561_v10 = vadd.f32 %v11077_v61, %v1840_v33  ;;  %v1706_v63 = vadd.f32 %v1674_v1, %v1562_v25  ;;  %v987_v22 = vsel %vm6481_vm1, %v6545_v42, %v6541_v55  ;;  %v1463_v13 = vmul.f32 %v5727_v6, %v6329_v27 }
 0x15c   :  { %v1427_v40 = vadd.f32 %v1395_v52, %v1283_v3  ;;  %v1607_v54 = vsel %vm6234_vm12, %v6545_v42, %v6541_v55  ;;  %v794_v26 = vrot.slane %v6501_v9, 7  ;;  %v860_v50 = vrot.slane %v6553_v17, 1 }
 0x15d   :  { %v11109_v38 = vand.u32 15, %v11108_v43  ;;  %v11110_v33 = vmov 0  ;;  %v1841_v41 = vadd.f32 %v1809_v29, %v1773_v8  ;;  %v1774_v12 = vadd.f32 %v1742_v62, %v1706_v63 }
 0x15e   :  { %v1329_v48 = vsel %vm6363_vm14, %v6545_v42, %v6541_v55  ;;  %v1396_v19 = vmul.f32 %v5739_v16, %v6490_v2  ;;  %v6588_v1 = vmul.f32 %v5735_v14, %v987_v22  ;;  %v1495_v25 = vadd.f32 %v1463_v13, %v1427_v40  ;;  %v6609_v13 = vld [vmem:[#allocation2 + $0x78] sm:$0xff] }
 0x15f   :  { %vm6577_vm2 = vcmp.eq.s32.totalorder %v11109_v38, 0  ;;  %v1531_v52 = vmul.f32 %v5745_v20, %v6435_v32  ;;  %v6594_v3 = vsel %vm10745_vm3, %v859_v45, %v860_v50  ;;  %v1675_v29 = vmul.f32 %v5778_v35, %v1607_v54  ;;  %v11114_v38 = vld [vmem:[#allocation11_spill] sm:$0xff] }
 0x160   :  { %v11111_v33 = vsel %vm6577_vm2, 4294967295, %v11110_v33  ;;  %v1743_v8 = vmul.f32 %v5731_v11, %v6443_v34  ;;  %v1811_v55 = vmul.f32 %v5988_v21, %v6545_v42  ;;  %vm11113_vm12 = vcmp.lt.s32.totalorder %v5702_v56, 1 }
 0x161   :  { %11112 = vst [vmem:[#allocation15_spill] sm:$0xff] %v11111_v33  ;;  %v832_v2 = vsel %vm11113_vm12, %v793_v47, %v794_v26  ;;  %v1563_v62 = vadd.f32 %v1531_v52, %v1495_v25  ;;  %v1428_v22 = vadd.f32 %v1396_v19, %v6438_v49  ;;  %v1464_v45 = vmul.f32 %v5727_v6, %v6394_v0 }
 0x162   :  { %v1084_v63 = vsel %vm6524_vm0, %v832_v2, %v6594_v3  ;;  %v6612_v40 = vadd.f32 %v11077_v61, %v1841_v41  ;;  %v1842_v54 = vadd.f32 %v1810_v4, %v1774_v12  ;;  %v1188_v43 = vmul.f32 %v5725_v5, %v6501_v9 }
 0x163   :  { %v1532_v47 = vmul.f32 %v5745_v20, %v1360_v51  ;;  %v11115_v25 = vand.u32 15, %v11114_v38  ;;  %v11116_v52 = vmov 0  ;;  %v1707_v49 = vadd.f32 %v1675_v29, %v1563_v62 }
 0x164   :  { %v1120_v0 = vmul.f32 %v5735_v14, %v832_v2  ;;  %v1496_v19 = vadd.f32 %v1464_v45, %v1428_v22  ;;  %v795_v46 = vrot.slane %v6553_v17, 7  ;;  %v1256_v41 = vmul.f32 %v5737_v15, %v1084_v63 }
 0x165   :  { %vm6619_vm12 = vcmp.eq.s32.totalorder %v11115_v25, 15  ;;  %v1362_v4 = vsel %vm6415_vm15, %v832_v2, %v6594_v3  ;;  %v861_v51 = vrot.slane %v6609_v13, 1  ;;  %v1185_v12 = vmul.f32 %v5725_v5, %v6329_v27 }
 0x166   :  { %v11117_v52 = vsel %vm6619_vm12, 4294967295, %v11116_v52  ;;  %v1775_v38 = vadd.f32 %v1743_v8, %v1707_v49  ;;  %v1564_v25 = vadd.f32 %v1532_v47, %v1496_v19  ;;  %v1640_v29 = vsel %vm6292_vm13, %v832_v2, %v6594_v3  ;;  %v6650_v19 = vld [vmem:[#allocation2 + $0x80] sm:$0xff] }
 0x167   :  { %11118 = vst [vmem:[#allocation5_spill] sm:$0xff] %v11117_v52  ;;  %v1676_v62 = vmul.f32 %v5778_v35, %v832_v2  ;;  %v6637_v22 = vadd.f32 %v11077_v61, %v1842_v54  ;;  %v6641_v63 = vsel %vm10745_vm3, %v860_v50, %v861_v51  ;;  %v1217_v45 = vadd.f32 %v1185_v12, %v6486_v60 }
 0x168   :  { %v1253_v27 = vmul.f32 %v5737_v15, %v6435_v32  ;;  %v1220_v8 = vadd.f32 %v1188_v43, %v1120_v0  ;;  %v1744_v49 = vmul.f32 %v5731_v11, %v6501_v9  ;;  %vm11119_vm13 = vcmp.lt.s32.totalorder %v5702_v56, 1 }
 0x169   :  { %v1708_v47 = vadd.f32 %v1676_v62, %v1564_v25  ;;  %v831_v3 = vsel %vm11119_vm13, %v794_v26, %v795_v46  ;;  %v1812_v54 = vmul.f32 %v5988_v21, %v1640_v29  ;;  %v1397_v12 = vmul.f32 %v5739_v16, %v1329_v48 }
 0x16a   :  { %v989_v50 = vsel %vm6577_vm2, %v6641_v63, %v831_v3  ;;  %v1285_v60 = vadd.f32 %v1253_v27, %v1217_v45  ;;  %v1843_v32 = vadd.f32 %v1811_v55, %v1775_v38  ;;  %v6657_v43 = vadd.f32 %v1256_v41, %v1220_v8  ;;  %v11120_v27 = vld [vmem:[#allocation19_spill] sm:$0xff] }
 0x16b   :  { %v1465_v0 = vmul.f32 %v5727_v6, %v6443_v34  ;;  %v1533_v26 = vmul.f32 %v5745_v20, %v6545_v42  ;;  %v1609_v29 = vsel %vm6363_vm14, %v6641_v63, %v831_v3  ;;  %v796_v62 = vrot.slane %v6609_v13, 7 }
 0x16c   :  { %v1429_v25 = vadd.f32 %v1397_v12, %v1285_v60  ;;  %v862_v45 = vrot.slane %v6650_v19, 1  ;;  %v11121_v48 = vand.u32 15, %v11120_v27  ;;  %v11122_v55 = vmov 0 }
 0x16d   :  { %v1776_v41 = vadd.f32 %v1744_v49, %v1708_v47  ;;  %v6675_v38 = vmul.f32 %v5735_v14, %v989_v50  ;;  %v1331_v8 = vsel %vm6481_vm1, %v6641_v63, %v831_v3  ;;  %v1745_v60 = vmul.f32 %v5731_v11, %v6553_v17 }
 0x16e   :  { %vm6670_vm13 = vcmp.eq.s32.totalorder %v11121_v48, 0  ;;  %v1497_v12 = vadd.f32 %v1465_v0, %v1429_v25  ;;  %vm11125_vm3 = vcmp.lt.s32.totalorder %v5702_v56, 1  ;;  %vm11126_vm14 = vcmp.lt.s32.totalorder %v5702_v56, 7  ;;  %v6700_v0 = vld [vmem:[#allocation2 + $0x88] sm:$0xff] }
 0x16f   :  { %v11123_v55 = vsel %vm6670_vm13, 4294967295, %v11122_v55  ;;  %v6684_v53 = vsel %vm11125_vm3, %v795_v46, %v796_v62  ;;  %v6688_v27 = vsel %vm11126_vm14, %v861_v51, %v862_v45  ;;  %v1398_v47 = vmul.f32 %v5739_v16, %v832_v2 }
 0x170   :  { %11124 = vst [vmem:[#allocation25_spill] sm:$0xff] %v11123_v55  ;;  %v1677_v49 = vmul.f32 %v5778_v35, %v1609_v29  ;;  %v1086_v3 = vsel %vm6619_vm12, %v6684_v53, %v6688_v27  ;;  %v1122_v50 = vmul.f32 %v5735_v14, %v6684_v53  ;;  %v1190_v46 = vmul.f32 %v5725_v5, %v6609_v13 }
 0x171   :  { %v1565_v25 = vadd.f32 %v1533_v26, %v1497_v12  ;;  %v1430_v51 = vadd.f32 %v1398_v47, %v6555_v36  ;;  %v1466_v2 = vmul.f32 %v5727_v6, %v6501_v9  ;;  %v1534_v29 = vmul.f32 %v5745_v20, %v1362_v4 }
 0x172   :  { %v1844_v48 = vadd.f32 %v1812_v54, %v1776_v41  ;;  %v1258_v30 = vmul.f32 %v5737_v15, %v1086_v3  ;;  %v1642_v7 = vsel %vm6415_vm15, %v6684_v53, %v6688_v27  ;;  %v797_v28 = vrot.slane %v6650_v19, 7 }
 0x173   :  { %v1709_v31 = vadd.f32 %v1677_v49, %v1565_v25  ;;  %v1498_v18 = vadd.f32 %v1466_v2, %v1430_v51  ;;  %v863_v26 = vrot.slane %v6700_v0, 1  ;;  %v1187_v36 = vmul.f32 %v5725_v5, %v6443_v34  ;;  %v6750_v25 = vld [vmem:[%s10683_s5 + $0x8] ss:$0 sm:$0xff] }
 0x174   :  { %v1222_v9 = vadd.f32 %v1190_v46, %v1122_v50  ;;  %v1678_v4 = vmul.f32 %v5778_v35, %v6684_v53  ;;  %v6719_v54 = vsel %vm11125_vm3, %v796_v62, %v797_v28  ;;  %v1255_v41 = vmul.f32 %v5737_v15, %v6545_v42  ;;  %v6743_v46 = vld [vmem:[#allocation2 + $0x90] sm:$0xff] }
 0x175   :  { %v1566_v12 = vadd.f32 %v1534_v29, %v1498_v18  ;;  %v6725_v47 = vsel %vm11126_vm14, %v862_v45, %v863_v26  ;;  %v1219_v49 = vadd.f32 %v1187_v36, %v6588_v1  ;;  %v1399_v34 = vmul.f32 %v5739_v16, %v1331_v8 }
 0x176   :  { %v6730_v3 = vadd.f32 %v11077_v61, %v1843_v32  ;;  %v6733_v50 = vadd.f32 %v11077_v61, %v1844_v48  ;;  %v1813_v62 = vmul.f32 %v5988_v21, %v6641_v63  ;;  %v1746_v18 = vmul.f32 %v5731_v11, %v6609_v13 }
 0x177   :  { %v1777_v42 = vadd.f32 %v1745_v60, %v1709_v31  ;;  %v1364_v1 = vsel %vm6524_vm0, %v6684_v53, %v6688_v27  ;;  %v1710_v45 = vadd.f32 %v1678_v4, %v1566_v12  ;;  %v1287_v8 = vadd.f32 %v1255_v41, %v1219_v49 }
 0x178   :  { %v6745_v32 = vadd.f32 %v1258_v30, %v1222_v9  ;;  %v1814_v21 = vmul.f32 %v6750_v25, %v1642_v7  ;;  %v991_v31 = vsel %vm6670_vm13, %v6725_v47, %v6719_v54  ;;  %v1467_v51 = vmul.f32 %v5727_v6, %v6553_v17 }
 0x179   :  { %v1778_v60 = vadd.f32 %v1746_v18, %v1710_v45  ;;  %v1431_v30 = vadd.f32 %v1399_v34, %v1287_v8  ;;  %v10758_v2 = vmov 0.0   ;;  %v1611_v7 = vsel %vm6481_vm1, %v6725_v47, %v6719_v54 }
 0x17a   :  { %5044 = vmatprep.subr.bf16.mxu0 %v10758_v2  ;;  %v57_v29 = vadd.s32 136, %v5702_v56  ;;  %v10760_v48 = vrot.slane %v6700_v0, 7  ;;  %v10761_v36 = vrot.slane %v6743_v46, 1  ;;  %v1845_v9 = vadd.f32 %v1813_v62, %v1777_v42 }
 0x17b   :  { %v1499_v4 = vadd.f32 %v1467_v51, %v1431_v30  ;;  %v1535_v41 = vmul.f32 %v5745_v20, %v6641_v63  ;;  %v1400_v12 = vmul.f32 %v5739_v16, %v6684_v53  ;;  %v6776_v49 = vmul.f32 %v5735_v14, %v991_v31  ;;  %v2138_v31 = vld [vmem:[%s10686_s7] sm:$0x3] }
 0x17c   :  { %v89_v34 = vand.u32 15, %v57_v29  ;;  %v6782_v18 = vsel %vm11125_vm3, %v797_v28, %v10760_v48  ;;  %v6788_v62 = vsel %vm11126_vm14, %v863_v26, %v10761_v36  ;;  %v1846_v42 = vadd.f32 %v1814_v21, %v1778_v60 }
 0x17d   :  { %v1567_v45 = vadd.f32 %v1535_v41, %v1499_v4  ;;  %v1679_v53 = vmul.f32 %v5778_v35, %v1611_v7  ;;  %v1747_v8 = vmul.f32 %v5731_v11, %v6650_v19  ;;  %v1815_v28 = vmul.f32 %v6750_v25, %v6725_v47  ;;  %v1943_v4 = vpop.permute.xlu1 %1942 }
 0x17e   :  { %vm6798_vm3 = vcmp.eq.s32.totalorder %v89_v34, 15  ;;  %v11127_v30 = vmov 0  ;;  %v1432_v26 = vadd.f32 %v1400_v12, %v6657_v43  ;;  %v1468_v21 = vmul.f32 %v5727_v6, %v6609_v13  ;;  %v1939_v34 = vpop.permute.xlu0 %1938 }
 0x17f   :  { %v11128_v30 = vsel %vm6798_vm3, 4294967295, %v11127_v30  ;;  %v6806_v60 = vadd.f32 %v11077_v61, %v1845_v9  ;;  %v1711_v51 = vadd.f32 %v1679_v53, %v1567_v45  ;;  %v1088_v7 = vsel %vm6798_vm3, %v6782_v18, %v6788_v62  ;;  %v6818_v9 = vld [vmem:[#allocation2 + $0x98] sm:$0xff] }
 0x180   :  { %11129 = vst [vmem:[#allocation26_spill] sm:$0xff] %v11128_v30  ;;  %v1124_v29 = vmul.f32 %v5735_v14, %v6782_v18  ;;  %v1192_v41 = vmul.f32 %v5725_v5, %v6700_v0  ;;  %v1500_v43 = vadd.f32 %v1468_v21, %v1432_v26  ;;  %v1536_v12 = vmul.f32 %v5745_v20, %v1364_v1 }
 0x181   :  { %vm11130_vm14 = vcmask 1041408   ;;  %v6821_v45 = vadd.f32 %v11077_v61, %v1846_v42  ;;  %v1260_v53 = vmul.f32 %v5737_v15, %v1088_v7  ;;  %v1644_v2 = vsel %vm6524_vm0, %v6782_v18, %v6788_v62  ;;  %v5422_v7 = vld [vmem:[%s10679_s3] sm:$0x3]  ;;  %v1945_v1 = vpop.permute.xlu1 %1944 }
 0x182   :  { %v2144_v13 = vsel %vm11130_vm14, %v2138_v31, 0  ;;  %v58_v26 = vadd.s32 144, %v5702_v56  ;;  %v1779_v21 = vadd.f32 %v1747_v8, %v1711_v51  ;;  %v1568_v31 = vadd.f32 %v1536_v12, %v1500_v43 }
 0x183   :  { %5045 = vmatpush3.bf16.msra.mxu0 %v2144_v13  ;;  %v1680_v42 = vmul.f32 %v5778_v35, %v6782_v18  ;;  %v1224_v27 = vadd.f32 %v1192_v41, %v1124_v29  ;;  %v1748_v13 = vmul.f32 %v5731_v11, %v6700_v0  ;;  %v865_v51 = vrot.slane %v6818_v9, 1  ;;  %v1941_v41 = vpop.permute.xlu0 %1940 }
 0x184   :  { %5160 = vmatprep.subr.msk.bf16.mxu0 %vm11130_vm14, %v5422_v7  ;;  %v90_v8 = vand.u32 15, %v58_v26  ;;  %v2034_v48 = vmul.f32 %v1939_v34, %v6446_v58  ;;  %v1816_v12 = vmul.f32 %v6750_v25, %v1644_v2  ;;  %v1189_v36 = vmul.f32 %v5725_v5, %v6553_v17 }
 0x185   :  { %v1712_v43 = vadd.f32 %v1680_v42, %v1568_v31  ;;  %v6847_v37 = vmul.f32 %v1943_v4, %v11131_v24  ;;  %v6850_v29 = vmul.f32 %v1945_v1, %v6334_v59  ;;  %v6852_v7 = vadd.f32 %v1260_v53, %v1224_v27 }
 0x186   :  { %v799_v26 = vrot.slane %v6743_v46, 7  ;;  %v2035_v58 = vmul.f32 %v1941_v41, %v6369_v57  ;;  %v1847_v34 = vadd.f32 %v1815_v28, %v1779_v21  ;;  %v1221_v31 = vadd.f32 %v1189_v36, %v6675_v38 }
 0x187   :  { %11132 = vst [vmem:[#allocation6_spill] sm:$0xff] %v6847_v37  ;;  %11133 = vst [vmem:[#allocation23_spill] sm:$0xff] %v6850_v29  ;;  %v1257_v2 = vmul.f32 %v5737_v15, %v6641_v63  ;;  %v1780_v17 = vadd.f32 %v1748_v13, %v1712_v43  ;;  %vm6861_vm14 = vcmp.eq.s32.totalorder %v90_v8, 0  ;;  %v11134_v59 = vmov 0  ;;  %v1947_v21 = vpop.permute.xlu0 %1946 }
 0x188   :  { %v11135_v59 = vsel %vm6861_vm14, 4294967295, %v11134_v59  ;;  %v11137_v27 = vrot.slane %v6743_v46, 1  ;;  %vm11138_vm0 = vcmp.lt.s32.totalorder %v5702_v56, 7  ;;  %vm11139_vm15 = vcmask 31744  }
 0x189   :  { %11136 = vst [vmem:[#allocation8_spill] sm:$0xff] %v11135_v59  ;;  %v2066_v38 = vsel %vm11139_vm15, %v2034_v48, 0.0  ;;  %vm11140_vm1 = vmmov %vm11139_vm15  ;;  %v2198_v36 = vpack.c.bf16 %v2035_v58, %v2034_v48  ;;  %v1289_v28 = vadd.f32 %v1257_v2, %v1221_v31  ;;  %v11142_v1 = vrot.slane %v6700_v0, 7 }
 0x18a   :  { %v6871_v57 = vsel %vm11138_vm0, %v11137_v27, %v865_v51  ;;  %v2067_v63 = vsel %vm11140_vm1, %v2035_v58, 0.0  ;;  %vm11141_vm11 = vmmov %vm11140_vm1  ;;  %vm11143_vm9 = vcmp.lt.s32.totalorder %v5702_v56, 1  ;;  %v11144_v13 = vsel %vm6577_vm2, %v6725_v47, %v6719_v54  ;;  %v1949_v54 = vpop.permute.xlu1 %1948 }
 0x18b   :  { %v2069_v4 = vsel %vm11141_vm11, %v6847_v37, 0.0  ;;  %v2068_v53 = vadd.f32 %v2067_v63, %v2066_v38  ;;  %v6881_v42 = vsel %vm11143_vm9, %v11142_v1, %v799_v26  ;;  %v1401_v8 = vmul.f32 %v5739_v16, %v11144_v13  ;;  %vm11145_vm0 = vmmov %vm11140_vm1  ;;  %v6904_v63 = vld [vmem:[#allocation2 + $0xa0] sm:$0xff] }
 0x18c   :  { %v2071_v48 = vsel %vm11145_vm0, %v6850_v29, 0.0  ;;  %v6892_v43 = vmul.f32 %v1947_v21, %v6512_v44  ;;  %vm11147_vm1 = vmmov %vm11145_vm0  ;;  %v6896_v41 = vadd.f32 %v11077_v61, %v1847_v34  ;;  %v993_v58 = vsel %vm6861_vm14, %v6871_v57, %v6881_v42 }
 0x18d   :  { %5052 = vmatprep.mubr.msk.bf16.mxu1 %vm11147_vm1, %v2198_v36  ;;  %v2070_v31 = vadd.f32 %v2069_v4, %v2068_v53  ;;  %v1848_v2 = vadd.f32 %v1816_v12, %v1780_v17  ;;  %v1433_v27 = vadd.f32 %v1401_v8, %v1289_v28  ;;  %v1469_v38 = vmul.f32 %v5727_v6, %v6650_v19  ;;  %vm11149_vm9 = vmmov %vm11145_vm0  ;;  %v1951_v28 = vpop.permute.xlu0 %1950 }
 0x18e   :  { %11146 = vst [vmem:[#allocation9_spill] sm:$0xff] %v6892_v43  ;;  %v6907_v44 = vmul.f32 %v1949_v54, %v6561_v10  ;;  %v1537_v61 = vmul.f32 %v5745_v20, %v6725_v47  ;;  %v1613_v34 = vsel %vm6577_vm2, %v6871_v57, %v6881_v42  ;;  %v59_v36 = vadd.s32 152, %v5702_v56  ;;  %v1953_v54 = vpop.permute.xlu1 %1952  ;;  %vm11151_vm11 = vmmov %vm11145_vm0 }
 0x18f   :  { %v2072_v12 = vadd.f32 %v2071_v48, %v2070_v31  ;;  %v2073_v17 = vsel %vm11149_vm9, %v6892_v43, 0.0  ;;  %v1501_v4 = vadd.f32 %v1469_v38, %v1433_v27  ;;  %v10777_v53 = vrot.slane %v6818_v9, 7 }
 0x190   :  { %11148 = vst [vmem:[#allocation10_spill] sm:$0xff] %v6907_v44  ;;  %v6922_v21 = vmul.f32 %v1951_v28, %v6612_v40  ;;  %v91_v1 = vand.u32 15, %v59_v36  ;;  %v10776_v13 = vrot.slane %v6904_v63, 1  ;;  %v6926_v48 = vmul.f32 %v5735_v14, %v993_v58  ;;  %v6937_v40 = vld [vmem:[%s10685_s6] ss:$0 sm:$0xff] }
 0x191   :  { %v2074_v8 = vadd.f32 %v2073_v17, %v2072_v12  ;;  %v1569_v31 = vadd.f32 %v1537_v61, %v1501_v4  ;;  %v1681_v24 = vmul.f32 %v5778_v35, %v1613_v34  ;;  %v2075_v27 = vsel %vm11151_vm11, %v6907_v44, 0.0  ;;  %v1955_v28 = vpop.permute.xlu0 %1954  ;;  %vm11159_vm11 = vmmov %vm11145_vm0 }
 0x192   :  { %11150 = vst [vmem:[#allocation11_spill] sm:$0xff] %v6922_v21  ;;  %v6932_v38 = vmul.f32 %v1953_v54, %v6637_v22  ;;  %v1887_v36 = vadd.f32 %v6937_v40, %v1848_v2  ;;  %v1749_v12 = vmul.f32 %v5731_v11, %v6743_v46  ;;  %vm11153_vm15 = vcmp.lt.s32.totalorder %v5702_v56, 1 }
 0x193   :  { %v2076_v61 = vadd.f32 %v2075_v27, %v2074_v8  ;;  %v1713_v34 = vadd.f32 %v1681_v24, %v1569_v31  ;;  %v6950_v22 = vsel %vm11153_vm15, %v799_v26, %v10777_v53  ;;  %v2077_v17 = vsel %vm11145_vm0, %v6922_v21, 0.0  ;;  %v1957_v27 = vpop.permute.xlu1 %1956  ;;  %vm11161_vm15 = vmmov %vm11145_vm0  ;;  %v7013_v21 = vld [vmem:[#allocation2 + $0xa8] sm:$0xff] }
 0x194   :  { %11152 = vst [vmem:[#allocation19_spill] sm:$0xff] %v6932_v38  ;;  %vm6956_vm1 = vcmp.eq.s32.totalorder %v91_v1, 15  ;;  %v11154_v4 = vmov 0  ;;  %vm11157_vm9 = vcmp.lt.s32.totalorder %v5702_v56, 7  ;;  %v6969_v8 = vmul.f32 %v1955_v28, %v6730_v3 }
 0x195   :  { %v11155_v4 = vsel %vm6956_vm1, 4294967295, %v11154_v4  ;;  %v6966_v24 = vsel %vm11157_vm9, %v865_v51, %v10776_v13  ;;  %v2078_v26 = vadd.f32 %v2077_v17, %v2076_v61  ;;  %v1781_v54 = vadd.f32 %v1749_v12, %v1713_v34  ;;  %v1959_v28 = vpop.permute.xlu0 %1958  ;;  %vm11165_vm9 = vmmov %vm11145_vm0 }
 0x196   :  { %11156 = vst [vmem:[#allocation30_spill] sm:$0xff] %v11155_v4  ;;  %11158 = vst [vmem:[#allocation36_spill] sm:$0xff] %v6969_v8  ;;  %v1817_v31 = vmul.f32 %v6750_v25, %v6871_v57  ;;  %v2079_v1 = vsel %vm11159_vm11, %v6932_v38, 0.0  ;;  %v1126_v2 = vmul.f32 %v5735_v14, %v6950_v22  ;;  %v1194_v10 = vmul.f32 %v5725_v5, %v6818_v9 }
 0x197   :  { %v1402_v51 = vmul.f32 %v5739_v16, %v6782_v18  ;;  %v2080_v61 = vadd.f32 %v2079_v1, %v2078_v26  ;;  %v6982_v3 = vmul.f32 %v1957_v27, %v6733_v50  ;;  %v1090_v34 = vsel %vm6956_vm1, %v6950_v22, %v6966_v24  ;;  %v1961_v53 = vpop.permute.xlu1 %1960  ;;  %vm11167_vm11 = vmmov %vm11145_vm0 }
 0x198   :  { %v1470_v12 = vmul.f32 %v5727_v6, %v6700_v0  ;;  %v2081_v17 = vsel %vm11161_vm15, %v6969_v8, 0.0  ;;  %v11162_v50 = vsel %vm6619_vm12, %v6782_v18, %v6788_v62  ;;  %v1646_v1 = vsel %vm6619_vm12, %v6950_v22, %v6966_v24 }
 0x199   :  { %11160 = vst [vmem:[#allocation37_spill] sm:$0xff] %v6982_v3  ;;  %v1434_v58 = vadd.f32 %v1402_v51, %v6745_v32  ;;  %v1538_v26 = vmul.f32 %v5745_v20, %v11162_v50  ;;  %v2082_v27 = vadd.f32 %v2081_v17, %v2080_v61  ;;  %v7006_v13 = vmul.f32 %v1959_v28, %v6806_v60 }
 0x19a   :  { %v1849_v32 = vadd.f32 %v1817_v31, %v1781_v54  ;;  %v2083_v51 = vsel %vm11145_vm0, %v6982_v3, 0.0  ;;  %v1682_v62 = vmul.f32 %v5778_v35, %v6950_v22  ;;  %v60_v50 = vadd.s32 160, %v5702_v56 }
 0x19b   :  { %11163 = vst [vmem:[#allocation38_spill] sm:$0xff] %v7006_v13  ;;  %v1502_v18 = vadd.f32 %v1470_v12, %v1434_v58  ;;  %v2084_v61 = vadd.f32 %v2083_v51, %v2082_v27  ;;  %v7016_v17 = vmul.f32 %v1961_v53, %v6821_v45  ;;  %v1750_v60 = vmul.f32 %v5731_v11, %v6818_v9  ;;  %v1963_v58 = vpop.permute.xlu0 %1962  ;;  %v1965_v3 = vpop.permute.xlu1 %1964 }
 0x19c   :  { %v801_v54 = vrot.slane %v6904_v63, 7  ;;  %v2085_v31 = vsel %vm11165_vm9, %v7006_v13, 0.0  ;;  %v92_v28 = vand.u32 15, %v60_v50  ;;  %v1191_v0 = vmul.f32 %v5725_v5, %v6650_v19 }
 0x19d   :  { %11164 = vst [vmem:[#allocation39_spill] sm:$0xff] %v7016_v17  ;;  %v1570_v12 = vadd.f32 %v1538_v26, %v1502_v18  ;;  %v2086_v8 = vadd.f32 %v2085_v31, %v2084_v61  ;;  %v7028_v45 = vmul.f32 %v1963_v58, %v6896_v41  ;;  %v867_v53 = vrot.slane %v7013_v21, 1 }
 0x19e   :  { %v2087_v51 = vsel %vm11167_vm11, %v7016_v17, 0.0  ;;  %v1818_v26 = vmul.f32 %v6750_v25, %v1646_v1  ;;  %v1223_v18 = vadd.f32 %v1191_v0, %v6776_v49  ;;  %v7035_v19 = vmul.f32 %v1965_v3, %v1887_v36 }
 0x19f   :  { %11166 = vst [vmem:[#allocation40_spill] sm:$0xff] %v7028_v45  ;;  %v1714_v38 = vadd.f32 %v1682_v62, %v1570_v12  ;;  %v2088_v50 = vadd.f32 %v2087_v51, %v2086_v8  ;;  %v1888_v61 = vadd.f32 %v6937_v40, %v1849_v32  ;;  %v11169_v31 = vrot.slane %v6818_v9, 7  ;;  %v1967_v27 = vpop.permute.xlu0 %1966 }
 0x1a0   :  { %11168 = vst [vmem:[#allocation41_spill] sm:$0xff] %v7035_v19  ;;  %vm11170_vm15 = vcmp.lt.s32.totalorder %v5702_v56, 1  ;;  %v2089_v58 = vsel %vm11145_vm0, %v7028_v45, 0.0  ;;  %vm7046_vm9 = vcmp.eq.s32.totalorder %v92_v28, 0  ;;  %v11171_v1 = vmov 0 }
 0x1a1   :  { %v7042_v41 = vsel %vm11170_vm15, %v11169_v31, %v801_v54  ;;  %v1782_v62 = vadd.f32 %v1750_v60, %v1714_v38  ;;  %v11172_v1 = vsel %vm7046_vm9, 4294967295, %v11171_v1  ;;  %v1259_v49 = vmul.f32 %v5737_v15, %v6725_v47  ;;  %vm11177_vm15 = vmmov %vm11145_vm0  ;;  %v1969_v31 = vpop.permute.xlu1 %1968 }
 0x1a2   :  { %11173 = vst [vmem:[#allocation42_spill] sm:$0xff] %v11172_v1  ;;  %v2090_v36 = vadd.f32 %v2089_v58, %v2088_v50  ;;  %v7054_v3 = vmul.f32 %v1967_v27, %v1888_v61  ;;  %v11175_v0 = vrot.slane %v6904_v63, 1  ;;  %vm11176_vm11 = vcmp.lt.s32.totalorder %v5702_v56, 7  ;;  %v7075_v58 = vld [vmem:[#allocation2 + $0xb0] sm:$0xff] }
 0x1a3   :  { %v2091_v38 = vsel %vm11177_vm15, %v7035_v19, 0.0  ;;  %v1850_v60 = vadd.f32 %v1818_v26, %v1782_v62  ;;  %v1291_v12 = vadd.f32 %v1259_v49, %v1223_v18  ;;  %v11178_v47 = vsel %vm6670_vm13, %v6871_v57, %v6881_v42 }
 0x1a4   :  { %11174 = vst [vmem:[#allocation43_spill] sm:$0xff] %v7054_v3  ;;  %v7060_v32 = vsel %vm11176_vm11, %v11175_v0, %v867_v53  ;;  %v1403_v28 = vmul.f32 %v5739_v16, %v11178_v47  ;;  %v2092_v27 = vadd.f32 %v2091_v38, %v2090_v36  ;;  %v1226_v51 = vadd.f32 %v1194_v10, %v1126_v2 }
 0x1a5   :  { %v1262_v50 = vmul.f32 %v5737_v15, %v1090_v34  ;;  %v1368_v61 = vsel %vm6798_vm3, %v6950_v22, %v6966_v24  ;;  %v1889_v26 = vadd.f32 %v6937_v40, %v1850_v60  ;;  %v995_v42 = vsel %vm7046_vm9, %v7060_v32, %v7042_v41 }
 0x1a6   :  { %v1435_v18 = vadd.f32 %v1403_v28, %v1291_v12  ;;  %v1471_v10 = vmul.f32 %v5727_v6, %v6743_v46  ;;  %v2093_v2 = vsel %vm11145_vm0, %v7054_v3, 0.0  ;;  %v1615_v24 = vsel %vm6670_vm13, %v7060_v32, %v7042_v41 }
 0x1a7   :  { %v61_v34 = vadd.s32 168, %v5702_v56  ;;  %v802_v62 = vrot.slane %v7013_v21, 7  ;;  %v7092_v49 = vmul.f32 %v1969_v31, %v1889_v26  ;;  %v1539_v0 = vmul.f32 %v5745_v20, %v6871_v57 }
 0x1a8   :  { %v1503_v36 = vadd.f32 %v1471_v10, %v1435_v18  ;;  %v868_v38 = vrot.slane %v7075_v58, 1  ;;  %v2094_v60 = vadd.f32 %v2093_v2, %v2092_v27  ;;  %v7097_v12 = vadd.f32 %v1262_v50, %v1226_v51 }
 0x1a9   :  { %11179 = vst [vmem:[#allocation44_spill] sm:$0xff] %v7092_v49  ;;  %v93_v47 = vand.u32 15, %v61_v34  ;;  %v1404_v28 = vmul.f32 %v5739_v16, %v6950_v22  ;;  %v7104_v55 = vmul.f32 %v5735_v14, %v995_v42  ;;  %v1683_v26 = vmul.f32 %v5778_v35, %v1615_v24  ;;  %v7126_v24 = vld [vmem:[#allocation2 + $0xb8] sm:$0xff] }
 0x1aa   :  { %v1571_v31 = vadd.f32 %v1539_v0, %v1503_v36  ;;  %v1751_v18 = vmul.f32 %v5731_v11, %v6904_v63  ;;  %v11180_v27 = vmov 0  ;;  %vm11183_vm15 = vcmp.lt.s32.totalorder %v5702_v56, 1 }
 0x1ab   :  { %vm7109_vm11 = vcmp.eq.s32.totalorder %v93_v47, 15  ;;  %v7115_v51 = vsel %vm11183_vm15, %v801_v54, %v802_v62  ;;  %vm11184_vm0 = vcmp.lt.s32.totalorder %v5702_v56, 7  ;;  %vm11185_vm13 = vcmask 31744  }
 0x1ac   :  { %v11181_v27 = vsel %vm7109_vm11, 4294967295, %v11180_v27  ;;  %v7119_v22 = vsel %vm11184_vm0, %v867_v53, %v868_v38  ;;  %v2095_v50 = vsel %vm11185_vm13, %v7092_v49, 0.0  ;;  %v1715_v42 = vadd.f32 %v1683_v26, %v1571_v31  ;;  %vm11186_vm13 = vmmov %vm11184_vm0 }
 0x1ad   :  { %11182 = vst [vmem:[#allocation45_spill] sm:$0xff] %v11181_v27  ;;  %v1436_v10 = vadd.f32 %v1404_v28, %v6852_v7  ;;  %v1472_v2 = vmul.f32 %v5727_v6, %v6818_v9  ;;  %v7128_v34 = vadd.f32 %v2095_v50, %v2094_v60  ;;  %v1337_v54 = vsel %vm6861_vm14, %v7060_v32, %v7042_v41 }
 0x1ae   :  { %v1819_v53 = vmul.f32 %v6750_v25, %v7060_v32  ;;  %v1196_v36 = vmul.f32 %v5725_v5, %v7013_v21  ;;  %v1783_v0 = vadd.f32 %v1751_v18, %v1715_v42  ;;  %v1092_v9 = vsel %vm7109_vm11, %v7115_v51, %v7119_v22 }
 0x1af   :  { %v1504_v7 = vadd.f32 %v1472_v2, %v1436_v10  ;;  %v1540_v60 = vmul.f32 %v5745_v20, %v1368_v61  ;;  %v1128_v47 = vmul.f32 %v5735_v14, %v7115_v51  ;;  %v1648_v41 = vsel %vm6798_vm3, %v7115_v51, %v7119_v22 }
 0x1b0   :  { %v62_v28 = vadd.s32 176, %v5702_v56  ;;  %v869_v31 = vrot.slane %v7126_v24, 1  ;;  %v1684_v18 = vmul.f32 %v5778_v35, %v7115_v51  ;;  %v803_v50 = vrot.slane %v7075_v58, 7 }
 0x1b1   :  { %v1572_v26 = vadd.f32 %v1540_v60, %v1504_v7  ;;  %v1193_v61 = vmul.f32 %v5725_v5, %v6743_v46  ;;  %v1851_v42 = vadd.f32 %v1819_v53, %v1783_v0  ;;  %v1264_v10 = vmul.f32 %v5737_v15, %v1092_v9 }
 0x1b2   :  { %v1752_v2 = vmul.f32 %v5731_v11, %v7013_v21  ;;  %v94_v8 = vand.u32 15, %v62_v28  ;;  %v7161_v49 = vsel %vm11186_vm13, %v868_v38, %v869_v31  ;;  %v1261_v60 = vmul.f32 %v5737_v15, %v6871_v57  ;;  %v1971_v28 = vpop.permute.xlu0 %1970 }
 0x1b3   :  { %v1716_v3 = vadd.f32 %v1684_v18, %v1572_v26  ;;  %v1225_v7 = vadd.f32 %v1193_v61, %v6926_v48  ;;  %v1228_v45 = vadd.f32 %v1196_v36, %v1128_v47  ;;  %v1370_v46 = vsel %vm6956_vm1, %v7115_v51, %v7119_v22  ;;  %v7180_v36 = vld [vmem:[#allocation2 + $0xc0] sm:$0xff]  ;;  %v1973_v18 = vpop.permute.xlu1 %1972 }
 0x1b4   :  { %v1820_v53 = vmul.f32 %v6750_v25, %v1648_v41  ;;  %vm7171_vm15 = vcmp.eq.s32.totalorder %v94_v8, 0  ;;  %v11187_v0 = vmov 0  ;;  %vm11190_vm0 = vcmp.lt.s32.totalorder %v5702_v56, 1 }
 0x1b5   :  { %v11188_v0 = vsel %vm7171_vm15, 4294967295, %v11187_v0  ;;  %v1784_v9 = vadd.f32 %v1752_v2, %v1716_v3  ;;  %v7177_v38 = vsel %vm11190_vm0, %v802_v62, %v803_v50  ;;  %v1293_v48 = vadd.f32 %v1261_v60, %v1225_v7  ;;  %vm11192_vm13 = vmmov %vm11190_vm0 }
 0x1b6   :  { %11189 = vst [vmem:[#allocation46_spill] sm:$0xff] %v11188_v0  ;;  %v1405_v57 = vmul.f32 %v5739_v16, %v1337_v54  ;;  %v1890_v47 = vadd.f32 %v6937_v40, %v1851_v42  ;;  %v7183_v22 = vadd.f32 %v1264_v10, %v1228_v45  ;;  %v1473_v8 = vmul.f32 %v5727_v6, %v6904_v63 }
 0x1b7   :  { %v1617_v3 = vsel %vm6861_vm14, %v7161_v49, %v7177_v38  ;;  %v1852_v62 = vadd.f32 %v1820_v53, %v1784_v9  ;;  %v997_v54 = vsel %vm7171_vm15, %v7161_v49, %v7177_v38  ;;  %v63_v26 = vadd.s32 184, %v5702_v56 }
 0x1b8   :  { %v1437_v41 = vadd.f32 %v1405_v57, %v1293_v48  ;;  %v1339_v45 = vsel %vm7046_vm9, %v7161_v49, %v7177_v38  ;;  %v1541_v61 = vmul.f32 %v5745_v20, %v7060_v32  ;;  %v804_v42 = vrot.slane %v7126_v24, 7 }
 0x1b9   :  { %v870_v10 = vrot.slane %v7180_v36, 1  ;;  %v7204_v2 = vmul.f32 %v1971_v28, %v1890_v47  ;;  %v1891_v7 = vadd.f32 %v6937_v40, %v1852_v62  ;;  %v95_v53 = vand.u32 15, %v63_v26 }
 0x1ba   :  { %v1505_v60 = vadd.f32 %v1473_v8, %v1437_v41  ;;  %v7208_v9 = vmul.f32 %v5735_v14, %v997_v54  ;;  %v1685_v48 = vmul.f32 %v5778_v35, %v1617_v3  ;;  %v7213_v38 = vsel %vm11192_vm13, %v803_v50, %v804_v42 }
 0x1bb   :  { %11191 = vst [vmem:[#allocation47_spill] sm:$0xff] %v7204_v2  ;;  %v1406_v57 = vmul.f32 %v5739_v16, %v7115_v51  ;;  %v7217_v59 = vmul.f32 %v1973_v18, %v1891_v7  ;;  %vm7219_vm0 = vcmp.eq.s32.totalorder %v95_v53, 15  ;;  %v11194_v28 = vmov 0  ;;  %v7239_v18 = vld [vmem:[#allocation2 + $0xc8] sm:$0xff] }
 0x1bc   :  { %v1573_v47 = vadd.f32 %v1541_v61, %v1505_v60  ;;  %v11195_v28 = vsel %vm7219_vm0, 4294967295, %v11194_v28  ;;  %vm11197_vm14 = vcmp.lt.s32.totalorder %v5702_v56, 7  ;;  %v1753_v3 = vmul.f32 %v5731_v11, %v7075_v58 }
 0x1bd   :  { %11193 = vst [vmem:[#allocation48_spill] sm:$0xff] %v7217_v59  ;;  %11196 = vst [vmem:[#allocation49_spill] sm:$0xff] %v11195_v28  ;;  %v7225_v8 = vsel %vm11197_vm14, %v869_v31, %v870_v10  ;;  %v1438_v50 = vadd.f32 %v1406_v57, %v7097_v12  ;;  %v1474_v62 = vmul.f32 %v5727_v6, %v7013_v21  ;;  %vm11198_vm13 = vcmask 31744  }
 0x1be   :  { %v1542_v51 = vmul.f32 %v5745_v20, %v1370_v46  ;;  %v2097_v54 = vsel %vm11198_vm13, %v7204_v2, 0.0  ;;  %v1717_v26 = vadd.f32 %v1685_v48, %v1573_v47  ;;  %v1130_v31 = vmul.f32 %v5735_v14, %v7213_v38 }
 0x1bf   :  { %v2098_v61 = vadd.f32 %v2097_v54, %v7128_v34  ;;  %v1821_v12 = vmul.f32 %v6750_v25, %v7161_v49  ;;  %v1094_v21 = vsel %vm7219_vm0, %v7213_v38, %v7225_v8  ;;  %v1506_v46 = vadd.f32 %v1474_v62, %v1438_v50 }
 0x1c0   :  { %v1785_v7 = vadd.f32 %v1753_v3, %v1717_v26  ;;  %v1198_v60 = vmul.f32 %v5725_v5, %v7126_v24  ;;  %v1650_v53 = vsel %vm6956_vm1, %v7213_v38, %v7225_v8  ;;  %v64_v34 = vadd.s32 192, %v5702_v56 }
 0x1c1   :  { %v1574_v48 = vadd.f32 %v1542_v51, %v1506_v46  ;;  %v1686_v57 = vmul.f32 %v5778_v35, %v7213_v38  ;;  %v805_v47 = vrot.slane %v7180_v36, 7  ;;  %v871_v54 = vrot.slane %v7239_v18, 1 }
 0x1c2   :  { %v1230_v50 = vadd.f32 %v1198_v60, %v1130_v31  ;;  %v1266_v3 = vmul.f32 %v5737_v15, %v1094_v21  ;;  %v96_v62 = vand.u32 15, %v64_v34  ;;  %v1195_v26 = vmul.f32 %v5725_v5, %v6904_v63 }
 0x1c3   :  { %v1853_v41 = vadd.f32 %v1821_v12, %v1785_v7  ;;  %v1718_v2 = vadd.f32 %v1686_v57, %v1574_v48  ;;  %v1754_v19 = vmul.f32 %v5731_v11, %v7126_v24  ;;  %v1263_v51 = vmul.f32 %v5737_v15, %v7060_v32  ;;  %v1975_v57 = vpop.permute.xlu0 %1974 }
 0x1c4   :  { %vm11199_vm14 = vcmp.lt.s32.totalorder %v5702_v56, 1  ;;  %vm11200_vm13 = vcmp.lt.s32.totalorder %v5702_v56, 7  ;;  %v1227_v21 = vadd.f32 %v1195_v26, %v7104_v55  ;;  %v1407_v63 = vmul.f32 %v5739_v16, %v1339_v45  ;;  %v7289_v45 = vld [vmem:[#allocation2 + $0xd0] sm:$0xff] }
 0x1c5   :  { %v7268_v46 = vsel %vm11199_vm14, %v804_v42, %v805_v47  ;;  %v7272_v31 = vsel %vm11200_vm13, %v870_v10, %v871_v54  ;;  %vm11201_vm2 = vcmask 31744   ;;  %v1372_v32 = vsel %vm7109_vm11, %v7213_v38, %v7225_v8  ;;  %v1977_v8 = vpop.permute.xlu1 %1976 }
 0x1c6   :  { %v2099_v12 = vsel %vm11201_vm2, %v7217_v59, 0.0  ;;  %v1786_v7 = vadd.f32 %v1754_v19, %v1718_v2  ;;  %v1822_v42 = vmul.f32 %v6750_v25, %v1650_v53  ;;  %v7283_v34 = vadd.f32 %v1266_v3, %v1230_v50 }
 0x1c7   :  { %v2100_v60 = vadd.f32 %v2099_v12, %v2098_v61  ;;  %vm7285_vm14 = vcmp.eq.s32.totalorder %v96_v62, 0  ;;  %v11202_v10 = vmov 0  ;;  %v1295_v55 = vadd.f32 %v1263_v51, %v1227_v21 }
 0x1c8   :  { %v11203_v10 = vsel %vm7285_vm14, 4294967295, %v11202_v10  ;;  %v1892_v48 = vadd.f32 %v6937_v40, %v1853_v41  ;;  %v1854_v26 = vadd.f32 %v1822_v42, %v1786_v7  ;;  %v1341_v19 = vsel %vm7171_vm15, %v7272_v31, %v7268_v46 }
 0x1c9   :  { %11204 = vst [vmem:[#allocation50_spill] sm:$0xff] %v11203_v10  ;;  %v1475_v2 = vmul.f32 %v5727_v6, %v7075_v58  ;;  %v1439_v61 = vadd.f32 %v1407_v63, %v1295_v55  ;;  %v1619_v53 = vsel %vm7046_vm9, %v7272_v31, %v7268_v46  ;;  %v65_v50 = vadd.s32 200, %v5702_v56 }
 0x1ca   :  { %v806_v41 = vrot.slane %v7239_v18, 7  ;;  %v1893_v3 = vadd.f32 %v6937_v40, %v1854_v26  ;;  %v999_v62 = vsel %vm7285_vm14, %v7272_v31, %v7268_v46  ;;  %v1543_v51 = vmul.f32 %v5745_v20, %v7161_v49 }
 0x1cb   :  { %v872_v21 = vrot.slane %v7289_v45, 1  ;;  %v7312_v63 = vmul.f32 %v1975_v57, %v1892_v48  ;;  %v1507_v12 = vadd.f32 %v1475_v2, %v1439_v61  ;;  %v97_v7 = vand.u32 15, %v65_v50  ;;  %v7349_v50 = vld [vmem:[#allocation2 + $0xd8] sm:$0xff] }
 0x1cc   :  { %v1408_v42 = vmul.f32 %v5739_v16, %v7213_v38  ;;  %v7316_v55 = vmul.f32 %v1977_v8, %v1893_v3  ;;  %v1687_v26 = vmul.f32 %v5778_v35, %v1619_v53  ;;  %vm11207_vm2 = vcmp.lt.s32.totalorder %v5702_v56, 1 }
 0x1cd   :  { %11205 = vst [vmem:[#allocation51_spill] sm:$0xff] %v7312_v63  ;;  %v7321_v1 = vsel %vm11207_vm2, %v805_v47, %v806_v41  ;;  %v7325_v46 = vsel %vm11200_vm13, %v871_v54, %v872_v21  ;;  %v1575_v59 = vadd.f32 %v1543_v51, %v1507_v12  ;;  %vm7327_vm9 = vcmp.eq.s32.totalorder %v97_v7, 15 }
 0x1ce   :  { %11206 = vst [vmem:[#allocation52_spill] sm:$0xff] %v7316_v55  ;;  %v11208_v48 = vmov 0  ;;  %v1440_v57 = vadd.f32 %v1408_v42, %v7183_v22  ;;  %v1476_v38 = vmul.f32 %v5727_v6, %v7126_v24  ;;  %v7337_v47 = vmul.f32 %v5735_v14, %v999_v62 }
 0x1cf   :  { %v11209_v48 = vsel %vm7327_vm9, 4294967295, %v11208_v48  ;;  %v1755_v54 = vmul.f32 %v5731_v11, %v7180_v36  ;;  %v1096_v8 = vsel %vm7327_vm9, %v7321_v1, %v7325_v46  ;;  %vm11211_vm2 = vcmask 31744  }
 0x1d0   :  { %11210 = vst [vmem:[#allocation53_spill] sm:$0xff] %v11209_v48  ;;  %v2101_v22 = vsel %vm11211_vm2, %v7312_v63, 0.0  ;;  %v1719_v61 = vadd.f32 %v1687_v26, %v1575_v59  ;;  %v1823_v24 = vmul.f32 %v6750_v25, %v7272_v31  ;;  %v1508_v53 = vadd.f32 %v1476_v38, %v1440_v57  ;;  %vm11212_vm13 = vmmov %vm11211_vm2 }
 0x1d1   :  { %v2102_v3 = vadd.f32 %v2101_v22, %v2100_v60  ;;  %v1132_v62 = vmul.f32 %v5735_v14, %v7321_v1  ;;  %v1200_v51 = vmul.f32 %v5725_v5, %v7239_v18  ;;  %v1544_v12 = vmul.f32 %v5745_v20, %v1372_v32 }
 0x1d2   :  { %v2103_v7 = vsel %vm11212_vm13, %v7316_v55, 0.0  ;;  %v1787_v42 = vadd.f32 %v1755_v54, %v1719_v61  ;;  %v1268_v59 = vmul.f32 %v5737_v15, %v1096_v8  ;;  %v66_v26 = vadd.s32 208, %v5702_v56 }
 0x1d3   :  { %v1576_v57 = vadd.f32 %v1544_v12, %v1508_v53  ;;  %v1688_v60 = vmul.f32 %v5778_v35, %v7321_v1  ;;  %v873_v38 = vrot.slane %v7349_v50, 1  ;;  %v1197_v22 = vmul.f32 %v5725_v5, %v7075_v58 }
 0x1d4   :  { %v1855_v2 = vadd.f32 %v1823_v24, %v1787_v42  ;;  %v1652_v32 = vsel %vm7109_vm11, %v7321_v1, %v7325_v46  ;;  %v98_v54 = vand.u32 15, %v66_v26  ;;  %v807_v8 = vrot.slane %v7289_v45, 7 }
 0x1d5   :  { %v1720_v61 = vadd.f32 %v1688_v60, %v1576_v57  ;;  %v1756_v53 = vmul.f32 %v5731_v11, %v7239_v18  ;;  %v1229_v12 = vadd.f32 %v1197_v22, %v7208_v9  ;;  %v1265_v63 = vmul.f32 %v5737_v15, %v7161_v49  ;;  %v7385_v22 = vld [vmem:[#allocation2 + $0xe0] sm:$0xff] }
 0x1d6   :  { %v2104_v55 = vadd.f32 %v2103_v7, %v2102_v3  ;;  %v1232_v58 = vadd.f32 %v1200_v51, %v1132_v62  ;;  %v1374_v24 = vsel %vm7219_vm0, %v7321_v1, %v7325_v46  ;;  %vm11213_vm2 = vcmp.lt.s32.totalorder %v5702_v56, 7  ;;  %v1979_v3 = vpop.permute.xlu0 %1978 }
 0x1d7   :  { %v7381_v42 = vsel %vm11213_vm2, %v872_v21, %v873_v38  ;;  %v1788_v26 = vadd.f32 %v1756_v53, %v1720_v61  ;;  %v1824_v57 = vmul.f32 %v6750_v25, %v1652_v32  ;;  %v1297_v60 = vadd.f32 %v1265_v63, %v1229_v12 }
 0x1d8   :  { %v1409_v9 = vmul.f32 %v5739_v16, %v1341_v19  ;;  %v1894_v49 = vadd.f32 %v6937_v40, %v1855_v2  ;;  %v7388_v62 = vadd.f32 %v1268_v59, %v1232_v58  ;;  %vm7390_vm13 = vcmp.eq.s32.totalorder %v98_v54, 0  ;;  %v1981_v2 = vpop.permute.xlu1 %1980 }
 0x1d9   :  { %v11214_v51 = vmov 0  ;;  %vm11217_vm2 = vcmp.lt.s32.totalorder %v5702_v56, 1  ;;  %v1856_v46 = vadd.f32 %v1824_v57, %v1788_v26  ;;  %v1477_v63 = vmul.f32 %v5727_v6, %v7180_v36 }
 0x1da   :  { %v11215_v51 = vsel %vm7390_vm13, 4294967295, %v11214_v51  ;;  %v819_v21 = vsel %vm11217_vm2, %v806_v41, %v807_v8  ;;  %v1441_v7 = vadd.f32 %v1409_v9, %v1297_v60  ;;  %v67_v32 = vadd.s32 216, %v5702_v56  ;;  %v1983_v13 = vpop.permute.xlu0 %1982 }
 0x1db   :  { %11216 = vst [vmem:[#allocation54_spill] sm:$0xff] %v11215_v51  ;;  %v1621_v19 = vsel %vm7171_vm15, %v7381_v42, %v819_v21  ;;  %v1343_v59 = vsel %vm7285_vm14, %v7381_v42, %v819_v21  ;;  %v808_v54 = vrot.slane %v7349_v50, 7  ;;  %v874_v41 = vrot.slane %v7385_v22, 1 }
 0x1dc   :  { %v7407_v61 = vmul.f32 %v1979_v3, %v1894_v49  ;;  %v1895_v53 = vadd.f32 %v6937_v40, %v1856_v46  ;;  %v1509_v12 = vadd.f32 %v1477_v63, %v1441_v7  ;;  %v1545_v58 = vmul.f32 %v5745_v20, %v7272_v31 }
 0x1dd   :  { %v1689_v26 = vmul.f32 %v5778_v35, %v1621_v19  ;;  %v99_v57 = vand.u32 15, %v67_v32  ;;  %v7415_v60 = vsel %vm11217_vm2, %v807_v8, %v808_v54  ;;  %v1410_v9 = vmul.f32 %v5739_v16, %v7321_v1 }
 0x1de   :  { %11218 = vst [vmem:[#allocation55_spill] sm:$0xff] %v7407_v61  ;;  %v7419_v0 = vmul.f32 %v1981_v2, %v1895_v53  ;;  %v1577_v49 = vadd.f32 %v1545_v58, %v1509_v12  ;;  %vm11220_vm15 = vcmp.lt.s32.totalorder %v5702_v56, 7  ;;  %v1134_v46 = vmul.f32 %v5735_v14, %v7415_v60  ;;  %v7448_v12 = vld [vmem:[#allocation2 + $0xe8] sm:$0xff] }
 0x1df   :  { %v7423_v3 = vsel %vm11220_vm15, %v873_v38, %v874_v41  ;;  %vm7427_vm11 = vcmp.eq.s32.totalorder %v99_v57, 15  ;;  %v11221_v7 = vmov 0  ;;  %v1442_v8 = vadd.f32 %v1410_v9, %v7283_v34 }
 0x1e0   :  { %11219 = vst [vmem:[#allocation56_spill] sm:$0xff] %v7419_v0  ;;  %v11222_v7 = vsel %vm7427_vm11, 4294967295, %v11221_v7  ;;  %v1478_v63 = vmul.f32 %v5727_v6, %v7239_v18  ;;  %v1546_v1 = vmul.f32 %v5745_v20, %v1374_v24  ;;  %v1721_v2 = vadd.f32 %v1689_v26, %v1577_v49 }
 0x1e1   :  { %11223 = vst [vmem:[#allocation57_spill] sm:$0xff] %v11222_v7  ;;  %v1757_v38 = vmul.f32 %v5731_v11, %v7289_v45  ;;  %v1202_v32 = vmul.f32 %v5725_v5, %v7349_v50  ;;  %vm11224_vm15 = vcmask 31744   ;;  %v1001_v34 = vsel %vm7390_vm13, %v7381_v42, %v819_v21 }
 0x1e2   :  { %v2105_v53 = vsel %vm11224_vm15, %v7407_v61, 0.0  ;;  %v1825_v18 = vmul.f32 %v6750_v25, %v7381_v42  ;;  %v1510_v24 = vadd.f32 %v1478_v63, %v1442_v8  ;;  %v1098_v57 = vsel %vm7427_vm11, %v7415_v60, %v7423_v3 }
 0x1e3   :  { %v2106_v58 = vadd.f32 %v2105_v53, %v2104_v55  ;;  %v1789_v26 = vadd.f32 %v1757_v38, %v1721_v2  ;;  %v1234_v9 = vadd.f32 %v1202_v32, %v1134_v46  ;;  %v1654_v21 = vsel %vm7219_vm0, %v7415_v60, %v7423_v3 }
 0x1e4   :  { %v1578_v49 = vadd.f32 %v1546_v1, %v1510_v24  ;;  %v1690_v19 = vmul.f32 %v5778_v35, %v7415_v60  ;;  %v68_v8 = vadd.s32 224, %v5702_v56  ;;  %v809_v55 = vrot.slane %v7385_v22, 7 }
 0x1e5   :  { %v1857_v63 = vadd.f32 %v1825_v18, %v1789_v26  ;;  %v875_v2 = vrot.slane %v7448_v12, 1  ;;  %v1199_v38 = vmul.f32 %v5725_v5, %v7180_v36  ;;  %v1270_v46 = vmul.f32 %v5737_v15, %v1098_v57 }
 0x1e6   :  { %v1722_v1 = vadd.f32 %v1690_v19, %v1578_v49  ;;  %v1758_v32 = vmul.f32 %v5731_v11, %v7349_v50  ;;  %v100_v53 = vand.u32 15, %v68_v8  ;;  %v1826_v24 = vmul.f32 %v6750_v25, %v1654_v21 }
 0x1e7   :  { %v1231_v61 = vadd.f32 %v1199_v38, %v7337_v47  ;;  %v1267_v18 = vmul.f32 %v5737_v15, %v7272_v31  ;;  %v1411_v26 = vmul.f32 %v5739_v16, %v1343_v59  ;;  %v11225_v36 = vmov 0 }
 0x1e8   :  { %v1790_v17 = vadd.f32 %v1758_v32, %v1722_v1  ;;  %vm7473_vm2 = vcmp.eq.s32.totalorder %v100_v53, 0  ;;  %vm11228_vm15 = vcmp.lt.s32.totalorder %v5702_v56, 1  ;;  %vm11229_vm0 = vcmp.lt.s32.totalorder %v5702_v56, 7  ;;  %v7495_v1 = vld [vmem:[#allocation2 + $0xf0] sm:$0xff]  ;;  %v1985_v32 = vpop.permute.xlu1 %1984 }
 0x1e9   :  { %v11226_v36 = vsel %vm7473_vm2, 4294967295, %v11225_v36  ;;  %v7479_v19 = vsel %vm11228_vm15, %v808_v54, %v809_v55  ;;  %v7483_v57 = vsel %vm11229_vm0, %v874_v41, %v875_v2  ;;  %vm11230_vm1 = vcmask 31744  }
 0x1ea   :  { %11227 = vst [vmem:[#allocation58_spill] sm:$0xff] %v11226_v36  ;;  %v2107_v47 = vsel %vm11230_vm1, %v7419_v0, 0.0  ;;  %v1133_v31 = vmul.f32 %v5735_v14, %v1001_v34  ;;  %v1896_v59 = vadd.f32 %v6937_v40, %v1857_v63  ;;  %v1299_v49 = vadd.f32 %v1267_v18, %v1231_v61  ;;  %vm11233_vm1 = vmmov %vm11228_vm15 }
 0x1eb   :  { %v2108_v21 = vadd.f32 %v2107_v47, %v2106_v58  ;;  %v7489_v8 = vadd.f32 %v1270_v46, %v1234_v9  ;;  %v1376_v54 = vsel %vm7327_vm9, %v7415_v60, %v7423_v3  ;;  %v1858_v38 = vadd.f32 %v1826_v24, %v1790_v17 }
 0x1ec   :  { %v7497_v41 = vmul.f32 %v1983_v13, %v1896_v59  ;;  %v1003_v34 = vsel %vm7473_vm2, %v7483_v57, %v7479_v19  ;;  %v1443_v61 = vadd.f32 %v1411_v26, %v1299_v49  ;;  %v1479_v58 = vmul.f32 %v5727_v6, %v7289_v45  ;;  %v1989_v0 = vpop.permute.xlu1 %1988 }
 0x1ed   :  { %v1897_v9 = vadd.f32 %v6937_v40, %v1858_v38  ;;  %v1623_v17 = vsel %vm7285_vm14, %v7483_v57, %v7479_v19  ;;  %v69_v13 = vadd.s32 232, %v5702_v56  ;;  %v810_v3 = vrot.slane %v7448_v12, 7 }
 0x1ee   :  { %11231 = vst [vmem:[#allocation59_spill] sm:$0xff] %v7497_v41  ;;  %v1511_v63 = vadd.f32 %v1479_v58, %v1443_v61  ;;  %v1547_v46 = vmul.f32 %v5745_v20, %v7381_v42  ;;  %v876_v53 = vrot.slane %v7495_v1, 1  ;;  %v1412_v24 = vmul.f32 %v5739_v16, %v7415_v60 }
 0x1ef   :  { %v7517_v18 = vmul.f32 %v1985_v32, %v1897_v9  ;;  %v7520_v26 = vmul.f32 %v5735_v14, %v1003_v34  ;;  %v1345_v47 = vsel %vm7390_vm13, %v7483_v57, %v7479_v19  ;;  %v101_v59 = vand.u32 15, %v69_v13 }
 0x1f0   :  { %v1579_v49 = vadd.f32 %v1547_v46, %v1511_v63  ;;  %v1691_v38 = vmul.f32 %v5778_v35, %v1623_v17  ;;  %v7529_v61 = vsel %vm11233_vm1, %v809_v55, %v810_v3  ;;  %v1444_v60 = vadd.f32 %v1412_v24, %v7388_v62 }
 0x1f1   :  { %11232 = vst [vmem:[#allocation60_spill] sm:$0xff] %v7517_v18  ;;  %vm7534_vm0 = vcmp.eq.s32.totalorder %v101_v59, 15  ;;  %v11234_v34 = vmov 0  ;;  %vm11237_vm15 = vcmp.lt.s32.totalorder %v5702_v56, 7  ;;  %v1480_v58 = vmul.f32 %v5727_v6, %v7349_v50 }
 0x1f2   :  { %v11235_v34 = vsel %vm7534_vm0, 4294967295, %v11234_v34  ;;  %v7540_v19 = vsel %vm11237_vm15, %v875_v2, %v876_v53  ;;  %vm11238_vm14 = vcmask 31744   ;;  %v1723_v9 = vadd.f32 %v1691_v38, %v1579_v49 }
 0x1f3   :  { %11236 = vst [vmem:[#allocation61_spill] sm:$0xff] %v11235_v34  ;;  %v2109_v55 = vsel %vm11238_vm14, %v7497_v41, 0.0  ;;  %v1759_v62 = vmul.f32 %v5731_v11, %v7385_v22  ;;  %v1827_v17 = vmul.f32 %v6750_v25, %v7483_v57  ;;  %v1204_v63 = vmul.f32 %v5725_v5, %v7448_v12  ;;  %vm11239_vm1 = vmmov %vm11238_vm14 }
 0x1f4   :  { %v2110_v13 = vadd.f32 %v2109_v55, %v2108_v21  ;;  %v1512_v46 = vadd.f32 %v1480_v58, %v1444_v60  ;;  %v1548_v2 = vmul.f32 %v5745_v20, %v1376_v54  ;;  %v2111_v50 = vsel %vm11239_vm1, %v7517_v18, 0.0  ;;  %v7569_v55 = vld [vmem:[#allocation2 + $0xf8] sm:$0xff]  ;;  %vm11240_vm14 = vmmov %vm11237_vm15 }
 0x1f5   :  { %v1791_v24 = vadd.f32 %v1759_v62, %v1723_v9  ;;  %v1100_v59 = vsel %vm7534_vm0, %v7529_v61, %v7540_v19  ;;  %v1136_v49 = vmul.f32 %v5735_v14, %v7529_v61  ;;  %v1656_v21 = vsel %vm7327_vm9, %v7529_v61, %v7540_v19 }
 0x1f6   :  { %v1580_v25 = vadd.f32 %v1548_v2, %v1512_v46  ;;  %v1692_v54 = vmul.f32 %v5778_v35, %v7529_v61  ;;  %v70_v38 = vadd.s32 240, %v5702_v56  ;;  %v811_v58 = vrot.slane %v7495_v1, 7 }
 0x1f7   :  { %v1859_v60 = vadd.f32 %v1827_v17, %v1791_v24  ;;  %v7572_v9 = vrot.slane %v7569_v55, 1  ;;  %v1201_v62 = vmul.f32 %v5725_v5, %v7289_v45  ;;  %v1272_v46 = vmul.f32 %v5737_v15, %v1100_v59  ;;  %v1987_v59 = vpop.permute.xlu0 %1986 }
 0x1f8   :  { %v1724_v2 = vadd.f32 %v1692_v54, %v1580_v25  ;;  %v1760_v32 = vmul.f32 %v5731_v11, %v7448_v12  ;;  %v102_v10 = vand.u32 15, %v70_v38  ;;  %v1378_v17 = vsel %vm7427_vm11, %v7529_v61, %v7540_v19  ;;  %v7593_v38 = vld [vmem:[%s10683_s5 + $0x8] ss:$0 sm:$0xff] }
 0x1f9   :  { %v7586_v24 = vsel %vm11240_vm14, %v876_v53, %v7572_v9  ;;  %v1233_v41 = vadd.f32 %v1201_v62, %v1133_v31  ;;  %v1269_v45 = vmul.f32 %v5737_v15, %v7381_v42  ;;  %v1236_v25 = vadd.f32 %v1204_v63, %v1136_v49 }
 0x1fa   :  { %v1792_v54 = vadd.f32 %v1760_v32, %v1724_v2  ;;  %v1828_v18 = vmul.f32 %v7593_v38, %v1656_v21  ;;  %vm7596_vm15 = vcmp.eq.s32.totalorder %v102_v10, 0  ;;  %v11241_v19 = vmov 0  ;;  %v7604_v32 = vld [vmem:[#allocation2 + $0x100] sm:$0xff] }
 0x1fb   :  { %v11242_v19 = vsel %vm7596_vm15, 4294967295, %v11241_v19  ;;  %v1898_v53 = vadd.f32 %v6937_v40, %v1859_v60  ;;  %vm11244_vm1 = vcmp.lt.s32.totalorder %v5702_v56, 1  ;;  %v1301_v42 = vadd.f32 %v1269_v45, %v1233_v41 }
 0x1fc   :  { %11243 = vst [vmem:[#allocation62_spill] sm:$0xff] %v11242_v19  ;;  %v815_v31 = vsel %vm11244_vm1, %v810_v3, %v811_v58  ;;  %v1413_v63 = vmul.f32 %v5739_v16, %v1345_v47  ;;  %v2112_v49 = vadd.f32 %v2111_v50, %v2110_v13  ;;  %v7606_v62 = vadd.f32 %v1272_v46, %v1236_v25  ;;  %vm11246_vm14 = vmmov %vm11244_vm1 }
 0x1fd   :  { %v1860_v2 = vadd.f32 %v1828_v18, %v1792_v54  ;;  %v1005_v10 = vsel %vm7596_vm15, %v7586_v24, %v815_v31  ;;  %v7611_v21 = vmul.f32 %v1987_v59, %v1898_v53  ;;  %v1347_v3 = vsel %vm7473_vm2, %v7586_v24, %v815_v31 }
 0x1fe   :  { %v1445_v41 = vadd.f32 %v1413_v63, %v1301_v42  ;;  %v1481_v47 = vmul.f32 %v5727_v6, %v7385_v22  ;;  %v1625_v18 = vsel %vm7390_vm13, %v7586_v24, %v815_v31  ;;  %v1314_v50 = vrot.slane %v7604_v32, 1 }
 0x1ff   :  { %11245 = vst [vmem:[#allocation63_spill] sm:$0xff] %v7611_v21  ;;  %v1899_v13 = vadd.f32 %v6937_v40, %v1860_v2  ;;  %v1414_v60 = vmul.f32 %v5739_v16, %v7529_v61  ;;  %v7626_v46 = vmul.f32 %v5735_v14, %v1005_v10  ;;  %v1549_v59 = vmul.f32 %v5745_v20, %v7483_v57 }
 0x200   :  { %v1513_v45 = vadd.f32 %v1481_v47, %v1445_v41  ;;  %v7633_v25 = vsel %vm11246_vm14, %v811_v58, %v6229_v39  ;;  %v1482_v31 = vmul.f32 %v5727_v6, %v7448_v12  ;;  %v1550_v61 = vmul.f32 %v5745_v20, %v1378_v17 }
 0x201   :  { %v7635_v54 = vmul.f32 %v1989_v0, %v1899_v13  ;;  %v1446_v53 = vadd.f32 %v1414_v60, %v7489_v8  ;;  %v1693_v63 = vmul.f32 %v5778_v35, %v1625_v18  ;;  %v1761_v2 = vmul.f32 %v5731_v11, %v7495_v1  ;;  %v7659_v60 = vld [vmem:[#allocation2 + $0x108] sm:$0xff] }
 0x202   :  { %v1581_v42 = vadd.f32 %v1549_v59, %v1513_v45  ;;  %v1203_v10 = vmul.f32 %v5725_v5, %v7385_v22  ;;  %vm11248_vm1 = vcmask 31744   ;;  %vm11249_vm14 = vcmp.lt.s32.totalorder %v5702_v56, 7 }
 0x203   :  { %11247 = vst [vmem:[#allocation64_spill] sm:$0xff] %v7635_v54  ;;  %v2113_v0 = vsel %vm11248_vm1, %v7611_v21, 0.0  ;;  %v1317_v12 = vsel %vm11249_vm14, %v7572_v9, %v1314_v50  ;;  %v1514_v58 = vadd.f32 %v1482_v31, %v1446_v53  ;;  %v1694_v41 = vmul.f32 %v5778_v35, %v7633_v25 }
 0x204   :  { %v1725_v17 = vadd.f32 %v1693_v63, %v1581_v42  ;;  %v1235_v47 = vadd.f32 %v1203_v10, %v7520_v26  ;;  %v1271_v22 = vmul.f32 %v5737_v15, %v7483_v57  ;;  %v1309_v18 = vrot.slane %v7604_v32, 7 }
 0x205   :  { %v1582_v13 = vadd.f32 %v1550_v61, %v1514_v58  ;;  %v7662_v45 = vrot.slane %v7659_v60, 1  ;;  %v1415_v59 = vmul.f32 %v5739_v16, %v1347_v3  ;;  %v1829_v31 = vmul.f32 %v7593_v38, %v7586_v24 }
 0x206   :  { %v1793_v53 = vadd.f32 %v1761_v2, %v1725_v17  ;;  %v1658_v26 = vsel %vm7427_vm11, %v7633_v25, %v1317_v12  ;;  %v1303_v42 = vadd.f32 %v1271_v22, %v1235_v47  ;;  %v1762_v61 = vmul.f32 %v7569_v55, %v5731_v11 }
 0x207   :  { %v1726_v57 = vadd.f32 %v1694_v41, %v1582_v13  ;;  %vm11250_vm1 = vcmp.lt.s32.totalorder %v5702_v56, 1  ;;  %v7678_v3 = vsel %vm11249_vm14, %v1314_v50, %v7662_v45  ;;  %v2114_v2 = vadd.f32 %v2113_v0, %v2112_v49  ;;  %v7689_v13 = vld [vmem:[#allocation2 + $0x110] sm:$0xff] }
 0x208   :  { %v1312_v63 = vsel %vm11250_vm1, %v6229_v39, %v1309_v18  ;;  %v1447_v10 = vadd.f32 %v1415_v59, %v1303_v42  ;;  %v1483_v58 = vmul.f32 %v5727_v6, %v7495_v1  ;;  %v1861_v41 = vadd.f32 %v1829_v31, %v1793_v53  ;;  %v11252_v42 = vld [vmem:[#allocation32_spill] sm:$0xff] }
 0x209   :  { %v1627_v17 = vsel %vm7473_vm2, %v7678_v3, %v1312_v63  ;;  %v1380_v47 = vsel %vm7534_vm0, %v7633_v25, %v1317_v12  ;;  %v1794_v39 = vadd.f32 %v1762_v61, %v1726_v57  ;;  %v1830_v22 = vmul.f32 %v7593_v38, %v1658_v26  ;;  %v1991_v57 = vpop.permute.xlu0 %1990  ;;  %v1993_v61 = vpop.permute.xlu1 %1992 }
 0x20a   :  { %vm11251_vm1 = vcmask 31744   ;;  %v1515_v50 = vadd.f32 %v1483_v58, %v1447_v10  ;;  %v1551_v0 = vmul.f32 %v5745_v20, %v7586_v24  ;;  %v1416_v59 = vmul.f32 %v5739_v16, %v7633_v25 }
 0x20b   :  { %v2115_v49 = vsel %vm11251_vm1, %v7635_v54, 0.0  ;;  %v1862_v53 = vadd.f32 %v1830_v22, %v1794_v39  ;;  %v1695_v31 = vmul.f32 %v5778_v35, %v1627_v17  ;;  %v1763_v12 = vmul.f32 %v5731_v11, %v7604_v32 }
 0x20c   :  { %vm11253_vm14 = vcmp.lt.s32.totalorder %v5702_v56, 1  ;;  %v1583_v10 = vadd.f32 %v1551_v0, %v1515_v50  ;;  %v1448_v58 = vadd.f32 %v1416_v59, %v7606_v62  ;;  %v1484_v8 = vmul.f32 %v7569_v55, %v5727_v6 }
 0x20d   :  { %v7703_v26 = vsel %vm11253_vm14, %v1309_v18, %v11252_v42  ;;  %v1594_v39 = vrot.slane %v7689_v13, 1  ;;  %v1900_v17 = vadd.f32 %v6937_v40, %v1861_v41  ;;  %v1901_v22 = vadd.f32 %v6937_v40, %v1862_v53 }
 0x20e   :  { %v1349_v36 = vsel %vm7596_vm15, %v7678_v3, %v1312_v63  ;;  %v1205_v18 = vmul.f32 %v5725_v5, %v7495_v1  ;;  %v1727_v51 = vadd.f32 %v1695_v31, %v1583_v10  ;;  %v1516_v50 = vadd.f32 %v1484_v8, %v1448_v58 }
 0x20f   :  { %v1552_v62 = vmul.f32 %v5745_v20, %v1380_v47  ;;  %vm11254_vm1 = vcmp.lt.s32.totalorder %v5702_v56, 7  ;;  %v7720_v59 = vmul.f32 %v1991_v57, %v1900_v17  ;;  %v7722_v41 = vmul.f32 %v1993_v61, %v1901_v22 }
 0x210   :  { %v1597_v0 = vsel %vm11254_vm1, %v7662_v45, %v1594_v39  ;;  %v1237_v63 = vadd.f32 %v1205_v18, %v7626_v46  ;;  %v1795_v53 = vadd.f32 %v1763_v12, %v1727_v51  ;;  %v1696_v8 = vmul.f32 %v5778_v35, %v7703_v26  ;;  %vm11259_vm14 = vmmov %vm11254_vm1 }
 0x211   :  { %11255 = vst [vmem:[#allocation32_spill] sm:$0xff] %v7720_v59  ;;  %11256 = vst [vmem:[#allocation65_spill] sm:$0xff] %v7722_v41  ;;  %v1660_v40 = vsel %vm7534_vm0, %v7703_v26, %v1597_v0  ;;  %v1584_v1 = vadd.f32 %v1552_v62, %v1516_v50  ;;  %v1273_v47 = vmul.f32 %v5737_v15, %v7586_v24  ;;  %v1589_v22 = vrot.slane %v7689_v13, 7  ;;  %v5427_v24 = vld [vmem:[#allocation2 + $0x118] sm:$0xff]  ;;  %v11257_v62 = vld [vmem:[#allocation20_spill] sm:$0xff] }
 0x212   :  { %v2116_v31 = vadd.f32 %v2115_v49, %v2114_v2  ;;  %v1417_v61 = vmul.f32 %v5739_v16, %v1349_v36  ;;  %v1831_v10 = vmul.f32 %v7593_v38, %v7678_v3  ;;  %v1764_v51 = vmul.f32 %v7659_v60, %v5731_v11  ;;  %vm11261_vm2 = vmmov %vm11259_vm14 }
 0x213   :  { %v1728_v58 = vadd.f32 %v1696_v8, %v1584_v1  ;;  %v1832_v46 = vmul.f32 %v7593_v38, %v1660_v40  ;;  %v1305_v12 = vadd.f32 %v1273_v47, %v1237_v63  ;;  %v1595_v2 = vrot.slane %v5427_v24, 1 }
 0x214   :  { %v1863_v17 = vadd.f32 %v1831_v10, %v1795_v53  ;;  %v71_v49 = vadd.s32 248, %v5702_v56  ;;  %v1485_v36 = vmul.f32 %v5727_v6, %v7604_v32  ;;  %v11258_v0 = vrot.slane %v11257_v62, 1 }
 0x215   :  { %v1796_v18 = vadd.f32 %v1764_v51, %v1728_v58  ;;  %v1449_v50 = vadd.f32 %v1417_v61, %v1305_v12  ;;  %vm11260_vm1 = vcmp.lt.s32.totalorder %v5702_v56, 1  ;;  %v1596_v63 = vsel %vm11261_vm2, %v1594_v39, %v1595_v2  ;;  %v1995_v58 = vpop.permute.xlu0 %1994  ;;  %v1997_v51 = vpop.permute.xlu1 %1996 }
 0x216   :  { %v910_v1 = vsel %vm11259_vm14, %v7572_v9, %v11258_v0  ;;  %v1592_v40 = vsel %vm11260_vm1, %v11252_v42, %v1589_v22  ;;  %v103_v53 = vand.u32 15, %v71_v49  ;;  %v1138_v8 = vmul.f32 %v5735_v14, %v7633_v25  ;;  %v5428_v42 = vld [vmem:[%s10685_s6] ss:$0 sm:$0xff] }
 0x217   :  { %v1864_v47 = vadd.f32 %v1832_v46, %v1796_v18  ;;  %v1517_v61 = vadd.f32 %v1485_v36, %v1449_v50  ;;  %v1553_v32 = vmul.f32 %v5745_v20, %v7678_v3  ;;  %v1629_v10 = vsel %vm7596_vm15, %v1596_v63, %v1592_v40 }
 0x218   :  { %vm11262_vm14 = vcmask 31744   ;;  %v1902_v39 = vadd.f32 %v5428_v42, %v1863_v17  ;;  %vm7765_vm2 = vcmp.eq.s32.totalorder %v103_v53, 15  ;;  %v11263_v12 = vmov 0 }
 0x219   :  { %v2117_v9 = vsel %vm11262_vm14, %v7720_v59, 0.0  ;;  %v11264_v12 = vsel %vm7765_vm2, 4294967295, %v11263_v12  ;;  %v1206_v3 = vmul.f32 %v7569_v55, %v5725_v5  ;;  %v1903_v46 = vadd.f32 %v5428_v42, %v1864_v47  ;;  %vm11268_vm1 = vmmov %vm11262_vm14 }
 0x21a   :  { %11265 = vst [vmem:[#allocation20_spill] sm:$0xff] %v11264_v12  ;;  %v1585_v49 = vadd.f32 %v1553_v32, %v1517_v61  ;;  %v1697_v18 = vmul.f32 %v5778_v35, %v1629_v10  ;;  %v1102_v50 = vsel %vm7765_vm2, %v7633_v25, %v910_v1  ;;  %v2118_v36 = vadd.f32 %v2117_v9, %v2116_v31  ;;  %v11269_v9 = vld [vmem:[#allocation14_spill] sm:$0xff] }
 0x21b   :  { %v1238_v62 = vadd.f32 %v1206_v3, %v1138_v8  ;;  %v1274_v17 = vmul.f32 %v5737_v15, %v1102_v50  ;;  %v7776_v0 = vmul.f32 %v1995_v58, %v1902_v39  ;;  %v7778_v40 = vmul.f32 %v1997_v51, %v1903_v46  ;;  %v11271_v58 = vld [vmem:[#allocation33_spill] sm:$0xff] }
 0x21c   :  { %v1729_v53 = vadd.f32 %v1697_v18, %v1585_v49  ;;  %v1765_v55 = vmul.f32 %v5731_v11, %v7689_v13  ;;  %v1418_v47 = vmul.f32 %v5739_v16, %v7703_v26  ;;  %v2119_v32 = vsel %vm11268_vm1, %v7722_v41, 0.0  ;;  %v11275_v18 = vld [vmem:[#allocation12_spill] sm:$0xff] }
 0x21d   :  { %11266 = vst [vmem:[#allocation66_spill] sm:$0xff] %v7776_v0  ;;  %11267 = vst [vmem:[#allocation67_spill] sm:$0xff] %v7778_v40  ;;  %v1306_v61 = vadd.f32 %v1274_v17, %v1238_v62  ;;  %v1833_v1 = vmul.f32 %v7593_v38, %v1596_v63  ;;  %v1486_v10 = vmul.f32 %v7659_v60, %v5727_v6  ;;  %vm11270_vm14 = vcmp.lt.s32.totalorder %v5702_v56, 7 }
 0x21e   :  { %v1797_v31 = vadd.f32 %v1765_v55, %v1729_v53  ;;  %v1318_v13 = vsel %vm11270_vm14, %v7662_v45, %v11269_v9  ;;  %v2120_v39 = vadd.f32 %v2119_v32, %v2118_v36  ;;  %v11272_v51 = vrot.slane %v11271_v58, 7  ;;  %vm11276_vm13 = vmmov %vm11270_vm14  ;;  %v2001_v9 = vpop.permute.xlu1 %2000 }
 0x21f   :  { %v1450_v8 = vadd.f32 %v1418_v47, %v1306_v61  ;;  %vm11273_vm1 = vcmp.lt.s32.totalorder %v5702_v56, 1  ;;  %v1382_v46 = vsel %vm7765_vm2, %v7703_v26, %v1318_v13  ;;  %vm10834_vm15 = vmmov 0   ;;  %v1999_v26 = vpop.permute.xlu0 %1998 }
 0x220   :  { %v1591_v3 = vsel %vm11273_vm1, %v1589_v22, %v11272_v51  ;;  %v11274_v63 = vmov 0.0   ;;  %v1865_v60 = vadd.f32 %v1833_v1, %v1797_v31  ;;  %v1598_v45 = vsel %vm11276_vm13, %v1595_v2, %v11275_v18 }
 0x221   :  { %5046 = vmatprep.mubr.msk.bf16.mxu0 %vm10834_vm15, %v11274_v63  ;;  %v1518_v49 = vadd.f32 %v1486_v10, %v1450_v8  ;;  %v1554_v50 = vmul.f32 %v5745_v20, %v1382_v46  ;;  %vm11277_vm14 = vcmask 31744   ;;  %v1698_v22 = vmul.f32 %v5778_v35, %v1591_v3 }
 0x222   :  { %v2121_v36 = vsel %vm11277_vm14, %v7776_v0, 0.0  ;;  %v1662_v53 = vsel %vm7765_vm2, %v1591_v3, %v1598_v45  ;;  %v1904_v55 = vadd.f32 %v5428_v42, %v1865_v60  ;;  %v1766_v47 = vmul.f32 %v5427_v24, %v5731_v11  ;;  %vm11278_vm1 = vmmov %vm11277_vm14  ;;  %v7836_v45 = vld [vmem:[%s10681_s1] ss:$0 sm:$0xff] }
 0x223   :  { %v1586_v62 = vadd.f32 %v1554_v50, %v1518_v49  ;;  %v2122_v17 = vadd.f32 %v2121_v36, %v2120_v39  ;;  %v2123_v2 = vsel %vm11278_vm1, %v7778_v40, 0.0  ;;  %v1834_v31 = vmul.f32 %v7593_v38, %v1662_v53  ;;  %vm11280_vm13 = vmmov %vm11278_vm1  ;;  %v4774_v49 = vld [vmem:[%s10680_s0 + $0x100] sm:$0xff] }
 0x224   :  { %v7816_v32 = vmul.f32 %v1999_v26, %v1904_v55  ;;  %vm11282_vm14 = vmmov %vm11278_vm1  ;;  %v2562_v50 = vsub.f32 %v4774_v49, %v7836_v45  ;;  %v4776_v55 = vld [vmem:[%s10680_s0 + $0x110] sm:$0xff] }
 0x225   :  { %v1730_v61 = vadd.f32 %v1698_v22, %v1586_v62  ;;  %v2124_v8 = vadd.f32 %v2123_v2, %v2122_v17  ;;  %v7843_v17 = vld [vmem:[%s10682_s2] ss:$0 sm:$0xff] }
 0x226   :  { %11279 = vst [vmem:[#allocation14_spill] sm:$0xff] %v7816_v32  ;;  %v2125_v13 = vsel %vm11280_vm13, %v7816_v32, 0.0  ;;  %v2594_v26 = vmul.f32 %v7843_v17, %v2562_v50  ;;  %v4778_v2 = vld [vmem:[%s10680_s0 + $0x120] sm:$0xff]  ;;  %vm11284_vm13 = vmmov %vm11278_vm1 }
 0x227   :  { %v1798_v1 = vadd.f32 %v1766_v47, %v1730_v61  ;;  %v2126_v58 = vadd.f32 %v2125_v13, %v2124_v8  ;;  %v4777_v47 = vld [vmem:[%s10680_s0 + $0x118] sm:$0xff]  ;;  %v2564_v8 = vsub.f32 %v4776_v55, %v7836_v45  ;;  %v2566_v13 = vsub.f32 %v4778_v2, %v7836_v45  ;;  %v4782_v50 = vld [vmem:[%s10680_s0 + $0x140] sm:$0xff] }
 0x228   :  { %v2570_v55 = vsub.f32 %v4782_v50, %v7836_v45 }
 0x229   :  { %v1866_v10 = vadd.f32 %v1834_v31, %v1798_v1  ;;  %v4779_v31 = vld [vmem:[%s10680_s0 + $0x128] sm:$0xff] }
 0x22b   :  { %v1905_v39 = vadd.f32 %v5428_v42, %v1866_v10  ;;  %v4775_v42 = vld [vmem:[%s10680_s0 + $0x108] sm:$0xff]  ;;  %v2565_v10 = vsub.f32 %v4777_v47, %v7836_v45 }
 0x22c   :  { %v2563_v36 = vsub.f32 %v4775_v42, %v7836_v45  ;;  %v4780_v42 = vld [vmem:[%s10680_s0 + $0x130] sm:$0xff] }
 0x22d   :  { %v7821_v51 = vmul.f32 %v2001_v9, %v1905_v39  ;;  %v2567_v39 = vsub.f32 %v4779_v31, %v7836_v45  ;;  %v2602_v31 = vmul.f32 %v7843_v17, %v2570_v55 }
 0x22e   :  { %v2595_v53 = vmul.f32 %v7843_v17, %v2563_v36  ;;  %v4783_v36 = vld [vmem:[%s10680_s0 + $0x148] sm:$0xff] }
 0x22f   :  { %11281 = vst [vmem:[#allocation33_spill] sm:$0xff] %v7821_v51  ;;  %v2127_v24 = vsel %vm11282_vm14, %v7821_v51, 0.0  ;;  %v2599_v49 = vmul.f32 %v7843_v17, %v2567_v39  ;;  %v2571_v47 = vsub.f32 %v4783_v36, %v7836_v45  ;;  %vm11285_vm14 = vmmov %vm11278_vm1  ;;  %v4788_v36 = vld [vmem:[%s10680_s0 + $0x170] sm:$0xff] }
 0x230   :  { %v2128_v46 = vadd.f32 %v2127_v24, %v2126_v58  ;;  %v2626_v9 = vpack.c.bf16 %v2595_v53, %v2594_v26  ;;  %v2596_v24 = vmul.f32 %v7843_v17, %v2564_v8  ;;  %v4784_v8 = vld [vmem:[%s10680_s0 + $0x150] sm:$0xff]  ;;  %v2576_v55 = vsub.f32 %v4788_v36, %v7836_v45 }
 0x232   :  { %v2129_v60 = vrot.slane %v2128_v46, 4 }
 0x234   :  { %v2130_v38 = vadd.f32 %v2129_v60, %v2128_v46  ;;  %v2597_v46 = vmul.f32 %v7843_v17, %v2565_v10  ;;  %v11283_v60 = vld [vmem:[#allocation3_spill] sm:$0xff]  ;;  %v4785_v10 = vld [vmem:[%s10680_s0 + $0x158] sm:$0xff] }
 0x236   :  { %v2131_v18 = vrot.slane %v2130_v38, 2 }
 0x238   :  { %v2132_v22 = vadd.f32 %v2131_v18, %v2130_v38  ;;  %v2598_v38 = vmul.f32 %v7843_v17, %v2566_v13  ;;  %v4781_v18 = vld [vmem:[%s10680_s0 + $0x138] sm:$0xff]  ;;  %v4787_v13 = vld [vmem:[%s10680_s0 + $0x168] sm:$0xff] }
 0x239   :  { %v2569_v26 = vsub.f32 %v4781_v18, %v7836_v45 }
 0x23a   :  { %v2133_v62 = vrot.slane %v2132_v22, 1  ;;  %v2628_v53 = vpack.c.bf16 %v2599_v49, %v2598_v38  ;;  %v2575_v38 = vsub.f32 %v4787_v13, %v7836_v45  ;;  %v4792_v13 = vld [vmem:[%s10680_s0 + $0x190] sm:$0xff] }
 0x23b   :  { %v2601_v2 = vmul.f32 %v7843_v17, %v2569_v26  ;;  %v4791_v26 = vld [vmem:[%s10680_s0 + $0x188] sm:$0xff] }
 0x23c   :  { %v2134_v61 = vadd.f32 %v2133_v62, %v2132_v22  ;;  %v2627_v22 = vpack.c.bf16 %v2597_v46, %v2596_v24  ;;  %v2568_v62 = vsub.f32 %v4780_v42, %v7836_v45  ;;  %v2573_v24 = vsub.f32 %v4785_v10, %v7836_v45 }
 0x23d   :  { %v2607_v50 = vmul.f32 %v7843_v17, %v2575_v38 }
 0x23e   :  { %v2136_v1 = vmul.f32 0.00390625, %v2134_v61  ;;  %v2600_v61 = vmul.f32 %v7843_v17, %v2568_v62  ;;  %v2605_v42 = vmul.f32 %v7843_v17, %v2573_v24  ;;  %v4790_v62 = vld [vmem:[%s10680_s0 + $0x180] sm:$0xff]  ;;  %v4795_v24 = vld [vmem:[%s10680_s0 + $0x1a8] sm:$0xff] }
 0x240   :  { %v2137_v58 = vpack.c.bf16 %v2136_v1, %v2136_v1  ;;  %v2603_v1 = vmul.f32 %v7843_v17, %v2571_v47  ;;  %v2629_v39 = vpack.c.bf16 %v2601_v2, %v2600_v61  ;;  %v2578_v2 = vsub.f32 %v4790_v62, %v7836_v45 }
 0x242   :  { %5047 = vmatmul.mubr.msk.bf16.vlgmr.msra.gmra.mrb[32].mxu0 %vm11278_vm1, %v2137_v58  ;;  %v2572_v58 = vsub.f32 %v4784_v8, %v7836_v45  ;;  %v2630_v46 = vpack.c.bf16 %v2603_v1, %v2602_v31  ;;  %v2579_v31 = vsub.f32 %v4791_v26, %v7836_v45  ;;  %v2608_v1 = vmul.f32 %v7843_v17, %v2576_v55  ;;  %v4796_v26 = vld [vmem:[%s10680_s0 + $0x1b0] sm:$0xff]  ;;  %v4798_v55 = vld [vmem:[%s10680_s0 + $0x1c0] sm:$0xff] }
 0x243   :  { %5085 = vmatpush3.bf16.msra.mxu0 %v11283_v60  ;;  %5086 = vmatprep.mubr.msk.bf16.mxu0 %vm11284_vm13, %v2626_v9  ;;  %v4786_v9 = vld [vmem:[%s10680_s0 + $0x160] sm:$0xff]  ;;  %vm11286_vm13 = vmmov %vm11278_vm1  ;;  %v2610_v10 = vmul.f32 %v7843_v17, %v2578_v2  ;;  %v2584_v2 = vsub.f32 %v4796_v26, %v7836_v45 }
 0x244   :  { %v2574_v60 = vsub.f32 %v4786_v9, %v7836_v45  ;;  %v2604_v49 = vmul.f32 %v7843_v17, %v2572_v58  ;;  %v2611_v9 = vmul.f32 %v7843_v17, %v2579_v31  ;;  %v4794_v58 = vld [vmem:[%s10680_s0 + $0x1a0] sm:$0xff] }
 0x246   :  { %v2606_v18 = vmul.f32 %v7843_v17, %v2574_v60  ;;  %v2580_v60 = vsub.f32 %v4792_v13, %v7836_v45 }
 0x248   :  { %v2632_v61 = vpack.c.bf16 %v2607_v50, %v2606_v18  ;;  %v2583_v18 = vsub.f32 %v4795_v24, %v7836_v45  ;;  %v2612_v50 = vmul.f32 %v7843_v17, %v2580_v60  ;;  %v4800_v24 = vld [vmem:[%s10680_s0 + $0x1d0] sm:$0xff]  ;;  %v4802_v60 = vld [vmem:[%s10680_s0 + $0x1e0] sm:$0xff] }
 0x24a   :  { %5087 = vmatmul.mubr.msk.bf16.vlgmr.msra.gmra.mrb[36].mxu0 %vm11285_vm14, %v2627_v22  ;;  %vm11287_vm14 = vmmov %vm11278_vm1  ;;  %v4789_v22 = vld [vmem:[%s10680_s0 + $0x178] sm:$0xff]  ;;  %v2615_v62 = vmul.f32 %v7843_v17, %v2583_v18 }
 0x24b   :  { %5090 = vmatprep.mubr.msk.bf16.mxu0 %vm11278_vm1, %v2628_v53  ;;  %v2631_v53 = vpack.c.bf16 %v2605_v42, %v2604_v49  ;;  %v2577_v47 = vsub.f32 %v4789_v22, %v7836_v45  ;;  %v2634_v49 = vpack.c.bf16 %v2611_v9, %v2610_v10  ;;  %v2582_v42 = vsub.f32 %v4794_v58, %v7836_v45 }
 0x24c   :  { %v2616_v9 = vmul.f32 %v7843_v17, %v2584_v2 }
 0x24d   :  { %v2609_v8 = vmul.f32 %v7843_v17, %v2577_v47  ;;  %v2614_v22 = vmul.f32 %v7843_v17, %v2582_v42  ;;  %v4799_v47 = vld [vmem:[%s10680_s0 + $0x1c8] sm:$0xff]  ;;  %v2588_v42 = vsub.f32 %v4800_v24, %v7836_v45 }
 0x24e   :  { %v2587_v10 = vsub.f32 %v4799_v47, %v7836_v45  ;;  %v4804_v47 = vld [vmem:[%s10680_s0 + $0x1f0] sm:$0xff] }
 0x250   :  { %v2619_v58 = vmul.f32 %v7843_v17, %v2587_v10 }
 0x252   :  { %5091 = vmatmul.mubr.msk.bf16.gmra.mrb[40].mxu0 %vm11286_vm13, %v2629_v39  ;;  %vm11288_vm13 = vmmov %vm11278_vm1  ;;  %v4793_v39 = vld [vmem:[%s10680_s0 + $0x198] sm:$0xff] }
 0x253   :  { %5094 = vmatprep.mubr.msk.bf16.mxu0 %vm11287_vm14, %v2630_v46  ;;  %v2633_v46 = vpack.c.bf16 %v2609_v8, %v2608_v1  ;;  %v2581_v38 = vsub.f32 %v4793_v39, %v7836_v45  ;;  %vm11289_vm14 = vmmov %vm11278_vm1  ;;  %v2636_v1 = vpack.c.bf16 %v2615_v62, %v2614_v22  ;;  %v2586_v8 = vsub.f32 %v4798_v55, %v7836_v45 }
 0x254   :  { %v2620_v62 = vmul.f32 %v7843_v17, %v2588_v42 }
 0x255   :  { %v2613_v36 = vmul.f32 %v7843_v17, %v2581_v38  ;;  %v2618_v39 = vmul.f32 %v7843_v17, %v2586_v8  ;;  %v4803_v38 = vld [vmem:[%s10680_s0 + $0x1e8] sm:$0xff] }
 0x256   :  { %v2591_v22 = vsub.f32 %v4803_v38, %v7836_v45 }
 0x258   :  { %v2623_v55 = vmul.f32 %v7843_v17, %v2591_v22 }
 0x25a   :  { %5095 = vmatmul.mubr.msk.bf16.gmra.mrb[44].mxu0 %vm11278_vm1, %v2631_v53  ;;  %v4797_v53 = vld [vmem:[%s10680_s0 + $0x1b8] sm:$0xff] }
 0x25b   :  { %5098 = vmatprep.mubr.msk.bf16.mxu0 %vm11288_vm13, %v2632_v61  ;;  %v2635_v61 = vpack.c.bf16 %v2613_v36, %v2612_v50  ;;  %v2585_v31 = vsub.f32 %v4797_v53, %v7836_v45  ;;  %vm11290_vm13 = vmmov %vm11278_vm1  ;;  %v2638_v50 = vpack.c.bf16 %v2619_v58, %v2618_v39  ;;  %v2590_v36 = vsub.f32 %v4802_v60, %v7836_v45  ;;  %v2139_v39 = vld [vmem:[%s10687_s8] sm:$0x1] }
 0x25c   :  { %v11295_v58 = vlaneseq }
 0x25d   :  { %v2617_v13 = vmul.f32 %v7843_v17, %v2585_v31  ;;  %v2622_v53 = vmul.f32 %v7843_v17, %v2590_v36  ;;  %v2592_v31 = vsub.f32 %v4804_v47, %v7836_v45  ;;  %v8031_v36 = vld [vmem:[%s10684_s4] ss:$0 sm:$0xff] }
 0x25e   :  { %v8019_v24 = vand.u32 127, %v11295_v58 }
 0x25f   :  { %v2640_v8 = vpack.c.bf16 %v2623_v55, %v2622_v53  ;;  %v2624_v10 = vmul.f32 %v7843_v17, %v2592_v31 }
 0x260   :  { %11296 = vst [vmem:[#allocation12_spill] sm:$0xff] %v8019_v24 }
 0x262   :  { %5099 = vmatmul.mubr.msk.bf16.gmra.mrb[48].mxu0 %vm11289_vm14, %v2633_v46  ;;  %vm11291_vm14 = vmmov %vm11278_vm1  ;;  %v4801_v46 = vld [vmem:[%s10680_s0 + $0x1d8] sm:$0xff] }
 0x263   :  { %5102 = vmatprep.mubr.msk.bf16.mxu0 %vm11278_vm1, %v2634_v49  ;;  %v2637_v49 = vpack.c.bf16 %v2617_v13, %v2616_v9  ;;  %v2589_v18 = vsub.f32 %v4801_v46, %v7836_v45 }
 0x265   :  { %v2621_v26 = vmul.f32 %v7843_v17, %v2589_v18 }
 0x267   :  { %v2639_v2 = vpack.c.bf16 %v2621_v26, %v2620_v62 }
 0x26a   :  { %5103 = vmatmul.mubr.msk.bf16.gmra.mrb[52].mxu0 %vm11290_vm13, %v2635_v61  ;;  %vm11292_vm13 = vmmov %vm11278_vm1  ;;  %v4805_v61 = vld [vmem:[%s10680_s0 + $0x1f8] sm:$0xff] }
 0x26b   :  { %5106 = vmatprep.mubr.msk.bf16.mxu0 %vm11291_vm14, %v2636_v1  ;;  %v2593_v1 = vsub.f32 %v4805_v61, %v7836_v45  ;;  %vm11293_vm14 = vmmov %vm11278_vm1 }
 0x26d   :  { %v2625_v9 = vmul.f32 %v7843_v17, %v2593_v1  ;;  %v11297_v17 = vld [vmem:[#allocation4_spill] sm:$0xff] }
 0x26f   :  { %v2641_v13 = vpack.c.bf16 %v2625_v9, %v2624_v10 }
 0x272   :  { %5107 = vmatmul.mubr.msk.bf16.gmra.mrb[56].mxu0 %vm11278_vm1, %v2637_v49 }
 0x273   :  { %5110 = vmatprep.mubr.msk.bf16.mxu0 %vm11292_vm13, %v2638_v50  ;;  %vm11294_vm13 = vmmov %vm11278_vm1 }
 0x274   :  { %vm11298_vm15 = vmmov %vm11294_vm13 }
 0x27a   :  { %5111 = vmatmul.mubr.msk.bf16.gmra.mrb[60].mxu0 %vm11293_vm14, %v2639_v2  ;;  %vm10836_vm14 = vcmp.eq.s32.totalorder %v5702_v56, %v8019_v24 }
 0x27b   :  { %5114 = vmatprep.mubr.msk.bf16.mxu0 %vm11278_vm1, %v2640_v8  ;;  %vm10835_vm1 = vcmask 27648  }
 0x282   :  { %5115 = vmatmul.mubr.msk.bf16.gmra.mrb[64].mxu0 %vm11294_vm13, %v2641_v13 }
 0x315   :  { %v2180_v45 = vpop.f32.mrb[32].mxu0 }
 0x316   :  { %v2181_v46 = vadd.f32 %v2180_v45, %v2139_v39  ;;  %v5048_v60 = vpop.f32.mrb[33].mxu0 }
 0x317   :  { %v2183_v38 = vpop.f32.mrb[34].mxu0 }
 0x318   :  { %v2189_v49 = vrot.slane %v2181_v46, %v11297_v17  ;;  %v5049_v42 = vpop.f32.mrb[35].mxu0 }
 0x31a   :  { %v2190_v18 = vsel %vm10836_vm14, %v2189_v49, 0.0 }
 0x31b   :  { %v2192_v50 = vsel %vm10835_vm1, %v2190_v18, 0.0  ;;  %vm11299_vm1 = vmmov %vm11294_vm13 }
 0x31c   :  { %2193 = vadd.xlane.f32.xlu0 %v2192_v50  ;;  %vm11300_vm14 = vmmov %vm11299_vm1 }
 0x31d   :  { %v5088_v22 = vpop.f32.mrb[36].mxu0  ;;  %vm11301_vm2 = vmmov %vm11299_vm1 }
 0x31e   :  { %v2740_v62 = vadd.f32 %v5088_v22, %v8031_v36  ;;  %v2731_v26 = vpop.f32.mrb[37].mxu0  ;;  %vm11302_vm0 = vmmov %vm11299_vm1 }
 0x31f   :  { %v2732_v53 = vadd.f32 %v8031_v36, %v2731_v26  ;;  %v5089_v55 = vpop.f32.mrb[38].mxu0 }
 0x320   :  { %v4825_v47 = vmul.f32 -1.442695, %v2740_v62  ;;  %3052 = vst.msk [vmem:[#allocation2 + $0x20] sm:$0xff] %vm11294_vm13, %v2740_v62  ;;  %v2743_v61 = vadd.f32 %v5089_v55, %v8031_v36  ;;  %v2734_v2 = vpop.f32.mrb[39].mxu0  ;;  %vm11309_vm13 = vcmp.lt.s32.totalorder %v5702_v56, 7 }
 0x321   :  { %3082 = vst.msk [vmem:[#allocation2] sm:$0xff] %vm11298_vm15, %v2740_v62  ;;  %v4823_v31 = vmul.f32 -1.442695, %v2732_v53  ;;  %v2735_v1 = vadd.f32 %v8031_v36, %v2734_v2  ;;  %vm11303_vm15 = vmmov %vm11302_vm0 }
 0x322   :  { %3050 = vst.msk [vmem:[#allocation2 + $0x10] sm:$0xff] %vm11299_vm1, %v2732_v53  ;;  %5293 = vpow2.f32 %v4825_v47  ;;  %v4826_v8 = vmul.f32 -1.442695, %v2743_v61  ;;  %vm11306_vm1 = vcmp.lt.s32.totalorder %v5702_v56, 1 }
 0x323   :  { %3053 = vst.msk [vmem:[#allocation2 + $0x28] sm:$0xff] %vm11300_vm14, %v2743_v61  ;;  %5295 = vpow2.f32 %v4823_v31  ;;  %v4824_v10 = vmul.f32 -1.442695, %v2735_v1  ;;  %vm11305_vm14 = vmmov %vm11302_vm0 }
 0x324   :  { %3083 = vst.msk [vmem:[#allocation2 + $0x8] sm:$0xff] %vm11301_vm2, %v2743_v61  ;;  %5297 = vpow2.f32 %v4826_v8  ;;  %vm11304_vm2 = vmmov %vm11302_vm0 }
 0x325   :  { %3051 = vst.msk [vmem:[#allocation2 + $0x18] sm:$0xff] %vm11302_vm0, %v2735_v1  ;;  %v5092_v9 = vpop.f32.mrb[40].mxu0  ;;  %5299 = vpow2.f32 %v4824_v10 }
 0x326   :  { %v2756_v13 = vadd.f32 %v5092_v9, %v8031_v36  ;;  %v2747_v39 = vpop.f32.mrb[41].mxu0 }
 0x327   :  { %v2748_v58 = vadd.f32 %v8031_v36, %v2747_v39  ;;  %v5093_v45 = vpop.f32.mrb[42].mxu0 }
 0x328   :  { %v4829_v46 = vmul.f32 -1.442695, %v2756_v13  ;;  %3056 = vst.msk [vmem:[#allocation2 + $0x40] sm:$0xff] %vm11303_vm15, %v2756_v13  ;;  %v2759_v60 = vadd.f32 %v5093_v45, %v8031_v36  ;;  %v2750_v38 = vpop.f32.mrb[43].mxu0  ;;  %v8072_v13 = vld [vmem:[#allocation2 + $0x20] sm:$0xff]  ;;  %vm11311_vm15 = vmmov %vm11302_vm0 }
 0x329   :  { %v8047_v49 = vld [vmem:[#allocation2 + $0x10] sm:$0xff]  ;;  %v4827_v42 = vmul.f32 -1.442695, %v2748_v58  ;;  %3054 = vst.msk [vmem:[#allocation2 + $0x30] sm:$0xff] %vm11304_vm2, %v2748_v58  ;;  %v2751_v18 = vadd.f32 %v8031_v36, %v2750_v38  ;;  %11308 = vst [vmem:[#allocation68_spill] sm:$0xff] %v8072_v13 }
 0x32a   :  { %v8054_v22 = vrot.slane %v8047_v49, 7  ;;  %5301 = vpow2.f32 %v4829_v46  ;;  %3057 = vst.msk [vmem:[#allocation2 + $0x48] sm:$0xff] %vm11302_vm0, %v2759_v60  ;;  %v4830_v55 = vmul.f32 -1.442695, %v2759_v60  ;;  %v8061_v47 = vld [vmem:[#allocation2 + $0x28] sm:$0xff]  ;;  %v8069_v2 = vrot.slane %v8047_v49, 1  ;;  %vm11312_vm2 = vmmov %vm11302_vm0 }
 0x32b   :  { %v8051_v50 = vld [vmem:[#allocation2 + $0x8] sm:$0xff]  ;;  %3055 = vst.msk [vmem:[#allocation2 + $0x38] sm:$0xff] %vm11305_vm14, %v2751_v18  ;;  %5303 = vpow2.f32 %v4827_v42  ;;  %v4828_v10 = vmul.f32 -1.442695, %v2751_v18  ;;  %vm11314_vm14 = vmmov %vm11306_vm1 }
 0x32c   :  { %v8057_v62 = vld [vmem:[#allocation2 + $0x18] sm:$0xff]  ;;  %v10841_v26 = vrot.slane %v8051_v50, 7  ;;  %v5294_v53 = vpop.eup %5293  ;;  %11307 = vst [vmem:[#allocation3_spill] sm:$0xff] %v8069_v2 }
 0x32d   :  { %v10842_v31 = vrot.slane %v8057_v62, 1  ;;  %v5296_v1 = vpop.eup %5295  ;;  %v2956_v8 = vadd.f32 1.0, %v5294_v53  ;;  %v5096_v9 = vpop.f32.mrb[44].mxu0  ;;  %v10843_v46 = vrot.slane %v8057_v62, 7  ;;  %v8096_v53 = vrot.slane %v8072_v13, 1 }
 0x32e   :  { %v3179_v61 = vsel %vm11306_vm1, %v10841_v26, %v8054_v22  ;;  %v2954_v39 = vadd.f32 1.0, %v5296_v1  ;;  %v2772_v58 = vadd.f32 %v5096_v9, %v8031_v36  ;;  %v2763_v45 = vpop.f32.mrb[45].mxu0  ;;  %v5298_v38 = vpop.eup %5297  ;;  %vm11316_vm1 = vmmov %vm11302_vm0 }
 0x32f   :  { %v8081_v60 = vsel %vm11309_vm13, %v8069_v2, %v10842_v31  ;;  %5305 = vrcp.f32 %v2956_v8  ;;  %v2764_v42 = vadd.f32 %v8031_v36, %v2763_v45  ;;  %v5097_v18 = vpop.f32.mrb[46].mxu0  ;;  %v5300_v3 = vpop.eup %5299  ;;  %v8091_v31 = vrot.slane %v8072_v13, 7  ;;  %11313 = vst [vmem:[#allocation7_spill] sm:$0xff] %v8096_v53  ;;  %v8266_v30 = vld [vmem:[#allocation2 + $0x40] sm:$0xff] }
 0x330   :  { %v3248_v9 = vsel %vm5784_vm4, %v8081_v60, %v3179_v61  ;;  %5307 = vpow2.f32 %v4830_v55  ;;  %v4833_v25 = vmul.f32 -1.442695, %v2772_v58  ;;  %3060 = vst.msk [vmem:[#allocation2 + $0x60] sm:$0xff] %vm11311_vm15, %v2772_v58  ;;  %v2775_v57 = vadd.f32 %v5097_v18, %v8031_v36  ;;  %v2766_v26 = vpop.f32.mrb[47].mxu0  ;;  %v8117_v24 = vld [vmem:[#allocation2 + $0x30] sm:$0xff]  ;;  %vm11319_vm15 = vmmov %vm11302_vm0 }
 0x331   :  { %5309 = vpow2.f32 %v4828_v10  ;;  %v4831_v8 = vmul.f32 -1.442695, %v2764_v42  ;;  %3058 = vst.msk [vmem:[#allocation2 + $0x50] sm:$0xff] %vm11312_vm2, %v2764_v42  ;;  %v2767_v45 = vadd.f32 %v8031_v36, %v2766_v26  ;;  %v2957_v55 = vadd.f32 1.0, %v5298_v38  ;;  %vm11320_vm2 = vmmov %vm11302_vm0 }
 0x332   :  { %5311 = vrcp.f32 %v2954_v39  ;;  %3061 = vst.msk [vmem:[#allocation2 + $0x68] sm:$0xff] %vm11302_vm0, %v2775_v57  ;;  %v8104_v61 = vsel %vm11314_vm14, %v10843_v46, %v8091_v31  ;;  %v3312_v10 = vmul.f32 %v3248_v9, %v5735_v14  ;;  %v2955_v58 = vadd.f32 1.0, %v5300_v3  ;;  %v8120_v19 = vld [vmem:[#allocation2 + $0x38] sm:$0xff]  ;;  %vm11321_vm14 = vmmov %vm11302_vm0 }
 0x333   :  { %11315 = vst [vmem:[#allocation69_spill] sm:$0xff] %v8104_v61  ;;  %5313 = vpow2.f32 %v4833_v25  ;;  %3059 = vst.msk [vmem:[#allocation2 + $0x58] sm:$0xff] %vm11316_vm1, %v2767_v45  ;;  %v11317_v26 = vrot.slane %v8061_v47, 1  ;;  %v3376_v38 = vmul.f32 %v8047_v49, %v5725_v5  ;;  %v4834_v18 = vmul.f32 -1.442695, %v2775_v57 }
 0x334   :  { %v5302_v42 = vpop.eup %5301  ;;  %5315 = vpow2.f32 %v4831_v8  ;;  %v4832_v25 = vmul.f32 -1.442695, %v2767_v45  ;;  %vm11323_vm1 = vcmp.lt.s32.totalorder %v5702_v56, 1  ;;  %v8234_v28 = vmul.f32 %v8081_v60, %v5745_v20 }
 0x335   :  { %v8113_v39 = vsel %vm11309_vm13, %v8096_v53, %v11317_v26  ;;  %v5100_v46 = vpop.f32.mrb[48].mxu0  ;;  %v3408_v3 = vadd.f32 %v3376_v38, %v3312_v10  ;;  %5317 = vrcp.f32 %v2957_v55  ;;  %v5304_v12 = vpop.eup %5303  ;;  %v2960_v8 = vadd.f32 1.0, %v5302_v42 }
 0x336   :  { %11318 = vst [vmem:[#allocation70_spill] sm:$0xff] %v8113_v39  ;;  %v2788_v9 = vadd.f32 %v5100_v46, %v8031_v36  ;;  %v2779_v17 = vpop.f32.mrb[49].mxu0  ;;  %v3516_v26 = vsel %vm5784_vm4, %v8113_v39, %v8104_v61  ;;  %5319 = vrcp.f32 %v2955_v58  ;;  %v3440_v55 = vmul.f32 %v8081_v60, %v5737_v15  ;;  %11339 = vst [vmem:[#allocation75_spill] sm:$0xff] %v8234_v28 }
 0x337   :  { %v2780_v57 = vadd.f32 %v8031_v36, %v2779_v17  ;;  %v5101_v32 = vpop.f32.mrb[50].mxu0  ;;  %5321 = vpow2.f32 %v4834_v18  ;;  %v10860_v17 = vrot.slane %v8120_v19, 1  ;;  %v3580_v34 = vmul.f32 %v3516_v26, %v5739_v16 }
 0x338   :  { %v4837_v45 = vmul.f32 -1.442695, %v2788_v9  ;;  %3064 = vst.msk [vmem:[#allocation2 + $0x80] sm:$0xff] %vm11319_vm15, %v2788_v9  ;;  %v2791_v46 = vadd.f32 %v5101_v32, %v8031_v36  ;;  %v2782_v10 = vpop.f32.mrb[51].mxu0  ;;  %v3472_v42 = vadd.f32 %v3440_v55, %v3408_v3  ;;  %v2958_v18 = vadd.f32 1.0, %v5304_v12  ;;  %vm11325_vm15 = vmmov %vm11302_vm0 }
 0x339   :  { %v5306_v51 = vpop.eup %5305  ;;  %3062 = vst.msk [vmem:[#allocation2 + $0x70] sm:$0xff] %vm11320_vm2, %v2780_v57  ;;  %v2783_v58 = vadd.f32 %v8031_v36, %v2782_v10  ;;  %5323 = vpow2.f32 %v4832_v25  ;;  %v10856_v32 = vrot.slane %v8061_v47, 7  ;;  %v4835_v38 = vmul.f32 -1.442695, %v2780_v57  ;;  %vm11327_vm2 = vmmov %vm11302_vm0 }
 0x33a   :  { %v5308_v0 = vpop.eup %5307  ;;  %v4838_v40 = vmul.f32 -1.442695, %v2791_v46  ;;  %3065 = vst.msk [vmem:[#allocation2 + $0x88] sm:$0xff] %vm11302_vm0, %v2791_v46  ;;  %4113 = vrot.lane.b32.xlu1 %v5306_v51, %s5444_s15  ;;  %5325 = vrcp.f32 %v2960_v8  ;;  %v10861_v10 = vrot.slane %v8117_v24, 1  ;;  %v3612_v3 = vadd.f32 %v3580_v34, %v3472_v42 }
 0x33b   :  { %v5310_v9 = vpop.eup %5309  ;;  %3063 = vst.msk [vmem:[#allocation2 + $0x78] sm:$0xff] %vm11321_vm14, %v2783_v58  ;;  %5327 = vpow2.f32 %v4837_v45  ;;  %v4836_v26 = vmul.f32 -1.442695, %v2783_v58  ;;  %v3644_v46 = vmul.f32 %v8072_v13, %v5727_v6  ;;  %v11322_v51 = vrot.slane %v8117_v24, 7  ;;  %vm11328_vm14 = vmmov %vm11302_vm0 }
 0x33c   :  { %v5312_v55 = vpop.eup %5311  ;;  %5329 = vpow2.f32 %v4838_v40  ;;  %v8157_v34 = vsel %vm11309_vm13, %v10861_v10, %v10860_v17  ;;  %v2961_v57 = vadd.f32 1.0, %v5308_v0  ;;  %v2959_v45 = vadd.f32 1.0, %v5310_v9 }
 0x33d   :  { %v5314_v12 = vpop.eup %5313  ;;  %v5104_v25 = vpop.f32.mrb[52].mxu0  ;;  %v8149_v8 = vsel %vm11323_vm1, %v10856_v32, %v11322_v51  ;;  %5331 = vrcp.f32 %v2958_v18  ;;  %v3676_v41 = vadd.f32 %v3644_v46, %v3612_v3  ;;  %v3708_v3 = vmul.f32 %v8113_v39, %v5745_v20  ;;  %vm11334_vm1 = vmmov %vm11309_vm13 }
 0x33e   :  { %11324 = vst [vmem:[#allocation71_spill] sm:$0xff] %v8149_v8  ;;  %v5316_v40 = vpop.eup %5315  ;;  %v2804_v58 = vadd.f32 %v5104_v25, %v8031_v36  ;;  %v2795_v42 = vpop.f32.mrb[53].mxu0  ;;  %4109 = vrot.lane.b32.xlu1 %v5312_v55, %s5444_s15  ;;  %5333 = vpow2.f32 %v4835_v38  ;;  %v3252_v25 = vsel %vm5837_vm5, %v8157_v34, %v8149_v8  ;;  %vm11335_vm13 = vmmov %vm11302_vm0  ;;  %v3190_v52 = vrot.slane %v8266_v30, 1 }
 0x33f   :  { %v2962_v59 = vadd.f32 1.0, %v5316_v40  ;;  %v2796_v51 = vadd.f32 %v8031_v36, %v2795_v42  ;;  %v5105_v32 = vpop.f32.mrb[54].mxu0  ;;  %v5318_v21 = vpop.eup %5317  ;;  %5335 = vpow2.f32 %v4836_v26  ;;  %v2964_v40 = vadd.f32 1.0, %v5314_v12 }
 0x340   :  { %v4841_v54 = vmul.f32 -1.442695, %v2804_v58  ;;  %3068 = vst.msk [vmem:[#allocation2 + $0xa0] sm:$0xff] %vm11325_vm15, %v2804_v58  ;;  %v2807_v18 = vadd.f32 %v5105_v32, %v8031_v36  ;;  %v2798_v0 = vpop.f32.mrb[55].mxu0  ;;  %v5320_v55 = vpop.eup %5319  ;;  %v3784_v32 = vsel %vm5784_vm4, %v8157_v34, %v8149_v8  ;;  %v3740_v12 = vadd.f32 %v3708_v3, %v3676_v41  ;;  %v8179_v58 = vld [vmem:[#allocation2] sm:$0xff]  ;;  %vm11332_vm4 = vmmov %vm11302_vm0 }
 0x341   :  { %5337 = vrcp.f32 %v2962_v59  ;;  %3066 = vst.msk [vmem:[#allocation2 + $0x90] sm:$0xff] %vm11327_vm2, %v2796_v51  ;;  %v2799_v38 = vadd.f32 %v8031_v36, %v2798_v0  ;;  %v5322_v26 = vpop.eup %5321  ;;  %11329 = vst [vmem:[#allocation72_spill] sm:$0xff] %v8179_v58  ;;  %v8182_v0 = vmul.f32 %v3252_v25, %v5735_v14  ;;  %v3848_v41 = vmul.f32 %v3784_v32, %v5778_v35 }
 0x342   :  { %5339 = vrcp.f32 %v2961_v57  ;;  %v4842_v46 = vmul.f32 -1.442695, %v2807_v18  ;;  %3069 = vst.msk [vmem:[#allocation2 + $0xa8] sm:$0xff] %vm11302_vm0, %v2807_v18  ;;  %4115 = vrot.lane.b32.xlu1 %v5318_v21, %s5444_s15  ;;  %v4839_v57 = vmul.f32 -1.442695, %v2796_v51  ;;  %v2965_v17 = vadd.f32 1.0, %v5322_v26  ;;  %vm11336_vm15 = vmmov %vm11302_vm0 }
 0x343   :  { %5341 = vrcp.f32 %v2959_v45  ;;  %v4840_v59 = vmul.f32 -1.442695, %v2799_v38  ;;  %3067 = vst.msk [vmem:[#allocation2 + $0x98] sm:$0xff] %vm11328_vm14, %v2799_v38  ;;  %v5324_v42 = vpop.eup %5323  ;;  %11330 = vst [vmem:[#allocation73_spill] sm:$0xff] %v8182_v0  ;;  %v3912_v25 = vmul.f32 %v8117_v24, %v5731_v11  ;;  %v3880_v7 = vadd.f32 %v3848_v41, %v3740_v12 }
 0x344   :  { %5343 = vpow2.f32 %v4841_v54  ;;  %v5326_v18 = vpop.eup %5325  ;;  %v2963_v10 = vadd.f32 1.0, %v5324_v42  ;;  %vm11337_vm2 = vmmov %vm11302_vm0  ;;  %vm11343_vm0 = vcmp.lt.s32.totalorder %v5702_v56, 1  ;;  %v11353_v8 = vrot.slane %v8117_v24, 7 }
 0x345   :  { %5345 = vrcp.f32 %v2964_v40  ;;  %v5108_v1 = vpop.f32.mrb[56].mxu0  ;;  %v5328_v3 = vpop.eup %5327  ;;  %v10866_v40 = vrot.slane %v8179_v58, 1  ;;  %vm11345_vm14 = vmmov %vm11334_vm1  ;;  %v11371_v61 = vrot.slane %v8051_v50, 7 }
 0x346   :  { %5347 = vpow2.f32 %v4842_v46  ;;  %v2820_v54 = vadd.f32 %v5108_v1, %v8031_v36  ;;  %v2811_v51 = vpop.f32.mrb[57].mxu0  ;;  %4111 = vrot.lane.b32.xlu1 %v5320_v55, %s5444_s15  ;;  %v5330_v26 = vpop.eup %5329  ;;  %v11333_v1 = vrot.slane %v8051_v50, 1 }
 0x347   :  { %5349 = vpow2.f32 %v4840_v59  ;;  %v2812_v21 = vadd.f32 %v8031_v36, %v2811_v51  ;;  %v5109_v38 = vpop.f32.mrb[58].mxu0  ;;  %v5332_v32 = vpop.eup %5331  ;;  %v2969_v48 = vadd.f32 1.0, %v5330_v26  ;;  %v2968_v51 = vadd.f32 1.0, %v5328_v3 }
 0x348   :  { %5351 = vpow2.f32 %v4839_v57  ;;  %3072 = vst.msk [vmem:[#allocation2 + $0xc0] sm:$0xff] %vm11332_vm4, %v2820_v54  ;;  %v2823_v46 = vadd.f32 %v5109_v38, %v8031_v36  ;;  %v2814_v55 = vpop.f32.mrb[59].mxu0  ;;  %v8204_v42 = vsel %vm11334_vm1, %v10866_v40, %v11333_v1  ;;  %v5334_v59 = vpop.eup %5333  ;;  %v8211_v57 = vld [vmem:[%s10683_s5 + $0x8] ss:$0 sm:$0xff]  ;;  %v8220_v3 = vmul.f32 %v8179_v58, %v5725_v5  ;;  %vm11346_vm4 = vmmov %vm11337_vm2 }
 0x349   :  { %5353 = vrcp.f32 %v2965_v17  ;;  %3070 = vst.msk [vmem:[#allocation2 + $0xb0] sm:$0xff] %vm11335_vm13, %v2812_v21  ;;  %v2815_v12 = vadd.f32 %v8031_v36, %v2814_v55  ;;  %v3976_v38 = vmul.f32 %v8211_v57, %v8157_v34  ;;  %v5336_v41 = vpop.eup %5335  ;;  %v8225_v40 = vmul.f32 %v8204_v42, %v5737_v15  ;;  %vm11348_vm1 = vmmov %vm11337_vm2 }
 0x34a   :  { %5355 = vrcp.f32 %v2969_v48  ;;  %v4846_v26 = vmul.f32 -1.442695, %v2823_v46  ;;  %3073 = vst.msk [vmem:[#allocation2 + $0xc8] sm:$0xff] %vm11336_vm15, %v2823_v46  ;;  %4121 = vrot.lane.b32.xlu1 %v5326_v18, %s5444_s15  ;;  %v8229_v48 = vmul.f32 %v8047_v49, %v5727_v6  ;;  %v2966_v46 = vadd.f32 1.0, %v5334_v59  ;;  %vm11350_vm13 = vmmov %vm11348_vm1 }
 0x34b   :  { %v5338_v55 = vpop.eup %5337  ;;  %5357 = vrcp.f32 %v2963_v10  ;;  %v4844_v1 = vmul.f32 -1.442695, %v2815_v12  ;;  %3071 = vst.msk [vmem:[#allocation2 + $0xb8] sm:$0xff] %vm11337_vm2, %v2815_v12  ;;  %v3944_v17 = vadd.f32 %v3912_v25, %v3880_v7  ;;  %v8238_v10 = vmul.f32 %v8072_v13, %v5731_v11  ;;  %vm11351_vm15 = vmmov %vm11348_vm1 }
 0x34c   :  { %11338 = vst [vmem:[#allocation74_spill] sm:$0xff] %v8229_v48  ;;  %v5340_v18 = vpop.eup %5339  ;;  %4125 = vrot.lane.b32.xlu0 %v5338_v55, %s5444_s15  ;;  %5359 = vrcp.f32 %v2968_v51  ;;  %v2967_v43 = vadd.f32 1.0, %v5336_v41  ;;  %v8242_v49 = vmul.f32 %v8211_v57, %v8113_v39  ;;  %v11342_v59 = vrot.slane %v8057_v62, 7  ;;  %vm11354_vm2 = vmmov %vm11343_vm0 }
 0x34d   :  { %11340 = vst [vmem:[#allocation76_spill] sm:$0xff] %v8238_v10  ;;  %v5342_v12 = vpop.eup %5341  ;;  %v5112_v44 = vpop.f32.mrb[60].mxu0  ;;  %v4845_v55 = vmul.f32 -1.442695, %v2820_v54  ;;  %5361 = vpow2.f32 %v4846_v26  ;;  %v11344_v51 = vrot.slane %v8057_v62, 1  ;;  %v4008_v4 = vadd.f32 %v3976_v38, %v3944_v17  ;;  %v11410_v26 = vld [vmem:[#allocation68_spill] sm:$0xff] }
 0x34e   :  { %11341 = vst [vmem:[#allocation77_spill] sm:$0xff] %v8242_v49  ;;  %v8249_v7 = vsel %vm11343_vm0, %v8054_v22, %v11342_v59  ;;  %v5344_v25 = vpop.eup %5343  ;;  %v2836_v37 = vadd.f32 %v5112_v44, %v8031_v36  ;;  %v2827_v29 = vpop.f32.mrb[61].mxu0  ;;  %4117 = vrot.lane.b32.xlu1 %v5332_v32, %s5444_s15  ;;  %v4843_v33 = vmul.f32 -1.442695, %v2812_v21  ;;  %5363 = vpow2.f32 %v4844_v1 }
 0x34f   :  { %v8258_v41 = vsel %vm11345_vm14, %v11344_v51, %v8096_v53  ;;  %v8260_v63 = vpop.eup %5345  ;;  %v2828_v59 = vadd.f32 %v8031_v36, %v2827_v29  ;;  %v5113_v54 = vpop.f32.mrb[62].mxu0  ;;  %5365 = vrcp.f32 %v2966_v46  ;;  %v8268_v51 = vld [vmem:[#allocation2 + $0x48] sm:$0xff]  ;;  %v3313_v21 = vmul.f32 %v8249_v7, %v5735_v14 }
 0x350   :  { %v5348_v44 = vpop.eup %5347  ;;  %3076 = vst.msk [vmem:[#allocation2 + $0xe0] sm:$0xff] %vm11346_vm4, %v2836_v37  ;;  %v2839_v32 = vadd.f32 %v5113_v54, %v8031_v36  ;;  %v2830_v27 = vpop.f32.mrb[63].mxu0  ;;  %11347 = vst [vmem:[#allocation78_spill] sm:$0xff] %v8268_v51  ;;  %5367 = vrcp.f32 %v2967_v43  ;;  %v2972_v29 = vadd.f32 1.0, %v5344_v25  ;;  %v3281_v54 = vsel %vm5973_vm7, %v8249_v7, %v8258_v41 }
 0x351   :  { %v5350_v1 = vpop.eup %5349  ;;  %3074 = vst.msk [vmem:[#allocation2 + $0xd0] sm:$0xff] %vm11348_vm1, %v2828_v59  ;;  %v2831_v46 = vadd.f32 %v8031_v36, %v2830_v27  ;;  %v2973_v17 = vadd.f32 1.0, %v5348_v44  ;;  %5369 = vpow2.f32 %v4845_v55  ;;  %v3377_v43 = vmul.f32 %v8057_v62, %v5725_v5  ;;  %vm11360_vm4 = vmmov %vm11348_vm1 }
 0x352   :  { %v5352_v38 = vpop.eup %5351  ;;  %v2971_v53 = vadd.f32 1.0, %v5350_v1  ;;  %3077 = vst.msk [vmem:[#allocation2 + $0xe8] sm:$0xff] %vm11350_vm13, %v2839_v32  ;;  %4123 = vrot.lane.b32.xlu1 %v5340_v18, %s5444_s15  ;;  %5371 = vpow2.f32 %v4843_v33  ;;  %v4850_v27 = vmul.f32 -1.442695, %v2839_v32  ;;  %v3441_v49 = vmul.f32 %v3281_v54, %v5737_v15  ;;  %vm11362_vm1 = vmmov %vm11345_vm14 }
 0x353   :  { %v8282_v25 = vpop.eup %5353  ;;  %3075 = vst.msk [vmem:[#allocation2 + $0xd8] sm:$0xff] %vm11351_vm15, %v2831_v46  ;;  %v4848_v55 = vmul.f32 -1.442695, %v2831_v46  ;;  %v3409_v1 = vadd.f32 %v3377_v43, %v3313_v21  ;;  %v2970_v10 = vadd.f32 1.0, %v5352_v38  ;;  %v11352_v32 = vrot.slane %v8120_v19, 7  ;;  %vm11363_vm13 = vmmov %vm11360_vm4 }
 0x354   :  { %v5356_v44 = vpop.eup %5355  ;;  %5373 = vrcp.f32 %v2971_v53  ;;  %v11355_v53 = vrot.slane %v8061_v47, 7  ;;  %v8311_v38 = vld [vmem:[%s10685_s6] ss:$0 sm:$0xff]  ;;  %v11358_v43 = vrot.slane %v8061_v47, 1  ;;  %vm11364_vm15 = vmmov %vm11360_vm4 }
 0x355   :  { %v8288_v18 = vpop.eup %5357  ;;  %5375 = vrcp.f32 %v2972_v29  ;;  %4139 = vrot.lane.b32.xlu0 %v5356_v44, %s5444_s15  ;;  %v5116_v33 = vpop.f32.mrb[64].mxu0  ;;  %v8297_v23 = vsel %vm11354_vm2, %v11353_v8, %v11352_v32  ;;  %v4849_v29 = vmul.f32 -1.442695, %v2836_v37  ;;  %11356 = vst [vmem:[#allocation21_spill] sm:$0xff] %v8311_v38  ;;  %v11357_v8 = vrot.slane %v8117_v24, 1  ;;  %vm11366_vm2 = vmmov %vm11362_vm1 }
 0x356   :  { %v8304_v21 = vsel %vm11343_vm0, %v8091_v31, %v11355_v53  ;;  %5377 = vrcp.f32 %v2973_v17  ;;  %v2852_v46 = vadd.f32 %v5116_v33, %v8031_v36  ;;  %v2843_v54 = vpop.f32.mrb[65].mxu0  ;;  %4119 = vrot.lane.b32.xlu1 %v5342_v12, %s5444_s15  ;;  %v8321_v17 = vpop.eup %5359  ;;  %v4847_v37 = vmul.f32 -1.442695, %v2828_v59  ;;  %vm11368_vm0 = vmmov %vm11360_vm4 }
 0x357   :  { %v8319_v44 = vsel %vm11345_vm14, %v11358_v43, %v11357_v8  ;;  %5379 = vpow2.f32 %v4850_v27  ;;  %v2844_v33 = vadd.f32 %v8031_v36, %v2843_v54  ;;  %v5117_v12 = vpop.f32.mrb[66].mxu0  ;;  %v8325_v32 = vadd.f32 %v8311_v38, %v4008_v4  ;;  %v5362_v53 = vpop.eup %5361  ;;  %vm11369_vm14 = vmmov %vm11368_vm0 }
 0x358   :  { %5381 = vpow2.f32 %v4848_v55  ;;  %3080 = vst.msk [vmem:[#allocation2 + $0x100] sm:$0xff] %vm11360_vm4, %v2852_v46  ;;  %v2855_v13 = vadd.f32 %v5117_v12, %v8031_v36  ;;  %v2846_v45 = vpop.f32.mrb[67].mxu0  ;;  %v11361_v8 = vrot.slane %v8268_v51, 1  ;;  %v3473_v59 = vadd.f32 %v3441_v49, %v3409_v1  ;;  %v5364_v27 = vpop.eup %5363  ;;  %vm11370_vm4 = vmmov %vm11368_vm0 }
 0x359   :  { %11359 = vst [vmem:[#allocation79_spill] sm:$0xff] %v8325_v32  ;;  %5383 = vrcp.f32 %v2970_v10  ;;  %3078 = vst.msk [vmem:[#allocation2 + $0xf0] sm:$0xff] %vm11363_vm13, %v2844_v33  ;;  %v2847_v4 = vadd.f32 %v8031_v36, %v2846_v45  ;;  %v11365_v55 = vrot.slane %v8120_v19, 1  ;;  %v8348_v49 = vpop.eup %5365  ;;  %v2977_v10 = vadd.f32 1.0, %v5362_v53 }
 0x35a   :  { %v8333_v43 = vsel %vm11362_vm1, %v3190_v52, %v11361_v8  ;;  %3084 = vst.msk [vmem:[#allocation2 + $0x110] sm:$0xff] %vm11364_vm15, %v2844_v33  ;;  %v2975_v1 = vadd.f32 1.0, %v5364_v27  ;;  %5385 = vpow2.f32 %v4849_v29  ;;  %4129 = vrot.lane.b32.xlu1 %v8260_v63, %s5444_s15  ;;  %v3581_v36 = vmul.f32 %v8304_v21, %v5739_v16  ;;  %vm11375_vm13 = vmmov %vm11366_vm2 }
 0x35b   :  { %v8342_v54 = vsel %vm11366_vm2, %v11365_v55, %v3190_v52  ;;  %3081 = vst.msk [vmem:[#allocation2 + $0x108] sm:$0xff] %vm11368_vm0, %v2855_v13  ;;  %v8355_v52 = vpop.eup %5367  ;;  %5387 = vpow2.f32 %v4847_v37  ;;  %v4854_v45 = vmul.f32 -1.442695, %v2855_v13  ;;  %v3317_v53 = vmul.f32 %v8297_v23, %v5735_v14 }
 0x35c   :  { %3079 = vst.msk [vmem:[#allocation2 + $0xf8] sm:$0xff] %vm11369_vm14, %v2847_v4  ;;  %v3381_v29 = vmul.f32 %v8120_v19, %v5725_v5  ;;  %v5370_v27 = vpop.eup %5369  ;;  %5389 = vrcp.f32 %v2975_v1  ;;  %v4852_v63 = vmul.f32 -1.442695, %v2847_v4  ;;  %v3549_v55 = vsel %vm5973_vm7, %v8304_v21, %v8319_v44 }
 0x35d   :  { %3085 = vst.msk [vmem:[#allocation2 + $0x118] sm:$0xff] %vm11370_vm4, %v2847_v4  ;;  %v3613_v37 = vadd.f32 %v3581_v36, %v3473_v59  ;;  %v5372_v13 = vpop.eup %5371  ;;  %v4853_v8 = vmul.f32 -1.442695, %v2852_v46  ;;  %v3645_v32 = vmul.f32 %v8061_v47, %v5727_v6  ;;  %v11372_v38 = vrot.slane %v8179_v58, 7 }
 0x35e   :  { %vm11373_vm1 = vcmp.lt.s32.totalorder %v5702_v56, 1  ;;  %v11374_v4 = vrot.slane %v8051_v50, 1  ;;  %v5374_v39 = vpop.eup %5373  ;;  %5391 = vrcp.f32 %v2977_v10  ;;  %4131 = vrot.lane.b32.xlu1 %v8282_v25, %s5444_s15  ;;  %v3375_v51 = vmul.f32 %v8051_v50, %v5725_v5  ;;  %v11378_v10 = vld [vmem:[#allocation27_spill] sm:$0xff] }
 0x35f   :  { %v3180_v28 = vsel %vm11373_vm1, %v11372_v38, %v11371_v61  ;;  %v8387_v61 = vpop.eup %5375  ;;  %v4851_v38 = vmul.f32 -1.442695, %v2844_v33  ;;  %5393 = vpow2.f32 %v4854_v45  ;;  %4143 = vrot.lane.b32.xlu0 %v5374_v39, %s5444_s15  ;;  %vm11379_vm15 = vnez %v11378_v10  ;;  %vm11382_vm2 = vmmov %vm11373_vm1 }
 0x360   :  { %v3243_v1 = vsel %vm11375_vm13, %v11374_v4, %v8069_v2  ;;  %v3311_v36 = vmul.f32 %v3180_v28, %v5735_v14  ;;  %11377 = vst [vmem:[#allocation22_spill] sm:$0xff] %v8387_v61  ;;  %v3285_v4 = vsel %vm11379_vm15, %v8297_v23, %v8342_v54  ;;  %v5378_v2 = vpop.eup %5377  ;;  %5395 = vpow2.f32 %v4852_v63  ;;  %vm11384_vm0 = vmmov %vm11373_vm1 }
 0x361   :  { %v3279_v59 = vsel %vm6123_vm10, %v3180_v28, %v3243_v1  ;;  %v3677_v1 = vadd.f32 %v3645_v32, %v3613_v37  ;;  %v3709_v28 = vmul.f32 %v3549_v55, %v5745_v20  ;;  %v5380_v50 = vpop.eup %5379  ;;  %v2976_v48 = vadd.f32 1.0, %v5370_v27  ;;  %vm11391_vm4 = vmmov %vm11384_vm0 }
 0x362   :  { %v3439_v25 = vmul.f32 %v3279_v59, %v5737_v15  ;;  %v3407_v0 = vadd.f32 %v3375_v51, %v3311_v36  ;;  %v2974_v61 = vadd.f32 1.0, %v5372_v13  ;;  %v3503_v33 = vld [vmem:[#allocation2 + $0x108] sm:$0xff]  ;;  %v8396_v45 = vadd.f32 %v3381_v29, %v3317_v53  ;;  %v5382_v9 = vpop.eup %5381  ;;  %4127 = vrot.lane.b32.xlu1 %v8288_v18, %s5444_s15  ;;  %vm11398_vm1 = vmmov %vm11384_vm0 }
 0x363   :  { %v3849_v39 = vmul.f32 %v8297_v23, %v5778_v35  ;;  %5397 = vpow2.f32 %v4853_v8  ;;  %v3117_v59 = vld [vmem:[#allocation2 + $0xf8] sm:$0xff]  ;;  %v8402_v63 = vrot.slane %v3503_v33, 7  ;;  %v3579_v51 = vmul.f32 %v8249_v7, %v5739_v16  ;;  %v8406_v27 = vpop.eup %5383  ;;  %4147 = vrot.lane.b32.xlu0 %v5378_v2, %s5444_s15 }
 0x364   :  { %v3471_v32 = vadd.f32 %v3439_v25, %v3407_v0  ;;  %v2981_v55 = vadd.f32 1.0, %v5380_v50  ;;  %v2979_v53 = vadd.f32 1.0, %v5382_v9  ;;  %v8409_v29 = vrot.slane %v3117_v59, 7  ;;  %v5386_v8 = vpop.eup %5385  ;;  %v8424_v25 = vld [vmem:[#allocation2 + $0x118] sm:$0xff] }
 0x365   :  { %11380 = vst [vmem:[#allocation28_spill] sm:$0xff] %v8402_v63  ;;  %v3547_v18 = vsel %vm6123_vm10, %v8249_v7, %v8258_v41  ;;  %5399 = vpow2.f32 %v4851_v38  ;;  %v3508_v0 = vsel %vm11382_vm2, %v8402_v63, %v8054_v22  ;;  %v3741_v37 = vadd.f32 %v3709_v28, %v3677_v1  ;;  %v5388_v36 = vpop.eup %5387  ;;  %11385 = vst [vmem:[#allocation80_spill] sm:$0xff] %v8424_v25  ;;  %v11386_v22 = vld [vmem:[#allocation31_spill] sm:$0xff] }
 0x366   :  { %11381 = vst [vmem:[#allocation27_spill] sm:$0xff] %v8409_v29  ;;  %v3611_v13 = vadd.f32 %v3579_v51, %v3471_v32  ;;  %5401 = vrcp.f32 %v2979_v53  ;;  %v11383_v2 = vrot.slane %v8179_v58, 7  ;;  %v8427_v7 = vmul.f32 %v3285_v4, %v5737_v15  ;;  %v5390_v38 = vpop.eup %5389  ;;  %4133 = vrot.lane.b32.xlu1 %v8348_v49, %s5444_s15 }
 0x367   :  { %v3643_v41 = vmul.f32 %v8057_v62, %v5727_v6  ;;  %5403 = vrcp.f32 %v2976_v48  ;;  %vm11387_vm14 = vnez %v11386_v22  ;;  %v3817_v28 = vsel %vm5973_vm7, %v8297_v23, %v8342_v54  ;;  %4151 = vrot.lane.b32.xlu0 %v5390_v38, %s5444_s15  ;;  %vm11389_vm7 = vmmov %vm11384_vm0  ;;  %v11400_v22 = vld [vmem:[#allocation18_spill] sm:$0xff] }
 0x368   :  { %v3181_v9 = vsel %vm11384_vm0, %v8409_v29, %v11383_v2  ;;  %v3707_v4 = vmul.f32 %v3547_v18, %v5745_v20  ;;  %5405 = vrcp.f32 %v2981_v55  ;;  %v3514_v48 = vsel %vm11387_vm14, %v8081_v60, %v3508_v0  ;;  %v5392_v50 = vpop.eup %5391 }
 0x369   :  { %v3246_v1 = vsel %vm11387_vm14, %v8204_v42, %v3181_v9  ;;  %v3675_v49 = vadd.f32 %v3643_v41, %v3611_v13  ;;  %5407 = vrcp.f32 %v2974_v61  ;;  %v10896_v42 = vrot.slane %v8424_v25, 7  ;;  %v5394_v59 = vpop.eup %5393 }
 0x36a   :  { %v3310_v62 = vmul.f32 %v3246_v1, %v5735_v14  ;;  %v3881_v33 = vadd.f32 %v3849_v39, %v3741_v37  ;;  %v3847_v55 = vmul.f32 %v8304_v21, %v5778_v35  ;;  %v10899_v60 = vrot.slane %v8266_v30, 7  ;;  %v5396_v53 = vpop.eup %5395  ;;  %4135 = vrot.lane.b32.xlu1 %v8355_v52, %s5444_s15  ;;  %v8461_v37 = vld [vmem:[#allocation2 + $0x58] sm:$0xff] }
 0x36b   :  { %v3739_v51 = vadd.f32 %v3707_v4, %v3675_v49  ;;  %v2980_v18 = vadd.f32 1.0, %v5386_v8  ;;  %v3578_v61 = vmul.f32 %v3514_v48, %v5739_v16  ;;  %v3913_v0 = vmul.f32 %v8120_v19, %v5731_v11  ;;  %11388 = vst [vmem:[#allocation31_spill] sm:$0xff] %v8461_v37  ;;  %4155 = vrot.lane.b32.xlu0 %v5392_v50, %s5444_s15 }
 0x36c   :  { %v3406_v32 = vadd.f32 %v8220_v3, %v3310_v62  ;;  %v3977_v39 = vmul.f32 %v8211_v57, %v3817_v28  ;;  %v2985_v3 = vadd.f32 1.0, %v5394_v59  ;;  %v2983_v13 = vadd.f32 1.0, %v5396_v53  ;;  %v8472_v28 = vld [vmem:[#allocation2 + $0x50] sm:$0xff] }
 0x36d   :  { %v3879_v9 = vadd.f32 %v3847_v55, %v3739_v51  ;;  %v5398_v8 = vpop.eup %5397  ;;  %v2978_v41 = vadd.f32 1.0, %v5388_v36  ;;  %v3776_v52 = vsel %vm11389_vm7, %v10896_v42, %v8091_v31  ;;  %v3945_v38 = vadd.f32 %v3913_v0, %v3881_v33  ;;  %v11393_v51 = vld [vmem:[#allocation74_spill] sm:$0xff]  ;;  %v11408_v42 = vld [vmem:[#allocation69_spill] sm:$0xff]  ;;  %vm11426_vm7 = vmmov %vm11398_vm1 }
 0x36e   :  { %v3470_v2 = vadd.f32 %v8225_v40, %v3406_v32  ;;  %v3911_v1 = vmul.f32 %v8061_v47, %v5731_v11  ;;  %5409 = vrcp.f32 %v2983_v13  ;;  %v11390_v40 = vrot.slane %v8120_v19, 7  ;;  %4137 = vrot.lane.b32.xlu1 %v8321_v17, %s5444_s15 }
 0x36f   :  { %v10897_v62 = vrot.slane %v8461_v37, 1  ;;  %v5400_v48 = vpop.eup %5399  ;;  %v3815_v47 = vsel %vm6123_vm10, %v8304_v21, %v8319_v44  ;;  %v3380_v31 = vmul.f32 %v8117_v24, %v5725_v5  ;;  %v3444_v19 = vmul.f32 %v8157_v34, %v5737_v15  ;;  %vm11396_vm10 = vmmov %vm11375_vm13 }
 0x370   :  { %v3610_v4 = vadd.f32 %v3578_v61, %v3470_v2  ;;  %v8480_v36 = vsel %vm11391_vm4, %v11390_v40, %v10899_v60  ;;  %v5402_v33 = vpop.eup %5401  ;;  %5411 = vrcp.f32 %v2985_v3  ;;  %v3943_v59 = vadd.f32 %v3911_v1, %v3879_v9  ;;  %v11394_v61 = vld [vmem:[#allocation73_spill] sm:$0xff]  ;;  %v11395_v9 = vld [vmem:[#allocation78_spill] sm:$0xff]  ;;  %vm11428_vm4 = vmmov %vm11398_vm1 }
 0x371   :  { %v3520_v50 = vsel %vm5837_vm5, %v8333_v43, %v8480_v36  ;;  %v10898_v17 = vrot.slane %v8472_v28, 7  ;;  %v10901_v32 = vrot.slane %v8472_v28, 1  ;;  %v8499_v46 = vpop.eup %5403  ;;  %4159 = vrot.lane.b32.xlu0 %v5402_v33, %s5444_s15  ;;  %v4009_v53 = vadd.f32 %v3977_v39, %v3945_v38  ;;  %v11397_v38 = vld [vmem:[#allocation70_spill] sm:$0xff] }
 0x372   :  { %v3674_v55 = vadd.f32 %v11393_v51, %v3610_v4  ;;  %v3412_v0 = vadd.f32 %v3380_v31, %v11394_v61  ;;  %v3584_v13 = vmul.f32 %v3520_v50, %v5739_v16  ;;  %v5406_v2 = vpop.eup %5405  ;;  %v2984_v40 = vadd.f32 1.0, %v5398_v8  ;;  %4141 = vrot.lane.b32.xlu1 %v8406_v27, %s5444_s15  ;;  %v11399_v27 = vld [vmem:[#allocation75_spill] sm:$0xff]  ;;  %v11402_v61 = vld [vmem:[#allocation21_spill] sm:$0xff] }
 0x373   :  { %v3975_v3 = vmul.f32 %v8211_v57, %v3815_v47  ;;  %v10900_v1 = vrot.slane %v11395_v9, 7  ;;  %v8513_v33 = vsel %vm11396_vm10, %v10901_v32, %v10897_v62  ;;  %v5408_v4 = vpop.eup %5407  ;;  %5413 = vrcp.f32 %v2980_v18 }
 0x374   :  { %v2982_v39 = vadd.f32 1.0, %v5400_v48  ;;  %v3782_v8 = vsel %vm11387_vm14, %v11397_v38, %v3776_v52  ;;  %v3476_v47 = vadd.f32 %v3444_v19, %v3412_v0  ;;  %5415 = vrcp.f32 %v2978_v41 }
 0x375   :  { %v4007_v31 = vadd.f32 %v3975_v3, %v3943_v59  ;;  %v3171_v50 = vsel %vm11398_vm1, %v10900_v1, %v10898_v17  ;;  %v3648_v18 = vmul.f32 %v8266_v30, %v5727_v6  ;;  %4163 = vrot.lane.b32.xlu0 %v5406_v2, %s5444_s15  ;;  %v3738_v48 = vadd.f32 %v11399_v27, %v3674_v55  ;;  %v8544_v55 = vld [vmem:[#allocation2 + $0x60] sm:$0xff]  ;;  %v11404_v2 = vld [vmem:[#allocation22_spill] sm:$0xff]  ;;  %v11413_v27 = vld [vmem:[#allocation76_spill] sm:$0xff] }
 0x376   :  { %vm11401_vm13 = vnez %v11400_v22  ;;  %v3616_v41 = vadd.f32 %v3584_v13, %v3476_v47  ;;  %v3788_v19 = vsel %vm5837_vm5, %v8513_v33, %v3171_v50  ;;  %5417 = vrcp.f32 %v2984_v40  ;;  %4145 = vrot.lane.b32.xlu1 %v11404_v2, %s5444_s15  ;;  %v11405_v13 = vld [vmem:[#allocation34_spill] sm:$0xff]  ;;  %vm11415_vm5 = vmmov %vm11384_vm0 }
 0x377   :  { %v3256_v52 = vsel %vm11401_vm13, %v8513_v33, %v3171_v50  ;;  %v3846_v59 = vmul.f32 %v3782_v8, %v5778_v35  ;;  %v8539_v51 = vadd.f32 %v8427_v7, %v8396_v45  ;;  %v8542_v0 = vadd.f32 %v11402_v61, %v4009_v53  ;;  %v8553_v8 = vld [vmem:[#allocation2 + $0x68] sm:$0xff]  ;;  %vm11417_vm0 = vmmov %vm11396_vm10 }
 0x378   :  { %5419 = vrcp.f32 %v2982_v39  ;;  %vm11406_vm2 = vnez %v11405_v13  ;;  %v3680_v40 = vadd.f32 %v3648_v18, %v3616_v41  ;;  %v3712_v3 = vmul.f32 %v8333_v43, %v5745_v20  ;;  %v5410_v45 = vpop.eup %5409  ;;  %vm11420_vm14 = vmmov %vm11417_vm0 }
 0x379   :  { %11403 = vst [vmem:[#allocation13_spill] sm:$0xff] %v8542_v0  ;;  %v3522_v49 = vsel %vm11406_vm2, %v8513_v33, %v3171_v50  ;;  %v8556_v7 = vadd.f32 %v11402_v61, %v4007_v31  ;;  %v8559_v53 = vmul.f32 %v3256_v52, %v5735_v14  ;;  %v3852_v39 = vmul.f32 %v3788_v19, %v5778_v35  ;;  %vm11431_vm10 = vmmov %vm11417_vm0 }
 0x37a   :  { %v3916_v47 = vmul.f32 %v8472_v28, %v5731_v11  ;;  %4167 = vrot.lane.b32.xlu0 %v5410_v45, %s5444_s15  ;;  %v3878_v50 = vadd.f32 %v3846_v59, %v3738_v48  ;;  %v3744_v18 = vadd.f32 %v3712_v3, %v3680_v40  ;;  %v3382_v41 = vmul.f32 %v8266_v30, %v5725_v5  ;;  %v5412_v2 = vpop.eup %5411  ;;  %v11422_v45 = vld [vmem:[#allocation29_spill] sm:$0xff] }
 0x37b   :  { %11407 = vst [vmem:[#allocation74_spill] sm:$0xff] %v8556_v7  ;;  %v3194_v31 = vrot.slane %v8544_v55, 1  ;;  %v3254_v19 = vsel %vm11406_vm2, %v8333_v43, %v8480_v36  ;;  %v3250_v48 = vsel %vm5887_vm6, %v11397_v38, %v11408_v42  ;;  %4149 = vrot.lane.b32.xlu1 %v5408_v4, %s5444_s15  ;;  %v3446_v59 = vmul.f32 %v8333_v43, %v5737_v15 }
 0x37c   :  { %v3318_v40 = vmul.f32 %v3254_v19, %v5735_v14  ;;  %v3314_v3 = vmul.f32 %v3250_v48, %v5735_v14  ;;  %v3378_v62 = vmul.f32 %v11410_v26, %v5725_v5  ;;  %v3884_v17 = vadd.f32 %v3852_v39, %v3744_v18  ;;  %v11411_v26 = vld [vmem:[#allocation71_spill] sm:$0xff] }
 0x37d   :  { %v3980_v60 = vmul.f32 %v8211_v57, %v8513_v33  ;;  %v3129_v1 = vrot.slane %v8461_v37, 7  ;;  %v3586_v42 = vmul.f32 %v3522_v49, %v5739_v16  ;;  %v5414_v32 = vpop.eup %5413  ;;  %v3442_v19 = vmul.f32 %v11397_v38, %v5737_v15 }
 0x37e   :  { %4171 = vrot.lane.b32.xlu0 %v5412_v2, %s5444_s15  ;;  %v3414_v4 = vadd.f32 %v3382_v41, %v3318_v40  ;;  %v3410_v52 = vadd.f32 %v3378_v62, %v3314_v3  ;;  %v11412_v39 = vsel %vm5887_vm6, %v8157_v34, %v11411_v26  ;;  %v5416_v48 = vpop.eup %5415  ;;  %v3942_v25 = vadd.f32 %v11413_v27, %v3878_v50 }
 0x37f   :  { %v3582_v18 = vmul.f32 %v11412_v39, %v5739_v16  ;;  %v11414_v49 = vrot.slane %v8544_v55, 7  ;;  %v11416_v62 = vrot.slane %v8553_v8, 1  ;;  %v3650_v41 = vmul.f32 %v8472_v28, %v5727_v6  ;;  %4153 = vrot.lane.b32.xlu1 %v8499_v46, %s5444_s15 }
 0x380   :  { %v3478_v27 = vadd.f32 %v3446_v59, %v3414_v4  ;;  %v3474_v40 = vadd.f32 %v3442_v19, %v3410_v52  ;;  %v3646_v3 = vmul.f32 %v8117_v24, %v5727_v6  ;;  %v8621_v26 = vpop.eup %5417  ;;  %v3948_v39 = vadd.f32 %v3916_v47, %v3884_v17  ;;  %v11421_v19 = vld [vmem:[#allocation77_spill] sm:$0xff] }
 0x381   :  { %v8603_v2 = vsel %vm11415_vm5, %v3129_v1, %v11414_v49  ;;  %v8609_v38 = vsel %vm11417_vm0, %v3194_v31, %v11416_v62  ;;  %v3714_v49 = vmul.f32 %v8513_v33, %v5745_v20  ;;  %v3918_v62 = vmul.f32 %v8544_v55, %v5731_v11  ;;  %vm11445_vm5 = vmmov %vm11417_vm0 }
 0x382   :  { %v3790_v50 = vsel %vm11406_vm2, %v8609_v38, %v8603_v2  ;;  %v3786_v46 = vsel %vm5887_vm6, %v8333_v43, %v8480_v36  ;;  %v5420_v13 = vpop.eup %5419  ;;  %v3618_v59 = vadd.f32 %v3586_v42, %v3478_v27  ;;  %v3614_v52 = vadd.f32 %v3582_v18, %v3474_v40  ;;  %vm11443_vm2 = vmmov %vm11428_vm4 }
 0x383   :  { %v3710_v24 = vmul.f32 %v8157_v34, %v5745_v20  ;;  %v11418_v4 = vrot.slane %v8472_v28, 1  ;;  %v11419_v17 = vrot.slane %v11395_v9, 1  ;;  %v4006_v63 = vadd.f32 %v11421_v19, %v3942_v25  ;;  %4157 = vrot.lane.b32.xlu1 %v5416_v48, %s5444_s15 }
 0x384   :  { %vm11423_vm6 = vnez %v11422_v45  ;;  %v3854_v42 = vmul.f32 %v3790_v50, %v5778_v35  ;;  %v11424_v18 = vrot.slane %v11395_v9, 7  ;;  %v11425_v34 = vrot.slane %v8266_v30, 7 }
 0x385   :  { %v8639_v47 = vsel %vm11420_vm14, %v11419_v17, %v11418_v4  ;;  %v3258_v36 = vsel %vm11423_vm6, %v8609_v38, %v8603_v2  ;;  %v3682_v40 = vadd.f32 %v3650_v41, %v3618_v59  ;;  %v3678_v4 = vadd.f32 %v3646_v3, %v3614_v52  ;;  %vm11451_vm14 = vmmov %vm11443_vm2 }
 0x386   :  { %v8653_v27 = vsel %vm11426_vm7, %v11425_v34, %v11424_v18  ;;  %v3850_v25 = vmul.f32 %v3786_v46, %v5778_v35  ;;  %v4012_v19 = vadd.f32 %v3980_v60, %v3948_v39  ;;  %v11427_v50 = vrot.slane %v8472_v28, 7  ;;  %v8689_v46 = vld [vmem:[#allocation2 + $0x70] sm:$0xff]  ;;  %vm11456_vm7 = vmmov %vm11445_vm5 }
 0x387   :  { %v3585_v17 = vmul.f32 %v8653_v27, %v5739_v16  ;;  %v11430_v29 = vrot.slane %v8461_v37, 1  ;;  %v3553_v48 = vsel %vm11379_vm15, %v8653_v27, %v8639_v47  ;;  %v3746_v41 = vadd.f32 %v3714_v49, %v3682_v40  ;;  %11434 = vst [vmem:[#allocation75_spill] sm:$0xff] %v8689_v46  ;;  %4161 = vrot.lane.b32.xlu1 %v5414_v32, %s5444_s15  ;;  %v11437_v32 = vld [vmem:[#allocation17_spill] sm:$0xff] }
 0x388   :  { %v8663_v58 = vsel %vm11428_vm4, %v11427_v50, %v3129_v1  ;;  %v3742_v3 = vadd.f32 %v3710_v24, %v3678_v4  ;;  %v3649_v39 = vmul.f32 %v11395_v9, %v5727_v6  ;;  %v8679_v1 = vmul.f32 %v3258_v36, %v5735_v14  ;;  %v8697_v36 = vld [vmem:[#allocation2 + $0x80] sm:$0xff]  ;;  %vm11463_vm4 = vmmov %vm11445_vm5 }
 0x389   :  { %11429 = vst [vmem:[#allocation73_spill] sm:$0xff] %v8663_v58  ;;  %v8669_v18 = vsel %vm11431_vm10, %v11430_v29, %v3194_v31  ;;  %v3617_v60 = vadd.f32 %v3585_v17, %v8539_v51  ;;  %v3321_v31 = vmul.f32 %v8663_v58, %v5735_v14  ;;  %v3385_v49 = vmul.f32 %v8461_v37, %v5725_v5  ;;  %v8691_v51 = vld [vmem:[#allocation2 + $0x78] sm:$0xff]  ;;  %v8714_v29 = vld [vmem:[#allocation2 + $0x88] sm:$0xff] }
 0x38a   :  { %11432 = vst [vmem:[#allocation78_spill] sm:$0xff] %v8669_v18  ;;  %11433 = vst [vmem:[#allocation70_spill] sm:$0xff] %v8679_v1  ;;  %v3982_v59 = vmul.f32 %v8211_v57, %v8609_v38  ;;  %v3713_v24 = vmul.f32 %v3553_v48, %v5745_v20  ;;  %v8701_v40 = vadd.f32 %v11402_v61, %v4006_v63  ;;  %vm11438_vm1 = vnez %v11437_v32  ;;  %v8716_v63 = vld [vmem:[#allocation2 + $0x90] sm:$0xff] }
 0x38b   :  { %v3681_v52 = vadd.f32 %v3649_v39, %v3617_v60  ;;  %11435 = vst [vmem:[#allocation18_spill] sm:$0xff] %v8697_v36  ;;  %v3914_v4 = vmul.f32 %v8266_v30, %v5731_v11  ;;  %v3978_v17 = vmul.f32 %v8211_v57, %v8333_v43  ;;  %v3289_v50 = vsel %vm11438_vm1, %v8663_v58, %v8669_v18 }
 0x38c   :  { %11436 = vst [vmem:[#allocation21_spill] sm:$0xff] %v8701_v40  ;;  %v8712_v48 = vadd.f32 %v11402_v61, %v4012_v19  ;;  %v3886_v60 = vadd.f32 %v3854_v42, %v3746_v41  ;;  %v3882_v39 = vadd.f32 %v3850_v25, %v3742_v3  ;;  %11440 = vst [vmem:[#allocation34_spill] sm:$0xff] %v8714_v29  ;;  %v10908_v34 = vrot.slane %v8689_v46, 7 }
 0x38d   :  { %11441 = vst [vmem:[#allocation69_spill] sm:$0xff] %v8716_v63  ;;  %v3417_v30 = vadd.f32 %v3385_v49, %v3321_v31  ;;  %v10913_v1 = vrot.slane %v8714_v29, 7  ;;  %v10910_v43 = vrot.slane %v8691_v51, 1  ;;  %v10909_v7 = vrot.slane %v8697_v36, 1  ;;  %4165 = vrot.lane.b32.xlu1 %v5420_v13, %s5444_s15 }
 0x38e   :  { %11439 = vst [vmem:[#allocation22_spill] sm:$0xff] %v8712_v48  ;;  %v3449_v19 = vmul.f32 %v3289_v50, %v5737_v15  ;;  %v3745_v48 = vadd.f32 %v3713_v24, %v3681_v52  ;;  %v3853_v42 = vmul.f32 %v8663_v58, %v5778_v35  ;;  %v11442_v25 = vrot.slane %v8691_v51, 7  ;;  %v11447_v50 = vld [vmem:[#allocation35_spill] sm:$0xff] }
 0x38f   :  { %v10914_v3 = vrot.slane %v8697_v36, 7  ;;  %v8742_v13 = vsel %vm11445_vm5, %v10910_v43, %v10909_v7  ;;  %v3950_v52 = vadd.f32 %v3918_v62, %v3886_v60  ;;  %v3946_v24 = vadd.f32 %v3914_v4, %v3882_v39  ;;  %v8758_v43 = vld [vmem:[#allocation2 + $0xa0] sm:$0xff]  ;;  %v8779_v36 = vld [vmem:[#allocation2 + $0x98] sm:$0xff]  ;;  %vm11477_vm5 = vmmov %vm11463_vm4 }
 0x390   :  { %v8732_v41 = vsel %vm11443_vm2, %v10908_v34, %v11442_v25  ;;  %11446 = vst [vmem:[#allocation68_spill] sm:$0xff] %v8742_v13  ;;  %vm11448_vm0 = vnez %v11447_v50  ;;  %11450 = vst [vmem:[#allocation71_spill] sm:$0xff] %v8758_v43  ;;  %v3389_v60 = vmul.f32 %v8691_v51, %v5725_v5  ;;  %v3821_v39 = vsel %vm11379_vm15, %v8663_v58, %v8669_v18 }
 0x391   :  { %11444 = vst [vmem:[#allocation16_spill] sm:$0xff] %v8732_v41  ;;  %v3325_v49 = vmul.f32 %v8732_v41, %v5735_v14  ;;  %v3293_v31 = vsel %vm6619_vm12, %v8732_v41, %v8742_v13  ;;  %v8766_v62 = vsel %vm11451_vm14, %v10914_v3, %v10913_v1  ;;  %4169 = vrot.lane.b32.xlu1 %v8621_v26, %s5444_s15  ;;  %11453 = vst [vmem:[#allocation77_spill] sm:$0xff] %v8779_v36 }
 0x392   :  { %11452 = vst [vmem:[#allocation76_spill] sm:$0xff] %v8766_v62  ;;  %v3885_v7 = vadd.f32 %v3853_v42, %v3745_v48  ;;  %v3917_v25 = vmul.f32 %v8461_v37, %v5731_v11  ;;  %v3453_v1 = vmul.f32 %v3293_v31, %v5737_v15  ;;  %v8782_v3 = vadd.f32 %v3449_v19, %v3417_v30  ;;  %vm11459_vm15 = vmmov %vm11443_vm2 }
 0x393   :  { %v11454_v40 = vrot.slane %v8716_v63, 1  ;;  %v11455_v26 = vrot.slane %v8714_v29, 1  ;;  %v3421_v48 = vadd.f32 %v3389_v60, %v3325_v49  ;;  %v4014_v42 = vadd.f32 %v3982_v59, %v3950_v52 }
 0x394   :  { %v4010_v18 = vadd.f32 %v3978_v17, %v3946_v24  ;;  %v10919_v37 = vrot.slane %v8758_v43, 1  ;;  %v3593_v31 = vmul.f32 %v8766_v62, %v5739_v16  ;;  %v3981_v30 = vmul.f32 %v8211_v57, %v3821_v39 }
 0x395   :  { %v8791_v10 = vsel %vm11456_vm7, %v11455_v26, %v11454_v40  ;;  %v10921_v19 = vrot.slane %v8716_v63, 7  ;;  %v3485_v4 = vadd.f32 %v3453_v1, %v3421_v48  ;;  %v3657_v0 = vmul.f32 %v8714_v29, %v5727_v6 }
 0x396   :  { %11457 = vst [vmem:[#allocation29_spill] sm:$0xff] %v8791_v10  ;;  %v3949_v58 = vadd.f32 %v3917_v25, %v3885_v7  ;;  %v10920_v40 = vrot.slane %v8779_v36, 1  ;;  %v3561_v59 = vsel %vm6619_vm12, %v8766_v62, %v8791_v10  ;;  %v3315_v17 = vmul.f32 %v8304_v21, %v5735_v14  ;;  %v5432_v7 = vld [vmem:[#allocation2 + $0x28] sm:$0xff] }
 0x397   :  { %v11458_v49 = vrot.slane %v8779_v36, 7  ;;  %v3625_v52 = vadd.f32 %v3593_v31, %v3485_v4  ;;  %v3379_v24 = vmul.f32 %v5432_v7, %v5725_v5  ;;  %v11460_v25 = vsel %vm5979_vm8, %v8304_v21, %v8319_v44 }
 0x398   :  { %v3443_v60 = vmul.f32 %v11460_v25, %v5737_v15  ;;  %v8823_v39 = vadd.f32 %v11402_v61, %v4014_v42  ;;  %v8826_v26 = vadd.f32 %v11402_v61, %v4010_v18  ;;  %v8834_v4 = vsel %vm11463_vm4, %v10920_v40, %v10919_v37  ;;  %v11465_v40 = vld [vmem:[#allocation30_spill] sm:$0xff] }
 0x399   :  { %v8813_v1 = vsel %vm11459_vm15, %v10921_v19, %v11458_v49  ;;  %v3295_v21 = vsel %vm6798_vm3, %v8766_v62, %v8791_v10  ;;  %v3689_v44 = vadd.f32 %v3657_v0, %v3625_v52  ;;  %v3721_v42 = vmul.f32 %v3561_v59, %v5745_v20  ;;  %vm11485_vm15 = vmmov %vm11463_vm4 }
 0x39a   :  { %11461 = vst [vmem:[#allocation17_spill] sm:$0xff] %v8823_v39  ;;  %11462 = vst [vmem:[#allocation5_spill] sm:$0xff] %v8826_v26  ;;  %v3411_v31 = vadd.f32 %v3379_v24, %v3315_v17  ;;  %v3583_v18 = vmul.f32 %v8297_v23, %v5739_v16  ;;  %v4013_v49 = vadd.f32 %v3981_v30, %v3949_v58  ;;  %vm11466_vm10 = vnez %v11465_v40  ;;  %v5433_v17 = vld [vmem:[#allocation2 + $0x38] sm:$0xff]  ;;  %v8873_v39 = vld [vmem:[#allocation2 + $0xa8] sm:$0xff] }
 0x39b   :  { %v3329_v7 = vmul.f32 %v8813_v1, %v5735_v14  ;;  %v3384_v25 = vmul.f32 %v8472_v28, %v5725_v5  ;;  %v3448_v37 = vmul.f32 %v8513_v33, %v5737_v15  ;;  %v3297_v0 = vsel %vm11466_vm10, %v8813_v1, %v8834_v4  ;;  %11469 = vst [vmem:[#allocation26_spill] sm:$0xff] %v8873_v39  ;;  %v11521_v40 = vld [vmem:[#allocation78_spill] sm:$0xff] }
 0x39c   :  { %v3475_v59 = vadd.f32 %v3443_v60, %v3411_v31  ;;  %v3647_v52 = vmul.f32 %v5433_v17, %v5727_v6  ;;  %v3196_v58 = vrot.slane %v8689_v46, 1  ;;  %v3393_v30 = vmul.f32 %v8779_v36, %v5725_v5 }
 0x39d   :  { %v3861_v28 = vmul.f32 %v8813_v1, %v5778_v35  ;;  %v3416_v24 = vadd.f32 %v3384_v25, %v8559_v53  ;;  %v11467_v33 = vsel %vm11401_vm13, %v8609_v38, %v8603_v2  ;;  %v3753_v31 = vadd.f32 %v3721_v42, %v3689_v44 }
 0x39e   :  { %v3588_v60 = vmul.f32 %v11467_v33, %v5739_v16  ;;  %v3615_v19 = vadd.f32 %v3583_v18, %v3475_v59  ;;  %v11468_v17 = vsel %vm5979_vm8, %v8297_v23, %v8342_v54  ;;  %v3131_v10 = vrot.slane %v8553_v8, 7  ;;  %v8882_v18 = vld [vmem:[#allocation2 + $0xb0] sm:$0xff] }
 0x39f   :  { %v3711_v63 = vmul.f32 %v11468_v17, %v5745_v20  ;;  %v3457_v53 = vmul.f32 %v3297_v0, %v5737_v15  ;;  %v3829_v2 = vsel %vm6619_vm12, %v8813_v1, %v8834_v4  ;;  %v3480_v44 = vadd.f32 %v3448_v37, %v3416_v24  ;;  %11470 = vst [vmem:[#allocation30_spill] sm:$0xff] %v8882_v18  ;;  %vm11473_vm12 = vmmov %vm11463_vm4 }
 0x3a0   :  { %v3652_v42 = vmul.f32 %v8544_v55, %v5727_v6  ;;  %v3925_v23 = vmul.f32 %v8779_v36, %v5731_v11  ;;  %v3679_v54 = vadd.f32 %v3647_v52, %v3615_v19  ;;  %v11471_v25 = vrot.slane %v8689_v46, 7 }
 0x3a1   :  { %v11472_v59 = vrot.slane %v8691_v51, 1  ;;  %v3620_v34 = vadd.f32 %v3588_v60, %v3480_v44  ;;  %v3716_v24 = vmul.f32 %v8609_v38, %v5745_v20  ;;  %v10930_v19 = vrot.slane %v8873_v39, 7 }
 0x3a2   :  { %v8890_v0 = vsel %vm11443_vm2, %v3131_v10, %v11471_v25  ;;  %v3893_v52 = vadd.f32 %v3861_v28, %v3753_v31  ;;  %v3743_v17 = vadd.f32 %v3711_v63, %v3679_v54  ;;  %v10933_v26 = vrot.slane %v8882_v18, 1 }
 0x3a3   :  { %v8896_v37 = vsel %vm11473_vm12, %v3196_v58, %v11472_v59  ;;  %v3327_v25 = vmul.f32 %v8766_v62, %v5735_v14  ;;  %v3684_v50 = vadd.f32 %v3652_v42, %v3620_v34  ;;  %v10934_v44 = vrot.slane %v8873_v39, 1 }
 0x3a4   :  { %11474 = vst [vmem:[#allocation81_spill] sm:$0xff] %v8896_v37  ;;  %v3792_v60 = vsel %vm11401_vm13, %v8896_v37, %v8890_v0  ;;  %v3391_v59 = vmul.f32 %v8714_v29, %v5725_v5  ;;  %v3425_v33 = vadd.f32 %v3393_v30, %v3329_v7  ;;  %v3563_v63 = vsel %vm6798_vm3, %v8813_v1, %v8834_v4  ;;  %vm11476_vm13 = vmmov %vm11443_vm2 }
 0x3a5   :  { %v3851_v28 = vmul.f32 %v8653_v27, %v5778_v35  ;;  %v11475_v31 = vrot.slane %v8758_v43, 7  ;;  %v3989_v42 = vmul.f32 %v8211_v57, %v3829_v2  ;;  %v8933_v4 = vsel %vm11477_vm5, %v10934_v44, %v10933_v26 }
 0x3a6   :  { %v3423_v7 = vadd.f32 %v3391_v59, %v3327_v25  ;;  %v3455_v30 = vmul.f32 %v3295_v21, %v5737_v15  ;;  %v3957_v54 = vadd.f32 %v3925_v23, %v3893_v52  ;;  %v3748_v43 = vadd.f32 %v3716_v24, %v3684_v50  ;;  %v11478_v23 = vld [vmem:[#allocation45_spill] sm:$0xff]  ;;  %v11480_v52 = vld [vmem:[#allocation15_spill] sm:$0xff] }
 0x3a7   :  { %v8924_v22 = vsel %vm11476_vm13, %v11475_v31, %v10930_v19  ;;  %v3883_v34 = vadd.f32 %v3851_v28, %v3743_v17  ;;  %v3856_v62 = vmul.f32 %v3792_v60, %v5778_v35  ;;  %v3395_v2 = vmul.f32 %v8873_v39, %v5725_v5  ;;  %vm11500_vm13 = vmmov %vm11477_vm5 }
 0x3a8   :  { %v3331_v31 = vmul.f32 %v8924_v22, %v5735_v14  ;;  %v3487_v19 = vadd.f32 %v3455_v30, %v3423_v7  ;;  %v3595_v29 = vmul.f32 %v8813_v1, %v5739_v16  ;;  %v8944_v26 = vadd.f32 %v11402_v61, %v4013_v49 }
 0x3a9   :  { %v3819_v50 = vsel %vm5979_vm8, %v8653_v27, %v8639_v47  ;;  %v3915_v21 = vmul.f32 %v11395_v9, %v5731_v11  ;;  %vm11479_vm14 = vnez %v11478_v23  ;;  %vm11481_vm7 = vnez %v11480_v52  ;;  %vm11483_vm8 = vmmov %vm11443_vm2 }
 0x3aa   :  { %v3299_v24 = vsel %vm11479_vm14, %v8924_v22, %v8933_v4  ;;  %v3260_v1 = vsel %vm11481_vm7, %v8896_v37, %v8890_v0  ;;  %v3920_v49 = vmul.f32 %v8689_v46, %v5731_v11  ;;  %v3627_v17 = vadd.f32 %v3595_v29, %v3487_v19  ;;  %vm11495_vm12 = vmmov %vm11483_vm8 }
 0x3ab   :  { %v3659_v12 = vmul.f32 %v8779_v36, %v5727_v6  ;;  %v3947_v25 = vadd.f32 %v3915_v21, %v3883_v34  ;;  %v3888_v60 = vadd.f32 %v3856_v62, %v3748_v43  ;;  %v11482_v59 = vrot.slane %v8544_v55, 7  ;;  %v2195_v43 = vld [vmem:[%s10688_s9] sm:$0xf] }
 0x3ac   :  { %v11484_v7 = vrot.slane %v8553_v8, 1  ;;  %v3489_v44 = vadd.f32 %v3457_v53, %v3425_v33  ;;  %v4021_v52 = vadd.f32 %v3989_v42, %v3957_v54  ;;  %v3427_v29 = vadd.f32 %v3395_v2, %v3331_v31  ;;  %v2194_v31 = vpop.xlane.xlu0 %2193 }
 0x3ad   :  { %v8968_v28 = vsel %vm11483_vm8, %v11482_v59, %v3131_v10  ;;  %v3459_v19 = vmul.f32 %v3299_v24, %v5737_v15  ;;  %v3979_v62 = vmul.f32 %v8211_v57, %v3819_v50  ;;  %v3653_v53 = vmul.f32 %v8553_v8, %v5727_v6 }
 0x3ae   :  { %v8974_v30 = vsel %vm11485_vm15, %v11484_v7, %v3196_v58  ;;  %v3589_v58 = vmul.f32 %v8968_v28, %v5739_v16  ;;  %v8990_v33 = vmul.f32 %v3260_v1, %v5735_v14  ;;  %v3691_v42 = vadd.f32 %v3659_v12, %v3627_v17  ;;  %v9009_v12 = vld [vmem:[#allocation2 + $0xb8] sm:$0xff]  ;;  %v4114_v7 = vpop.permute.xlu1 %4113 }
 0x3af   :  { %v3723_v54 = vmul.f32 %v3563_v63, %v5745_v20  ;;  %v3557_v34 = vsel %vm11438_vm1, %v8968_v28, %v8974_v30  ;;  %v4011_v2 = vadd.f32 %v3979_v62, %v3947_v25  ;;  %v3952_v50 = vadd.f32 %v3920_v49, %v3888_v60  ;;  %11488 = vst [vmem:[#allocation83_spill] sm:$0xff] %v9009_v12  ;;  %v9016_v25 = vld [vmem:[#allocation2 + $0xc0] sm:$0xff] }
 0x3b0   :  { %11486 = vst [vmem:[#allocation45_spill] sm:$0xff] %v8990_v33  ;;  %v3984_v21 = vmul.f32 %v8211_v57, %v8896_v37  ;;  %v3621_v24 = vadd.f32 %v3589_v58, %v8782_v3  ;;  %v2196_v59 = vmul.f32 %v2195_v43, %v2194_v31  ;;  %v9001_v1 = vadd.f32 %v11402_v61, %v4021_v52 }
 0x3b1   :  { %v9003_v17 = vadd.f32 %v3459_v19, %v3427_v29  ;;  %v3565_v63 = vsel %vm11466_vm10, %v8924_v22, %v8933_v4  ;;  %v3831_v57 = vsel %vm6798_vm3, %v8924_v22, %v8933_v4  ;;  %v3717_v3 = vmul.f32 %v3557_v34, %v5745_v20  ;;  %11489 = vst [vmem:[#allocation84_spill] sm:$0xff] %v9016_v25 }
 0x3b2   :  { %11487 = vst [vmem:[#allocation82_spill] sm:$0xff] %v9001_v1  ;;  %v3685_v49 = vadd.f32 %v3653_v53, %v3621_v24  ;;  %v3597_v52 = vmul.f32 %v8924_v22, %v5739_v16  ;;  %v2197_v60 = vpack.c.bf16 %v2196_v59, %v2196_v59  ;;  %v3755_v29 = vadd.f32 %v3723_v54, %v3691_v42  ;;  %v9034_v42 = vld [vmem:[%s10683_s5 + $0x8] ss:$0 sm:$0xff]  ;;  %v4110_v59 = vpop.permute.xlu1 %4109  ;;  %v11527_v1 = vld [vmem:[#allocation37_spill] sm:$0xff] }
 0x3b3   :  { %v3863_v19 = vmul.f32 %v8924_v22, %v5778_v35  ;;  %v3927_v43 = vmul.f32 %v8873_v39, %v5731_v11  ;;  %v9025_v48 = vadd.f32 %v11402_v61, %v4011_v2  ;;  %v4016_v4 = vadd.f32 %v3984_v21, %v3952_v50  ;;  %v11492_v54 = vld [vmem:[#allocation24_spill] sm:$0xff] }
 0x3b4   :  { %v10936_v62 = vrot.slane %v8882_v18, 7  ;;  %v10935_v58 = vrot.slane %v9009_v12, 7  ;;  %vm11490_vm3 = vcmask 1041408   ;;  %v9037_v22 = vmul.f32 %v9034_v42, %v3831_v57 }
 0x3b5   :  { %5159 = vmatprep.subr.msk.bf16.mxu1 %vm11490_vm3, %v2197_v60  ;;  %vm11491_vm4 = vmmov %vm11490_vm3  ;;  %vm11493_vm2 = vnez %v11492_v54  ;;  %v10937_v31 = vrot.slane %v9016_v25, 1  ;;  %v3749_v2 = vadd.f32 %v3717_v3, %v3685_v49  ;;  %v3857_v50 = vmul.f32 %v8732_v41, %v5778_v35 }
 0x3b6   :  { %v2270_v53 = vsel %vm11491_vm4, %v2197_v60, 0  ;;  %v3629_v21 = vadd.f32 %v3597_v52, %v3489_v44  ;;  %v3661_v24 = vmul.f32 %v8873_v39, %v5727_v6  ;;  %v3895_v60 = vadd.f32 %v3863_v19, %v3755_v29  ;;  %v11496_v52 = vld [vmem:[#allocation23_spill] sm:$0xff]  ;;  %v11497_v29 = vld [vmem:[#allocation6_spill] sm:$0xff]  ;;  %v4116_v39 = vpop.permute.xlu1 %4115  ;;  %vm11534_vm4 = vmmov %vm11495_vm12 }
 0x3b7   :  { %5051 = vmatpush3.bf16.msra.mxu1 %v2270_v53  ;;  %v3825_v57 = vsel %vm11438_vm1, %v8732_v41, %v8742_v13  ;;  %v10938_v34 = vrot.slane %v9009_v12, 1  ;;  %v3725_v10 = vmul.f32 %v3565_v63, %v5745_v20  ;;  %v11494_v53 = vmov 0.0  }
 0x3b8   :  { %5118 = vmatprep.subr.bf16.mxu1 %v11494_v53  ;;  %v9056_v49 = vadd.f32 %v11402_v61, %v4016_v4  ;;  %v3921_v44 = vmul.f32 %v8691_v51, %v5731_v11  ;;  %v9066_v32 = vsel %vm11495_vm12, %v10936_v62, %v10935_v58  ;;  %v3693_v3 = vadd.f32 %v3661_v24, %v3629_v21  ;;  %v11501_v24 = vld [vmem:[#allocation10_spill] sm:$0xff]  ;;  %vm11536_vm12 = vmmov %vm11500_vm13 }
 0x3b9   :  { %v11498_v63 = vpack.c.bf16 %v11496_v52, %v11497_v29  ;;  %vm11499_vm1 = vcmask 31744   ;;  %v9078_v61 = vsel %vm11500_vm13, %v10938_v34, %v10937_v31  ;;  %v3865_v19 = vmul.f32 %v9066_v32, %v5778_v35  ;;  %v11502_v52 = vld [vmem:[#allocation9_spill] sm:$0xff] }
 0x3ba   :  { %v3319_v4 = vmul.f32 %v8653_v27, %v5735_v14  ;;  %v3383_v21 = vmul.f32 %v11395_v9, %v5725_v5  ;;  %v11503_v29 = vpack.c.bf16 %v11501_v24, %v11502_v52  ;;  %vm11504_vm5 = vmmov %vm11499_vm1  ;;  %v3985_v58 = vmul.f32 %v9034_v42, %v3825_v57  ;;  %v11507_v24 = vld [vmem:[#allocation73_spill] sm:$0xff] }
 0x3bb   :  { %5053 = vmatmul.mubr.msk.bf16.vlgmr.msra.gmra.mrb[0].mxu1 %vm11499_vm1, %v11498_v63  ;;  %v3889_v63 = vadd.f32 %v3857_v50, %v3749_v2  ;;  %v3757_v62 = vadd.f32 %v3725_v10, %v3693_v3  ;;  %v11506_v34 = vsel %vm11448_vm0, %v8653_v27, %v8639_v47  ;;  %v3959_v53 = vadd.f32 %v3927_v43, %v3895_v60  ;;  %v11508_v2 = vld [vmem:[#allocation79_spill] sm:$0xff]  ;;  %v11510_v10 = vld [vmem:[#allocation13_spill] sm:$0xff]  ;;  %v9113_v43 = vld [vmem:[#allocation2 + $0xc8] sm:$0xff] }
 0x3bc   :  { %5056 = vmatprep.mubr.msk.bf16.mxu1 %vm11504_vm5, %v11503_v29  ;;  %v3447_v18 = vmul.f32 %v11506_v34, %v5737_v15  ;;  %v3397_v9 = vmul.f32 %v9009_v12, %v5725_v5  ;;  %v3415_v33 = vadd.f32 %v3383_v21, %v3319_v4  ;;  %v3587_v52 = vmul.f32 %v11507_v24, %v5739_v16  ;;  %v11512_v3 = vld [vmem:[#allocation49_spill] sm:$0xff]  ;;  %vm11530_vm15 = vmmov %vm11499_vm1 }
 0x3bd   :  { %v9102_v50 = vmul.f32 %v4114_v7, %v11508_v2  ;;  %v9105_v57 = vmul.f32 %v4116_v39, %v11510_v10  ;;  %vm11513_vm8 = vnez %v11512_v3  ;;  %v3333_v27 = vmul.f32 %v9066_v32, %v5735_v14  ;;  %11514 = vst [vmem:[#allocation6_spill] sm:$0xff] %v9113_v43  ;;  %v9115_v34 = vld [vmem:[#allocation2 + $0xd0] sm:$0xff]  ;;  %v11516_v39 = vld [vmem:[#allocation31_spill] sm:$0xff]  ;;  %vm11531_vm3 = vmmov %vm11499_vm1 }
 0x3be   :  { %v3301_v47 = vsel %vm11513_vm8, %v9066_v32, %v9078_v61  ;;  %11515 = vst [vmem:[#allocation10_spill] sm:$0xff] %v9115_v34  ;;  %v3897_v60 = vadd.f32 %v3865_v19, %v3757_v62  ;;  %v3929_v7 = vmul.f32 %v9009_v12, %v5731_v11  ;;  %v3479_v4 = vadd.f32 %v3447_v18, %v3415_v33  ;;  %v4112_v19 = vpop.permute.xlu1 %4111  ;;  %v11517_v29 = vld [vmem:[#allocation21_spill] sm:$0xff]  ;;  %v11524_v18 = vld [vmem:[#allocation11_spill] sm:$0xff]  ;;  %vm11537_vm13 = vmmov %vm11499_vm1 }
 0x3bf   :  { %11509 = vst [vmem:[#allocation24_spill] sm:$0xff] %v9102_v50  ;;  %11511 = vst [vmem:[#allocation23_spill] sm:$0xff] %v9105_v57  ;;  %v3651_v21 = vmul.f32 %v11516_v39, %v5727_v6  ;;  %v3953_v2 = vadd.f32 %v3921_v44, %v3889_v63  ;;  %v3567_v10 = vsel %vm11479_vm14, %v9066_v32, %v9078_v61  ;;  %v11519_v63 = vld [vmem:[#allocation74_spill] sm:$0xff] }
 0x3c0   :  { %v3833_v62 = vsel %vm11466_vm10, %v9066_v32, %v9078_v61  ;;  %v3619_v36 = vadd.f32 %v3587_v52, %v3479_v4  ;;  %v9135_v44 = vmul.f32 %v4110_v59, %v11517_v29  ;;  %v9138_v13 = vmul.f32 %v4112_v19, %v11519_v63  ;;  %v11523_v4 = vld [vmem:[#allocation19_spill] sm:$0xff]  ;;  %vm11526_vm10 = vmmov %vm11499_vm1  ;;  %v11541_v39 = vld [vmem:[#allocation38_spill] sm:$0xff] }
 0x3c1   :  { %v11522_v61 = vsel %vm11448_vm0, %v11507_v24, %v11521_v40  ;;  %v3599_v52 = vmul.f32 %v9066_v32, %v5739_v16  ;;  %v11525_v33 = vpack.c.bf16 %v11523_v4, %v11524_v18  ;;  %v3961_v59 = vadd.f32 %v3929_v7, %v3897_v60  ;;  %v11528_v24 = vld [vmem:[#allocation36_spill] sm:$0xff] }
 0x3c2   :  { %11518 = vst [vmem:[#allocation9_spill] sm:$0xff] %v9135_v44  ;;  %11520 = vst [vmem:[#allocation35_spill] sm:$0xff] %v9138_v13  ;;  %v3715_v41 = vmul.f32 %v11522_v61, %v5745_v20  ;;  %v3993_v29 = vmul.f32 %v9034_v42, %v3833_v62  ;;  %v3683_v19 = vadd.f32 %v3651_v21, %v3619_v36  ;;  %v10948_v63 = vrot.slane %v9113_v43, 1  ;;  %v4122_v7 = vpop.permute.xlu1 %4121 }
 0x3c3   :  { %5057 = vmatmul.mubr.msk.bf16.gmra.mrb[4].mxu1 %vm11526_vm10, %v11525_v33  ;;  %v11529_v40 = vpack.c.bf16 %v11527_v1, %v11528_v24  ;;  %v4023_v32 = vadd.f32 %v9037_v22, %v3959_v53  ;;  %v3429_v61 = vadd.f32 %v3397_v9, %v3333_v27  ;;  %v3461_v18 = vmul.f32 %v3301_v47, %v5737_v15 }
 0x3c4   :  { %v4238_v60 = vsel %vm11531_vm3, %v9138_v13, 0.0  ;;  %v4017_v36 = vadd.f32 %v3985_v58, %v3953_v2  ;;  %v11532_v21 = vrot.slane %v9113_v43, 7  ;;  %v11533_v62 = vrot.slane %v9016_v25, 7  ;;  %vm11562_vm3 = vmmov %vm11536_vm12  ;;  %v9291_v25 = vld [vmem:[#allocation2 + $0xe0] sm:$0xff] }
 0x3c5   :  { %5060 = vmatprep.mubr.msk.bf16.mxu1 %vm11530_vm15, %v11529_v40  ;;  %v11535_v1 = vrot.slane %v9115_v34, 1  ;;  %v3747_v53 = vadd.f32 %v3715_v41, %v3683_v19  ;;  %v3855_v58 = vmul.f32 %v8968_v28, %v5778_v35  ;;  %v3631_v9 = vadd.f32 %v3599_v52, %v9003_v17  ;;  %v9196_v17 = vld [vmem:[%s10685_s6] ss:$0 sm:$0xff]  ;;  %vm11558_vm15 = vmmov %vm11534_vm4 }
 0x3c6   :  { %v9170_v33 = vsel %vm11534_vm4, %v11533_v62, %v11532_v21  ;;  %v3663_v47 = vmul.f32 %v9009_v12, %v5727_v6  ;;  %v4240_v27 = vsel %vm11499_vm1, %v9102_v50, 0.0  ;;  %v4237_v2 = vsel %vm11537_vm13, %v9135_v44, 0.0 }
 0x3c7   :  { %v9178_v22 = vsel %vm11536_vm12, %v10948_v63, %v11535_v1  ;;  %v4025_v4 = vadd.f32 %v3993_v29, %v3961_v59  ;;  %v3823_v41 = vsel %vm11448_vm0, %v8968_v28, %v8974_v30  ;;  %v4239_v19 = vadd.f32 %v4238_v60, %v4237_v2  ;;  %v4118_v29 = vpop.permute.xlu1 %4117  ;;  %vm11539_vm0 = vmmov %vm11499_vm1 }
 0x3c8   :  { %v9199_v52 = vadd.f32 %v9196_v17, %v4023_v32  ;;  %v9201_v24 = vadd.f32 %v3461_v18, %v3429_v61  ;;  %v3303_v59 = vsel %vm7327_vm9, %v9170_v33, %v9178_v22  ;;  %v9208_v31 = vadd.f32 %v9196_v17, %v4017_v36  ;;  %v11540_v36 = vld [vmem:[#allocation39_spill] sm:$0xff]  ;;  %vm11543_vm5 = vmmov %vm11539_vm0 }
 0x3c9   :  { %v3919_v60 = vmul.f32 %v8553_v8, %v5731_v11  ;;  %v3335_v21 = vmul.f32 %v9170_v33, %v5735_v14  ;;  %v3399_v32 = vmul.f32 %v9113_v43, %v5725_v5  ;;  %v3887_v61 = vadd.f32 %v3855_v58, %v3747_v53  ;;  %vm11549_vm10 = vmmov %vm11539_vm0 }
 0x3ca   :  { %v3983_v18 = vmul.f32 %v9034_v42, %v3823_v41  ;;  %v3695_v62 = vadd.f32 %v3663_v47, %v3631_v9  ;;  %v3727_v1 = vmul.f32 %v3567_v10, %v5745_v20  ;;  %v4242_v2 = vsel %vm11539_vm0, %v9105_v57, 0.0  ;;  %v11544_v9 = vld [vmem:[#allocation22_spill] sm:$0xff]  ;;  %v11546_v10 = vld [vmem:[#allocation41_spill] sm:$0xff]  ;;  %v11547_v41 = vld [vmem:[#allocation40_spill] sm:$0xff] }
 0x3cb   :  { %v11542_v63 = vpack.c.bf16 %v11540_v36, %v11541_v39  ;;  %v9225_v50 = vadd.f32 %v9196_v17, %v4025_v4  ;;  %v3463_v44 = vmul.f32 %v3303_v59, %v5737_v15  ;;  %v3386_v53 = vmul.f32 %v8544_v55, %v5725_v5  ;;  %v4126_v4 = vpop.permute.xlu0 %4125  ;;  %v11550_v59 = vld [vmem:[#allocation5_spill] sm:$0xff]  ;;  %v11552_v36 = vld [vmem:[#allocation70_spill] sm:$0xff]  ;;  %vm11563_vm4 = vmmov %vm11539_vm0 }
 0x3cc   :  { %v4241_v58 = vadd.f32 %v4240_v27, %v4239_v19  ;;  %v9231_v47 = vmul.f32 %v4122_v7, %v11544_v9  ;;  %v11548_v57 = vpack.c.bf16 %v11546_v10, %v11547_v41  ;;  %v3569_v39 = vsel %vm11513_vm8, %v9170_v33, %v9178_v22  ;;  %v4124_v27 = vpop.permute.xlu1 %4123  ;;  %vm11566_vm12 = vmmov %vm11539_vm0 }
 0x3cd   :  { %5061 = vmatmul.mubr.msk.bf16.gmra.mrb[8].mxu1 %vm11543_vm5, %v11542_v63  ;;  %v3450_v63 = vmul.f32 %v8609_v38, %v5737_v15  ;;  %v9244_v55 = vmul.f32 %v4118_v29, %v11550_v59  ;;  %v3431_v7 = vadd.f32 %v3399_v32, %v3335_v21  ;;  %v3867_v19 = vmul.f32 %v9170_v33, %v5778_v35  ;;  %v11555_v59 = vld [vmem:[#allocation18_spill] sm:$0xff]  ;;  %vm11574_vm13 = vmmov %vm11539_vm0 }
 0x3ce   :  { %11545 = vst [vmem:[#allocation73_spill] sm:$0xff] %v9231_v47  ;;  %5064 = vmatprep.mubr.msk.bf16.mxu1 %vm11549_vm10, %v11548_v57  ;;  %v3418_v9 = vadd.f32 %v3386_v53, %v11552_v36  ;;  %v9250_v57 = vmul.f32 %v4124_v27, %v8944_v26  ;;  %v3951_v10 = vadd.f32 %v3919_v60, %v3887_v61  ;;  %v11556_v13 = vrot.slane %v11555_v59, 7  ;;  %v11559_v53 = vld [vmem:[#allocation34_spill] sm:$0xff]  ;;  %v11564_v27 = vld [vmem:[#allocation17_spill] sm:$0xff]  ;;  %vm11579_vm5 = vmmov %vm11562_vm3 }
 0x3cf   :  { %11551 = vst [vmem:[#allocation79_spill] sm:$0xff] %v9244_v55  ;;  %v3759_v41 = vadd.f32 %v3727_v1, %v3695_v62  ;;  %v11554_v38 = vsel %vm11423_vm6, %v8896_v37, %v8890_v0  ;;  %v11557_v21 = vrot.slane %v8691_v51, 7  ;;  %v11560_v26 = vrot.slane %v11559_v53, 1  ;;  %vm11580_vm10 = vmmov %vm11558_vm15 }
 0x3d0   :  { %11553 = vst [vmem:[#allocation13_spill] sm:$0xff] %v9250_v57  ;;  %v3590_v29 = vmul.f32 %v11554_v38, %v5739_v16  ;;  %v11561_v60 = vrot.slane %v11555_v59, 1  ;;  %v3482_v62 = vadd.f32 %v3450_v63, %v3418_v9  ;;  %v3654_v0 = vmul.f32 %v8689_v46, %v5727_v6  ;;  %v4120_v9 = vpop.permute.xlu1 %4119  ;;  %v11576_v46 = vld [vmem:[#allocation47_spill] sm:$0xff] }
 0x3d1   :  { %v9264_v32 = vsel %vm11558_vm15, %v11557_v21, %v11556_v13  ;;  %v4248_v1 = vsel %vm11563_vm4, %v9231_v47, 0.0  ;;  %v9279_v36 = vmul.f32 %v4126_v4, %v11564_v27  ;;  %v3835_v38 = vsel %vm11479_vm14, %v9170_v33, %v9178_v22  ;;  %vm11571_vm14 = vmmov %vm11539_vm0 }
 0x3d2   :  { %v9272_v61 = vsel %vm11562_vm3, %v11561_v60, %v11560_v26  ;;  %v4243_v21 = vadd.f32 %v4242_v2, %v4241_v58  ;;  %v4244_v63 = vsel %vm11566_vm12, %v9244_v55, 0.0  ;;  %v3622_v26 = vadd.f32 %v3590_v29, %v3482_v62  ;;  %v9304_v2 = vld [vmem:[#allocation2 + $0xd8] sm:$0xff]  ;;  %v11568_v58 = vld [vmem:[#allocation44_spill] sm:$0xff]  ;;  %v11569_v29 = vld [vmem:[#allocation43_spill] sm:$0xff] }
 0x3d3   :  { %11565 = vst [vmem:[#allocation49_spill] sm:$0xff] %v9279_v36  ;;  %v3718_v60 = vmul.f32 %v8896_v37, %v5745_v20  ;;  %v9294_v4 = vmul.f32 %v4120_v9, %v9025_v48  ;;  %v9296_v27 = vadd.f32 %v3463_v44, %v3431_v7  ;;  %v3931_v23 = vmul.f32 %v9113_v43, %v5731_v11  ;;  %v11572_v44 = vld [vmem:[#allocation25_spill] sm:$0xff]  ;;  %v11575_v37 = vld [vmem:[#allocation48_spill] sm:$0xff]  ;;  %vm11583_vm15 = vmmov %vm11539_vm0 }
 0x3d4   :  { %v3794_v22 = vsel %vm11423_vm6, %v9272_v61, %v9264_v32  ;;  %v11570_v62 = vpack.c.bf16 %v11568_v58, %v11569_v29  ;;  %v4015_v13 = vadd.f32 %v3983_v18, %v3951_v10  ;;  %v3899_v48 = vadd.f32 %v3867_v19, %v3759_v41  ;;  %vm11578_vm6 = vmmov %vm11539_vm0  ;;  %v4130_v19 = vpop.permute.xlu1 %4129  ;;  %v4140_v29 = vpop.permute.xlu0 %4139 }
 0x3d5   :  { %11567 = vst [vmem:[#allocation31_spill] sm:$0xff] %v9294_v4  ;;  %vm11573_vm1 = vnez %v11572_v44  ;;  %v3686_v9 = vadd.f32 %v3654_v0, %v3622_v26  ;;  %v4245_v47 = vadd.f32 %v4244_v63, %v4243_v21  ;;  %v4246_v45 = vsel %vm11574_vm13, %v9294_v4, 0.0  ;;  %vm11587_vm3 = vmmov %vm11539_vm0 }
 0x3d6   :  { %5065 = vmatmul.mubr.msk.bf16.gmra.mrb[12].mxu1 %vm11571_vm14, %v11570_v62  ;;  %v3262_v7 = vsel %vm11573_vm1, %v9272_v61, %v9264_v32  ;;  %v11577_v58 = vpack.c.bf16 %v11575_v37, %v11576_v46  ;;  %v10960_v18 = vrot.slane %v9291_v25, 1  ;;  %v3858_v41 = vmul.f32 %v3794_v22, %v5778_v35  ;;  %vm11592_vm4 = vmmov %vm11539_vm0 }
 0x3d7   :  { %v3750_v10 = vadd.f32 %v3718_v60, %v3686_v9  ;;  %v10963_v0 = vrot.slane %v9115_v34, 7  ;;  %v10961_v21 = vrot.slane %v9304_v2, 7  ;;  %v9328_v63 = vsel %vm11539_vm0, %v9279_v36, 0.0  ;;  %v11598_v34 = vld [vmem:[#allocation16_spill] sm:$0xff]  ;;  %vm11600_vm12 = vmmov %vm11539_vm0 }
 0x3d8   :  { %5068 = vmatprep.mubr.msk.bf16.mxu1 %vm11578_vm6, %v11577_v58  ;;  %v3995_v26 = vmul.f32 %v9034_v42, %v3835_v38  ;;  %v10962_v46 = vrot.slane %v9304_v2, 1  ;;  %v3601_v37 = vmul.f32 %v9170_v33, %v5739_v16  ;;  %v4247_v62 = vadd.f32 %v4246_v45, %v4245_v47  ;;  %vm11601_vm14 = vmmov %vm11539_vm0 }
 0x3d9   :  { %v4054_v60 = vadd.f32 %v9196_v17, %v4015_v13  ;;  %v3963_v22 = vadd.f32 %v3931_v23, %v3899_v48  ;;  %v9336_v9 = vmul.f32 %v3262_v7, %v5735_v14  ;;  %v3665_v33 = vmul.f32 %v9113_v43, %v5727_v6  ;;  %v4132_v13 = vpop.permute.xlu1 %4131  ;;  %vm11607_vm6 = vmmov %vm11539_vm0 }
 0x3da   :  { %v9344_v38 = vsel %vm11579_vm5, %v10962_v46, %v10960_v18  ;;  %v3633_v58 = vadd.f32 %v3601_v37, %v9201_v24  ;;  %v3729_v47 = vmul.f32 %v3569_v39, %v5745_v20  ;;  %v3890_v23 = vadd.f32 %v3858_v41, %v3750_v10  ;;  %v4144_v18 = vpop.permute.xlu0 %4143  ;;  %v11585_v46 = vld [vmem:[#allocation51_spill] sm:$0xff]  ;;  %vm11616_vm5 = vmmov %vm11539_vm0 }
 0x3db   :  { %v3922_v48 = vmul.f32 %v11555_v59, %v5731_v11  ;;  %v9358_v7 = vsel %vm11580_vm10, %v10963_v0, %v10961_v21  ;;  %v3401_v24 = vmul.f32 %v9304_v2, %v5725_v5  ;;  %v9363_v45 = vmul.f32 %v4130_v19, %v9056_v49  ;;  %v11584_v21 = vld [vmem:[#allocation52_spill] sm:$0xff]  ;;  %vm11617_vm10 = vmmov %vm11539_vm0 }
 0x3dc   :  { %v9366_v39 = vmul.f32 %v4132_v13, %v9208_v31  ;;  %v3337_v10 = vmul.f32 %v9358_v7, %v5735_v14  ;;  %v3697_v41 = vadd.f32 %v3665_v33, %v3633_v58  ;;  %v4250_v37 = vsel %vm11583_vm15, %v9250_v57, 0.0  ;;  %v11589_v58 = vld [vmem:[#allocation56_spill] sm:$0xff]  ;;  %v11590_v33 = vld [vmem:[#allocation55_spill] sm:$0xff] }
 0x3dd   :  { %11581 = vst [vmem:[#allocation21_spill] sm:$0xff] %v9363_v45  ;;  %v4249_v12 = vadd.f32 %v4248_v1, %v4247_v62  ;;  %v11586_v0 = vpack.c.bf16 %v11584_v21, %v11585_v46  ;;  %v4027_v55 = vadd.f32 %v3995_v26, %v3963_v22  ;;  %v3305_v31 = vsel %vm7427_vm11, %v9358_v7, %v9344_v38  ;;  %v4128_v26 = vpop.permute.xlu1 %4127 }
 0x3de   :  { %11582 = vst [vmem:[#allocation74_spill] sm:$0xff] %v9366_v39  ;;  %v11591_v13 = vpack.c.bf16 %v11589_v58, %v11590_v33  ;;  %v3761_v1 = vadd.f32 %v3729_v47, %v3697_v41  ;;  %v3869_v21 = vmul.f32 %v9358_v7, %v5778_v35  ;;  %v3954_v46 = vadd.f32 %v3922_v48, %v3890_v23  ;;  %v11594_v58 = vld [vmem:[#allocation82_spill] sm:$0xff] }
 0x3df   :  { %5069 = vmatmul.mubr.msk.bf16.gmra.mrb[16].mxu1 %vm11587_vm3, %v11586_v0  ;;  %v3323_v0 = vmul.f32 %v8968_v28, %v5735_v14  ;;  %v3986_v62 = vmul.f32 %v9034_v42, %v9272_v61  ;;  %v3387_v22 = vmul.f32 %v8553_v8, %v5725_v5  ;;  %v11593_v47 = vsel %vm11493_vm2, %v8968_v28, %v8974_v30 }
 0x3e0   :  { %5072 = vmatprep.mubr.msk.bf16.mxu1 %vm11592_vm4, %v11591_v13  ;;  %v3451_v41 = vmul.f32 %v11593_v47, %v5737_v15  ;;  %v9401_v33 = vmul.f32 %v4140_v29, %v11594_v58  ;;  %v9403_v13 = vmul.f32 %v4128_v26, %v4054_v60  ;;  %v3433_v19 = vadd.f32 %v3401_v24, %v3337_v10  ;;  %v11599_v60 = vld [vmem:[#allocation68_spill] sm:$0xff]  ;;  %v4308_v24 = vld [vmem:[%s10686_s7] sm:$0x3]  ;;  %v4148_v10 = vpop.permute.xlu0 %4147  ;;  %vm11624_vm4 = vmmov %vm11539_vm0 }
 0x3e1   :  { %v3465_v23 = vmul.f32 %v3305_v31, %v5737_v15  ;;  %v4251_v48 = vadd.f32 %v4250_v37, %v4249_v12  ;;  %v3419_v4 = vadd.f32 %v3387_v22, %v3323_v0  ;;  %v3591_v43 = vmul.f32 %v11598_v34, %v5739_v16  ;;  %v11608_v58 = vld [vmem:[#allocation64_spill] sm:$0xff] }
 0x3e2   :  { %11595 = vst [vmem:[#allocation78_spill] sm:$0xff] %v9401_v33  ;;  %11596 = vst [vmem:[#allocation19_spill] sm:$0xff] %v9403_v13  ;;  %v3901_v30 = vadd.f32 %v3869_v21, %v3761_v1  ;;  %v3933_v29 = vmul.f32 %v9304_v2, %v5731_v11  ;;  %v3559_v12 = vsel %vm11493_vm2, %v11598_v34, %v11599_v60  ;;  %v9431_v0 = vsel %vm11600_vm12, %v9401_v33, 0.0 }
 0x3e3   :  { %v4018_v37 = vadd.f32 %v3986_v62, %v3954_v46  ;;  %v3837_v31 = vsel %vm11513_vm8, %v9358_v7, %v9344_v38  ;;  %v3483_v1 = vadd.f32 %v3451_v41, %v3419_v4  ;;  %v3655_v21 = vmul.f32 %v8691_v51, %v5727_v6  ;;  %v11602_v4 = vld [vmem:[#allocation60_spill] sm:$0xff]  ;;  %v11603_v62 = vld [vmem:[#allocation59_spill] sm:$0xff]  ;;  %vm11605_vm8 = vmmov %vm11539_vm0 }
 0x3e4   :  { %v4066_v34 = vadd.f32 %v9196_v17, %v4027_v55  ;;  %v9434_v26 = vadd.f32 %v3465_v23, %v3433_v19  ;;  %v3571_v46 = vsel %vm7327_vm9, %v9358_v7, %v9344_v38  ;;  %v4254_v3 = vsel %vm11601_vm14, %v9403_v13, 0.0  ;;  %v11609_v38 = vld [vmem:[#allocation63_spill] sm:$0xff]  ;;  %vm11629_vm12 = vmmov %vm11539_vm0 }
 0x3e5   :  { %v11604_v22 = vpack.c.bf16 %v11602_v4, %v11603_v62  ;;  %v3623_v51 = vadd.f32 %v3591_v43, %v3483_v1  ;;  %v3719_v47 = vmul.f32 %v3559_v12, %v5745_v20  ;;  %vm11606_vm13 = vcmask 1041408   ;;  %v9456_v62 = vld [vmem:[#allocation2 + $0xe8] sm:$0xff] }
 0x3e6   :  { %v4314_v55 = vsel %vm11606_vm13, %v4308_v24, 0  ;;  %v4256_v19 = vsel %vm11607_vm6, %v9363_v45, 0.0  ;;  %v4253_v41 = vadd.f32 %v9328_v63, %v4251_v48  ;;  %v11610_v23 = vpack.c.bf16 %v11608_v58, %v11609_v38  ;;  %v11612_v1 = vld [vmem:[#allocation76_spill] sm:$0xff]  ;;  %v11614_v58 = vld [vmem:[#allocation29_spill] sm:$0xff]  ;;  %vm11646_vm6 = vmmov %vm11539_vm0 }
 0x3e7   :  { %5073 = vmatmul.mubr.msk.bf16.gmra.mrb[20].mxu1 %vm11605_vm8, %v11604_v22  ;;  %v3965_v60 = vadd.f32 %v3933_v29, %v3901_v30  ;;  %v3997_v4 = vmul.f32 %v9034_v42, %v3837_v31  ;;  %v9459_v43 = vmul.f32 %v4144_v18, %v9199_v52  ;;  %v4057_v12 = vadd.f32 %v9196_v17, %v4018_v37  ;;  %v4152_v52 = vpop.permute.xlu0 %4151 }
 0x3e8   :  { %5076 = vmatprep.mubr.msk.bf16.mxu1 %vm11539_vm0, %v11610_v23  ;;  %5119 = vmatpush3.bf16.msra.mxu1 %v4314_v55  ;;  %v3687_v24 = vadd.f32 %v3655_v21, %v3623_v51  ;;  %v3859_v63 = vmul.f32 %v11612_v1, %v5778_v35  ;;  %v9465_v48 = vmul.f32 %v4148_v10, %v9225_v50  ;;  %v10974_v31 = vrot.slane %v9291_v25, 7  ;;  %v4134_v50 = vpop.permute.xlu1 %4133 }
 0x3e9   :  { %11611 = vst [vmem:[#allocation11_spill] sm:$0xff] %v9459_v43  ;;  %v4255_v22 = vadd.f32 %v4254_v3, %v4253_v41  ;;  %v3827_v30 = vsel %vm11493_vm2, %v11612_v1, %v11614_v58  ;;  %v3603_v29 = vmul.f32 %v9358_v7, %v5739_v16  ;;  %v3923_v37 = vmul.f32 %v11559_v53, %v5731_v11  ;;  %v9477_v3 = vld [vmem:[#allocation2 + $0xf0] sm:$0xff]  ;;  %vm11615_vm2 = vmmov %vm11539_vm0 }
 0x3ea   :  { %11613 = vst [vmem:[#allocation37_spill] sm:$0xff] %v9465_v48  ;;  %v3751_v18 = vadd.f32 %v3719_v47, %v3687_v24  ;;  %v10971_v21 = vrot.slane %v9456_v62, 7  ;;  %v4029_v10 = vadd.f32 %v3997_v4, %v3965_v60  ;;  %v3667_v54 = vmul.f32 %v9304_v2, %v5727_v6  ;;  %v11621_v58 = vld [vmem:[#allocation65_spill] sm:$0xff] }
 0x3eb   :  { %v3635_v51 = vadd.f32 %v3603_v29, %v9296_v27  ;;  %v3731_v7 = vmul.f32 %v3571_v46, %v5745_v20  ;;  %v3987_v47 = vmul.f32 %v9034_v42, %v3827_v30  ;;  %v10973_v41 = vrot.slane %v9456_v62, 1  ;;  %v11622_v30 = vld [vmem:[#allocation32_spill] sm:$0xff] }
 0x3ec   :  { %v3891_v55 = vadd.f32 %v3859_v63, %v3751_v18  ;;  %v10972_v38 = vrot.slane %v9477_v3, 1  ;;  %v9488_v23 = vsel %vm11615_vm2, %v9459_v43, 0.0  ;;  %v4258_v60 = vsel %vm11616_vm5, %v9366_v39, 0.0  ;;  %vm11653_vm2 = vmmov %vm11539_vm0 }
 0x3ed   :  { %v9494_v27 = vsel %vm11617_vm10, %v9465_v48, 0.0  ;;  %v3699_v4 = vadd.f32 %v3667_v54, %v3635_v51  ;;  %v9496_v46 = vmul.f32 %v4134_v50, %v4057_v12  ;;  %vm11619_vm15 = vcmp.lt.s32.totalorder %v5702_v56, 1  ;;  %v11626_v51 = vld [vmem:[#allocation67_spill] sm:$0xff]  ;;  %v11627_v54 = vld [vmem:[#allocation66_spill] sm:$0xff] }
 0x3ee   :  { %v3955_v24 = vadd.f32 %v3923_v37, %v3891_v55  ;;  %v3152_v1 = vsel %vm11619_vm15, %v10974_v31, %v10971_v21  ;;  %vm11620_vm3 = vcmp.lt.s32.totalorder %v5702_v56, 7  ;;  %v11623_v29 = vpack.c.bf16 %v11621_v58, %v11622_v30  ;;  %v4156_v21 = vpop.permute.xlu0 %4155  ;;  %v11631_v30 = vld [vmem:[#allocation81_spill] sm:$0xff]  ;;  %vm11637_vm8 = vmmov %vm11619_vm15 }
 0x3ef   :  { %11618 = vst [vmem:[#allocation36_spill] sm:$0xff] %v9496_v46  ;;  %v3215_v63 = vsel %vm11620_vm3, %v10973_v41, %v10972_v38  ;;  %v4257_v12 = vadd.f32 %v4256_v19, %v4255_v22  ;;  %v9514_v18 = vmul.f32 %v4152_v52, %v4066_v34  ;;  %v3763_v37 = vadd.f32 %v3731_v7, %v3699_v4  ;;  %v11630_v41 = vld [vmem:[#allocation75_spill] sm:$0xff]  ;;  %v4136_v34 = vpop.permute.xlu1 %4135  ;;  %v11632_v22 = vld [vmem:[#allocation61_spill] sm:$0xff]  ;;  %vm11641_vm13 = vmmov %vm11620_vm3 }
 0x3f0   :  { %5077 = vmatmul.mubr.msk.bf16.gmra.mrb[24].mxu1 %vm11624_vm4, %v11623_v29  ;;  %v3871_v50 = vmul.f32 %v3152_v1, %v5778_v35  ;;  %v11628_v55 = vpack.c.bf16 %v11626_v51, %v11627_v54  ;;  %v4068_v28 = vadd.f32 %v9196_v17, %v4029_v10  ;;  %v4019_v38 = vadd.f32 %v3987_v47, %v3955_v24  ;;  %v11634_v29 = vld [vmem:[#allocation69_spill] sm:$0xff]  ;;  %vm11658_vm10 = vmmov %vm11637_vm8 }
 0x3f1   :  { %11625 = vst [vmem:[#allocation53_spill] sm:$0xff] %v9514_v18  ;;  %v3388_v58 = vmul.f32 %v11630_v41, %v5725_v5  ;;  %v3452_v19 = vmul.f32 %v11631_v30, %v5737_v15  ;;  %vm11633_vm14 = vnez %v11632_v22  ;;  %v3339_v7 = vmul.f32 %v3152_v1, %v5735_v14  ;;  %v11638_v24 = vld [vmem:[#allocation77_spill] sm:$0xff]  ;;  %vm11659_vm15 = vmmov %vm11539_vm0 }
 0x3f2   :  { %5080 = vmatprep.mubr.msk.bf16.mxu1 %vm11629_vm12, %v11628_v55  ;;  %v3307_v52 = vsel %vm11633_vm14, %v3152_v1, %v3215_v63  ;;  %v3403_v4 = vmul.f32 %v9456_v62, %v5725_v5  ;;  %v11635_v51 = vrot.slane %v11634_v29, 7  ;;  %v11636_v10 = vrot.slane %v11559_v53, 7  ;;  %v11642_v31 = vld [vmem:[#allocation45_spill] sm:$0xff]  ;;  %vm11663_vm3 = vmmov %vm11637_vm8 }
 0x3f3   :  { %v4058_v41 = vadd.f32 %v9196_v17, %v4019_v38  ;;  %v11639_v54 = vrot.slane %v11638_v24, 1  ;;  %v11640_v55 = vrot.slane %v11634_v29, 1  ;;  %v3420_v8 = vadd.f32 %v3388_v58, %v11642_v31  ;;  %vm11667_vm4 = vmmov %vm11641_vm13 }
 0x3f4   :  { %v9537_v47 = vsel %vm11637_vm8, %v11636_v10, %v11635_v51  ;;  %v11643_v53 = vsel %vm11481_vm7, %v9272_v61, %v9264_v32  ;;  %v4259_v10 = vadd.f32 %v4258_v60, %v4257_v12  ;;  %v9555_v45 = vmul.f32 %v4156_v21, %v4068_v28  ;;  %vm11669_vm12 = vmmov %vm11667_vm4 }
 0x3f5   :  { %v9546_v30 = vsel %vm11641_vm13, %v11640_v55, %v11639_v54  ;;  %v3592_v51 = vmul.f32 %v11643_v53, %v5739_v16  ;;  %v3903_v38 = vadd.f32 %v3871_v50, %v3763_v37  ;;  %v3935_v39 = vmul.f32 %v9456_v62, %v5731_v11  ;;  %v11647_v37 = vld [vmem:[#allocation33_spill] sm:$0xff]  ;;  %v11648_v50 = vld [vmem:[#allocation14_spill] sm:$0xff]  ;;  %vm11677_vm8 = vmmov %vm11539_vm0 }
 0x3f6   :  { %11644 = vst [vmem:[#allocation39_spill] sm:$0xff] %v9555_v45  ;;  %v9559_v36 = vmul.f32 %v4136_v34, %v4058_v41  ;;  %v3839_v54 = vsel %vm7327_vm9, %v3152_v1, %v3215_v63  ;;  %v3484_v31 = vadd.f32 %v3452_v19, %v3420_v8  ;;  %v3656_v58 = vmul.f32 %v11555_v59, %v5727_v6  ;;  %vm11650_vm9 = vmmov %vm11539_vm0 }
 0x3f7   :  { %v3435_v55 = vadd.f32 %v3403_v4, %v3339_v7  ;;  %v3467_v32 = vmul.f32 %v3307_v52, %v5737_v15  ;;  %v3796_v28 = vsel %vm11481_vm7, %v9546_v30, %v9537_v47  ;;  %v3605_v21 = vmul.f32 %v3152_v1, %v5739_v16  ;;  %vm11679_vm13 = vmmov %vm11539_vm0 }
 0x3f8   :  { %11645 = vst [vmem:[#allocation38_spill] sm:$0xff] %v9559_v36  ;;  %v4260_v60 = vsel %vm11646_vm6, %v9496_v46, 0.0  ;;  %v3624_v8 = vadd.f32 %v3592_v51, %v3484_v31  ;;  %v3720_v12 = vmul.f32 %v9272_v61, %v5745_v20  ;;  %v11649_v19 = vpack.c.bf16 %v11647_v37, %v11648_v50  ;;  %vm11681_vm6 = vmmov %vm11663_vm3 }
 0x3f9   :  { %v9583_v57 = vsel %vm11539_vm0, %v9514_v18, 0.0  ;;  %v3573_v34 = vsel %vm7427_vm11, %v3152_v1, %v3215_v63  ;;  %v3967_v52 = vadd.f32 %v3935_v39, %v3903_v38  ;;  %v3999_v7 = vmul.f32 %v9034_v42, %v3839_v54  ;;  %v11655_v63 = vld [vmem:[#allocation8_spill] sm:$0xff]  ;;  %vm11686_vm0 = vmmov %vm11663_vm3 }
 0x3fa   :  { %5081 = vmatmul.mubr.msk.bf16.gmra.mrb[28].mxu1 %vm11650_vm9, %v11649_v19  ;;  %v11651_v4 = vmov 0.0   ;;  %vm11652_vm7 = vmmov 0   ;;  %v3688_v41 = vadd.f32 %v3656_v58, %v3624_v8  ;;  %v3860_v53 = vmul.f32 %v3796_v28, %v5778_v35  ;;  %v9614_v8 = vld [vmem:[#allocation2 + $0xf8] sm:$0xff] }
 0x3fb   :  { %5120 = vmatprep.mubr.msk.bf16.mxu1 %vm11652_vm7, %v11651_v4  ;;  %v3637_v51 = vadd.f32 %v3605_v21, %v9434_v26  ;;  %v3669_v31 = vmul.f32 %v9456_v62, %v5727_v6  ;;  %v4261_v37 = vadd.f32 %v4260_v60, %v4259_v10  ;;  %v9596_v50 = vsel %vm11653_vm2, %v9555_v45, 0.0  ;;  %v11657_v4 = vld [vmem:[#allocation27_spill] sm:$0xff]  ;;  %v11664_v45 = vld [vmem:[#allocation26_spill] sm:$0xff] }
 0x3fc   :  { %11654 = vst [vmem:[#allocation22_spill] sm:$0xff] %v9596_v50  ;;  %v3499_v1 = vadd.f32 %v3467_v32, %v3435_v55  ;;  %v10978_v39 = vrot.slane %v9477_v3, 7  ;;  %vm11656_vm5 = vnez %v11655_v63  ;;  %v3530_v26 = vsel %vm11573_vm1, %v9546_v30, %v9537_v47  ;;  %v11692_v63 = vld [vmem:[#allocation20_spill] sm:$0xff] }
 0x3fd   :  { %v3264_v38 = vsel %vm11656_vm5, %v9546_v30, %v9537_v47  ;;  %v3752_v54 = vadd.f32 %v3720_v12, %v3688_v41  ;;  %v3924_v10 = vmul.f32 %v11634_v29, %v5731_v11  ;;  %v3988_v58 = vmul.f32 %v9034_v42, %v9546_v30  ;;  %v9619_v47 = vld [vmem:[#allocation2 + $0x100] sm:$0xff] }
 0x3fe   :  { %v3701_v55 = vadd.f32 %v3669_v31, %v3637_v51  ;;  %v3733_v32 = vmul.f32 %v3573_v34, %v5745_v20  ;;  %v3390_v28 = vmul.f32 %v11555_v59, %v5725_v5  ;;  %v4031_v21 = vadd.f32 %v3999_v7, %v3967_v52  ;;  %v11660_v51 = vld [vmem:[#allocation71_spill] sm:$0xff] }
 0x3ff   :  { %v3892_v60 = vadd.f32 %v3860_v53, %v3752_v54  ;;  %v9617_v19 = vrot.slane %v9614_v8, 1  ;;  %v3454_v12 = vmul.f32 %v9272_v61, %v5737_v15  ;;  %v9628_v34 = vsel %vm11658_vm10, %v10978_v39, %v11657_v4  ;;  %v4160_v39 = vpop.permute.xlu0 %4159  ;;  %vm11700_vm10 = vmmov %vm11686_vm0 }
 0x400   :  { %v3422_v52 = vadd.f32 %v3390_v28, %v9336_v9  ;;  %v3594_v7 = vmul.f32 %v3530_v26, %v5739_v16  ;;  %v4262_v41 = vsel %vm11659_vm15, %v9559_v36, 0.0  ;;  %v3873_v61 = vmul.f32 %v9628_v34, %v5778_v35 }
 0x401   :  { %v3956_v53 = vadd.f32 %v3924_v10, %v3892_v60  ;;  %v11661_v31 = vrot.slane %v11660_v51, 7  ;;  %v11662_v54 = vrot.slane %v11638_v24, 7  ;;  %v3765_v59 = vadd.f32 %v3733_v32, %v3701_v55  ;;  %v4138_v32 = vpop.permute.xlu1 %4137 }
 0x402   :  { %v11665_v9 = vrot.slane %v11664_v45, 1  ;;  %v11666_v26 = vrot.slane %v11660_v51, 1  ;;  %v3486_v10 = vadd.f32 %v3454_v12, %v3422_v52  ;;  %v3658_v60 = vmul.f32 %v11634_v29, %v5727_v6 }
 0x403   :  { %v3161_v40 = vsel %vm11663_vm3, %v11662_v54, %v11661_v31  ;;  %v4070_v18 = vadd.f32 %v9196_v17, %v4031_v21  ;;  %v3328_v24 = vmul.f32 %v3264_v38, %v5735_v14  ;;  %v4020_v46 = vadd.f32 %v3988_v58, %v3956_v53 }
 0x404   :  { %v9649_v28 = vsel %vm11667_vm4, %v11666_v26, %v11665_v9  ;;  %v11668_v31 = vrot.slane %v9619_v47, 1  ;;  %v3626_v12 = vadd.f32 %v3594_v7, %v3486_v10  ;;  %v3722_v29 = vmul.f32 %v9546_v30, %v5745_v20 }
 0x405   :  { %v3798_v55 = vsel %vm11573_vm1, %v9649_v28, %v3161_v40  ;;  %v3607_v21 = vmul.f32 %v9628_v34, %v5739_v16  ;;  %v4263_v38 = vadd.f32 %v4262_v41, %v4261_v37  ;;  %v9667_v58 = vmul.f32 %v4160_v39, %v4070_v18  ;;  %vm11674_vm1 = vmmov %vm11667_vm4 }
 0x406   :  { %v3512_v54 = vsel %vm11669_vm12, %v9617_v19, %v11668_v31  ;;  %v4059_v44 = vadd.f32 %v9196_v17, %v4020_v46  ;;  %v3905_v53 = vadd.f32 %v3873_v61, %v3765_v59  ;;  %v3937_v9 = vmul.f32 %v9614_v8, %v5731_v11  ;;  %v11672_v31 = vld [vmem:[#allocation72_spill] sm:$0xff]  ;;  %v11675_v46 = vld [vmem:[#allocation42_spill] sm:$0xff]  ;;  %vm11682_vm9 = vmmov %vm11674_vm1 }
 0x407   :  { %11670 = vst [vmem:[#allocation41_spill] sm:$0xff] %v9667_v58  ;;  %v3841_v52 = vsel %vm7427_vm11, %v9628_v34, %v3512_v54  ;;  %v3690_v7 = vadd.f32 %v3658_v60, %v3626_v12  ;;  %v3862_v26 = vmul.f32 %v3798_v55, %v5778_v35  ;;  %v11673_v36 = vrot.slane %v11672_v31, 1  ;;  %v11680_v60 = vld [vmem:[#allocation28_spill] sm:$0xff]  ;;  %vm11690_vm7 = vmmov %vm11674_vm1 }
 0x408   :  { %v9676_v10 = vmul.f32 %v4138_v32, %v4059_v44  ;;  %v3575_v49 = vsel %vm11633_vm14, %v9628_v34, %v3512_v54  ;;  %vm11676_vm11 = vnez %v11675_v46  ;;  %v3926_v59 = vmul.f32 %v11660_v51, %v5731_v11  ;;  %vm11702_vm15 = vmmov %vm11674_vm1 }
 0x409   :  { %v9683_v18 = vsel %vm11674_vm1, %v9617_v19, %v11673_v36  ;;  %v3266_v37 = vsel %vm11676_vm11, %v9649_v28, %v3161_v40  ;;  %v3754_v39 = vadd.f32 %v3722_v29, %v3690_v7  ;;  %v3639_v41 = vadd.f32 %v3607_v21, %v3499_v1  ;;  %v5437_v21 = vld [vmem:[#allocation2 + $0x108] sm:$0xff]  ;;  %v9713_v7 = vld [vmem:[#allocation2 + $0x110] sm:$0xff]  ;;  %vm11704_vm3 = vmmov %vm11674_vm1 }
 0x40a   :  { %11671 = vst [vmem:[#allocation40_spill] sm:$0xff] %v9676_v10  ;;  %v3671_v61 = vmul.f32 %v9614_v8, %v5727_v6  ;;  %v9697_v36 = vsel %vm11677_vm8, %v9667_v58, 0.0  ;;  %v4001_v55 = vmul.f32 %v9034_v42, %v3841_v52  ;;  %v10986_v32 = vrot.slane %v9619_v47, 7  ;;  %v5438_v52 = vld [vmem:[#allocation2 + $0x90] sm:$0xff]  ;;  %vm11708_vm4 = vmmov %vm11686_vm0 }
 0x40b   :  { %11678 = vst [vmem:[#allocation5_spill] sm:$0xff] %v9697_v36  ;;  %v3969_v54 = vadd.f32 %v3937_v9, %v3905_v53  ;;  %v3532_v51 = vsel %vm11656_vm5, %v9649_v28, %v3161_v40  ;;  %v3894_v1 = vadd.f32 %v3862_v26, %v3754_v39  ;;  %v3990_v12 = vmul.f32 %v9034_v42, %v9649_v28  ;;  %vm11712_vm12 = vmmov %vm11674_vm1 }
 0x40c   :  { %v9709_v29 = vmul.f32 %v3266_v37, %v5735_v14  ;;  %v9711_v44 = vrot.slane %v5437_v21, 1  ;;  %v3392_v31 = vmul.f32 %v5438_v52, %v5725_v5  ;;  %v3456_v53 = vmul.f32 %v9546_v30, %v5737_v15 }
 0x40d   :  { %v3958_v9 = vadd.f32 %v3926_v59, %v3894_v1  ;;  %v3703_v40 = vadd.f32 %v3671_v61, %v3639_v41  ;;  %v3735_v26 = vmul.f32 %v3575_v49, %v5745_v20  ;;  %v10987_v39 = vrot.slane %v9713_v7, 1  ;;  %v4142_v61 = vpop.permute.xlu1 %4141  ;;  %v11683_v1 = vld [vmem:[#allocation30_spill] sm:$0xff] }
 0x40e   :  { %v4264_v37 = vsel %vm11679_vm13, %v9676_v10, 0.0  ;;  %v9727_v33 = vsel %vm11681_vm6, %v10986_v32, %v11680_v60  ;;  %v3424_v52 = vadd.f32 %v3392_v31, %v3328_v24  ;;  %v3596_v13 = vmul.f32 %v3532_v51, %v5739_v16  ;;  %v11687_v51 = vld [vmem:[#allocation83_spill] sm:$0xff] }
 0x40f   :  { %v4033_v30 = vadd.f32 %v4001_v55, %v3969_v54  ;;  %v4022_v59 = vadd.f32 %v3990_v12, %v3958_v9  ;;  %v3780_v49 = vsel %vm11682_vm9, %v9711_v44, %v10987_v39  ;;  %v3875_v41 = vmul.f32 %v9727_v33, %v5778_v35  ;;  %v5439_v9 = vld [vmem:[#allocation2 + $0xa0] sm:$0xff]  ;;  %vm11727_vm9 = vmmov %vm11686_vm0 }
 0x410   :  { %v11684_v10 = vrot.slane %v11683_v1, 7  ;;  %v11685_v32 = vrot.slane %v11664_v45, 7  ;;  %v11688_v55 = vrot.slane %v11687_v51, 1  ;;  %v11689_v54 = vrot.slane %v11683_v1, 1 }
 0x411   :  { %v3488_v31 = vadd.f32 %v3456_v53, %v3424_v52  ;;  %v3660_v39 = vmul.f32 %v5439_v9, %v5727_v6  ;;  %v4265_v36 = vadd.f32 %v4264_v37, %v4263_v38  ;;  %v4061_v58 = vadd.f32 %v9196_v17, %v4022_v59 }
 0x412   :  { %v3159_v24 = vsel %vm11686_vm0, %v11685_v32, %v11684_v10  ;;  %v9749_v12 = vsel %vm11690_vm7, %v11689_v54, %v11688_v55  ;;  %v3767_v60 = vadd.f32 %v3735_v26, %v3703_v40  ;;  %v3724_v32 = vmul.f32 %v9649_v28, %v5745_v20  ;;  %v4164_v26 = vpop.permute.xlu0 %4163 }
 0x413   :  { %v3800_v45 = vsel %vm11656_vm5, %v9749_v12, %v3159_v24  ;;  %v3628_v10 = vadd.f32 %v3596_v13, %v3488_v31  ;;  %v3341_v55 = vmul.f32 %v9628_v34, %v5735_v14  ;;  %v3405_v53 = vmul.f32 %v9614_v8, %v5725_v5  ;;  %v11694_v31 = vld [vmem:[#allocation46_spill] sm:$0xff] }
 0x414   :  { %v4072_v52 = vadd.f32 %v9196_v17, %v4033_v30  ;;  %v9763_v38 = vmul.f32 %v4142_v61, %v4061_v58  ;;  %v3609_v40 = vmul.f32 %v9727_v33, %v5739_v16  ;;  %vm11693_vm2 = vnez %v11692_v63 }
 0x415   :  { %v3309_v13 = vsel %vm11693_vm2, %v9628_v34, %v9683_v18  ;;  %v3843_v37 = vsel %vm11633_vm14, %v9727_v33, %v3780_v49  ;;  %v3939_v59 = vmul.f32 %v5437_v21, %v5731_v11  ;;  %v3692_v8 = vadd.f32 %v3660_v39, %v3628_v10  ;;  %vm11696_vm14 = vmmov %vm11677_vm8 }
 0x416   :  { %11691 = vst [vmem:[#allocation70_spill] sm:$0xff] %v9763_v38  ;;  %v3864_v30 = vmul.f32 %v3800_v45, %v5778_v35  ;;  %v4267_v58 = vadd.f32 %v9431_v0, %v4265_v36  ;;  %v3907_v54 = vadd.f32 %v3875_v41, %v3767_v60  ;;  %vm11695_vm5 = vnez %v11694_v31  ;;  %v9790_v45 = vld [vmem:[#allocation2 + $0x118] sm:$0xff]  ;;  %vm11722_vm8 = vmmov %vm11704_vm3 }
 0x417   :  { %v3268_v34 = vsel %vm11695_vm5, %v9749_v12, %v3159_v24  ;;  %v3756_v18 = vadd.f32 %v3724_v32, %v3692_v8  ;;  %v3928_v22 = vmul.f32 %v11683_v1, %v5731_v11  ;;  %v3437_v49 = vadd.f32 %v3405_v53, %v3341_v55 }
 0x418   :  { %v3469_v50 = vmul.f32 %v3309_v13, %v5737_v15  ;;  %v9785_v39 = vmul.f32 %v4164_v26, %v4072_v52  ;;  %v4268_v0 = vsel %vm11696_vm14, %v9763_v38, 0.0  ;;  %v10991_v36 = vrot.slane %v9713_v7, 7  ;;  %vm11736_vm14 = vmmov %vm11679_vm13 }
 0x419   :  { %v10990_v60 = vrot.slane %v9790_v45, 1  ;;  %v9794_v41 = vmul.f32 %v9034_v42, %v3843_v37  ;;  %v3332_v10 = vmul.f32 %v3268_v34, %v5735_v14  ;;  %v3896_v1 = vadd.f32 %v3864_v30, %v3756_v18  ;;  %v11698_v30 = vld [vmem:[#allocation80_spill] sm:$0xff] }
 0x41a   :  { %v3992_v32 = vmul.f32 %v9034_v42, %v9749_v12  ;;  %v9799_v55 = vadd.f32 %v3939_v59, %v3907_v54  ;;  %v3534_v53 = vsel %vm11676_vm11, %v9749_v12, %v3159_v24  ;;  %v3673_v52 = vmul.f32 %v5437_v21, %v5727_v6  ;;  %v11701_v24 = vld [vmem:[#allocation7_spill] sm:$0xff] }
 0x41b   :  { %v3394_v13 = vmul.f32 %v5439_v9, %v5725_v5  ;;  %v4269_v26 = vadd.f32 %v4268_v0, %v4267_v58  ;;  %v3960_v8 = vadd.f32 %v3928_v22, %v3896_v1  ;;  %v3501_v37 = vadd.f32 %v3469_v50, %v3437_v49  ;;  %v11703_v22 = vld [vmem:[#allocation3_spill] sm:$0xff]  ;;  %v4146_v1 = vpop.permute.xlu1 %4145 }
 0x41c   :  { %v9808_v34 = vmul.f32 %v9790_v45, %v5731_v11  ;;  %v11699_v18 = vrot.slane %v11698_v30, 7  ;;  %v9823_v21 = vsel %vm11702_vm15, %v10990_v60, %v11701_v24  ;;  %v3458_v9 = vmul.f32 %v9649_v28, %v5737_v15  ;;  %v11705_v30 = vld [vmem:[#allocation84_spill] sm:$0xff]  ;;  %v5441_v60 = vld [vmem:[#allocation2 + $0xb0] sm:$0xff] }
 0x41d   :  { %v3426_v50 = vadd.f32 %v3394_v13, %v9709_v29  ;;  %v4024_v58 = vadd.f32 %v3992_v32, %v3960_v8  ;;  %v3513_v49 = vsel %vm11704_vm3, %v9711_v44, %v11703_v22  ;;  %v3598_v0 = vmul.f32 %v3534_v53, %v5739_v16  ;;  %v11709_v32 = vld [vmem:[#allocation6_spill] sm:$0xff] }
 0x41e   :  { %11697 = vst [vmem:[#allocation18_spill] sm:$0xff] %v9808_v34  ;;  %v9816_v59 = vsel %vm11700_vm10, %v10991_v36, %v11699_v18  ;;  %v11706_v18 = vrot.slane %v11705_v30, 7  ;;  %v11707_v29 = vrot.slane %v11687_v51, 7  ;;  %v11710_v13 = vrot.slane %v11709_v32, 1 }
 0x41f   :  { %v9830_v54 = vmul.f32 %v9816_v59, %v5778_v35  ;;  %v11711_v8 = vrot.slane %v11705_v30, 1  ;;  %v3490_v61 = vadd.f32 %v3458_v9, %v3426_v50  ;;  %v3662_v22 = vmul.f32 %v5441_v60, %v5727_v6 }
 0x420   :  { %v3157_v28 = vsel %vm11708_vm4, %v11707_v29, %v11706_v18  ;;  %v4063_v53 = vadd.f32 %v9196_v17, %v4024_v58  ;;  %v4271_v36 = vadd.f32 %v9488_v23, %v4269_v26  ;;  %v3641_v38 = vadd.f32 %v3609_v40, %v3501_v37  ;;  %v11714_v23 = vld [vmem:[#allocation50_spill] sm:$0xff] }
 0x421   :  { %v3220_v24 = vsel %vm11712_vm12, %v11711_v8, %v11710_v13  ;;  %v3630_v29 = vadd.f32 %v3598_v0, %v3490_v61  ;;  %v3726_v43 = vmul.f32 %v9749_v12, %v5745_v20  ;;  %v3396_v50 = vmul.f32 %v5441_v60, %v5725_v5 }
 0x422   :  { %v3802_v51 = vsel %vm11676_vm11, %v3220_v24, %v3157_v28  ;;  %v3536_v18 = vsel %vm11695_vm5, %v3220_v24, %v3157_v28  ;;  %v9859_v9 = vmul.f32 %v4146_v1, %v4063_v53  ;;  %v3577_v58 = vsel %vm11693_vm2, %v9727_v33, %v3513_v49  ;;  %v11716_v1 = vld [vmem:[#allocation10_spill] sm:$0xff]  ;;  %vm11719_vm11 = vmmov %vm11686_vm0 }
 0x423   :  { %vm11715_vm1 = vnez %v11714_v23  ;;  %v3460_v46 = vmul.f32 %v9749_v12, %v5737_v15  ;;  %v3694_v26 = vadd.f32 %v3662_v22, %v3630_v29  ;;  %v3866_v61 = vmul.f32 %v3802_v51, %v5778_v35  ;;  %vm11730_vm0 = vmmov %vm11704_vm3 }
 0x424   :  { %11713 = vst [vmem:[#allocation34_spill] sm:$0xff] %v9859_v9  ;;  %v3270_v40 = vsel %vm11715_vm1, %v3220_v24, %v3157_v28  ;;  %v3930_v37 = vmul.f32 %v11705_v30, %v5731_v11  ;;  %v3428_v0 = vadd.f32 %v3396_v50, %v3332_v10  ;;  %v11717_v13 = vrot.slane %v11716_v1, 7  ;;  %vm11738_vm10 = vmmov %vm11730_vm0 }
 0x425   :  { %v11718_v33 = vrot.slane %v11709_v32, 7  ;;  %v11720_v28 = vrot.slane %v9304_v2, 1  ;;  %v11721_v12 = vrot.slane %v11716_v1, 1  ;;  %v3600_v22 = vmul.f32 %v3536_v18, %v5739_v16  ;;  %vm11742_vm3 = vmmov %vm11708_vm4 }
 0x426   :  { %v4272_v10 = vsel %vm11679_vm13, %v9859_v9, 0.0  ;;  %v3758_v53 = vadd.f32 %v3726_v43, %v3694_v26  ;;  %v3492_v51 = vadd.f32 %v3460_v46, %v3428_v0  ;;  %v3664_v32 = vmul.f32 %v11705_v30, %v5727_v6  ;;  %vm11745_vm12 = vmmov %vm11730_vm0 }
 0x427   :  { %v3155_v49 = vsel %vm11719_vm11, %v11718_v33, %v11717_v13  ;;  %v3218_v8 = vsel %vm11722_vm8, %v11721_v12, %v11720_v28  ;;  %v9890_v29 = vadd.f32 %v3673_v52, %v3641_v38  ;;  %v3334_v50 = vmul.f32 %v3270_v40, %v5735_v14  ;;  %v11723_v12 = vld [vmem:[#allocation54_spill] sm:$0xff]  ;;  %vm11752_vm11 = vmmov %vm11730_vm0 }
 0x428   :  { %v3994_v13 = vmul.f32 %v9034_v42, %v3220_v24  ;;  %v3804_v33 = vsel %vm11695_vm5, %v3218_v8, %v3155_v49  ;;  %v3898_v28 = vadd.f32 %v3866_v61, %v3758_v53  ;;  %vm11724_vm6 = vnez %v11723_v12  ;;  %vm11735_vm5 = vmmov %vm11708_vm4 }
 0x429   :  { %v3272_v18 = vsel %vm11724_vm6, %v3218_v8, %v3155_v49  ;;  %v3632_v60 = vadd.f32 %v3600_v22, %v3492_v51  ;;  %v3728_v43 = vmul.f32 %v3220_v24, %v5745_v20  ;;  %v4273_v46 = vadd.f32 %v4272_v10, %v4271_v36  ;;  %v11731_v51 = vld [vmem:[#allocation58_spill] sm:$0xff]  ;;  %vm11743_vm4 = vmmov %vm11679_vm13 }
 0x42a   :  { %v3538_v26 = vsel %vm11715_vm1, %v3218_v8, %v3155_v49  ;;  %v11725_v38 = vrot.slane %v9291_v25, 7  ;;  %v11726_v52 = vrot.slane %v9304_v2, 7  ;;  %v11728_v31 = vrot.slane %v9456_v62, 1  ;;  %vm11753_vm8 = vmmov %vm11743_vm4 }
 0x42b   :  { %v11729_v61 = vrot.slane %v9291_v25, 1  ;;  %v3962_v22 = vadd.f32 %v3930_v37, %v3898_v28  ;;  %v3696_v53 = vadd.f32 %v3664_v32, %v3632_v60  ;;  %v3868_v36 = vmul.f32 %v3804_v33, %v5778_v35  ;;  %v4150_v33 = vpop.permute.xlu1 %4149  ;;  %vm11756_vm13 = vmmov %vm11743_vm4 }
 0x42c   :  { %v3153_v40 = vsel %vm11727_vm9, %v11726_v52, %v11725_v38  ;;  %v3398_v49 = vmul.f32 %v11705_v30, %v5725_v5  ;;  %v9917_v10 = vmul.f32 %v3577_v58, %v5745_v20  ;;  %v3932_v2 = vmul.f32 %v11716_v1, %v5731_v11 }
 0x42d   :  { %v3216_v0 = vsel %vm11730_vm0, %v11729_v61, %v11728_v31  ;;  %vm11732_vm7 = vnez %v11731_v51  ;;  %v3462_v52 = vmul.f32 %v3220_v24, %v5737_v15  ;;  %v4026_v9 = vadd.f32 %v3994_v13, %v3962_v22 }
 0x42e   :  { %v3274_v38 = vsel %vm11732_vm7, %v3216_v0, %v3153_v40  ;;  %v3760_v31 = vadd.f32 %v3728_v43, %v3696_v53  ;;  %v3430_v37 = vadd.f32 %v3398_v49, %v3334_v50  ;;  %v3602_v60 = vmul.f32 %v3538_v26, %v5739_v16 }
 0x42f   :  { %v4275_v32 = vadd.f32 %v9494_v27, %v4273_v46  ;;  %v3336_v30 = vmul.f32 %v3272_v18, %v5735_v14  ;;  %v3996_v58 = vmul.f32 %v9034_v42, %v3218_v8  ;;  %v3666_v28 = vmul.f32 %v11716_v1, %v5727_v6 }
 0x430   :  { %v4065_v61 = vadd.f32 %v9196_v17, %v4026_v9  ;;  %v3900_v48 = vadd.f32 %v3868_v36, %v3760_v31  ;;  %v3494_v34 = vadd.f32 %v3462_v52, %v3430_v37  ;;  %v3806_v24 = vsel %vm11715_vm1, %v3216_v0, %v3153_v40  ;;  %v4154_v52 = vpop.permute.xlu1 %4153  ;;  %vm11749_vm1 = vmmov %vm11742_vm3 }
 0x431   :  { %v3338_v50 = vmul.f32 %v3274_v38, %v5735_v14  ;;  %v3540_v27 = vsel %vm11724_vm6, %v3216_v0, %v3153_v40  ;;  %v3730_v13 = vmul.f32 %v3218_v8, %v5745_v20  ;;  %v3400_v42 = vmul.f32 %v11716_v1, %v5725_v5 }
 0x432   :  { %v9939_v18 = vmul.f32 %v4150_v33, %v4065_v61  ;;  %v3964_v43 = vadd.f32 %v3932_v2, %v3900_v48  ;;  %v3634_v46 = vadd.f32 %v3602_v60, %v3494_v34  ;;  %v3934_v9 = vmul.f32 %v9291_v25, %v5731_v11  ;;  %v9965_v33 = vld [vmem:[%s10683_s5 + $0x8] ss:$0 sm:$0xff] }
 0x433   :  { %v3870_v23 = vmul.f32 %v3806_v24, %v5778_v35  ;;  %v11733_v26 = vrot.slane %v9477_v3, 7  ;;  %v11734_v22 = vrot.slane %v9456_v62, 7  ;;  %v3432_v53 = vadd.f32 %v3400_v42, %v3336_v30 }
 0x434   :  { %v3464_v36 = vmul.f32 %v3218_v8, %v5737_v15  ;;  %v4276_v1 = vsel %vm11736_vm14, %v9939_v18, 0.0  ;;  %v4028_v48 = vadd.f32 %v3996_v58, %v3964_v43  ;;  %v3698_v34 = vadd.f32 %v3666_v28, %v3634_v46  ;;  %v11739_v58 = vld [vmem:[#allocation62_spill] sm:$0xff] }
 0x435   :  { %v3151_v40 = vsel %vm11735_vm5, %v11734_v22, %v11733_v26  ;;  %v11737_v49 = vrot.slane %v9477_v3, 1  ;;  %v4277_v38 = vadd.f32 %v4276_v1, %v4275_v32  ;;  %v3604_v31 = vmul.f32 %v3540_v27, %v5739_v16 }
 0x436   :  { %v3496_v62 = vadd.f32 %v3464_v36, %v3432_v53  ;;  %v3668_v37 = vmul.f32 %v9291_v25, %v5727_v6  ;;  %v4067_v8 = vadd.f32 %v9196_v17, %v4028_v48  ;;  %v3762_v60 = vadd.f32 %v3730_v13, %v3698_v34 }
 0x437   :  { %v3214_v2 = vsel %vm11738_vm10, %v11737_v49, %v9617_v19  ;;  %v3998_v30 = vmul.f32 %v9965_v33, %v3216_v0  ;;  %v4279_v32 = vadd.f32 %v9583_v57, %v4277_v38  ;;  %vm11740_vm15 = vnez %v11739_v58 }
 0x438   :  { %v3808_v19 = vsel %vm11724_vm6, %v3214_v2, %v3151_v40  ;;  %v3276_v28 = vsel %vm11740_vm15, %v3214_v2, %v3151_v40  ;;  %v3636_v61 = vadd.f32 %v3604_v31, %v3496_v62  ;;  %v3732_v24 = vmul.f32 %v3216_v0, %v5745_v20  ;;  %vm11758_vm6 = vmmov %vm11743_vm4 }
 0x439   :  { %v9974_v27 = vmul.f32 %v4154_v52, %v4067_v8  ;;  %v3902_v13 = vadd.f32 %v3870_v23, %v3762_v60  ;;  %v3542_v42 = vsel %vm11732_vm7, %v3214_v2, %v3151_v40  ;;  %v3402_v43 = vmul.f32 %v9291_v25, %v5725_v5 }
 0x43a   :  { %v3700_v46 = vadd.f32 %v3668_v37, %v3636_v61  ;;  %v3872_v12 = vmul.f32 %v3808_v19, %v5778_v35  ;;  %v3466_v57 = vmul.f32 %v3216_v0, %v5737_v15  ;;  %v11741_v26 = vrot.slane %v9619_v47, 7 }
 0x43b   :  { %v4280_v23 = vsel %vm11743_vm4, %v9974_v27, 0.0  ;;  %v3966_v53 = vadd.f32 %v3934_v9, %v3902_v13  ;;  %v3434_v36 = vadd.f32 %v3402_v43, %v3338_v50  ;;  %v11744_v40 = vrot.slane %v9619_v47, 1 }
 0x43c   :  { %v3507_v22 = vsel %vm11742_vm3, %v11657_v4, %v11741_v26  ;;  %v4281_v1 = vadd.f32 %v4280_v23, %v4279_v32  ;;  %v3764_v48 = vadd.f32 %v3732_v24, %v3700_v46  ;;  %v3936_v0 = vmul.f32 %v9477_v3, %v5731_v11  ;;  %v4158_v4 = vpop.permute.xlu1 %4157  ;;  %v11748_v46 = vld [vmem:[#allocation28_spill] sm:$0xff] }
 0x43d   :  { %v3511_v25 = vsel %vm11745_vm12, %v11744_v40, %v9711_v44  ;;  %v3606_v34 = vmul.f32 %v3542_v42, %v5739_v16  ;;  %v4030_v49 = vadd.f32 %v3998_v30, %v3966_v53  ;;  %v3340_v38 = vmul.f32 %v3276_v28, %v5735_v14  ;;  %v11746_v30 = vld [vmem:[#allocation22_spill] sm:$0xff] }
 0x43e   :  { %v3498_v52 = vadd.f32 %v3466_v57, %v3434_v36  ;;  %v3670_v50 = vmul.f32 %v9477_v3, %v5727_v6  ;;  %v3904_v9 = vadd.f32 %v3872_v12, %v3764_v48  ;;  %v4000_v62 = vmul.f32 %v9965_v33, %v3214_v2 }
 0x43f   :  { %v3544_v44 = vsel %vm11740_vm15, %v3511_v25, %v3507_v22  ;;  %v3810_v31 = vsel %vm11732_vm7, %v3511_v25, %v3507_v22  ;;  %v3769_v37 = vadd.f32 %v9917_v10, %v9890_v29  ;;  %v4069_v8 = vadd.f32 %v9196_v17, %v4030_v49  ;;  %v11755_v49 = vld [vmem:[#allocation5_spill] sm:$0xff] }
 0x440   :  { %v3638_v60 = vadd.f32 %v3606_v34, %v3498_v52  ;;  %v3734_v14 = vmul.f32 %v3214_v2, %v5745_v20  ;;  %v4283_v19 = vadd.f32 %v11746_v30, %v4281_v1  ;;  %v3968_v32 = vadd.f32 %v3936_v0, %v3904_v9  ;;  %v4162_v26 = vpop.permute.xlu1 %4161 }
 0x441   :  { %v3404_v28 = vmul.f32 %v9477_v3, %v5725_v5  ;;  %v3468_v61 = vmul.f32 %v3214_v2, %v5737_v15  ;;  %v10013_v24 = vmul.f32 %v4158_v4, %v4069_v8  ;;  %v3608_v51 = vmul.f32 %v3544_v44, %v5739_v16  ;;  %v11754_v3 = vld [vmem:[#allocation41_spill] sm:$0xff] }
 0x442   :  { %v3702_v13 = vadd.f32 %v3670_v50, %v3638_v60  ;;  %v3874_v29 = vmul.f32 %v3810_v31, %v5778_v35  ;;  %v4032_v10 = vadd.f32 %v4000_v62, %v3968_v32  ;;  %v11747_v43 = vrot.slane %v9713_v7, 7  ;;  %v11757_v31 = vld [vmem:[#allocation18_spill] sm:$0xff] }
 0x443   :  { %v3436_v42 = vadd.f32 %v3404_v28, %v3340_v38  ;;  %v11750_v57 = vrot.slane %v9790_v45, 1  ;;  %v11751_v5 = vrot.slane %v9713_v7, 1  ;;  %v4284_v16 = vsel %vm11753_vm8, %v10013_v24, 0.0 }
 0x444   :  { %v3775_v12 = vsel %vm11749_vm1, %v11748_v46, %v11747_v43  ;;  %v4379_v2 = vpack.c.bf16 %v11754_v3, %v10013_v24  ;;  %v3766_v22 = vadd.f32 %v3734_v14, %v3702_v13  ;;  %v3938_v23 = vmul.f32 %v9619_v47, %v5731_v11  ;;  %v4874_v3 = vld [vmem:[%s10680_s0 + $0x100] sm:$0xff] }
 0x445   :  { %v3779_v15 = vsel %vm11752_vm11, %v11751_v5, %v11750_v57  ;;  %v4285_v53 = vadd.f32 %v4284_v16, %v4283_v19  ;;  %v4071_v36 = vadd.f32 %v9196_v17, %v4032_v10  ;;  %v3500_v45 = vadd.f32 %v3468_v61, %v3436_v42 }
 0x446   :  { %v3672_v40 = vmul.f32 %v9619_v47, %v5727_v6  ;;  %v3909_v1 = vadd.f32 %v9830_v54, %v3769_v37  ;;  %v3906_v48 = vadd.f32 %v3874_v29, %v3766_v22  ;;  %v4002_v0 = vmul.f32 %v9965_v33, %v3511_v25 }
 0x447   :  { %v3812_v34 = vsel %vm11740_vm15, %v3779_v15, %v3775_v12  ;;  %v4287_v4 = vadd.f32 %v11755_v49, %v4285_v53  ;;  %v10042_v38 = vmul.f32 %v4162_v26, %v4071_v36  ;;  %v3640_v52 = vadd.f32 %v3608_v51, %v3500_v45  ;;  %v11764_v49 = vld [vmem:[#allocation35_spill] sm:$0xff] }
 0x448   :  { %v3736_v50 = vmul.f32 %v3511_v25, %v5745_v20  ;;  %v4035_v17 = vadd.f32 %v9794_v41, %v9799_v55  ;;  %v3970_v9 = vadd.f32 %v3938_v23, %v3906_v48  ;;  %v3876_v58 = vmul.f32 %v3812_v34, %v5778_v35  ;;  %v4168_v25 = vpop.permute.xlu0 %4167  ;;  %v4166_v55 = vpop.permute.xlu1 %4165  ;;  %v5443_v35 = vld [vmem:[%s10685_s6] ss:$0 sm:$0xff] }
 0x449   :  { %v4288_v6 = vsel %vm11756_vm13, %v10042_v38, 0.0  ;;  %v4380_v47 = vpack.c.bf16 %v9785_v39, %v10042_v38  ;;  %v3704_v54 = vadd.f32 %v3672_v40, %v3640_v52  ;;  %v3845_v62 = vsel %vm11693_vm2, %v9816_v59, %v9823_v21  ;;  %vm11759_vm2 = vmmov %vm11743_vm4 }
 0x44a   :  { %v4289_v44 = vadd.f32 %v4288_v6, %v4287_v4  ;;  %v4034_v20 = vadd.f32 %v4002_v0, %v3970_v9  ;;  %v3973_v41 = vadd.f32 %v11757_v31, %v3909_v1  ;;  %v3940_v8 = vmul.f32 %v9713_v7, %v5731_v11  ;;  %vm11760_vm9 = vmmov %vm11759_vm2  ;;  %v11765_v4 = vld [vmem:[#allocation9_spill] sm:$0xff] }
 0x44b   :  { %v3768_v37 = vadd.f32 %v3736_v50, %v3704_v54  ;;  %v4290_v60 = vsel %vm11758_vm6, %v9785_v39, 0.0  ;;  %v4074_v14 = vadd.f32 %v5443_v35, %v4035_v17  ;;  %v4005_v59 = vmul.f32 %v9965_v33, %v3845_v62  ;;  %vm11761_vm0 = vmmov %vm11759_vm2  ;;  %v10094_v50 = vld [vmem:[%s10689_s10] ss:$0 sm:$0xff]  ;;  %v2435_v9 = vld [vmem:[%s10680_s0 + $0x10] sm:$0xff] }
 0x44c   :  { %v4073_v63 = vadd.f32 %v5443_v35, %v4034_v20  ;;  %v4291_v21 = vadd.f32 %v4290_v60, %v4289_v44  ;;  %v4004_v19 = vmul.f32 %v9965_v33, %v3779_v15  ;;  %v4172_v10 = vpop.permute.xlu0 %4171  ;;  %v4170_v42 = vpop.permute.xlu1 %4169  ;;  %vm11762_vm7 = vmmov %vm11761_vm0  ;;  %v11766_v52 = vpack.c.bf16 %v11764_v49, %v11765_v4  ;;  %v2436_v20 = vld [vmem:[%s10680_s0 + $0x18] sm:$0xff] }
 0x44d   :  { %v3908_v30 = vadd.f32 %v3876_v58, %v3768_v37  ;;  %v10066_v32 = vmul.f32 %v4168_v25, %v4074_v14  ;;  %v4037_v11 = vadd.f32 %v4005_v59, %v3973_v41  ;;  %vm11763_vm5 = vmmov %vm11761_vm0  ;;  %v2433_v58 = vld [vmem:[%s10680_s0] sm:$0xff] }
 0x44e   :  { %v10068_v28 = vmul.f32 %v4166_v55, %v4073_v63  ;;  %vm11767_vm14 = vmmov %vm11761_vm0  ;;  %v2434_v55 = vld [vmem:[%s10680_s0 + $0x8] sm:$0xff]  ;;  %v2439_v63 = vld [vmem:[%s10680_s0 + $0x30] sm:$0xff] }
 0x44f   :  { %v3972_v7 = vadd.f32 %v3940_v8, %v3908_v30  ;;  %v4294_v43 = vsel %vm11760_vm9, %v10066_v32, 0.0  ;;  %v4076_v33 = vadd.f32 %v5443_v35, %v4037_v11  ;;  %vm11768_vm10 = vmmov %vm11761_vm0  ;;  %v2437_v30 = vld [vmem:[%s10680_s0 + $0x20] sm:$0xff] }
 0x450   :  { %v4292_v61 = vsel %vm11759_vm2, %v10068_v28, 0.0  ;;  %v4381_v51 = vpack.c.bf16 %v10066_v32, %v10068_v28  ;;  %vm11769_vm15 = vmmov %vm11761_vm0 }
 0x451   :  { %v4293_v13 = vadd.f32 %v4292_v61, %v4291_v21  ;;  %v4036_v29 = vadd.f32 %v4004_v19, %v3972_v7  ;;  %v10076_v57 = vmul.f32 %v4172_v10, %v4076_v33  ;;  %vm11770_vm3 = vmmov %vm11761_vm0  ;;  %v2440_v7 = vld [vmem:[%s10680_s0 + $0x38] sm:$0xff]  ;;  %v2438_v10 = vld [vmem:[%s10680_s0 + $0x28] sm:$0xff] }
 0x452   :  { %vm11771_vm4 = vmmov %vm11761_vm0 }
 0x453   :  { %v4075_v46 = vadd.f32 %v5443_v35, %v4036_v29  ;;  %v4295_v12 = vadd.f32 %v4294_v43, %v4293_v13  ;;  %v4298_v22 = vsel %vm11762_vm7, %v10076_v57, 0.0  ;;  %vm11772_vm12 = vmmov %vm11761_vm0 }
 0x454   :  { %vm11773_vm1 = vmmov %vm11761_vm0 }
 0x455   :  { %v10078_v5 = vmul.f32 %v4170_v42, %v4075_v46  ;;  %vm11774_vm11 = vmmov %vm11761_vm0 }
 0x456   :  { %vm11775_vm8 = vmmov %vm11761_vm0 }
 0x457   :  { %v4296_v15 = vsel %vm11761_vm0, %v10078_v5, 0.0  ;;  %v4382_v16 = vpack.c.bf16 %v10076_v57, %v10078_v5  ;;  %vm11776_vm13 = vmmov %vm11761_vm0  ;;  %v4875_v57 = vld [vmem:[%s10680_s0 + $0x108] sm:$0xff] }
 0x458   :  { %v4297_v26 = vadd.f32 %v4296_v15, %v4295_v12  ;;  %v2443_v15 = vld [vmem:[%s10680_s0 + $0x50] sm:$0xff]  ;;  %vm11777_vm6 = vmmov %vm11761_vm0 }
 0x459   :  { %vm11778_vm2 = vmmov %vm11761_vm0 }
 0x45a   :  { %v4299_v23 = vadd.f32 %v4298_v22, %v4297_v26  ;;  %vm11779_vm9 = vmmov %vm11761_vm0 }
 0x45b   :  { %vm11780_vm7 = vmmov %vm11761_vm0 }
 0x45c   :  { %v4300_v53 = vrot.slane %v4299_v23, 4 }
 0x45e   :  { %v4301_v36 = vadd.f32 %v4300_v53, %v4299_v23  ;;  %v2441_v23 = vld [vmem:[%s10680_s0 + $0x40] sm:$0xff] }
 0x460   :  { %v4302_v45 = vrot.slane %v4301_v36, 2 }
 0x462   :  { %v4303_v40 = vadd.f32 %v4302_v45, %v4301_v36  ;;  %v2444_v45 = vld [vmem:[%s10680_s0 + $0x58] sm:$0xff] }
 0x464   :  { %v4304_v1 = vrot.slane %v4303_v40, 1 }
 0x466   :  { %v4305_v48 = vadd.f32 %v4304_v1, %v4303_v40 }
 0x468   :  { %v4306_v0 = vmul.f32 0.00390625, %v4305_v48 }
 0x46a   :  { %v4307_v34 = vpack.c.bf16 %v4306_v0, %v4306_v0  ;;  %v2442_v0 = vld [vmem:[%s10680_s0 + $0x48] sm:$0xff] }
 0x46c   :  { %5121 = vmatmul.mubr.msk.bf16.vlgmr.msra.gmra.mrb[32].mxu1 %vm11763_vm5, %v4307_v34  ;;  %vm11781_vm5 = vmmov %vm11761_vm0 }
 0x46d   :  { %5126 = vmatprep.mubr.msk.bf16.mxu1 %vm11767_vm14, %v11766_v52  ;;  %vm11782_vm14 = vmmov %vm11761_vm0 }
 0x48e   :  { %v5054_v17 = vpop.f32.mrb[0].mxu1 }
 0x48f   :  { %v2315_v6 = vadd.f32 %v5054_v17, %v10094_v50  ;;  %v2306_v54 = vpop.f32.mrb[1].mxu1 }
 0x490   :  { %v2307_v62 = vadd.f32 %v10094_v50, %v2306_v54  ;;  %v5055_v44 = vpop.f32.mrb[2].mxu1 }
 0x491   :  { %v2467_v25 = vadd.f32 %v2435_v9, %v2315_v6  ;;  %v2318_v31 = vadd.f32 %v5055_v44, %v10094_v50  ;;  %v2309_v41 = vpop.f32.mrb[3].mxu1  ;;  %v2447_v9 = vld [vmem:[%s10680_s0 + $0x70] sm:$0xff] }
 0x492   :  { %v2465_v37 = vadd.f32 %v2433_v58, %v2307_v62  ;;  %v2310_v8 = vadd.f32 %v10094_v50, %v2309_v41  ;;  %v2445_v58 = vld [vmem:[%s10680_s0 + $0x60] sm:$0xff] }
 0x493   :  { %2499 = vst.msk [vmem:[%s10690_s11 + $0x10] sm:$0xff] %vm11768_vm10, %v2467_v25  ;;  %v2468_v60 = vadd.f32 %v2436_v20, %v2318_v31  ;;  %v2448_v20 = vld [vmem:[%s10680_s0 + $0x78] sm:$0xff]  ;;  %vm11783_vm10 = vmmov %vm11761_vm0 }
 0x494   :  { %2497 = vst.msk [vmem:[%s10690_s11] sm:$0xff] %vm11769_vm15, %v2465_v37  ;;  %v2466_v35 = vadd.f32 %v2434_v55, %v2310_v8  ;;  %v2446_v55 = vld [vmem:[%s10680_s0 + $0x68] sm:$0xff]  ;;  %vm11784_vm15 = vmmov %vm11761_vm0 }
 0x495   :  { %2500 = vst.msk [vmem:[%s10690_s11 + $0x18] sm:$0xff] %vm11770_vm3, %v2468_v60  ;;  %vm11785_vm3 = vmmov %vm11761_vm0 }
 0x496   :  { %2498 = vst.msk [vmem:[%s10690_s11 + $0x8] sm:$0xff] %vm11771_vm4, %v2466_v35  ;;  %v5058_v14 = vpop.f32.mrb[4].mxu1  ;;  %vm11786_vm4 = vmmov %vm11761_vm0 }
 0x497   :  { %v2331_v59 = vadd.f32 %v5058_v14, %v10094_v50  ;;  %v2322_v21 = vpop.f32.mrb[5].mxu1 }
 0x498   :  { %v2323_v19 = vadd.f32 %v10094_v50, %v2322_v21  ;;  %v5059_v11 = vpop.f32.mrb[6].mxu1 }
 0x499   :  { %v2471_v61 = vadd.f32 %v2439_v63, %v2331_v59  ;;  %v2334_v13 = vadd.f32 %v5059_v11, %v10094_v50  ;;  %v2325_v29 = vpop.f32.mrb[7].mxu1  ;;  %v2451_v63 = vld [vmem:[%s10680_s0 + $0x90] sm:$0xff] }
 0x49a   :  { %v2469_v42 = vadd.f32 %v2437_v30, %v2323_v19  ;;  %v2326_v43 = vadd.f32 %v10094_v50, %v2325_v29  ;;  %v2449_v30 = vld [vmem:[%s10680_s0 + $0x80] sm:$0xff] }
 0x49b   :  { %2503 = vst.msk [vmem:[%s10690_s11 + $0x30] sm:$0xff] %vm11772_vm12, %v2471_v61  ;;  %v2472_v33 = vadd.f32 %v2440_v7, %v2334_v13  ;;  %v2452_v7 = vld [vmem:[%s10680_s0 + $0x98] sm:$0xff]  ;;  %vm11787_vm12 = vmmov %vm11761_vm0 }
 0x49c   :  { %2501 = vst.msk [vmem:[%s10690_s11 + $0x20] sm:$0xff] %vm11773_vm1, %v2469_v42  ;;  %v2470_v46 = vadd.f32 %v2438_v10, %v2326_v43  ;;  %v2450_v10 = vld [vmem:[%s10680_s0 + $0x88] sm:$0xff]  ;;  %vm11788_vm1 = vmmov %vm11761_vm0 }
 0x49d   :  { %2504 = vst.msk [vmem:[%s10690_s11 + $0x38] sm:$0xff] %vm11774_vm11, %v2472_v33  ;;  %vm11789_vm11 = vmmov %vm11761_vm0 }
 0x49e   :  { %2502 = vst.msk [vmem:[%s10690_s11 + $0x28] sm:$0xff] %vm11775_vm8, %v2470_v46  ;;  %vm11790_vm8 = vmmov %vm11761_vm0 }
 0x4a0   :  { %v5062_v12 = vpop.f32.mrb[8].mxu1 }
 0x4a1   :  { %v2347_v26 = vadd.f32 %v5062_v12, %v10094_v50  ;;  %v2338_v22 = vpop.f32.mrb[9].mxu1 }
 0x4a2   :  { %v2339_v53 = vadd.f32 %v10094_v50, %v2338_v22  ;;  %v5063_v36 = vpop.f32.mrb[10].mxu1 }
 0x4a3   :  { %v2475_v40 = vadd.f32 %v2443_v15, %v2347_v26  ;;  %v2350_v1 = vadd.f32 %v5063_v36, %v10094_v50  ;;  %v2341_v48 = vpop.f32.mrb[11].mxu1  ;;  %v2455_v15 = vld [vmem:[%s10680_s0 + $0xb0] sm:$0xff] }
 0x4a4   :  { %v2473_v34 = vadd.f32 %v2441_v23, %v2339_v53  ;;  %v2342_v49 = vadd.f32 %v10094_v50, %v2341_v48  ;;  %v2453_v23 = vld [vmem:[%s10680_s0 + $0xa0] sm:$0xff] }
 0x4a5   :  { %2507 = vst.msk [vmem:[%s10690_s11 + $0x50] sm:$0xff] %vm11776_vm13, %v2475_v40  ;;  %v2476_v4 = vadd.f32 %v2444_v45, %v2350_v1  ;;  %v2456_v45 = vld [vmem:[%s10680_s0 + $0xb8] sm:$0xff]  ;;  %vm11791_vm13 = vmmov %vm11761_vm0 }
 0x4a6   :  { %2505 = vst.msk [vmem:[%s10690_s11 + $0x40] sm:$0xff] %vm11777_vm6, %v2473_v34  ;;  %v2474_v52 = vadd.f32 %v2442_v0, %v2342_v49  ;;  %v2454_v0 = vld [vmem:[%s10680_s0 + $0xa8] sm:$0xff]  ;;  %vm11792_vm6 = vmmov %vm11761_vm0 }
 0x4a7   :  { %2508 = vst.msk [vmem:[%s10690_s11 + $0x58] sm:$0xff] %vm11778_vm2, %v2476_v4  ;;  %vm11793_vm2 = vmmov %vm11761_vm0 }
 0x4a8   :  { %2506 = vst.msk [vmem:[%s10690_s11 + $0x48] sm:$0xff] %vm11779_vm9, %v2474_v52  ;;  %vm11794_vm9 = vmmov %vm11761_vm0 }
 0x4a9   :  { %v5066_v17 = vpop.f32.mrb[12].mxu1 }
 0x4aa   :  { %v2363_v6 = vadd.f32 %v5066_v17, %v10094_v50  ;;  %v2354_v54 = vpop.f32.mrb[13].mxu1 }
 0x4ab   :  { %v2355_v62 = vadd.f32 %v10094_v50, %v2354_v54  ;;  %v5067_v44 = vpop.f32.mrb[14].mxu1 }
 0x4ac   :  { %v2479_v25 = vadd.f32 %v2447_v9, %v2363_v6  ;;  %v2366_v31 = vadd.f32 %v5067_v44, %v10094_v50  ;;  %v2357_v41 = vpop.f32.mrb[15].mxu1  ;;  %v2459_v9 = vld [vmem:[%s10680_s0 + $0xd0] sm:$0xff] }
 0x4ad   :  { %v2477_v37 = vadd.f32 %v2445_v58, %v2355_v62  ;;  %v2358_v8 = vadd.f32 %v10094_v50, %v2357_v41  ;;  %v2457_v58 = vld [vmem:[%s10680_s0 + $0xc0] sm:$0xff] }
 0x4ae   :  { %2511 = vst.msk [vmem:[%s10690_s11 + $0x70] sm:$0xff] %vm11761_vm0, %v2479_v25  ;;  %v2480_v60 = vadd.f32 %v2448_v20, %v2366_v31  ;;  %v2460_v20 = vld [vmem:[%s10680_s0 + $0xd8] sm:$0xff] }
 0x4af   :  { %2509 = vst.msk [vmem:[%s10690_s11 + $0x60] sm:$0xff] %vm11780_vm7, %v2477_v37  ;;  %v2478_v35 = vadd.f32 %v2446_v55, %v2358_v8  ;;  %v2458_v55 = vld [vmem:[%s10680_s0 + $0xc8] sm:$0xff]  ;;  %vm11795_vm7 = vmmov %vm11761_vm0 }
 0x4b0   :  { %2512 = vst.msk [vmem:[%s10690_s11 + $0x78] sm:$0xff] %vm11781_vm5, %v2480_v60  ;;  %vm11796_vm5 = vmmov %vm11761_vm0 }
 0x4b1   :  { %2510 = vst.msk [vmem:[%s10690_s11 + $0x68] sm:$0xff] %vm11782_vm14, %v2478_v35  ;;  %vm11797_vm14 = vmmov %vm11761_vm0 }
 0x4b2   :  { %v5070_v14 = vpop.f32.mrb[16].mxu1 }
 0x4b3   :  { %v2379_v59 = vadd.f32 %v5070_v14, %v10094_v50  ;;  %v2370_v21 = vpop.f32.mrb[17].mxu1 }
 0x4b4   :  { %v2371_v19 = vadd.f32 %v10094_v50, %v2370_v21  ;;  %v5071_v11 = vpop.f32.mrb[18].mxu1 }
 0x4b5   :  { %v2483_v61 = vadd.f32 %v2451_v63, %v2379_v59  ;;  %v2382_v13 = vadd.f32 %v5071_v11, %v10094_v50  ;;  %v2373_v29 = vpop.f32.mrb[19].mxu1  ;;  %v2463_v63 = vld [vmem:[%s10680_s0 + $0xf0] sm:$0xff] }
 0x4b6   :  { %v2481_v42 = vadd.f32 %v2449_v30, %v2371_v19  ;;  %v2374_v43 = vadd.f32 %v10094_v50, %v2373_v29  ;;  %v2461_v30 = vld [vmem:[%s10680_s0 + $0xe0] sm:$0xff] }
 0x4b7   :  { %2515 = vst.msk [vmem:[%s10690_s11 + $0x90] sm:$0xff] %vm11783_vm10, %v2483_v61  ;;  %v2484_v33 = vadd.f32 %v2452_v7, %v2382_v13  ;;  %v2464_v7 = vld [vmem:[%s10680_s0 + $0xf8] sm:$0xff] }
 0x4b8   :  { %2513 = vst.msk [vmem:[%s10690_s11 + $0x80] sm:$0xff] %vm11784_vm15, %v2481_v42  ;;  %v2482_v46 = vadd.f32 %v2450_v10, %v2374_v43  ;;  %v2462_v10 = vld [vmem:[%s10680_s0 + $0xe8] sm:$0xff]  ;;  %vm11801_vm15 = vcmask 27648  }
 0x4b9   :  { %2516 = vst.msk [vmem:[%s10690_s11 + $0x98] sm:$0xff] %vm11785_vm3, %v2484_v33  ;;  %vm11802_vm3 = vcmask 1041408  }
 0x4ba   :  { %2514 = vst.msk [vmem:[%s10690_s11 + $0x88] sm:$0xff] %vm11786_vm4, %v2482_v46  ;;  %v5074_v12 = vpop.f32.mrb[20].mxu1  ;;  %vm11803_vm4 = vmmov %vm11802_vm3 }
 0x4bb   :  { %v2395_v26 = vadd.f32 %v5074_v12, %v10094_v50  ;;  %v2386_v22 = vpop.f32.mrb[21].mxu1  ;;  %v4309_v12 = vld [vmem:[%s10687_s8] sm:$0x1] }
 0x4bc   :  { %v2387_v53 = vadd.f32 %v10094_v50, %v2386_v22  ;;  %v5075_v36 = vpop.f32.mrb[22].mxu1 }
 0x4bd   :  { %v2487_v40 = vadd.f32 %v2455_v15, %v2395_v26  ;;  %v2398_v1 = vadd.f32 %v5075_v36, %v10094_v50  ;;  %v2389_v48 = vpop.f32.mrb[23].mxu1 }
 0x4be   :  { %v2485_v34 = vadd.f32 %v2453_v23, %v2387_v53  ;;  %v2390_v49 = vadd.f32 %v10094_v50, %v2389_v48  ;;  %v11798_v53 = vld [vmem:[#allocation4_spill] sm:$0xff] }
 0x4bf   :  { %2519 = vst.msk [vmem:[%s10690_s11 + $0xb0] sm:$0xff] %vm11787_vm12, %v2487_v40  ;;  %v2488_v4 = vadd.f32 %v2456_v45, %v2398_v1  ;;  %v11799_v40 = vld [vmem:[#allocation12_spill] sm:$0xff]  ;;  %vm11807_vm12 = vmmov %vm11761_vm0 }
 0x4c0   :  { %2517 = vst.msk [vmem:[%s10690_s11 + $0xa0] sm:$0xff] %vm11788_vm1, %v2485_v34  ;;  %v2486_v52 = vadd.f32 %v2454_v0, %v2390_v49  ;;  %vm11800_vm10 = vcmp.eq.s32.totalorder %v5702_v56, %v11799_v40  ;;  %v4364_v0 = vld [vmem:[%s10688_s9] sm:$0xf]  ;;  %vm11811_vm1 = vmmov %vm11761_vm0 }
 0x4c1   :  { %2520 = vst.msk [vmem:[%s10690_s11 + $0xb8] sm:$0xff] %vm11789_vm11, %v2488_v4  ;;  %v11808_v56 = vld [vmem:[#allocation31_spill] sm:$0xff]  ;;  %vm11815_vm11 = vmmov %vm11761_vm0 }
 0x4c2   :  { %2518 = vst.msk [vmem:[%s10690_s11 + $0xa8] sm:$0xff] %vm11790_vm8, %v2486_v52  ;;  %vm11819_vm8 = vmmov %vm11761_vm0 }
 0x4c3   :  { %v5078_v17 = vpop.f32.mrb[24].mxu1 }
 0x4c4   :  { %v2411_v6 = vadd.f32 %v5078_v17, %v10094_v50  ;;  %v2402_v54 = vpop.f32.mrb[25].mxu1  ;;  %v11804_v17 = vld [vmem:[#allocation23_spill] sm:$0xff] }
 0x4c5   :  { %v2403_v62 = vadd.f32 %v10094_v50, %v2402_v54  ;;  %v5079_v44 = vpop.f32.mrb[26].mxu1  ;;  %v11809_v54 = vld [vmem:[#allocation79_spill] sm:$0xff] }
 0x4c6   :  { %v2491_v25 = vadd.f32 %v2459_v9, %v2411_v6  ;;  %v2414_v31 = vadd.f32 %v5079_v44, %v10094_v50  ;;  %v2405_v41 = vpop.f32.mrb[27].mxu1  ;;  %v11805_v9 = vld [vmem:[#allocation24_spill] sm:$0xff]  ;;  %v11813_v44 = vld [vmem:[#allocation73_spill] sm:$0xff] }
 0x4c7   :  { %v2489_v37 = vadd.f32 %v2457_v58, %v2403_v62  ;;  %v2406_v8 = vadd.f32 %v10094_v50, %v2405_v41  ;;  %v11806_v6 = vpack.c.bf16 %v11804_v17, %v11805_v9  ;;  %v11810_v58 = vpack.c.bf16 %v11808_v56, %v11809_v54  ;;  %v11812_v62 = vld [vmem:[#allocation13_spill] sm:$0xff]  ;;  %v4882_v54 = vld [vmem:[%s10680_s0 + $0x140] sm:$0xff] }
 0x4c8   :  { %2523 = vst.msk [vmem:[%s10690_s11 + $0xd0] sm:$0xff] %vm11791_vm13, %v2491_v25  ;;  %v2492_v60 = vadd.f32 %v2460_v20, %v2414_v31  ;;  %v11814_v20 = vpack.c.bf16 %v11812_v62, %v11813_v44  ;;  %v11816_v25 = vld [vmem:[#allocation19_spill] sm:$0xff]  ;;  %v11817_v31 = vld [vmem:[#allocation49_spill] sm:$0xff]  ;;  %vm11823_vm13 = vmmov %vm11761_vm0 }
 0x4c9   :  { %2521 = vst.msk [vmem:[%s10690_s11 + $0xc0] sm:$0xff] %vm11792_vm6, %v2489_v37  ;;  %v2490_v35 = vadd.f32 %v2458_v55, %v2406_v8  ;;  %v11818_v41 = vpack.c.bf16 %v11816_v25, %v11817_v31  ;;  %v11820_v55 = vld [vmem:[#allocation74_spill] sm:$0xff]  ;;  %v11821_v37 = vld [vmem:[#allocation21_spill] sm:$0xff]  ;;  %vm11827_vm6 = vmmov %vm11761_vm0 }
 0x4ca   :  { %2524 = vst.msk [vmem:[%s10690_s11 + $0xd8] sm:$0xff] %vm11793_vm2, %v2492_v60  ;;  %v11822_v8 = vpack.c.bf16 %v11820_v55, %v11821_v37  ;;  %v11824_v60 = vld [vmem:[#allocation38_spill] sm:$0xff]  ;;  %vm11831_vm2 = vmmov %vm11761_vm0  ;;  %v4884_v9 = vld [vmem:[%s10680_s0 + $0x150] sm:$0xff] }
 0x4cb   :  { %2522 = vst.msk [vmem:[%s10690_s11 + $0xc8] sm:$0xff] %vm11794_vm9, %v2490_v35  ;;  %v11825_v35 = vld [vmem:[#allocation36_spill] sm:$0xff]  ;;  %vm11835_vm9 = vmmov %vm11761_vm0  ;;  %v4885_v44 = vld [vmem:[%s10680_s0 + $0x158] sm:$0xff] }
 0x4cd   :  { %v5082_v14 = vpop.f32.mrb[28].mxu1 }
 0x4ce   :  { %v2427_v59 = vadd.f32 %v5082_v14, %v10094_v50  ;;  %v2418_v21 = vpop.f32.mrb[29].mxu1  ;;  %v11826_v14 = vpack.c.bf16 %v11824_v60, %v11825_v35 }
 0x4cf   :  { %v2419_v19 = vadd.f32 %v10094_v50, %v2418_v21  ;;  %v5083_v11 = vpop.f32.mrb[30].mxu1 }
 0x4d0   :  { %v2495_v61 = vadd.f32 %v2463_v63, %v2427_v59  ;;  %v2430_v13 = vadd.f32 %v5083_v11, %v10094_v50  ;;  %v2421_v29 = vpop.f32.mrb[31].mxu1  ;;  %v11828_v63 = vld [vmem:[#allocation78_spill] sm:$0xff]  ;;  %v11829_v59 = vld [vmem:[#allocation40_spill] sm:$0xff] }
 0x4d1   :  { %v2493_v42 = vadd.f32 %v2461_v30, %v2419_v19  ;;  %v2422_v43 = vadd.f32 %v10094_v50, %v2421_v29  ;;  %v11830_v21 = vpack.c.bf16 %v11828_v63, %v11829_v59  ;;  %v11832_v30 = vld [vmem:[#allocation11_spill] sm:$0xff]  ;;  %v11833_v19 = vld [vmem:[#allocation70_spill] sm:$0xff] }
 0x4d2   :  { %2527 = vst.msk [vmem:[%s10690_s11 + $0xf0] sm:$0xff] %vm11761_vm0, %v2495_v61  ;;  %v2496_v33 = vadd.f32 %v2464_v7, %v2430_v13  ;;  %v11834_v11 = vpack.c.bf16 %v11832_v30, %v11833_v19  ;;  %v11836_v7 = vld [vmem:[#allocation53_spill] sm:$0xff]  ;;  %v11838_v29 = vld [vmem:[#allocation34_spill] sm:$0xff] }
 0x4d3   :  { %2525 = vst.msk [vmem:[%s10690_s11 + $0xe0] sm:$0xff] %vm11795_vm7, %v2493_v42  ;;  %v2494_v46 = vadd.f32 %v2462_v10, %v2422_v43  ;;  %v4377_v61 = vpack.c.bf16 %v11836_v7, %v9939_v18  ;;  %v11837_v13 = vld [vmem:[#allocation37_spill] sm:$0xff]  ;;  %vm11840_vm7 = vmmov %vm11761_vm0  ;;  %v11841_v42 = vld [vmem:[#allocation39_spill] sm:$0xff] }
 0x4d4   :  { %2528 = vst.msk [vmem:[%s10690_s11 + $0xf8] sm:$0xff] %vm11796_vm5, %v2496_v33  ;;  %v11839_v10 = vpack.c.bf16 %v11837_v13, %v11838_v29  ;;  %v4378_v43 = vpack.c.bf16 %v11841_v42, %v9974_v27  ;;  %vm11842_vm5 = vmmov %vm11761_vm0  ;;  %v4876_v27 = vld [vmem:[%s10680_s0 + $0x110] sm:$0xff]  ;;  %v4887_v29 = vld [vmem:[%s10680_s0 + $0x168] sm:$0xff] }
 0x4d5   :  { %2526 = vst.msk [vmem:[%s10690_s11 + $0xe8] sm:$0xff] %vm11797_vm14, %v2494_v46  ;;  %vm11843_vm14 = vmmov %vm11761_vm0 }
 0x53f   :  { %v4350_v15 = vpop.f32.mrb[32].mxu1 }
 0x540   :  { %v4351_v26 = vadd.f32 %v4350_v15, %v4309_v12  ;;  %v5122_v22 = vpop.f32.mrb[33].mxu1  ;;  %v4880_v15 = vld [vmem:[%s10680_s0 + $0x130] sm:$0xff] }
 0x541   :  { %v4353_v23 = vpop.f32.mrb[34].mxu1 }
 0x542   :  { %v4359_v36 = vrot.slane %v4351_v26, %v11798_v53  ;;  %v5123_v45 = vpop.f32.mrb[35].mxu1  ;;  %v4878_v23 = vld [vmem:[%s10680_s0 + $0x120] sm:$0xff] }
 0x543   :  { %v4881_v45 = vld [vmem:[%s10680_s0 + $0x138] sm:$0xff] }
 0x544   :  { %v4360_v1 = vsel %vm11800_vm10, %v4359_v36, 0.0  ;;  %vm11844_vm10 = vmmov %vm11761_vm0 }
 0x545   :  { %v4361_v48 = vsel %vm11801_vm15, %v4360_v1, 0.0  ;;  %vm11845_vm15 = vmmov %vm11761_vm0 }
 0x546   :  { %4362 = vadd.xlane.f32.xlu1 %v4361_v48 }
 0x5d3   :  { %v4363_v34 = vpop.xlane.xlu1 %4362 }
 0x5d4   :  { %v4365_v49 = vmul.f32 %v4364_v0, %v4363_v34  ;;  %v4879_v0 = vld [vmem:[%s10680_s0 + $0x128] sm:$0xff] }
 0x5d6   :  { %v4366_v4 = vpack.c.bf16 %v4365_v49, %v4365_v49 }
 0x5d8   :  { %v4439_v52 = vsel %vm11802_vm3, %v4366_v4, 0  ;;  %5161 = vmatprep.subr.msk.bf16.mxu1 %vm11803_vm4, %v4366_v4  ;;  %vm11846_vm3 = vmmov %vm11761_vm0 }
 0x5d9   :  { %5125 = vmatpush3.bf16.msra.mxu1 %v4439_v52  ;;  %vm11847_vm4 = vmmov %vm11761_vm0 }
 0x5dc   :  { %5127 = vmatmul.mubr.msk.bf16.vlgmr.msra.gmra.mrb[36].mxu1 %vm11807_vm12, %v11806_v6  ;;  %vm11848_vm12 = vmmov %vm11761_vm0 }
 0x5dd   :  { %5130 = vmatprep.mubr.msk.bf16.mxu1 %vm11811_vm1, %v11810_v58  ;;  %vm11849_vm1 = vmmov %vm11761_vm0 }
 0x5e4   :  { %5131 = vmatmul.mubr.msk.bf16.gmra.mrb[40].mxu1 %vm11815_vm11, %v11814_v20  ;;  %vm11850_vm11 = vmmov %vm11761_vm0 }
 0x5e5   :  { %5134 = vmatprep.mubr.msk.bf16.mxu1 %vm11819_vm8, %v11818_v41  ;;  %vm11851_vm8 = vmmov %vm11761_vm0  ;;  %v4883_v41 = vld [vmem:[%s10680_s0 + $0x148] sm:$0xff] }
 0x5ec   :  { %5135 = vmatmul.mubr.msk.bf16.gmra.mrb[44].mxu1 %vm11823_vm13, %v11822_v8  ;;  %vm11852_vm13 = vmmov %vm11761_vm0 }
 0x5ed   :  { %5138 = vmatprep.mubr.msk.bf16.mxu1 %vm11827_vm6, %v11826_v14  ;;  %vm11853_vm6 = vmmov %vm11761_vm0  ;;  %v4888_v14 = vld [vmem:[%s10680_s0 + $0x170] sm:$0xff] }
 0x5f4   :  { %5139 = vmatmul.mubr.msk.bf16.gmra.mrb[48].mxu1 %vm11831_vm2, %v11830_v21  ;;  %vm11854_vm2 = vmmov %vm11761_vm0  ;;  %v4886_v21 = vld [vmem:[%s10680_s0 + $0x160] sm:$0xff] }
 0x5f5   :  { %5142 = vmatprep.mubr.msk.bf16.mxu1 %vm11835_vm9, %v11834_v11  ;;  %vm11855_vm9 = vmmov %vm11761_vm0  ;;  %v4889_v11 = vld [vmem:[%s10680_s0 + $0x178] sm:$0xff] }
 0x5fc   :  { %5143 = vmatmul.mubr.msk.bf16.gmra.mrb[52].mxu1 %vm11761_vm0, %v11839_v10 }
 0x5fd   :  { %5146 = vmatprep.mubr.msk.bf16.mxu1 %vm11840_vm7, %v4377_v61  ;;  %vm11856_vm7 = vmmov %vm11761_vm0 }
 0x604   :  { %5147 = vmatmul.mubr.msk.bf16.gmra.mrb[56].mxu1 %vm11842_vm5, %v4378_v43  ;;  %vm11857_vm5 = vmmov %vm11761_vm0 }
 0x605   :  { %5150 = vmatprep.mubr.msk.bf16.mxu1 %vm11843_vm14, %v4379_v2  ;;  %vm11858_vm14 = vmmov %vm11761_vm0 }
 0x60c   :  { %5151 = vmatmul.mubr.msk.bf16.gmra.mrb[60].mxu1 %vm11844_vm10, %v4380_v47  ;;  %v4877_v47 = vld [vmem:[%s10680_s0 + $0x118] sm:$0xff]  ;;  %vm11859_vm10 = vmmov %vm11761_vm0 }
 0x60d   :  { %5154 = vmatprep.mubr.msk.bf16.mxu1 %vm11845_vm15, %v4381_v51  ;;  %vm11860_vm15 = vmmov %vm11761_vm0 }
 0x614   :  { %5155 = vmatmul.mubr.msk.bf16.gmra.mrb[64].mxu1 %vm11846_vm3, %v4382_v16  ;;  %vm11861_vm3 = vmmov %vm11761_vm0 }
 0x6af   :  { %v5128_v18 = vpop.f32.mrb[36].mxu1 }
 0x6b0   :  { %v4484_v24 = vadd.f32 %v5128_v18, %v10094_v50  ;;  %v4475_v39 = vpop.f32.mrb[37].mxu1 }
 0x6b1   :  { %v4476_v2 = vadd.f32 %v10094_v50, %v4475_v39  ;;  %v5129_v38 = vpop.f32.mrb[38].mxu1 }
 0x6b2   :  { %v4636_v32 = vadd.f32 %v4876_v27, %v4484_v24  ;;  %v4487_v28 = vadd.f32 %v5129_v38, %v10094_v50  ;;  %v4478_v51 = vpop.f32.mrb[39].mxu1  ;;  %v4892_v24 = vld [vmem:[%s10680_s0 + $0x190] sm:$0xff] }
 0x6b3   :  { %v4634_v5 = vadd.f32 %v4874_v3, %v4476_v2  ;;  %v4479_v16 = vadd.f32 %v10094_v50, %v4478_v51  ;;  %v4890_v2 = vld [vmem:[%s10680_s0 + $0x180] sm:$0xff] }
 0x6b4   :  { %4908 = vst.msk [vmem:[%s10690_s11 + $0x110] sm:$0xff] %vm11847_vm4, %v4636_v32  ;;  %v4637_v33 = vadd.f32 %v4877_v47, %v4487_v28  ;;  %v4893_v32 = vld [vmem:[%s10680_s0 + $0x198] sm:$0xff]  ;;  %vm11862_vm4 = vmmov %vm11761_vm0 }
 0x6b5   :  { %4906 = vst.msk [vmem:[%s10690_s11 + $0x100] sm:$0xff] %vm11848_vm12, %v4634_v5  ;;  %v4635_v46 = vadd.f32 %v4875_v57, %v4479_v16  ;;  %v4891_v5 = vld [vmem:[%s10680_s0 + $0x188] sm:$0xff]  ;;  %vm11863_vm12 = vmmov %vm11761_vm0 }
 0x6b6   :  { %4909 = vst.msk [vmem:[%s10690_s11 + $0x118] sm:$0xff] %vm11849_vm1, %v4637_v33  ;;  %vm11864_vm1 = vmmov %vm11761_vm0 }
 0x6b7   :  { %4907 = vst.msk [vmem:[%s10690_s11 + $0x108] sm:$0xff] %vm11850_vm11, %v4635_v46  ;;  %v5132_v12 = vpop.f32.mrb[40].mxu1  ;;  %vm11865_vm11 = vmmov %vm11761_vm0 }
 0x6b8   :  { %v4500_v26 = vadd.f32 %v5132_v12, %v10094_v50  ;;  %v4491_v22 = vpop.f32.mrb[41].mxu1 }
 0x6b9   :  { %v4492_v53 = vadd.f32 %v10094_v50, %v4491_v22  ;;  %v5133_v36 = vpop.f32.mrb[42].mxu1 }
 0x6ba   :  { %v4640_v40 = vadd.f32 %v4880_v15, %v4500_v26  ;;  %v4503_v1 = vadd.f32 %v5133_v36, %v10094_v50  ;;  %v4494_v48 = vpop.f32.mrb[43].mxu1  ;;  %v4896_v26 = vld [vmem:[%s10680_s0 + $0x1b0] sm:$0xff] }
 0x6bb   :  { %v4638_v34 = vadd.f32 %v4878_v23, %v4492_v53  ;;  %v4495_v49 = vadd.f32 %v10094_v50, %v4494_v48  ;;  %v4894_v53 = vld [vmem:[%s10680_s0 + $0x1a0] sm:$0xff] }
 0x6bc   :  { %4912 = vst.msk [vmem:[%s10690_s11 + $0x130] sm:$0xff] %vm11851_vm8, %v4640_v40  ;;  %v4641_v4 = vadd.f32 %v4881_v45, %v4503_v1  ;;  %v4897_v40 = vld [vmem:[%s10680_s0 + $0x1b8] sm:$0xff]  ;;  %vm11866_vm8 = vmmov %vm11761_vm0 }
 0x6bd   :  { %4910 = vst.msk [vmem:[%s10690_s11 + $0x120] sm:$0xff] %vm11852_vm13, %v4638_v34  ;;  %v4639_v52 = vadd.f32 %v4879_v0, %v4495_v49  ;;  %v4895_v34 = vld [vmem:[%s10680_s0 + $0x1a8] sm:$0xff]  ;;  %vm11867_vm13 = vmmov %vm11761_vm0 }
 0x6be   :  { %4913 = vst.msk [vmem:[%s10690_s11 + $0x138] sm:$0xff] %vm11853_vm6, %v4641_v4  ;;  %vm11868_vm6 = vmmov %vm11761_vm0 }
 0x6bf   :  { %4911 = vst.msk [vmem:[%s10690_s11 + $0x128] sm:$0xff] %vm11854_vm2, %v4639_v52  ;;  %v5136_v17 = vpop.f32.mrb[44].mxu1  ;;  %vm11869_vm2 = vmmov %vm11761_vm0 }
 0x6c0   :  { %v4516_v6 = vadd.f32 %v5136_v17, %v10094_v50  ;;  %v4507_v56 = vpop.f32.mrb[45].mxu1 }
 0x6c1   :  { %v4508_v58 = vadd.f32 %v10094_v50, %v4507_v56  ;;  %v5137_v62 = vpop.f32.mrb[46].mxu1 }
 0x6c2   :  { %v4644_v20 = vadd.f32 %v4884_v9, %v4516_v6  ;;  %v4519_v25 = vadd.f32 %v5137_v62, %v10094_v50  ;;  %v4510_v31 = vpop.f32.mrb[47].mxu1  ;;  %v4900_v6 = vld [vmem:[%s10680_s0 + $0x1d0] sm:$0xff] }
 0x6c3   :  { %v4642_v55 = vadd.f32 %v4882_v54, %v4508_v58  ;;  %v4511_v37 = vadd.f32 %v10094_v50, %v4510_v31  ;;  %v4898_v58 = vld [vmem:[%s10680_s0 + $0x1c0] sm:$0xff] }
 0x6c4   :  { %4916 = vst.msk [vmem:[%s10690_s11 + $0x150] sm:$0xff] %vm11855_vm9, %v4644_v20  ;;  %v4645_v8 = vadd.f32 %v4885_v44, %v4519_v25  ;;  %v4901_v20 = vld [vmem:[%s10680_s0 + $0x1d8] sm:$0xff]  ;;  %vm11870_vm9 = vmmov %vm11761_vm0 }
 0x6c5   :  { %4914 = vst.msk [vmem:[%s10690_s11 + $0x140] sm:$0xff] %vm11761_vm0, %v4642_v55  ;;  %v4643_v60 = vadd.f32 %v4883_v41, %v4511_v37  ;;  %v4899_v55 = vld [vmem:[%s10680_s0 + $0x1c8] sm:$0xff] }
 0x6c6   :  { %4917 = vst.msk [vmem:[%s10690_s11 + $0x158] sm:$0xff] %vm11856_vm7, %v4645_v8  ;;  %vm11871_vm7 = vmmov %vm11761_vm0 }
 0x6c7   :  { %4915 = vst.msk [vmem:[%s10690_s11 + $0x148] sm:$0xff] %vm11857_vm5, %v4643_v60  ;;  %v5140_v35 = vpop.f32.mrb[48].mxu1  ;;  %vm11872_vm5 = vmmov %vm11761_vm0 }
 0x6c8   :  { %v4532_v63 = vadd.f32 %v5140_v35, %v10094_v50  ;;  %v4523_v59 = vpop.f32.mrb[49].mxu1 }
 0x6c9   :  { %v4524_v30 = vadd.f32 %v10094_v50, %v4523_v59  ;;  %v5141_v19 = vpop.f32.mrb[50].mxu1 }
 0x6ca   :  { %v4648_v7 = vadd.f32 %v4888_v14, %v4532_v63  ;;  %v4535_v61 = vadd.f32 %v5141_v19, %v10094_v50  ;;  %v4526_v13 = vpop.f32.mrb[51].mxu1  ;;  %v4904_v63 = vld [vmem:[%s10680_s0 + $0x1f0] sm:$0xff] }
 0x6cb   :  { %v4646_v10 = vadd.f32 %v4886_v21, %v4524_v30  ;;  %v4527_v42 = vadd.f32 %v10094_v50, %v4526_v13  ;;  %v4902_v30 = vld [vmem:[%s10680_s0 + $0x1e0] sm:$0xff] }
 0x6cc   :  { %4920 = vst.msk [vmem:[%s10690_s11 + $0x170] sm:$0xff] %vm11858_vm14, %v4648_v7  ;;  %v4649_v43 = vadd.f32 %v4889_v11, %v4535_v61  ;;  %v4905_v7 = vld [vmem:[%s10680_s0 + $0x1f8] sm:$0xff]  ;;  %vm11873_vm14 = vmmov %vm11761_vm0 }
 0x6cd   :  { %4918 = vst.msk [vmem:[%s10690_s11 + $0x160] sm:$0xff] %vm11859_vm10, %v4646_v10  ;;  %v4647_v18 = vadd.f32 %v4887_v29, %v4527_v42  ;;  %v4903_v10 = vld [vmem:[%s10680_s0 + $0x1e8] sm:$0xff]  ;;  %vm11874_vm10 = vmmov %vm11761_vm0 }
 0x6ce   :  { %4921 = vst.msk [vmem:[%s10690_s11 + $0x178] sm:$0xff] %vm11860_vm15, %v4649_v43  ;;  %vm11875_vm15 = vmmov %vm11761_vm0 }
 0x6cf   :  { %4919 = vst.msk [vmem:[%s10690_s11 + $0x168] sm:$0xff] %vm11861_vm3, %v4647_v18  ;;  %v5144_v27 = vpop.f32.mrb[52].mxu1  ;;  %vm11876_vm3 = vmmov %vm11761_vm0 }
 0x6d0   :  { %v4548_v39 = vadd.f32 %v5144_v27, %v10094_v50  ;;  %v4539_v3 = vpop.f32.mrb[53].mxu1 }
 0x6d1   :  { %v4540_v38 = vadd.f32 %v10094_v50, %v4539_v3  ;;  %v5145_v47 = vpop.f32.mrb[54].mxu1 }
 0x6d2   :  { %v4652_v28 = vadd.f32 %v4892_v24, %v4548_v39  ;;  %v4551_v51 = vadd.f32 %v5145_v47, %v10094_v50  ;;  %v4542_v57 = vpop.f32.mrb[55].mxu1 }
 0x6d3   :  { %v4650_v16 = vadd.f32 %v4890_v2, %v4540_v38  ;;  %v4543_v33 = vadd.f32 %v10094_v50, %v4542_v57 }
 0x6d4   :  { %4924 = vst.msk [vmem:[%s10690_s11 + $0x190] sm:$0xff] %vm11862_vm4, %v4652_v28  ;;  %v4653_v46 = vadd.f32 %v4893_v32, %v4551_v51 }
 0x6d5   :  { %4922 = vst.msk [vmem:[%s10690_s11 + $0x180] sm:$0xff] %vm11863_vm12, %v4650_v16  ;;  %v4651_v12 = vadd.f32 %v4891_v5, %v4543_v33 }
 0x6d6   :  { %4925 = vst.msk [vmem:[%s10690_s11 + $0x198] sm:$0xff] %vm11864_vm1, %v4653_v46 }
 0x6d7   :  { %4923 = vst.msk [vmem:[%s10690_s11 + $0x188] sm:$0xff] %vm11865_vm11, %v4651_v12  ;;  %v5148_v15 = vpop.f32.mrb[56].mxu1 }
 0x6d8   :  { %v4564_v22 = vadd.f32 %v5148_v15, %v10094_v50  ;;  %v4555_v23 = vpop.f32.mrb[57].mxu1 }
 0x6d9   :  { %v4556_v36 = vadd.f32 %v10094_v50, %v4555_v23  ;;  %v5149_v45 = vpop.f32.mrb[58].mxu1 }
 0x6da   :  { %v4656_v1 = vadd.f32 %v4896_v26, %v4564_v22  ;;  %v4567_v48 = vadd.f32 %v5149_v45, %v10094_v50  ;;  %v4558_v0 = vpop.f32.mrb[59].mxu1 }
 0x6db   :  { %v4654_v49 = vadd.f32 %v4894_v53, %v4556_v36  ;;  %v4559_v4 = vadd.f32 %v10094_v50, %v4558_v0 }
 0x6dc   :  { %4928 = vst.msk [vmem:[%s10690_s11 + $0x1b0] sm:$0xff] %vm11866_vm8, %v4656_v1  ;;  %v4657_v52 = vadd.f32 %v4897_v40, %v4567_v48 }
 0x6dd   :  { %4926 = vst.msk [vmem:[%s10690_s11 + $0x1a0] sm:$0xff] %vm11867_vm13, %v4654_v49  ;;  %v4655_v17 = vadd.f32 %v4895_v34, %v4559_v4 }
 0x6de   :  { %4929 = vst.msk [vmem:[%s10690_s11 + $0x1b8] sm:$0xff] %vm11868_vm6, %v4657_v52 }
 0x6df   :  { %4927 = vst.msk [vmem:[%s10690_s11 + $0x1a8] sm:$0xff] %vm11869_vm2, %v4655_v17  ;;  %v5152_v9 = vpop.f32.mrb[60].mxu1 }
 0x6e0   :  { %v4580_v56 = vadd.f32 %v5152_v9, %v10094_v50  ;;  %v4571_v54 = vpop.f32.mrb[61].mxu1 }
 0x6e1   :  { %v4572_v62 = vadd.f32 %v10094_v50, %v4571_v54  ;;  %v5153_v44 = vpop.f32.mrb[62].mxu1 }
 0x6e2   :  { %v4660_v25 = vadd.f32 %v4900_v6, %v4580_v56  ;;  %v4583_v31 = vadd.f32 %v5153_v44, %v10094_v50  ;;  %v4574_v41 = vpop.f32.mrb[63].mxu1 }
 0x6e3   :  { %v4658_v37 = vadd.f32 %v4898_v58, %v4572_v62  ;;  %v4575_v8 = vadd.f32 %v10094_v50, %v4574_v41 }
 0x6e4   :  { %4932 = vst.msk [vmem:[%s10690_s11 + $0x1d0] sm:$0xff] %vm11870_vm9, %v4660_v25  ;;  %v4661_v60 = vadd.f32 %v4901_v20, %v4583_v31 }
 0x6e5   :  { %4930 = vst.msk [vmem:[%s10690_s11 + $0x1c0] sm:$0xff] %vm11761_vm0, %v4658_v37  ;;  %v4659_v35 = vadd.f32 %v4899_v55, %v4575_v8 }
 0x6e6   :  { %4933 = vst.msk [vmem:[%s10690_s11 + $0x1d8] sm:$0xff] %vm11871_vm7, %v4661_v60 }
 0x6e7   :  { %4931 = vst.msk [vmem:[%s10690_s11 + $0x1c8] sm:$0xff] %vm11872_vm5, %v4659_v35  ;;  %v5156_v14 = vpop.f32.mrb[64].mxu1 }
 0x6e8   :  { %v4596_v59 = vadd.f32 %v5156_v14, %v10094_v50  ;;  %v4587_v21 = vpop.f32.mrb[65].mxu1 }
 0x6e9   :  { %v4588_v19 = vadd.f32 %v10094_v50, %v4587_v21  ;;  %v5157_v11 = vpop.f32.mrb[66].mxu1 }
 0x6ea   :  { %v4664_v61 = vadd.f32 %v4904_v63, %v4596_v59  ;;  %v4599_v13 = vadd.f32 %v5157_v11, %v10094_v50  ;;  %v4590_v29 = vpop.f32.mrb[67].mxu1 }
 0x6eb   :  { %v4662_v42 = vadd.f32 %v4902_v30, %v4588_v19  ;;  %v4591_v43 = vadd.f32 %v10094_v50, %v4590_v29 }
 0x6ec   :  { %4936 = vst.msk [vmem:[%s10690_s11 + $0x1f0] sm:$0xff] %vm11873_vm14, %v4664_v61  ;;  %v4665_v18 = vadd.f32 %v4905_v7, %v4599_v13 }
 0x6ed   :  { %4934 = vst.msk [vmem:[%s10690_s11 + $0x1e0] sm:$0xff] %vm11874_vm10, %v4662_v42  ;;  %v4663_v27 = vadd.f32 %v4903_v10, %v4591_v43 }
 0x6ee   :  { %4937 = vst.msk [vmem:[%s10690_s11 + $0x1f8] sm:$0xff] %vm11875_vm15, %v4665_v18 }
 0x6ef   :  { %4935 = vst.msk [vmem:[%s10690_s11 + $0x1e8] sm:$0xff] %vm11876_vm3, %v4663_v27 }

</bundles_post_ra>
